<compile_context>
chip_gen: v7x
topology: tpu7x:2x2x1
jax: 0.10.0
libtpu: 0.0.40
codegen_flags: <defaults>
</compile_context>

<pallas_src>
import functools

import jax
import jax.numpy as jnp
from jax.experimental import pallas as pl
from jax.experimental.pallas import tpu as pltpu

EPS = 1e-5  # nn.BatchNorm2d default eps


# ---------------------------------------------------------------------------
# Small helpers
# ---------------------------------------------------------------------------
def _pick_tm(m, cap):
    """Largest lane-tile (multiple of 128) dividing m, capped; full m if small."""
    if m <= cap:
        return m
    t = (cap // 128) * 128
    while t >= 128:
        if m % t == 0:
            return t
        t -= 128
    return m


def _compiler_params(sem, footprint_bytes):
    # Footprint-derived VMEM limit: 2x margin + 2 MiB, clamped to [16, 48] MiB
    # (48 MiB leaves headroom on v7x's 64 MiB/TC; tiny on v5e/v6e's 128 MiB).
    limit = int(min(max(2 * footprint_bytes + (2 << 20), 16 << 20), 48 << 20))
    return pltpu.CompilerParams(dimension_semantics=sem, vmem_limit_bytes=limit)


# ---------------------------------------------------------------------------
# Pallas kernels
# ---------------------------------------------------------------------------
def _first_block_kernel(count, x_ref, w_ref, pt_ref, gamma_ref, beta_ref, o_ref):
    """ConvT(k4,s2,p0) on 1x1 input (a plain matmul) + BN(train) + ReLU, fused.

    x:(B,dz) bf16, w:(dz,OC*16) bf16, pt:(OC,OC*16) 0/1 pooling matrix f32,
    gamma/beta:(1,OC) f32 -> o:(B,OC*16) bf16 (columns ordered (oc,kh,kw))."""
    y = jnp.dot(x_ref[...], w_ref[...], preferred_element_type=jnp.float32)
    sb = jnp.sum(y, axis=0, keepdims=True)          # (1, OC*16) sublane reduce
    qb = jnp.sum(y * y, axis=0, keepdims=True)
    pool = (((1,), (1,)), ((), ()))                 # contract lane dim with pt lanes
    ch_s = jax.lax.dot_general(sb, pt_ref[...], pool, preferred_element_type=jnp.float32)
    ch_q = jax.lax.dot_general(qb, pt_ref[...], pool, preferred_element_type=jnp.float32)
    mean = ch_s / count
    var = jnp.maximum(ch_q / count - mean * mean, 0.0)   # clamp: guards rsqrt NaN
    scale = gamma_ref[...] * jax.lax.rsqrt(var + EPS)    # (1, OC)
    shift = beta_ref[...] - mean * scale
    # Broadcast channel -> 16 spatial columns with the same 0/1 matrix (MXU).
    scale_c = jnp.dot(scale, pt_ref[...], preferred_element_type=jnp.float32)
    shift_c = jnp.dot(shift, pt_ref[...], preferred_element_type=jnp.float32)
    o_ref[...] = jnp.maximum(y * scale_c + shift_c, 0.0).astype(o_ref.dtype)


def _bn_block_kernel(oc, count,
                     w_ref, x_ref, gamma_ref, beta_ref, o_ref,
                     y_scr, s_scr, q_scr):
    """Fused ConvT(k4,s2,p1,no bias) + BN(train) + ReLU for one layer.

    Grid (2, nt): pass 0 = matmul (all 4 phases merged into rows) + stats into
    VMEM scratch; pass 1 = normalize + ReLU, bf16 store.  Rows are phase-major:
    row = (2*ry+rx)*oc + c."""
    p = pl.program_id(0)
    m = pl.program_id(1)

    @pl.when(p == 0)
    def _matmul_and_stats():
        @pl.when(m == 0)
        def _init():
            s_scr[...] = jnp.zeros_like(s_scr)
            q_scr[...] = jnp.zeros_like(q_scr)

        y = jnp.dot(w_ref[...], x_ref[...], preferred_element_type=jnp.float32)
        y_scr[m] = y
        y2 = y * y
        # Per-channel partials: fold the 4 phase row-blocks (sublane-aligned
        # static slices), then a lane reduction.
        z = y[0:oc] + y[oc:2 * oc] + y[2 * oc:3 * oc] + y[3 * oc:4 * oc]
        z2 = y2[0:oc] + y2[oc:2 * oc] + y2[2 * oc:3 * oc] + y2[3 * oc:4 * oc]
        s_scr[...] += jnp.sum(z, axis=1, keepdims=True)
        q_scr[...] += jnp.sum(z2, axis=1, keepdims=True)

    @pl.when(p == 1)
    def _normalize():
        mean = s_scr[...] / count
        var = jnp.maximum(q_scr[...] / count - mean * mean, 0.0)
        scale = gamma_ref[...] * jax.lax.rsqrt(var + EPS)       # (oc, 1)
        shift = beta_ref[...] - mean * scale
        scale4 = jnp.tile(scale, (4, 1))                        # (4*oc, 1)
        shift4 = jnp.tile(shift, (4, 1))
        y = y_scr[m]
        o_ref[...] = jnp.maximum(y * scale4 + shift4, 0.0).astype(o_ref.dtype)


def _final_kernel(w_ref, b_ref, x_ref, o_ref):
    """Final ConvT(k4,s2,p1,bias) + Tanh, phases merged into rows."""
    y = jnp.dot(w_ref[...], x_ref[...], preferred_element_type=jnp.float32)
    o_ref[...] = jnp.tanh(y + b_ref[...])


# ---------------------------------------------------------------------------
# XLA-side glue: merged (9-tap) weights, shifted patches, depth-to-space
# ---------------------------------------------------------------------------
def _merged_weight_T(w):
    """w: (IC, OC, 4, 4) PyTorch ConvTranspose2d layout -> W_all (4*OC, 9*IC).

    Rows phase-major (ry, rx, oc); cols tap-major (dy, dx, ic).
    Phase (ry,rx), tap (dy,dx) contributes w[ic,oc,3+ry-2dy,3+rx-2dx] when
    dy-ry in {0,1} and dx-rx in {0,1}, else a structural zero block."""
    IC, OC = w.shape[0], w.shape[1]
    zeros = jnp.zeros((OC, IC), w.dtype)
    rows = []
    for ry in (0, 1):
        for rx in (0, 1):
            cols = []
            for dy in range(3):
                for dx in range(3):
                    ay, ax = dy - ry, dx - rx
                    if ay in (0, 1) and ax in (0, 1):
                        cols.append(w[:, :, 3 - ry - 2 * ay, 3 - rx - 2 * ax].T)
                    else:
                        cols.append(zeros)
            rows.append(jnp.concatenate(cols, axis=1))   # (OC, 9*IC)
    return jnp.concatenate(rows, axis=0)                 # (4*OC, 9*IC)


def _patches9_T(a):
    """a: (IC, B, H, W) -> X9^T (9*IC, B*H*W): 3x3 shifted windows of pad-1 input."""
    IC, B, H, W = a.shape
    ap = jnp.pad(a, ((0, 0), (0, 0), (1, 1), (1, 1)))
    taps = [ap[:, :, dy:dy + H, dx:dx + W] for dy in range(3) for dx in range(3)]
    return jnp.stack(taps, axis=0).reshape(9 * IC, B * H * W)


def _depth_to_space(y_rows, OC, B, H, W):
    """(4*OC, B*H*W) phase-major rows -> (OC, B, 2H, 2W).  Runs on bf16/f32 output."""
    return (y_rows.reshape(2, 2, OC, B, H, W)
            .transpose(2, 3, 4, 0, 5, 1)
            .reshape(OC, B, 2 * H, 2 * W))


# ---------------------------------------------------------------------------
# Layers (one fused pallas_call each)
# ---------------------------------------------------------------------------
def _first_block(x_bd, w, gamma, beta):
    B, dz = x_bd.shape
    OC = w.shape[1]
    C = OC * 16
    w2 = w.reshape(dz, C).astype(jnp.bfloat16)           # cols ordered (oc,kh,kw)
    pt = (jnp.arange(OC)[:, None] == (jnp.arange(C) // 16)[None, :]).astype(jnp.float32)
    kern = functools.partial(_first_block_kernel, float(16 * B))
    footprint = B * dz * 2 + dz * C * 2 + OC * C * 4 + 2 * OC * 4 + 3 * B * C * 4
    o = pl.pallas_call(
        kern,
        out_shape=jax.ShapeDtypeStruct((B, C), jnp.bfloat16),
        grid=(1,),
        in_specs=[pl.BlockSpec((B, dz), lambda i: (0, 0)),
                  pl.BlockSpec((dz, C), lambda i: (0, 0)),
                  pl.BlockSpec((OC, C), lambda i: (0, 0)),
                  pl.BlockSpec((1, OC), lambda i: (0, 0)),
                  pl.BlockSpec((1, OC), lambda i: (0, 0))],
        out_specs=pl.BlockSpec((B, C), lambda i: (0, 0)),
        compiler_params=_compiler_params(("arbitrary",), footprint),
    )(x_bd.astype(jnp.bfloat16), w2, pt, gamma.reshape(1, OC), beta.reshape(1, OC))
    return o.reshape(B, OC, 4, 4).transpose(1, 0, 2, 3)  # (OC, B, 4, 4) bf16


def _bn_block(a, w, gamma, beta):
    """ConvT(k4,s2,p1,no bias) + BN(train) + ReLU: (IC,B,H,W) bf16 -> (OC,B,2H,2W) bf16."""
    IC, B, H, W = a.shape
    OC = w.shape[1]
    M = B * H * W
    x9 = _patches9_T(a)                                   # (9*IC, M) bf16
    wT = _merged_weight_T(w).astype(jnp.bfloat16)         # (4*OC, 9*IC) bf16
    R, K = 4 * OC, 9 * IC
    tm = _pick_tm(M, 2048)
    nt = M // tm
    kern = functools.partial(_bn_block_kernel, OC, float(4 * M))
    footprint = (R * K * 2 + 2 * K * tm * 2 + 2 * R * tm * 2
                 + nt * R * tm * 4 + 4 * OC * 4)
    o = pl.pallas_call(
        kern,
        out_shape=jax.ShapeDtypeStruct((R, M), jnp.bfloat16),
        grid=(2, nt),                                     # (pass, M tile)
        in_specs=[pl.BlockSpec((R, K), lambda p, m: (0, 0)),          # resident
                  pl.BlockSpec((K, tm), lambda p, m: (0, m * (1 - p))),
                  pl.BlockSpec((OC, 1), lambda p, m: (0, 0)),
                  pl.BlockSpec((OC, 1), lambda p, m: (0, 0))],
        out_specs=pl.BlockSpec((R, tm), lambda p, m: (0, m * p)),     # written pass 1
        scratch_shapes=[pltpu.VMEM((nt, R, tm), jnp.float32),         # y resident in VMEM
                        pltpu.VMEM((OC, 1), jnp.float32),
                        pltpu.VMEM((OC, 1), jnp.float32)],
        compiler_params=_compiler_params(("arbitrary", "arbitrary"), footprint),
    )(wT, x9, gamma.reshape(OC, 1), beta.reshape(OC, 1))
    return _depth_to_space(o, OC, B, H, W)                # bf16 interleave


def _final_block(a, w, bias):
    """ConvT(k4,s2,p1,bias) + Tanh -> NCHW image (f32)."""
    IC, B, H, W = a.shape
    OC = w.shape[1]
    M = B * H * W
    x9 = _patches9_T(a)
    wT = _merged_weight_T(w).astype(jnp.bfloat16)         # (4*OC, 9*IC)
    b4 = jnp.tile(bias, 4).reshape(4 * OC, 1).astype(jnp.float32)
    R, K = 4 * OC, 9 * IC
    tm = _pick_tm(M, 1024)                                # nt >= 2 here: v7x dual-TC work
    nt = M // tm
    footprint = R * K * 2 + R * 4 + 2 * K * tm * 2 + 2 * R * tm * 4
    o = pl.pallas_call(
        _final_kernel,
        out_shape=jax.ShapeDtypeStruct((R, M), jnp.float32),
        grid=(nt,),
        in_specs=[pl.BlockSpec((R, K), lambda m: (0, 0)),
                  pl.BlockSpec((R, 1), lambda m: (0, 0)),
                  pl.BlockSpec((K, tm), lambda m: (0, m))],
        out_specs=pl.BlockSpec((R, tm), lambda m: (0, m)),
        compiler_params=_compiler_params(("parallel",), footprint),
    )(wT, b4, x9)
    img = _depth_to_space(o, OC, B, H, W)                 # (OC, B, 2H, 2W) f32
    return img.transpose(1, 0, 2, 3)                      # NCHW


# ---------------------------------------------------------------------------
# Generator
# ---------------------------------------------------------------------------
def init_params(key, dim_z, features_g, img_channels):
    chans = [dim_z, features_g * 16, features_g * 8, features_g * 4, features_g * 2]
    blocks = []
    for i in range(4):
        key, wk, gk, bk = jax.random.split(key, 4)
        w = 0.05 * jax.random.normal(wk, (chans[i], chans[i + 1], 4, 4), jnp.float32)
        gamma = 1.0 + 0.1 * jax.random.normal(gk, (chans[i + 1],), jnp.float32)
        beta = 0.1 * jax.random.normal(bk, (chans[i + 1],), jnp.float32)
        blocks.append((w, gamma, beta))
    key, wk, bk = jax.random.split(key, 3)
    w_final = 0.05 * jax.random.normal(wk, (chans[-1], img_channels, 4, 4), jnp.float32)
    b_final = 0.01 * jax.random.normal(bk, (img_channels,), jnp.float32)
    return {"blocks": blocks, "final": (w_final, b_final)}


def generator_forward(x_nchw, params):
    B = x_nchw.shape[0]
    x = x_nchw.reshape(B, -1)                        # (B, dim_z); spatial is 1x1
    a = _first_block(x, *params["blocks"][0])        # (fg*16, B, 4, 4) bf16
    for w, gamma, beta in params["blocks"][1:]:
        a = _bn_block(a, w, gamma, beta)             # 4 -> 8 -> 16 -> 32
    w_f, b_f = params["final"]
    return _final_block(a, w_f, b_f)                 # (B, img_channels, 64, 64) f32


# ---------------------------------------------------------------------------
# Pure-JAX reference (same bf16 operand rounding) for correctness check
# ---------------------------------------------------------------------------
def _ref_conv_transpose(x, w, stride, padding):
    k = w.shape[-1]
    w_flip = jnp.flip(w, axis=(2, 3)).transpose(1, 0, 2, 3)   # (OC, IC, kh, kw)
    pad = k - 1 - padding
    return jax.lax.conv_general_dilated(
        x, w_flip, window_strides=(1, 1), padding=[(pad, pad), (pad, pad)],
        lhs_dilation=(stride, stride),
        dimension_numbers=("NCHW", "OIHW", "NCHW"),
        preferred_element_type=jnp.float32)


def _reference_forward(x_nchw, params):
    bf = lambda t: t.astype(jnp.bfloat16).astype(jnp.float32)
    cfgs = [(2, 0), (2, 1), (2, 1), (2, 1)]
    x = bf(x_nchw)
    for (w, gamma, beta), (s, p) in zip(params["blocks"], cfgs):
        y = _ref_conv_transpose(x, bf(w), s, p)
        mu = jnp.mean(y, axis=(0, 2, 3), keepdims=True)
        var = jnp.mean((y - mu) ** 2, axis=(0, 2, 3), keepdims=True)
        yn = (y - mu) * jax.lax.rsqrt(var + EPS)
        yn = yn * gamma[None, :, None, None] + beta[None, :, None, None]
        x = bf(jnp.maximum(yn, 0.0))
    w_f, b_f = params["final"]
    y = _ref_conv_transpose(x, bf(w_f), 2, 1) + b_f[None, :, None, None]
    return jnp.tanh(y)


if __name__ == "__main__":
    B, dim_z, features_g, img_channels = 2, 32, 8, 3
    key = jax.random.PRNGKey(0)
    key, xk = jax.random.split(key)
    x = jax.random.normal(xk, (B, dim_z, 1, 1), jnp.float32)
    params = init_params(key, dim_z, features_g, img_channels)

    fwd = jax.jit(lambda inp: generator_forward(inp, params))
    out = fwd(x)
    jax.block_until_ready(out)

    assert out.shape == (B, img_channels, 64, 64), out.shape
    assert bool(jnp.all(jnp.isfinite(out)))
    assert bool(jnp.all(jnp.abs(out) <= 1.0 + 1e-6))   # tanh range

    ref = _reference_forward(x, params)
    err = float(jnp.max(jnp.abs(out - ref)))
    assert err < 5e-2, f"max abs diff vs reference = {err}"
    print("KERNEL_OK")
</pallas_src>

<mosaic_0001>
module attributes {stable_mosaic.version = 11 : i64} {
  func.func @_first_block_kernel(%arg0: i32, %arg1: memref<2x32xbf16, #tpu.memory_space<vmem>>, %arg2: memref<32x2048xbf16, #tpu.memory_space<vmem>>, %arg3: memref<128x2048xf32, #tpu.memory_space<vmem>>, %arg4: memref<1x128xf32, #tpu.memory_space<vmem>>, %arg5: memref<1x128xf32, #tpu.memory_space<vmem>>, %arg6: memref<2x2048xbf16, #tpu.memory_space<vmem>>) attributes {dimension_semantics = [#tpu.dimension_semantics<arbitrary>], iteration_bounds = array<i64: 1>, scalar_prefetch = 0 : i64, scratch_operands = 0 : i64, tpu.core_type = #tpu.core_type<tc>, window_params = [{pipeline_mode = #tpu.pipeline_mode<synchronous>, transform_indices = @transform_0, window_bounds = array<i64: 2, 32>}, {pipeline_mode = #tpu.pipeline_mode<synchronous>, transform_indices = @transform_1, window_bounds = array<i64: 32, 2048>}, {pipeline_mode = #tpu.pipeline_mode<synchronous>, transform_indices = @transform_2, window_bounds = array<i64: 128, 2048>}, {pipeline_mode = #tpu.pipeline_mode<synchronous>, transform_indices = @transform_3, window_bounds = array<i64: 1, 128>}, {pipeline_mode = #tpu.pipeline_mode<synchronous>, transform_indices = @transform_4, window_bounds = array<i64: 1, 128>}, {pipeline_mode = #tpu.pipeline_mode<synchronous>, transform_indices = @transform_5, window_bounds = array<i64: 2, 2048>}]} {
    %c0 = arith.constant 0 : index
    %c0_0 = arith.constant 0 : index
    %0 = vector.load %arg1[%c0, %c0_0] : memref<2x32xbf16, #tpu.memory_space<vmem>>, vector<2x32xbf16>
    %c0_1 = arith.constant 0 : index
    %c0_2 = arith.constant 0 : index
    %1 = vector.load %arg2[%c0_1, %c0_2] : memref<32x2048xbf16, #tpu.memory_space<vmem>>, vector<32x2048xbf16>
    %cst = arith.constant dense<0.000000e+00> : vector<2x2048xf32>
    %2 = tpu.matmul %0, %1, %cst {dimension_numbers = #tpu.dot_dimension_numbers<[1], [0], [0], [1], [0, 0, 1, 1], [], []>} : vector<2x32xbf16>, vector<32x2048xbf16>, vector<2x2048xf32> -> vector<2x2048xf32>
    %cst_3 = arith.constant dense<0.000000e+00> : vector<2048xf32>
    %3 = vector.multi_reduction <add>, %2, %cst_3 [0] : vector<2x2048xf32> to vector<2048xf32>
    %4 = vector.shape_cast %3 : vector<2048xf32> to vector<1x2048xf32>
    %5 = arith.mulf %2, %2 : vector<2x2048xf32>
    %cst_4 = arith.constant dense<0.000000e+00> : vector<2048xf32>
    %6 = vector.multi_reduction <add>, %5, %cst_4 [0] : vector<2x2048xf32> to vector<2048xf32>
    %7 = vector.shape_cast %6 : vector<2048xf32> to vector<1x2048xf32>
    %c0_5 = arith.constant 0 : index
    %c0_6 = arith.constant 0 : index
    %8 = vector.load %arg3[%c0_5, %c0_6] : memref<128x2048xf32, #tpu.memory_space<vmem>>, vector<128x2048xf32>
    %cst_7 = arith.constant dense<0.000000e+00> : vector<1x128xf32>
    %9 = tpu.matmul %4, %8, %cst_7 {dimension_numbers = #tpu.dot_dimension_numbers<[1], [1], [0], [0], [0, 0, 1, 0], [], []>} : vector<1x2048xf32>, vector<128x2048xf32>, vector<1x128xf32> -> vector<1x128xf32>
    %c0_8 = arith.constant 0 : index
    %c0_9 = arith.constant 0 : index
    %10 = vector.load %arg3[%c0_8, %c0_9] : memref<128x2048xf32, #tpu.memory_space<vmem>>, vector<128x2048xf32>
    %cst_10 = arith.constant dense<0.000000e+00> : vector<1x128xf32>
    %11 = tpu.matmul %7, %10, %cst_10 {dimension_numbers = #tpu.dot_dimension_numbers<[1], [1], [0], [0], [0, 0, 1, 0], [], []>} : vector<1x2048xf32>, vector<128x2048xf32>, vector<1x128xf32> -> vector<1x128xf32>
    %cst_11 = arith.constant 3.200000e+01 : f32
    %12 = vector.broadcast %cst_11 : f32 to vector<1x128xf32>
    %13 = arith.divf %9, %12 : vector<1x128xf32>
    %cst_12 = arith.constant 3.200000e+01 : f32
    %14 = vector.broadcast %cst_12 : f32 to vector<1x128xf32>
    %15 = arith.divf %11, %14 : vector<1x128xf32>
    %16 = arith.mulf %13, %13 : vector<1x128xf32>
    %17 = arith.subf %15, %16 : vector<1x128xf32>
    %cst_13 = arith.constant 0.000000e+00 : f32
    %18 = vector.broadcast %cst_13 : f32 to vector<1x128xf32>
    %19 = arith.maximumf %17, %18 : vector<1x128xf32>
    %c0_14 = arith.constant 0 : index
    %c0_15 = arith.constant 0 : index
    %20 = vector.load %arg4[%c0_14, %c0_15] : memref<1x128xf32, #tpu.memory_space<vmem>>, vector<1x128xf32>
    %cst_16 = arith.constant 9.99999974E-6 : f32
    %21 = vector.broadcast %cst_16 : f32 to vector<1x128xf32>
    %22 = arith.addf %19, %21 : vector<1x128xf32>
    %23 = math.rsqrt %22 : vector<1x128xf32>
    %24 = arith.mulf %20, %23 : vector<1x128xf32>
    %c0_17 = arith.constant 0 : index
    %c0_18 = arith.constant 0 : index
    %25 = vector.load %arg5[%c0_17, %c0_18] : memref<1x128xf32, #tpu.memory_space<vmem>>, vector<1x128xf32>
    %26 = arith.mulf %13, %24 : vector<1x128xf32>
    %27 = arith.subf %25, %26 : vector<1x128xf32>
    %c0_19 = arith.constant 0 : index
    %c0_20 = arith.constant 0 : index
    %28 = vector.load %arg3[%c0_19, %c0_20] : memref<128x2048xf32, #tpu.memory_space<vmem>>, vector<128x2048xf32>
    %cst_21 = arith.constant dense<0.000000e+00> : vector<1x2048xf32>
    %29 = tpu.matmul %24, %28, %cst_21 {dimension_numbers = #tpu.dot_dimension_numbers<[1], [0], [0], [1], [0, 0, 1, 1], [], []>} : vector<1x128xf32>, vector<128x2048xf32>, vector<1x2048xf32> -> vector<1x2048xf32>
    %c0_22 = arith.constant 0 : index
    %c0_23 = arith.constant 0 : index
    %30 = vector.load %arg3[%c0_22, %c0_23] : memref<128x2048xf32, #tpu.memory_space<vmem>>, vector<128x2048xf32>
    %cst_24 = arith.constant dense<0.000000e+00> : vector<1x2048xf32>
    %31 = tpu.matmul %27, %30, %cst_24 {dimension_numbers = #tpu.dot_dimension_numbers<[1], [0], [0], [1], [0, 0, 1, 1], [], []>} : vector<1x128xf32>, vector<128x2048xf32>, vector<1x2048xf32> -> vector<1x2048xf32>
    %32 = vector.broadcast %29 : vector<1x2048xf32> to vector<2x2048xf32>
    %33 = arith.mulf %2, %32 : vector<2x2048xf32>
    %34 = vector.broadcast %31 : vector<1x2048xf32> to vector<2x2048xf32>
    %35 = arith.addf %33, %34 : vector<2x2048xf32>
    %cst_25 = arith.constant 0.000000e+00 : f32
    %36 = vector.broadcast %cst_25 : f32 to vector<2x2048xf32>
    %37 = arith.maximumf %35, %36 : vector<2x2048xf32>
    %38 = arith.truncf %37 : vector<2x2048xf32> to vector<2x2048xbf16>
    %c0_26 = arith.constant 0 : index
    %c0_27 = arith.constant 0 : index
    %39 = vector.load %arg6[%c0_26, %c0_27] : memref<2x2048xbf16, #tpu.memory_space<vmem>>, vector<2x2048xbf16>
    tpu.vector_store %arg6[%c0_26, %c0_27], %38 {strides = array<i32>} : memref<2x2048xbf16, #tpu.memory_space<vmem>>, vector<2x2048xbf16>,
    return
  }
  func.func @transform_0(%arg0: i32) -> (i32, i32) {
    %c0_i32 = arith.constant 0 : i32
    %c0_i32_0 = arith.constant 0 : i32
    %c0_i32_1 = arith.constant 0 : i32
    return %c0_i32, %c0_i32_0 : i32, i32
  }
  func.func @transform_1(%arg0: i32) -> (i32, i32) {
    %c0_i32 = arith.constant 0 : i32
    %c0_i32_0 = arith.constant 0 : i32
    %c0_i32_1 = arith.constant 0 : i32
    return %c0_i32, %c0_i32_0 : i32, i32
  }
  func.func @transform_2(%arg0: i32) -> (i32, i32) {
    %c0_i32 = arith.constant 0 : i32
    %c0_i32_0 = arith.constant 0 : i32
    %c0_i32_1 = arith.constant 0 : i32
    return %c0_i32, %c0_i32_0 : i32, i32
  }
  func.func @transform_3(%arg0: i32) -> (i32, i32) {
    %c0_i32 = arith.constant 0 : i32
    %c0_i32_0 = arith.constant 0 : i32
    %c0_i32_1 = arith.constant 0 : i32
    return %c0_i32, %c0_i32_0 : i32, i32
  }
  func.func @transform_4(%arg0: i32) -> (i32, i32) {
    %c0_i32 = arith.constant 0 : i32
    %c0_i32_0 = arith.constant 0 : i32
    %c0_i32_1 = arith.constant 0 : i32
    return %c0_i32, %c0_i32_0 : i32, i32
  }
  func.func @transform_5(%arg0: i32) -> (i32, i32) {
    %c0_i32 = arith.constant 0 : i32
    %c0_i32_0 = arith.constant 0 : i32
    %c0_i32_1 = arith.constant 0 : i32
    return %c0_i32, %c0_i32_0 : i32, i32
  }
}

module attributes {stable_mosaic.version = 11 : i64} {
  func.func @_bn_block_kernel(%arg0: i32, %arg1: i32, %arg2: memref<256x1152xbf16, #tpu.memory_space<vmem>>, %arg3: memref<1152x32xbf16, #tpu.memory_space<vmem>>, %arg4: memref<64x1xf32, #tpu.memory_space<vmem>>, %arg5: memref<64x1xf32, #tpu.memory_space<vmem>>, %arg6: memref<256x32xbf16, #tpu.memory_space<vmem>>, %arg7: memref<1x256x32xf32, #tpu.memory_space<vmem>>, %arg8: memref<64x1xf32, #tpu.memory_space<vmem>>, %arg9: memref<64x1xf32, #tpu.memory_space<vmem>>) attributes {dimension_semantics = [#tpu.dimension_semantics<arbitrary>, #tpu.dimension_semantics<arbitrary>], iteration_bounds = array<i64: 2, 1>, scalar_prefetch = 0 : i64, scratch_operands = 3 : i64, tpu.core_type = #tpu.core_type<tc>, window_params = [{pipeline_mode = #tpu.pipeline_mode<synchronous>, transform_indices = @transform_0, window_bounds = array<i64: 256, 1152>}, {transform_indices = @transform_1, window_bounds = array<i64: 1152, 32>}, {pipeline_mode = #tpu.pipeline_mode<synchronous>, transform_indices = @transform_2, window_bounds = array<i64: 64, 1>}, {pipeline_mode = #tpu.pipeline_mode<synchronous>, transform_indices = @transform_3, window_bounds = array<i64: 64, 1>}, {transform_indices = @transform_4, window_bounds = array<i64: 256, 32>}]} {
    %c0_i32 = arith.constant 0 : i32
    %0 = arith.cmpi eq, %arg0, %c0_i32 : i32
    %1 = arith.extui %0 : i1 to i32
    %c0_i32_0 = arith.constant 0 : i32
    %2 = arith.cmpi ne, %1, %c0_i32_0 : i32
    scf.if %2 {
      %c0_i32_2 = arith.constant 0 : i32
      %6 = arith.cmpi eq, %arg1, %c0_i32_2 : i32
      %7 = arith.extui %6 : i1 to i32
      %c0_i32_3 = arith.constant 0 : i32
      %8 = arith.cmpi ne, %7, %c0_i32_3 : i32
      scf.if %8 {
        %cst_19 = arith.constant 0.000000e+00 : f32
        %41 = vector.broadcast %cst_19 : f32 to vector<64x1xf32>
        %c0_20 = arith.constant 0 : index
        %c0_21 = arith.constant 0 : index
        %42 = vector.load %arg8[%c0_20, %c0_21] : memref<64x1xf32, #tpu.memory_space<vmem>>, vector<64x1xf32>
        tpu.vector_store %arg8[%c0_20, %c0_21], %41 {strides = array<i32>} : memref<64x1xf32, #tpu.memory_space<vmem>>, vector<64x1xf32>,
        %cst_22 = arith.constant 0.000000e+00 : f32
        %43 = vector.broadcast %cst_22 : f32 to vector<64x1xf32>
        %c0_23 = arith.constant 0 : index
        %c0_24 = arith.constant 0 : index
        %44 = vector.load %arg9[%c0_23, %c0_24] : memref<64x1xf32, #tpu.memory_space<vmem>>, vector<64x1xf32>
        tpu.vector_store %arg9[%c0_23, %c0_24], %43 {strides = array<i32>} : memref<64x1xf32, #tpu.memory_space<vmem>>, vector<64x1xf32>,
      } else {
      }
      %c0 = arith.constant 0 : index
      %c0_4 = arith.constant 0 : index
      %9 = vector.load %arg2[%c0, %c0_4] : memref<256x1152xbf16, #tpu.memory_space<vmem>>, vector<256x1152xbf16>
      %c0_5 = arith.constant 0 : index
      %c0_6 = arith.constant 0 : index
      %10 = vector.load %arg3[%c0_5, %c0_6] : memref<1152x32xbf16, #tpu.memory_space<vmem>>, vector<1152x32xbf16>
      %cst = arith.constant dense<0.000000e+00> : vector<256x32xf32>
      %11 = tpu.matmul %9, %10, %cst {dimension_numbers = #tpu.dot_dimension_numbers<[1], [0], [0], [1], [0, 0, 1, 1], [], []>} : vector<256x1152xbf16>, vector<1152x32xbf16>, vector<256x32xf32> -> vector<256x32xf32>
      %12 = arith.index_cast %arg1 : i32 to index
      %c0_7 = arith.constant 0 : index
      %c0_8 = arith.constant 0 : index
      %13 = vector.load %arg7[%12, %c0_7, %c0_8] : memref<1x256x32xf32, #tpu.memory_space<vmem>>, vector<1x256x32xf32>
      %14 = vector.shape_cast %13 : vector<1x256x32xf32> to vector<256x32xf32>
      %15 = vector.shape_cast %11 : vector<256x32xf32> to vector<1x256x32xf32>
      tpu.vector_store %arg7[%12, %c0_7, %c0_8], %15 {strides = array<i32>} : memref<1x256x32xf32, #tpu.memory_space<vmem>>, vector<1x256x32xf32>,
      %16 = arith.mulf %11, %11 : vector<256x32xf32>
      %17 = vector.extract_strided_slice %11 {offsets = [0, 0], sizes = [64, 32], strides = [1, 1]} : vector<256x32xf32> to vector<64x32xf32>
      %18 = vector.extract_strided_slice %11 {offsets = [64, 0], sizes = [64, 32], strides = [1, 1]} : vector<256x32xf32> to vector<64x32xf32>
      %19 = arith.addf %17, %18 : vector<64x32xf32>
      %20 = vector.extract_strided_slice %11 {offsets = [128, 0], sizes = [64, 32], strides = [1, 1]} : vector<256x32xf32> to vector<64x32xf32>
      %21 = arith.addf %19, %20 : vector<64x32xf32>
      %22 = vector.extract_strided_slice %11 {offsets = [192, 0], sizes = [64, 32], strides = [1, 1]} : vector<256x32xf32> to vector<64x32xf32>
      %23 = arith.addf %21, %22 : vector<64x32xf32>
      %24 = vector.extract_strided_slice %16 {offsets = [0, 0], sizes = [64, 32], strides = [1, 1]} : vector<256x32xf32> to vector<64x32xf32>
      %25 = vector.extract_strided_slice %16 {offsets = [64, 0], sizes = [64, 32], strides = [1, 1]} : vector<256x32xf32> to vector<64x32xf32>
      %26 = arith.addf %24, %25 : vector<64x32xf32>
      %27 = vector.extract_strided_slice %16 {offsets = [128, 0], sizes = [64, 32], strides = [1, 1]} : vector<256x32xf32> to vector<64x32xf32>
      %28 = arith.addf %26, %27 : vector<64x32xf32>
      %29 = vector.extract_strided_slice %16 {offsets = [192, 0], sizes = [64, 32], strides = [1, 1]} : vector<256x32xf32> to vector<64x32xf32>
      %30 = arith.addf %28, %29 : vector<64x32xf32>
      %c0_9 = arith.constant 0 : index
      %c0_10 = arith.constant 0 : index
      %31 = vector.load %arg8[%c0_9, %c0_10] : memref<64x1xf32, #tpu.memory_space<vmem>>, vector<64x1xf32>
      %cst_11 = arith.constant dense<0.000000e+00> : vector<64xf32>
      %32 = vector.multi_reduction <add>, %23, %cst_11 [1] : vector<64x32xf32> to vector<64xf32>
      %33 = vector.shape_cast %32 : vector<64xf32> to vector<64x1xf32>
      %34 = arith.addf %31, %33 : vector<64x1xf32>
      %c0_12 = arith.constant 0 : index
      %c0_13 = arith.constant 0 : index
      %35 = vector.load %arg8[%c0_12, %c0_13] : memref<64x1xf32, #tpu.memory_space<vmem>>, vector<64x1xf32>
      tpu.vector_store %arg8[%c0_12, %c0_13], %34 {strides = array<i32>} : memref<64x1xf32, #tpu.memory_space<vmem>>, vector<64x1xf32>,
      %c0_14 = arith.constant 0 : index
      %c0_15 = arith.constant 0 : index
      %36 = vector.load %arg9[%c0_14, %c0_15] : memref<64x1xf32, #tpu.memory_space<vmem>>, vector<64x1xf32>
      %cst_16 = arith.constant dense<0.000000e+00> : vector<64xf32>
      %37 = vector.multi_reduction <add>, %30, %cst_16 [1] : vector<64x32xf32> to vector<64xf32>
      %38 = vector.shape_cast %37 : vector<64xf32> to vector<64x1xf32>
      %39 = arith.addf %36, %38 : vector<64x1xf32>
      %c0_17 = arith.constant 0 : index
      %c0_18 = arith.constant 0 : index
      %40 = vector.load %arg9[%c0_17, %c0_18] : memref<64x1xf32, #tpu.memory_space<vmem>>, vector<64x1xf32>
      tpu.vector_store %arg9[%c0_17, %c0_18], %39 {strides = array<i32>} : memref<64x1xf32, #tpu.memory_space<vmem>>, vector<64x1xf32>,
    } else {
    }
    %c1_i32 = arith.constant 1 : i32
    %3 = arith.cmpi eq, %arg0, %c1_i32 : i32
    %4 = arith.extui %3 : i1 to i32
    %c0_i32_1 = arith.constant 0 : i32
    %5 = arith.cmpi ne, %4, %c0_i32_1 : i32
    scf.if %5 {
      %c0 = arith.constant 0 : index
      %c0_2 = arith.constant 0 : index
      %6 = vector.load %arg8[%c0, %c0_2] : memref<64x1xf32, #tpu.memory_space<vmem>>, vector<64x1xf32>
      %cst = arith.constant 1.280000e+02 : f32
      %7 = vector.broadcast %cst : f32 to vector<64x1xf32>
      %8 = arith.divf %6, %7 : vector<64x1xf32>
      %c0_3 = arith.constant 0 : index
      %c0_4 = arith.constant 0 : index
      %9 = vector.load %arg9[%c0_3, %c0_4] : memref<64x1xf32, #tpu.memory_space<vmem>>, vector<64x1xf32>
      %cst_5 = arith.constant 1.280000e+02 : f32
      %10 = vector.broadcast %cst_5 : f32 to vector<64x1xf32>
      %11 = arith.divf %9, %10 : vector<64x1xf32>
      %12 = arith.mulf %8, %8 : vector<64x1xf32>
      %13 = arith.subf %11, %12 : vector<64x1xf32>
      %cst_6 = arith.constant 0.000000e+00 : f32
      %14 = vector.broadcast %cst_6 : f32 to vector<64x1xf32>
      %15 = arith.maximumf %13, %14 : vector<64x1xf32>
      %c0_7 = arith.constant 0 : index
      %c0_8 = arith.constant 0 : index
      %16 = vector.load %arg4[%c0_7, %c0_8] : memref<64x1xf32, #tpu.memory_space<vmem>>, vector<64x1xf32>
      %cst_9 = arith.constant 9.99999974E-6 : f32
      %17 = vector.broadcast %cst_9 : f32 to vector<64x1xf32>
      %18 = arith.addf %15, %17 : vector<64x1xf32>
      %19 = math.rsqrt %18 : vector<64x1xf32>
      %20 = arith.mulf %16, %19 : vector<64x1xf32>
      %c0_10 = arith.constant 0 : index
      %c0_11 = arith.constant 0 : index
      %21 = vector.load %arg5[%c0_10, %c0_11] : memref<64x1xf32, #tpu.memory_space<vmem>>, vector<64x1xf32>
      %22 = arith.mulf %8, %20 : vector<64x1xf32>
      %23 = arith.subf %21, %22 : vector<64x1xf32>
      %24 = tpu.concatenate %20, %20, %20, %20 in 0 : vector<64x1xf32>, vector<64x1xf32>, vector<64x1xf32>, vector<64x1xf32> -> vector<256x1xf32>
      %25 = tpu.concatenate %23, %23, %23, %23 in 0 : vector<64x1xf32>, vector<64x1xf32>, vector<64x1xf32>, vector<64x1xf32> -> vector<256x1xf32>
      %26 = arith.index_cast %arg1 : i32 to index
      %c0_12 = arith.constant 0 : index
      %c0_13 = arith.constant 0 : index
      %27 = vector.load %arg7[%26, %c0_12, %c0_13] : memref<1x256x32xf32, #tpu.memory_space<vmem>>, vector<1x256x32xf32>
      %28 = vector.shape_cast %27 : vector<1x256x32xf32> to vector<256x32xf32>
      %29 = vector.broadcast %24 : vector<256x1xf32> to vector<256x32xf32>
      %30 = arith.mulf %28, %29 : vector<256x32xf32>
      %31 = vector.broadcast %25 : vector<256x1xf32> to vector<256x32xf32>
      %32 = arith.addf %30, %31 : vector<256x32xf32>
      %cst_14 = arith.constant 0.000000e+00 : f32
      %33 = vector.broadcast %cst_14 : f32 to vector<256x32xf32>
      %34 = arith.maximumf %32, %33 : vector<256x32xf32>
      %35 = arith.truncf %34 : vector<256x32xf32> to vector<256x32xbf16>
      %c0_15 = arith.constant 0 : index
      %c0_16 = arith.constant 0 : index
      %36 = vector.load %arg6[%c0_15, %c0_16] : memref<256x32xbf16, #tpu.memory_space<vmem>>, vector<256x32xbf16>
      tpu.vector_store %arg6[%c0_15, %c0_16], %35 {strides = array<i32>} : memref<256x32xbf16, #tpu.memory_space<vmem>>, vector<256x32xbf16>,
    } else {
    }
    return
  }
  func.func @transform_0(%arg0: i32, %arg1: i32) -> (i32, i32) {
    %c0_i32 = arith.constant 0 : i32
    %c0_i32_0 = arith.constant 0 : i32
    %c0_i32_1 = arith.constant 0 : i32
    return %c0_i32, %c0_i32_0 : i32, i32
  }
  func.func @transform_1(%arg0: i32, %arg1: i32) -> (i32, i32) {
    %c1_i32 = arith.constant 1 : i32
    %0 = arith.subi %c1_i32, %arg0 : i32
    %1 = arith.muli %arg1, %0 : i32
    %c0_i32 = arith.constant 0 : i32
    %c0_i32_0 = arith.constant 0 : i32
    return %c0_i32, %1 : i32, i32
  }
  func.func @transform_2(%arg0: i32, %arg1: i32) -> (i32, i32) {
    %c0_i32 = arith.constant 0 : i32
    %c0_i32_0 = arith.constant 0 : i32
    %c0_i32_1 = arith.constant 0 : i32
    return %c0_i32, %c0_i32_0 : i32, i32
  }
  func.func @transform_3(%arg0: i32, %arg1: i32) -> (i32, i32) {
    %c0_i32 = arith.constant 0 : i32
    %c0_i32_0 = arith.constant 0 : i32
    %c0_i32_1 = arith.constant 0 : i32
    return %c0_i32, %c0_i32_0 : i32, i32
  }
  func.func @transform_4(%arg0: i32, %arg1: i32) -> (i32, i32) {
    %0 = arith.muli %arg1, %arg0 : i32
    %c0_i32 = arith.constant 0 : i32
    %c0_i32_0 = arith.constant 0 : i32
    return %c0_i32, %0 : i32, i32
  }
}

module attributes {stable_mosaic.version = 11 : i64} {
  func.func @_bn_block_kernel(%arg0: i32, %arg1: i32, %arg2: memref<128x576xbf16, #tpu.memory_space<vmem>>, %arg3: memref<576x128xbf16, #tpu.memory_space<vmem>>, %arg4: memref<32x1xf32, #tpu.memory_space<vmem>>, %arg5: memref<32x1xf32, #tpu.memory_space<vmem>>, %arg6: memref<128x128xbf16, #tpu.memory_space<vmem>>, %arg7: memref<1x128x128xf32, #tpu.memory_space<vmem>>, %arg8: memref<32x1xf32, #tpu.memory_space<vmem>>, %arg9: memref<32x1xf32, #tpu.memory_space<vmem>>) attributes {dimension_semantics = [#tpu.dimension_semantics<arbitrary>, #tpu.dimension_semantics<arbitrary>], iteration_bounds = array<i64: 2, 1>, scalar_prefetch = 0 : i64, scratch_operands = 3 : i64, tpu.core_type = #tpu.core_type<tc>, window_params = [{pipeline_mode = #tpu.pipeline_mode<synchronous>, transform_indices = @transform_0, window_bounds = array<i64: 128, 576>}, {transform_indices = @transform_1, window_bounds = array<i64: 576, 128>}, {pipeline_mode = #tpu.pipeline_mode<synchronous>, transform_indices = @transform_2, window_bounds = array<i64: 32, 1>}, {pipeline_mode = #tpu.pipeline_mode<synchronous>, transform_indices = @transform_3, window_bounds = array<i64: 32, 1>}, {transform_indices = @transform_4, window_bounds = array<i64: 128, 128>}]} {
    %c0_i32 = arith.constant 0 : i32
    %0 = arith.cmpi eq, %arg0, %c0_i32 : i32
    %1 = arith.extui %0 : i1 to i32
    %c0_i32_0 = arith.constant 0 : i32
    %2 = arith.cmpi ne, %1, %c0_i32_0 : i32
    scf.if %2 {
      %c0_i32_2 = arith.constant 0 : i32
      %6 = arith.cmpi eq, %arg1, %c0_i32_2 : i32
      %7 = arith.extui %6 : i1 to i32
      %c0_i32_3 = arith.constant 0 : i32
      %8 = arith.cmpi ne, %7, %c0_i32_3 : i32
      scf.if %8 {
        %cst_19 = arith.constant 0.000000e+00 : f32
        %41 = vector.broadcast %cst_19 : f32 to vector<32x1xf32>
        %c0_20 = arith.constant 0 : index
        %c0_21 = arith.constant 0 : index
        %42 = vector.load %arg8[%c0_20, %c0_21] : memref<32x1xf32, #tpu.memory_space<vmem>>, vector<32x1xf32>
        tpu.vector_store %arg8[%c0_20, %c0_21], %41 {strides = array<i32>} : memref<32x1xf32, #tpu.memory_space<vmem>>, vector<32x1xf32>,
        %cst_22 = arith.constant 0.000000e+00 : f32
        %43 = vector.broadcast %cst_22 : f32 to vector<32x1xf32>
        %c0_23 = arith.constant 0 : index
        %c0_24 = arith.constant 0 : index
        %44 = vector.load %arg9[%c0_23, %c0_24] : memref<32x1xf32, #tpu.memory_space<vmem>>, vector<32x1xf32>
        tpu.vector_store %arg9[%c0_23, %c0_24], %43 {strides = array<i32>} : memref<32x1xf32, #tpu.memory_space<vmem>>, vector<32x1xf32>,
      } else {
      }
      %c0 = arith.constant 0 : index
      %c0_4 = arith.constant 0 : index
      %9 = vector.load %arg2[%c0, %c0_4] : memref<128x576xbf16, #tpu.memory_space<vmem>>, vector<128x576xbf16>
      %c0_5 = arith.constant 0 : index
      %c0_6 = arith.constant 0 : index
      %10 = vector.load %arg3[%c0_5, %c0_6] : memref<576x128xbf16, #tpu.memory_space<vmem>>, vector<576x128xbf16>
      %cst = arith.constant dense<0.000000e+00> : vector<128x128xf32>
      %11 = tpu.matmul %9, %10, %cst {dimension_numbers = #tpu.dot_dimension_numbers<[1], [0], [0], [1], [0, 0, 1, 1], [], []>} : vector<128x576xbf16>, vector<576x128xbf16>, vector<128x128xf32> -> vector<128x128xf32>
      %12 = arith.index_cast %arg1 : i32 to index
      %c0_7 = arith.constant 0 : index
      %c0_8 = arith.constant 0 : index
      %13 = vector.load %arg7[%12, %c0_7, %c0_8] : memref<1x128x128xf32, #tpu.memory_space<vmem>>, vector<1x128x128xf32>
      %14 = vector.shape_cast %13 : vector<1x128x128xf32> to vector<128x128xf32>
      %15 = vector.shape_cast %11 : vector<128x128xf32> to vector<1x128x128xf32>
      tpu.vector_store %arg7[%12, %c0_7, %c0_8], %15 {strides = array<i32>} : memref<1x128x128xf32, #tpu.memory_space<vmem>>, vector<1x128x128xf32>,
      %16 = arith.mulf %11, %11 : vector<128x128xf32>
      %17 = vector.extract_strided_slice %11 {offsets = [0, 0], sizes = [32, 128], strides = [1, 1]} : vector<128x128xf32> to vector<32x128xf32>
      %18 = vector.extract_strided_slice %11 {offsets = [32, 0], sizes = [32, 128], strides = [1, 1]} : vector<128x128xf32> to vector<32x128xf32>
      %19 = arith.addf %17, %18 : vector<32x128xf32>
      %20 = vector.extract_strided_slice %11 {offsets = [64, 0], sizes = [32, 128], strides = [1, 1]} : vector<128x128xf32> to vector<32x128xf32>
      %21 = arith.addf %19, %20 : vector<32x128xf32>
      %22 = vector.extract_strided_slice %11 {offsets = [96, 0], sizes = [32, 128], strides = [1, 1]} : vector<128x128xf32> to vector<32x128xf32>
      %23 = arith.addf %21, %22 : vector<32x128xf32>
      %24 = vector.extract_strided_slice %16 {offsets = [0, 0], sizes = [32, 128], strides = [1, 1]} : vector<128x128xf32> to vector<32x128xf32>
      %25 = vector.extract_strided_slice %16 {offsets = [32, 0], sizes = [32, 128], strides = [1, 1]} : vector<128x128xf32> to vector<32x128xf32>
      %26 = arith.addf %24, %25 : vector<32x128xf32>
      %27 = vector.extract_strided_slice %16 {offsets = [64, 0], sizes = [32, 128], strides = [1, 1]} : vector<128x128xf32> to vector<32x128xf32>
      %28 = arith.addf %26, %27 : vector<32x128xf32>
      %29 = vector.extract_strided_slice %16 {offsets = [96, 0], sizes = [32, 128], strides = [1, 1]} : vector<128x128xf32> to vector<32x128xf32>
      %30 = arith.addf %28, %29 : vector<32x128xf32>
      %c0_9 = arith.constant 0 : index
      %c0_10 = arith.constant 0 : index
      %31 = vector.load %arg8[%c0_9, %c0_10] : memref<32x1xf32, #tpu.memory_space<vmem>>, vector<32x1xf32>
      %cst_11 = arith.constant dense<0.000000e+00> : vector<32xf32>
      %32 = vector.multi_reduction <add>, %23, %cst_11 [1] : vector<32x128xf32> to vector<32xf32>
      %33 = vector.shape_cast %32 : vector<32xf32> to vector<32x1xf32>
      %34 = arith.addf %31, %33 : vector<32x1xf32>
      %c0_12 = arith.constant 0 : index
      %c0_13 = arith.constant 0 : index
      %35 = vector.load %arg8[%c0_12, %c0_13] : memref<32x1xf32, #tpu.memory_space<vmem>>, vector<32x1xf32>
      tpu.vector_store %arg8[%c0_12, %c0_13], %34 {strides = array<i32>} : memref<32x1xf32, #tpu.memory_space<vmem>>, vector<32x1xf32>,
      %c0_14 = arith.constant 0 : index
      %c0_15 = arith.constant 0 : index
      %36 = vector.load %arg9[%c0_14, %c0_15] : memref<32x1xf32, #tpu.memory_space<vmem>>, vector<32x1xf32>
      %cst_16 = arith.constant dense<0.000000e+00> : vector<32xf32>
      %37 = vector.multi_reduction <add>, %30, %cst_16 [1] : vector<32x128xf32> to vector<32xf32>
      %38 = vector.shape_cast %37 : vector<32xf32> to vector<32x1xf32>
      %39 = arith.addf %36, %38 : vector<32x1xf32>
      %c0_17 = arith.constant 0 : index
      %c0_18 = arith.constant 0 : index
      %40 = vector.load %arg9[%c0_17, %c0_18] : memref<32x1xf32, #tpu.memory_space<vmem>>, vector<32x1xf32>
      tpu.vector_store %arg9[%c0_17, %c0_18], %39 {strides = array<i32>} : memref<32x1xf32, #tpu.memory_space<vmem>>, vector<32x1xf32>,
    } else {
    }
    %c1_i32 = arith.constant 1 : i32
    %3 = arith.cmpi eq, %arg0, %c1_i32 : i32
    %4 = arith.extui %3 : i1 to i32
    %c0_i32_1 = arith.constant 0 : i32
    %5 = arith.cmpi ne, %4, %c0_i32_1 : i32
    scf.if %5 {
      %c0 = arith.constant 0 : index
      %c0_2 = arith.constant 0 : index
      %6 = vector.load %arg8[%c0, %c0_2] : memref<32x1xf32, #tpu.memory_space<vmem>>, vector<32x1xf32>
      %cst = arith.constant 5.120000e+02 : f32
      %7 = vector.broadcast %cst : f32 to vector<32x1xf32>
      %8 = arith.divf %6, %7 : vector<32x1xf32>
      %c0_3 = arith.constant 0 : index
      %c0_4 = arith.constant 0 : index
      %9 = vector.load %arg9[%c0_3, %c0_4] : memref<32x1xf32, #tpu.memory_space<vmem>>, vector<32x1xf32>
      %cst_5 = arith.constant 5.120000e+02 : f32
      %10 = vector.broadcast %cst_5 : f32 to vector<32x1xf32>
      %11 = arith.divf %9, %10 : vector<32x1xf32>
      %12 = arith.mulf %8, %8 : vector<32x1xf32>
      %13 = arith.subf %11, %12 : vector<32x1xf32>
      %cst_6 = arith.constant 0.000000e+00 : f32
      %14 = vector.broadcast %cst_6 : f32 to vector<32x1xf32>
      %15 = arith.maximumf %13, %14 : vector<32x1xf32>
      %c0_7 = arith.constant 0 : index
      %c0_8 = arith.constant 0 : index
      %16 = vector.load %arg4[%c0_7, %c0_8] : memref<32x1xf32, #tpu.memory_space<vmem>>, vector<32x1xf32>
      %cst_9 = arith.constant 9.99999974E-6 : f32
      %17 = vector.broadcast %cst_9 : f32 to vector<32x1xf32>
      %18 = arith.addf %15, %17 : vector<32x1xf32>
      %19 = math.rsqrt %18 : vector<32x1xf32>
      %20 = arith.mulf %16, %19 : vector<32x1xf32>
      %c0_10 = arith.constant 0 : index
      %c0_11 = arith.constant 0 : index
      %21 = vector.load %arg5[%c0_10, %c0_11] : memref<32x1xf32, #tpu.memory_space<vmem>>, vector<32x1xf32>
      %22 = arith.mulf %8, %20 : vector<32x1xf32>
      %23 = arith.subf %21, %22 : vector<32x1xf32>
      %24 = tpu.concatenate %20, %20, %20, %20 in 0 : vector<32x1xf32>, vector<32x1xf32>, vector<32x1xf32>, vector<32x1xf32> -> vector<128x1xf32>
      %25 = tpu.concatenate %23, %23, %23, %23 in 0 : vector<32x1xf32>, vector<32x1xf32>, vector<32x1xf32>, vector<32x1xf32> -> vector<128x1xf32>
      %26 = arith.index_cast %arg1 : i32 to index
      %c0_12 = arith.constant 0 : index
      %c0_13 = arith.constant 0 : index
      %27 = vector.load %arg7[%26, %c0_12, %c0_13] : memref<1x128x128xf32, #tpu.memory_space<vmem>>, vector<1x128x128xf32>
      %28 = vector.shape_cast %27 : vector<1x128x128xf32> to vector<128x128xf32>
      %29 = vector.broadcast %24 : vector<128x1xf32> to vector<128x128xf32>
      %30 = arith.mulf %28, %29 : vector<128x128xf32>
      %31 = vector.broadcast %25 : vector<128x1xf32> to vector<128x128xf32>
      %32 = arith.addf %30, %31 : vector<128x128xf32>
      %cst_14 = arith.constant 0.000000e+00 : f32
      %33 = vector.broadcast %cst_14 : f32 to vector<128x128xf32>
      %34 = arith.maximumf %32, %33 : vector<128x128xf32>
      %35 = arith.truncf %34 : vector<128x128xf32> to vector<128x128xbf16>
      %c0_15 = arith.constant 0 : index
      %c0_16 = arith.constant 0 : index
      %36 = vector.load %arg6[%c0_15, %c0_16] : memref<128x128xbf16, #tpu.memory_space<vmem>>, vector<128x128xbf16>
      tpu.vector_store %arg6[%c0_15, %c0_16], %35 {strides = array<i32>} : memref<128x128xbf16, #tpu.memory_space<vmem>>, vector<128x128xbf16>,
    } else {
    }
    return
  }
  func.func @transform_0(%arg0: i32, %arg1: i32) -> (i32, i32) {
    %c0_i32 = arith.constant 0 : i32
    %c0_i32_0 = arith.constant 0 : i32
    %c0_i32_1 = arith.constant 0 : i32
    return %c0_i32, %c0_i32_0 : i32, i32
  }
  func.func @transform_1(%arg0: i32, %arg1: i32) -> (i32, i32) {
    %c1_i32 = arith.constant 1 : i32
    %0 = arith.subi %c1_i32, %arg0 : i32
    %1 = arith.muli %arg1, %0 : i32
    %c0_i32 = arith.constant 0 : i32
    %c0_i32_0 = arith.constant 0 : i32
    return %c0_i32, %1 : i32, i32
  }
  func.func @transform_2(%arg0: i32, %arg1: i32) -> (i32, i32) {
    %c0_i32 = arith.constant 0 : i32
    %c0_i32_0 = arith.constant 0 : i32
    %c0_i32_1 = arith.constant 0 : i32
    return %c0_i32, %c0_i32_0 : i32, i32
  }
  func.func @transform_3(%arg0: i32, %arg1: i32) -> (i32, i32) {
    %c0_i32 = arith.constant 0 : i32
    %c0_i32_0 = arith.constant 0 : i32
    %c0_i32_1 = arith.constant 0 : i32
    return %c0_i32, %c0_i32_0 : i32, i32
  }
  func.func @transform_4(%arg0: i32, %arg1: i32) -> (i32, i32) {
    %0 = arith.muli %arg1, %arg0 : i32
    %c0_i32 = arith.constant 0 : i32
    %c0_i32_0 = arith.constant 0 : i32
    return %c0_i32, %0 : i32, i32
  }
}

module attributes {stable_mosaic.version = 11 : i64} {
  func.func @_bn_block_kernel(%arg0: i32, %arg1: i32, %arg2: memref<64x288xbf16, #tpu.memory_space<vmem>>, %arg3: memref<288x512xbf16, #tpu.memory_space<vmem>>, %arg4: memref<16x1xf32, #tpu.memory_space<vmem>>, %arg5: memref<16x1xf32, #tpu.memory_space<vmem>>, %arg6: memref<64x512xbf16, #tpu.memory_space<vmem>>, %arg7: memref<1x64x512xf32, #tpu.memory_space<vmem>>, %arg8: memref<16x1xf32, #tpu.memory_space<vmem>>, %arg9: memref<16x1xf32, #tpu.memory_space<vmem>>) attributes {dimension_semantics = [#tpu.dimension_semantics<arbitrary>, #tpu.dimension_semantics<arbitrary>], iteration_bounds = array<i64: 2, 1>, scalar_prefetch = 0 : i64, scratch_operands = 3 : i64, tpu.core_type = #tpu.core_type<tc>, window_params = [{pipeline_mode = #tpu.pipeline_mode<synchronous>, transform_indices = @transform_0, window_bounds = array<i64: 64, 288>}, {transform_indices = @transform_1, window_bounds = array<i64: 288, 512>}, {pipeline_mode = #tpu.pipeline_mode<synchronous>, transform_indices = @transform_2, window_bounds = array<i64: 16, 1>}, {pipeline_mode = #tpu.pipeline_mode<synchronous>, transform_indices = @transform_3, window_bounds = array<i64: 16, 1>}, {transform_indices = @transform_4, window_bounds = array<i64: 64, 512>}]} {
    %c0_i32 = arith.constant 0 : i32
    %0 = arith.cmpi eq, %arg0, %c0_i32 : i32
    %1 = arith.extui %0 : i1 to i32
    %c0_i32_0 = arith.constant 0 : i32
    %2 = arith.cmpi ne, %1, %c0_i32_0 : i32
    scf.if %2 {
      %c0_i32_2 = arith.constant 0 : i32
      %6 = arith.cmpi eq, %arg1, %c0_i32_2 : i32
      %7 = arith.extui %6 : i1 to i32
      %c0_i32_3 = arith.constant 0 : i32
      %8 = arith.cmpi ne, %7, %c0_i32_3 : i32
      scf.if %8 {
        %cst_19 = arith.constant 0.000000e+00 : f32
        %41 = vector.broadcast %cst_19 : f32 to vector<16x1xf32>
        %c0_20 = arith.constant 0 : index
        %c0_21 = arith.constant 0 : index
        %42 = vector.load %arg8[%c0_20, %c0_21] : memref<16x1xf32, #tpu.memory_space<vmem>>, vector<16x1xf32>
        tpu.vector_store %arg8[%c0_20, %c0_21], %41 {strides = array<i32>} : memref<16x1xf32, #tpu.memory_space<vmem>>, vector<16x1xf32>,
        %cst_22 = arith.constant 0.000000e+00 : f32
        %43 = vector.broadcast %cst_22 : f32 to vector<16x1xf32>
        %c0_23 = arith.constant 0 : index
        %c0_24 = arith.constant 0 : index
        %44 = vector.load %arg9[%c0_23, %c0_24] : memref<16x1xf32, #tpu.memory_space<vmem>>, vector<16x1xf32>
        tpu.vector_store %arg9[%c0_23, %c0_24], %43 {strides = array<i32>} : memref<16x1xf32, #tpu.memory_space<vmem>>, vector<16x1xf32>,
      } else {
      }
      %c0 = arith.constant 0 : index
      %c0_4 = arith.constant 0 : index
      %9 = vector.load %arg2[%c0, %c0_4] : memref<64x288xbf16, #tpu.memory_space<vmem>>, vector<64x288xbf16>
      %c0_5 = arith.constant 0 : index
      %c0_6 = arith.constant 0 : index
      %10 = vector.load %arg3[%c0_5, %c0_6] : memref<288x512xbf16, #tpu.memory_space<vmem>>, vector<288x512xbf16>
      %cst = arith.constant dense<0.000000e+00> : vector<64x512xf32>
      %11 = tpu.matmul %9, %10, %cst {dimension_numbers = #tpu.dot_dimension_numbers<[1], [0], [0], [1], [0, 0, 1, 1], [], []>} : vector<64x288xbf16>, vector<288x512xbf16>, vector<64x512xf32> -> vector<64x512xf32>
      %12 = arith.index_cast %arg1 : i32 to index
      %c0_7 = arith.constant 0 : index
      %c0_8 = arith.constant 0 : index
      %13 = vector.load %arg7[%12, %c0_7, %c0_8] : memref<1x64x512xf32, #tpu.memory_space<vmem>>, vector<1x64x512xf32>
      %14 = vector.shape_cast %13 : vector<1x64x512xf32> to vector<64x512xf32>
      %15 = vector.shape_cast %11 : vector<64x512xf32> to vector<1x64x512xf32>
      tpu.vector_store %arg7[%12, %c0_7, %c0_8], %15 {strides = array<i32>} : memref<1x64x512xf32, #tpu.memory_space<vmem>>, vector<1x64x512xf32>,
      %16 = arith.mulf %11, %11 : vector<64x512xf32>
      %17 = vector.extract_strided_slice %11 {offsets = [0, 0], sizes = [16, 512], strides = [1, 1]} : vector<64x512xf32> to vector<16x512xf32>
      %18 = vector.extract_strided_slice %11 {offsets = [16, 0], sizes = [16, 512], strides = [1, 1]} : vector<64x512xf32> to vector<16x512xf32>
      %19 = arith.addf %17, %18 : vector<16x512xf32>
      %20 = vector.extract_strided_slice %11 {offsets = [32, 0], sizes = [16, 512], strides = [1, 1]} : vector<64x512xf32> to vector<16x512xf32>
      %21 = arith.addf %19, %20 : vector<16x512xf32>
      %22 = vector.extract_strided_slice %11 {offsets = [48, 0], sizes = [16, 512], strides = [1, 1]} : vector<64x512xf32> to vector<16x512xf32>
      %23 = arith.addf %21, %22 : vector<16x512xf32>
      %24 = vector.extract_strided_slice %16 {offsets = [0, 0], sizes = [16, 512], strides = [1, 1]} : vector<64x512xf32> to vector<16x512xf32>
      %25 = vector.extract_strided_slice %16 {offsets = [16, 0], sizes = [16, 512], strides = [1, 1]} : vector<64x512xf32> to vector<16x512xf32>
      %26 = arith.addf %24, %25 : vector<16x512xf32>
      %27 = vector.extract_strided_slice %16 {offsets = [32, 0], sizes = [16, 512], strides = [1, 1]} : vector<64x512xf32> to vector<16x512xf32>
      %28 = arith.addf %26, %27 : vector<16x512xf32>
      %29 = vector.extract_strided_slice %16 {offsets = [48, 0], sizes = [16, 512], strides = [1, 1]} : vector<64x512xf32> to vector<16x512xf32>
      %30 = arith.addf %28, %29 : vector<16x512xf32>
      %c0_9 = arith.constant 0 : index
      %c0_10 = arith.constant 0 : index
      %31 = vector.load %arg8[%c0_9, %c0_10] : memref<16x1xf32, #tpu.memory_space<vmem>>, vector<16x1xf32>
      %cst_11 = arith.constant dense<0.000000e+00> : vector<16xf32>
      %32 = vector.multi_reduction <add>, %23, %cst_11 [1] : vector<16x512xf32> to vector<16xf32>
      %33 = vector.shape_cast %32 : vector<16xf32> to vector<16x1xf32>
      %34 = arith.addf %31, %33 : vector<16x1xf32>
      %c0_12 = arith.constant 0 : index
      %c0_13 = arith.constant 0 : index
      %35 = vector.load %arg8[%c0_12, %c0_13] : memref<16x1xf32, #tpu.memory_space<vmem>>, vector<16x1xf32>
      tpu.vector_store %arg8[%c0_12, %c0_13], %34 {strides = array<i32>} : memref<16x1xf32, #tpu.memory_space<vmem>>, vector<16x1xf32>,
      %c0_14 = arith.constant 0 : index
      %c0_15 = arith.constant 0 : index
      %36 = vector.load %arg9[%c0_14, %c0_15] : memref<16x1xf32, #tpu.memory_space<vmem>>, vector<16x1xf32>
      %cst_16 = arith.constant dense<0.000000e+00> : vector<16xf32>
      %37 = vector.multi_reduction <add>, %30, %cst_16 [1] : vector<16x512xf32> to vector<16xf32>
      %38 = vector.shape_cast %37 : vector<16xf32> to vector<16x1xf32>
      %39 = arith.addf %36, %38 : vector<16x1xf32>
      %c0_17 = arith.constant 0 : index
      %c0_18 = arith.constant 0 : index
      %40 = vector.load %arg9[%c0_17, %c0_18] : memref<16x1xf32, #tpu.memory_space<vmem>>, vector<16x1xf32>
      tpu.vector_store %arg9[%c0_17, %c0_18], %39 {strides = array<i32>} : memref<16x1xf32, #tpu.memory_space<vmem>>, vector<16x1xf32>,
    } else {
    }
    %c1_i32 = arith.constant 1 : i32
    %3 = arith.cmpi eq, %arg0, %c1_i32 : i32
    %4 = arith.extui %3 : i1 to i32
    %c0_i32_1 = arith.constant 0 : i32
    %5 = arith.cmpi ne, %4, %c0_i32_1 : i32
    scf.if %5 {
      %c0 = arith.constant 0 : index
      %c0_2 = arith.constant 0 : index
      %6 = vector.load %arg8[%c0, %c0_2] : memref<16x1xf32, #tpu.memory_space<vmem>>, vector<16x1xf32>
      %cst = arith.constant 2.048000e+03 : f32
      %7 = vector.broadcast %cst : f32 to vector<16x1xf32>
      %8 = arith.divf %6, %7 : vector<16x1xf32>
      %c0_3 = arith.constant 0 : index
      %c0_4 = arith.constant 0 : index
      %9 = vector.load %arg9[%c0_3, %c0_4] : memref<16x1xf32, #tpu.memory_space<vmem>>, vector<16x1xf32>
      %cst_5 = arith.constant 2.048000e+03 : f32
      %10 = vector.broadcast %cst_5 : f32 to vector<16x1xf32>
      %11 = arith.divf %9, %10 : vector<16x1xf32>
      %12 = arith.mulf %8, %8 : vector<16x1xf32>
      %13 = arith.subf %11, %12 : vector<16x1xf32>
      %cst_6 = arith.constant 0.000000e+00 : f32
      %14 = vector.broadcast %cst_6 : f32 to vector<16x1xf32>
      %15 = arith.maximumf %13, %14 : vector<16x1xf32>
      %c0_7 = arith.constant 0 : index
      %c0_8 = arith.constant 0 : index
      %16 = vector.load %arg4[%c0_7, %c0_8] : memref<16x1xf32, #tpu.memory_space<vmem>>, vector<16x1xf32>
      %cst_9 = arith.constant 9.99999974E-6 : f32
      %17 = vector.broadcast %cst_9 : f32 to vector<16x1xf32>
      %18 = arith.addf %15, %17 : vector<16x1xf32>
      %19 = math.rsqrt %18 : vector<16x1xf32>
      %20 = arith.mulf %16, %19 : vector<16x1xf32>
      %c0_10 = arith.constant 0 : index
      %c0_11 = arith.constant 0 : index
      %21 = vector.load %arg5[%c0_10, %c0_11] : memref<16x1xf32, #tpu.memory_space<vmem>>, vector<16x1xf32>
      %22 = arith.mulf %8, %20 : vector<16x1xf32>
      %23 = arith.subf %21, %22 : vector<16x1xf32>
      %24 = tpu.concatenate %20, %20, %20, %20 in 0 : vector<16x1xf32>, vector<16x1xf32>, vector<16x1xf32>, vector<16x1xf32> -> vector<64x1xf32>
      %25 = tpu.concatenate %23, %23, %23, %23 in 0 : vector<16x1xf32>, vector<16x1xf32>, vector<16x1xf32>, vector<16x1xf32> -> vector<64x1xf32>
      %26 = arith.index_cast %arg1 : i32 to index
      %c0_12 = arith.constant 0 : index
      %c0_13 = arith.constant 0 : index
      %27 = vector.load %arg7[%26, %c0_12, %c0_13] : memref<1x64x512xf32, #tpu.memory_space<vmem>>, vector<1x64x512xf32>
      %28 = vector.shape_cast %27 : vector<1x64x512xf32> to vector<64x512xf32>
      %29 = vector.broadcast %24 : vector<64x1xf32> to vector<64x512xf32>
      %30 = arith.mulf %28, %29 : vector<64x512xf32>
      %31 = vector.broadcast %25 : vector<64x1xf32> to vector<64x512xf32>
      %32 = arith.addf %30, %31 : vector<64x512xf32>
      %cst_14 = arith.constant 0.000000e+00 : f32
      %33 = vector.broadcast %cst_14 : f32 to vector<64x512xf32>
      %34 = arith.maximumf %32, %33 : vector<64x512xf32>
      %35 = arith.truncf %34 : vector<64x512xf32> to vector<64x512xbf16>
      %c0_15 = arith.constant 0 : index
      %c0_16 = arith.constant 0 : index
      %36 = vector.load %arg6[%c0_15, %c0_16] : memref<64x512xbf16, #tpu.memory_space<vmem>>, vector<64x512xbf16>
      tpu.vector_store %arg6[%c0_15, %c0_16], %35 {strides = array<i32>} : memref<64x512xbf16, #tpu.memory_space<vmem>>, vector<64x512xbf16>,
    } else {
    }
    return
  }
  func.func @transform_0(%arg0: i32, %arg1: i32) -> (i32, i32) {
    %c0_i32 = arith.constant 0 : i32
    %c0_i32_0 = arith.constant 0 : i32
    %c0_i32_1 = arith.constant 0 : i32
    return %c0_i32, %c0_i32_0 : i32, i32
  }
  func.func @transform_1(%arg0: i32, %arg1: i32) -> (i32, i32) {
    %c1_i32 = arith.constant 1 : i32
    %0 = arith.subi %c1_i32, %arg0 : i32
    %1 = arith.muli %arg1, %0 : i32
    %c0_i32 = arith.constant 0 : i32
    %c0_i32_0 = arith.constant 0 : i32
    return %c0_i32, %1 : i32, i32
  }
  func.func @transform_2(%arg0: i32, %arg1: i32) -> (i32, i32) {
    %c0_i32 = arith.constant 0 : i32
    %c0_i32_0 = arith.constant 0 : i32
    %c0_i32_1 = arith.constant 0 : i32
    return %c0_i32, %c0_i32_0 : i32, i32
  }
  func.func @transform_3(%arg0: i32, %arg1: i32) -> (i32, i32) {
    %c0_i32 = arith.constant 0 : i32
    %c0_i32_0 = arith.constant 0 : i32
    %c0_i32_1 = arith.constant 0 : i32
    return %c0_i32, %c0_i32_0 : i32, i32
  }
  func.func @transform_4(%arg0: i32, %arg1: i32) -> (i32, i32) {
    %0 = arith.muli %arg1, %arg0 : i32
    %c0_i32 = arith.constant 0 : i32
    %c0_i32_0 = arith.constant 0 : i32
    return %c0_i32, %0 : i32, i32
  }
}

module attributes {stable_mosaic.version = 11 : i64} {
  func.func @_final_kernel(%arg0: i32, %arg1: memref<12x144xbf16, #tpu.memory_space<vmem>>, %arg2: memref<12x1xf32, #tpu.memory_space<vmem>>, %arg3: memref<144x1024xbf16, #tpu.memory_space<vmem>>, %arg4: memref<12x1024xf32, #tpu.memory_space<vmem>>) attributes {dimension_semantics = [#tpu.dimension_semantics<parallel>], iteration_bounds = array<i64: 2>, scalar_prefetch = 0 : i64, scratch_operands = 0 : i64, tpu.core_type = #tpu.core_type<tc>, window_params = [{pipeline_mode = #tpu.pipeline_mode<synchronous>, transform_indices = @transform_0, window_bounds = array<i64: 12, 144>}, {pipeline_mode = #tpu.pipeline_mode<synchronous>, transform_indices = @transform_1, window_bounds = array<i64: 12, 1>}, {transform_indices = @transform_2, window_bounds = array<i64: 144, 1024>}, {transform_indices = @transform_3, window_bounds = array<i64: 12, 1024>}]} {
    %c0 = arith.constant 0 : index
    %c0_0 = arith.constant 0 : index
    %0 = vector.load %arg1[%c0, %c0_0] : memref<12x144xbf16, #tpu.memory_space<vmem>>, vector<12x144xbf16>
    %c0_1 = arith.constant 0 : index
    %c0_2 = arith.constant 0 : index
    %1 = vector.load %arg3[%c0_1, %c0_2] : memref<144x1024xbf16, #tpu.memory_space<vmem>>, vector<144x1024xbf16>
    %cst = arith.constant dense<0.000000e+00> : vector<12x1024xf32>
    %2 = tpu.matmul %0, %1, %cst {dimension_numbers = #tpu.dot_dimension_numbers<[1], [0], [0], [1], [0, 0, 1, 1], [], []>} : vector<12x144xbf16>, vector<144x1024xbf16>, vector<12x1024xf32> -> vector<12x1024xf32>
    %c0_3 = arith.constant 0 : index
    %c0_4 = arith.constant 0 : index
    %3 = vector.load %arg2[%c0_3, %c0_4] : memref<12x1xf32, #tpu.memory_space<vmem>>, vector<12x1xf32>
    %4 = vector.broadcast %3 : vector<12x1xf32> to vector<12x1024xf32>
    %5 = arith.addf %2, %4 : vector<12x1024xf32>
    %6 = math.tanh %5 : vector<12x1024xf32>
    %c0_5 = arith.constant 0 : index
    %c0_6 = arith.constant 0 : index
    %7 = vector.load %arg4[%c0_5, %c0_6] : memref<12x1024xf32, #tpu.memory_space<vmem>>, vector<12x1024xf32>
    tpu.vector_store %arg4[%c0_5, %c0_6], %6 {strides = array<i32>} : memref<12x1024xf32, #tpu.memory_space<vmem>>, vector<12x1024xf32>,
    return
  }
  func.func @transform_0(%arg0: i32) -> (i32, i32) {
    %c0_i32 = arith.constant 0 : i32
    %c0_i32_0 = arith.constant 0 : i32
    %c0_i32_1 = arith.constant 0 : i32
    return %c0_i32, %c0_i32_0 : i32, i32
  }
  func.func @transform_1(%arg0: i32) -> (i32, i32) {
    %c0_i32 = arith.constant 0 : i32
    %c0_i32_0 = arith.constant 0 : i32
    %c0_i32_1 = arith.constant 0 : i32
    return %c0_i32, %c0_i32_0 : i32, i32
  }
  func.func @transform_2(%arg0: i32) -> (i32, i32) {
    %c0_i32 = arith.constant 0 : i32
    %c0_i32_0 = arith.constant 0 : i32
    return %c0_i32, %arg0 : i32, i32
  }
  func.func @transform_3(%arg0: i32) -> (i32, i32) {
    %c0_i32 = arith.constant 0 : i32
    %c0_i32_0 = arith.constant 0 : i32
    return %c0_i32, %arg0 : i32, i32
  }
}

</mosaic_0001>

<bundles_post_ra>
// kernel: _lambda_.5
= control target key start
LH: loop header
LB: loop body
LE: loop exit
PB: predicated region body
PF: predicated region fallthrough
CT: control target
= control target key end

     0   :  { %10 = vsyncpa [#allocation3], 0  ;;  %s6883_s0 = inlined_call_operand.vmem [shape: bf16[2,32], index: 0, kind: input, shape index: {}]   ;;  %s6884_s1 = inlined_call_operand.vmem [shape: bf16[32,2048], index: 1, kind: input, shape index: {}]   ;;  %s6885_s2 = inlined_call_operand.vmem [shape: f32[128,2048], index: 2, kind: input, shape index: {}]   ;;  %s6886_s3 = inlined_call_operand.hbm [shape: f32[1,128], index: 3, kind: input, shape index: {}]   ;;  %s6887_s4 = inlined_call_operand.hbm [shape: f32[1,128], index: 4, kind: input, shape index: {}]   ;;  %s6888_s5 = inlined_call_operand.vmem [shape: bf16[2,2048], index: 5, kind: output, shape index: {}]  }
   0x1   :  { %11 = vsyncpa [#allocation5], 0  ;;  %s4807_s18 = smov [#allocation2]   ;;  %s4808_s20 = smov [#allocation4]  }
   0x2   :  { %s24_s19 = sshll.u32 %s4807_s18, 4  ;;  %s34_s21 = sshll.u32 %s4808_s20, 4  ;;  %s25_s19 = int_to_ptr.vmem [resolvable:$true] %s24_s19  ;;  %s35_s21 = int_to_ptr.vmem [resolvable:$true] %s34_s21 }
   0x3   :  { %s4759_s24 = scalar_lea.hbm %s6886_s3, 16 }
   0x4   :  { %p4760_p0 = scmp.ne.s32.totalorder %s6886_s3, %s4759_s24  ;;  %p4763_p1 = scmp.lt.u32.totalorder %s4759_s24, %s6886_s3 }
   0x6   :  { %p4765_p2 = pnand %p4763_p1, %p4760_p0 }
   0x8   :  { %4768 = shalt.err (!%p4765_p2)
}
   0x9   :  { %s4769_s29 = scalar_lea.vmem %s25_s19, 16  ;;  %s4773_s30 = scalar_lea.vmem %s25_s19, 32 }
   0xa   :  { %p4770_p3 = scmp.ne.s32.totalorder %s25_s19, %s4769_s29  ;;  %p4774_p4 = scmp.lt.s32.totalorder %s25_s19, %s25_s19 }
   0xb   :  { %p4775_p5 = scmp.lt.s32.totalorder %s4773_s30, %s4769_s29 }
   0xd   :  { %p4776_p6 = por %p4775_p5, %p4774_p4 }
   0xf   :  { %p4777_p7 = pnand %p4776_p6, %p4770_p3 }
  0x11   :  { %4780 = shalt.err (!%p4777_p7)
}
  0x12   :  { %27 = dma.hbm_to_vmem [thread:$0]  %s6886_s3, 16, %s25_s19, [#allocation3]  }
  0x13   :  { %s4781_s10 = scalar_lea.hbm %s6887_s4, 16 }
  0x14   :  { %p4782_p8 = scmp.ne.s32.totalorder %s6887_s4, %s4781_s10  ;;  %p4785_p9 = scmp.lt.u32.totalorder %s4781_s10, %s6887_s4 }
  0x16   :  { %p4787_p10 = pnand %p4785_p9, %p4782_p8 }
  0x18   :  { %4790 = shalt.err (!%p4787_p10)
}
  0x19   :  { %s4791_s15 = scalar_lea.vmem %s35_s21, 16  ;;  %s4795_s16 = scalar_lea.vmem %s35_s21, 32 }
  0x1a   :  { %p4792_p11 = scmp.ne.s32.totalorder %s35_s21, %s4791_s15  ;;  %p4796_p12 = scmp.lt.s32.totalorder %s35_s21, %s35_s21 }
  0x1b   :  { %p4797_p13 = scmp.lt.s32.totalorder %s4795_s16, %s4791_s15 }
  0x1d   :  { %p4798_p0 = por %p4797_p13, %p4796_p12 }
  0x1f   :  { %p4799_p1 = pnand %p4798_p0, %p4792_p11 }
  0x21   :  { %4802 = shalt.err (!%p4799_p1)
}
  0x22   :  { %37 = dma.hbm_to_vmem [thread:$0]  %s6887_s4, 16, %s35_s21, [#allocation5]  }
  0x23   :  { %4803 = dma.done.wait [#allocation3], 16  }
  0x24   :  { %4804 = vsyncadd [#allocation3], 4294967280 }
  0x25   :  { %4805 = dma.done.wait [#allocation5], 16  }
  0x26   :  { %4806 = vsyncadd [#allocation5], 4294967280  ;;  %v4809_v0 = vmov 0   ;;  %v46_v1 = vld [vmem:[%s6884_s1] sm:$0xff]  ;;  %v47_v7 = vld [vmem:[%s6884_s1 + $0x8] sm:$0xff]  ;;  %vm238_vm0 = vcmask 261120  }
  0x27   :  { %274 = vmatprep.mubr.bf16.mxu0 %v4809_v0  ;;  %315 = vmatprep.mubr.bf16.mxu1 %v4809_v0  ;;  %v54_v2 = vld [vmem:[%s6884_s1 + $0x40] sm:$0xff]  ;;  %v55_v9 = vld [vmem:[%s6884_s1 + $0x48] sm:$0xff]  ;;  %v48_v15 = vld [vmem:[%s6884_s1 + $0x10] sm:$0xff]  ;;  %vm570_vm1 = vcmask 1041408  }
  0x28   :  { %v62_v3 = vld [vmem:[%s6884_s1 + $0x80] sm:$0xff]  ;;  %v3653_v4 = vcombine.high %v46_v1, %v54_v2  ;;  %v3652_v5 = vcombine.low %v46_v1, %v54_v2  ;;  %v63_v10 = vld [vmem:[%s6884_s1 + $0x88] sm:$0xff]  ;;  %v3655_v12 = vcombine.high %v47_v7, %v55_v9  ;;  %v3654_v13 = vcombine.low %v47_v7, %v55_v9  ;;  %v56_v16 = vld [vmem:[%s6884_s1 + $0x50] sm:$0xff] }
  0x29   :  { %v70_v6 = vld [vmem:[%s6884_s1 + $0xc0] sm:$0xff]  ;;  %v71_v11 = vld [vmem:[%s6884_s1 + $0xc8] sm:$0xff]  ;;  %v49_v18 = vld [vmem:[%s6884_s1 + $0x18] sm:$0xff]  ;;  %v3657_v20 = vcombine.high %v48_v15, %v56_v16  ;;  %v3656_v26 = vcombine.low %v48_v15, %v56_v16 }
  0x2a   :  { %v3669_v8 = vcombine.high %v62_v3, %v70_v6  ;;  %242 = vmatprep.subr.bf16.mxu0 %v3653_v4  ;;  %v3671_v14 = vcombine.high %v63_v10, %v71_v11  ;;  %v3668_v17 = vcombine.low %v62_v3, %v70_v6  ;;  %v57_v19 = vld [vmem:[%s6884_s1 + $0x58] sm:$0xff]  ;;  %283 = vmatprep.subr.bf16.mxu1 %v3655_v12  ;;  %v64_v22 = vld [vmem:[%s6884_s1 + $0x90] sm:$0xff]  ;;  %v4913_v25 = vld [vmem:[%s6883_s0] sm:$0x1] }
  0x2b   :  { %243 = vmatpush1.bf16.msra.mxu0 %v3652_v5  ;;  %284 = vmatpush1.bf16.msra.mxu1 %v3654_v13  ;;  %v3670_v21 = vcombine.low %v63_v10, %v71_v11  ;;  %v72_v23 = vld [vmem:[%s6884_s1 + $0xd0] sm:$0xff]  ;;  %v3659_v24 = vcombine.high %v49_v18, %v57_v19  ;;  %v65_v27 = vld [vmem:[%s6884_s1 + $0x98] sm:$0xff]  ;;  %v3658_v30 = vcombine.low %v49_v18, %v57_v19  ;;  %v50_v31 = vld [vmem:[%s6884_s1 + $0x20] sm:$0xff] }
  0x2c   :  { %244 = vmatprep.subr.bf16.mxu0 %v3669_v8  ;;  %285 = vmatprep.subr.bf16.mxu1 %v3671_v14  ;;  %v73_v28 = vld [vmem:[%s6884_s1 + $0xd8] sm:$0xff]  ;;  %v3673_v29 = vcombine.high %v64_v22, %v72_v23  ;;  %v58_v32 = vld [vmem:[%s6884_s1 + $0x60] sm:$0xff]  ;;  %v3672_v34 = vcombine.low %v64_v22, %v72_v23  ;;  %v51_v35 = vld [vmem:[%s6884_s1 + $0x28] sm:$0xff] }
  0x2d   :  { %v3675_v33 = vcombine.high %v65_v27, %v73_v28  ;;  %v59_v36 = vld [vmem:[%s6884_s1 + $0x68] sm:$0xff]  ;;  %v3661_v37 = vcombine.high %v50_v31, %v58_v32  ;;  %v3674_v38 = vcombine.low %v65_v27, %v73_v28  ;;  %v66_v39 = vld [vmem:[%s6884_s1 + $0xa0] sm:$0xff]  ;;  %v3660_v42 = vcombine.low %v50_v31, %v58_v32  ;;  %v52_v47 = vld [vmem:[%s6884_s1 + $0x30] sm:$0xff] }
  0x2e   :  { %v74_v40 = vld [vmem:[%s6884_s1 + $0xe0] sm:$0xff]  ;;  %v3663_v41 = vcombine.high %v51_v35, %v59_v36  ;;  %v67_v43 = vld [vmem:[%s6884_s1 + $0xa8] sm:$0xff]  ;;  %v3662_v46 = vcombine.low %v51_v35, %v59_v36  ;;  %v60_v48 = vld [vmem:[%s6884_s1 + $0x70] sm:$0xff] }
  0x2f   :  { %245 = vmatpush1.bf16.msra.mxu0 %v3668_v17  ;;  %286 = vmatpush1.bf16.msra.mxu1 %v3670_v21  ;;  %v75_v44 = vld [vmem:[%s6884_s1 + $0xe8] sm:$0xff]  ;;  %v3677_v45 = vcombine.high %v66_v39, %v74_v40  ;;  %v3676_v50 = vcombine.low %v66_v39, %v74_v40  ;;  %v53_v51 = vld [vmem:[%s6884_s1 + $0x38] sm:$0xff]  ;;  %v3665_v53 = vcombine.high %v52_v47, %v60_v48  ;;  %v68_v55 = vld [vmem:[%s6884_s1 + $0xb0] sm:$0xff] }
  0x30   :  { %324 = vmatprep.subr.bf16.mxu0 %v3657_v20  ;;  %365 = vmatprep.subr.bf16.mxu1 %v3659_v24  ;;  %v3679_v49 = vcombine.high %v67_v43, %v75_v44  ;;  %v61_v52 = vld [vmem:[%s6884_s1 + $0x78] sm:$0xff]  ;;  %v3678_v54 = vcombine.low %v67_v43, %v75_v44  ;;  %v76_v56 = vld [vmem:[%s6884_s1 + $0xf0] sm:$0xff]  ;;  %v3664_v58 = vcombine.low %v52_v47, %v60_v48  ;;  %v812_v63 = vld [vmem:[%s6885_s2 + $0x8] sm:$0xff] }
  0x31   :  { %v3667_v57 = vcombine.high %v53_v51, %v61_v52  ;;  %v69_v59 = vld [vmem:[%s6884_s1 + $0xb8] sm:$0xff]  ;;  %v3681_v61 = vcombine.high %v68_v55, %v76_v56  ;;  %v3666_v62 = vcombine.low %v53_v51, %v61_v52  ;;  %v828_v1 = vld [vmem:[%s6885_s2 + $0x88] sm:$0xff]  ;;  %v3680_v3 = vcombine.low %v68_v55, %v76_v56  ;;  %v811_v6 = vld [vmem:[%s6885_s2] sm:$0xff] }
  0x32   :  { %3684 = vmatmul.mubr.msk.bf16.vlgmr.msra.gmra.mrb[0].mxu0 %vm238_vm0, %v4913_v25  ;;  %3685 = vmatmul.mubr.msk.bf16.vlgmr.msra.gmra.mrb[0].mxu1 %vm238_vm0, %v4913_v25  ;;  %v77_v60 = vld [vmem:[%s6884_s1 + $0xf8] sm:$0xff]  ;;  %v4992_v4 = vpack.c.bf16 %v828_v1, %v812_v63  ;;  %v827_v7 = vld [vmem:[%s6885_s2 + $0x80] sm:$0xff]  ;;  %v860_v8 = vld [vmem:[%s6885_s2 + $0x188] sm:$0xff] }
  0x33   :  { %325 = vmatpush1.bf16.msra.mxu0 %v3656_v26  ;;  %356 = vmatprep.mubr.bf16.mxu0 %v4809_v0  ;;  %v3683_v2 = vcombine.high %v69_v59, %v77_v60  ;;  %v3682_v5 = vcombine.low %v69_v59, %v77_v60  ;;  %v5013_v9 = vpack.c.bf16 %v827_v7, %v811_v6  ;;  %v843_v11 = vld [vmem:[%s6885_s2 + $0x100] sm:$0xff]  ;;  %v876_v13 = vld [vmem:[%s6885_s2 + $0x208] sm:$0xff]  ;;  %v830_v51 = vld [vmem:[%s6885_s2 + $0x98] sm:$0xff] }
  0x34   :  { %326 = vmatprep.subr.bf16.mxu0 %v3673_v29  ;;  %366 = vmatpush1.bf16.msra.mxu1 %v3658_v30  ;;  %v859_v12 = vld [vmem:[%s6885_s2 + $0x180] sm:$0xff]  ;;  %v892_v14 = vld [vmem:[%s6885_s2 + $0x288] sm:$0xff] }
  0x35   :  { %397 = vmatprep.mubr.bf16.mxu1 %v4809_v0  ;;  %367 = vmatprep.subr.bf16.mxu1 %v3675_v33  ;;  %v5033_v15 = vpack.c.bf16 %v859_v12, %v843_v11  ;;  %v5035_v16 = vpack.c.bf16 %v892_v14, %v876_v13  ;;  %v875_v17 = vld [vmem:[%s6885_s2 + $0x200] sm:$0xff]  ;;  %v908_v19 = vld [vmem:[%s6885_s2 + $0x308] sm:$0xff] }
  0x36   :  { %v891_v18 = vld [vmem:[%s6885_s2 + $0x280] sm:$0xff]  ;;  %v924_v20 = vld [vmem:[%s6885_s2 + $0x388] sm:$0xff] }
  0x37   :  { %327 = vmatpush1.bf16.msra.mxu0 %v3672_v34  ;;  %v5053_v21 = vpack.c.bf16 %v891_v18, %v875_v17  ;;  %v5055_v22 = vpack.c.bf16 %v924_v20, %v908_v19  ;;  %v907_v23 = vld [vmem:[%s6885_s2 + $0x300] sm:$0xff]  ;;  %v956_v26 = vld [vmem:[%s6885_s2 + $0x488] sm:$0xff] }
  0x38   :  { %406 = vmatprep.subr.bf16.mxu0 %v3661_v37  ;;  %368 = vmatpush1.bf16.msra.mxu1 %v3674_v38  ;;  %v923_v24 = vld [vmem:[%s6885_s2 + $0x380] sm:$0xff]  ;;  %v972_v31 = vld [vmem:[%s6885_s2 + $0x508] sm:$0xff] }
  0x39   :  { %447 = vmatprep.subr.bf16.mxu1 %v3663_v41  ;;  %v5073_v27 = vpack.c.bf16 %v923_v24, %v907_v23  ;;  %v939_v29 = vld [vmem:[%s6885_s2 + $0x400] sm:$0xff]  ;;  %v988_v32 = vld [vmem:[%s6885_s2 + $0x588] sm:$0xff] }
  0x3a   :  { %3686 = vmatmul.mubr.msk.bf16.vlgmr.msra.gmra.mrb[4].mxu0 %vm238_vm0, %v4913_v25  ;;  %v955_v30 = vld [vmem:[%s6885_s2 + $0x480] sm:$0xff]  ;;  %v5095_v34 = vpack.c.bf16 %v988_v32, %v972_v31  ;;  %v1004_v37 = vld [vmem:[%s6885_s2 + $0x608] sm:$0xff]  ;;  %v813_v32 = vld [vmem:[%s6885_s2 + $0x10] sm:$0xff] }
  0x3b   :  { %407 = vmatpush1.bf16.msra.mxu0 %v3660_v42  ;;  %438 = vmatprep.mubr.bf16.mxu0 %v4809_v0  ;;  %v5093_v33 = vpack.c.bf16 %v955_v30, %v939_v29  ;;  %v971_v35 = vld [vmem:[%s6885_s2 + $0x500] sm:$0xff]  ;;  %v1020_v38 = vld [vmem:[%s6885_s2 + $0x688] sm:$0xff] }
  0x3c   :  { %3687 = vmatmul.mubr.msk.bf16.vlgmr.msra.gmra.mrb[4].mxu1 %vm238_vm0, %v4913_v25  ;;  %408 = vmatprep.subr.bf16.mxu0 %v3677_v45  ;;  %v987_v36 = vld [vmem:[%s6885_s2 + $0x580] sm:$0xff]  ;;  %v5115_v40 = vpack.c.bf16 %v1020_v38, %v1004_v37  ;;  %v1036_v44 = vld [vmem:[%s6885_s2 + $0x708] sm:$0xff] }
  0x3d   :  { %448 = vmatpush1.bf16.msra.mxu1 %v3662_v46  ;;  %479 = vmatprep.mubr.bf16.mxu1 %v4809_v0  ;;  %v5113_v39 = vpack.c.bf16 %v987_v36, %v971_v35  ;;  %v1003_v41 = vld [vmem:[%s6885_s2 + $0x600] sm:$0xff]  ;;  %v1052_v45 = vld [vmem:[%s6885_s2 + $0x788] sm:$0xff]  ;;  %v829_v35 = vld [vmem:[%s6885_s2 + $0x90] sm:$0xff] }
  0x3e   :  { %449 = vmatprep.subr.bf16.mxu1 %v3679_v49  ;;  %7083 = vst [vmem:[#allocation9_spill] sm:$0xff] %v5115_v40  ;;  %v1019_v42 = vld [vmem:[%s6885_s2 + $0x680] sm:$0xff]  ;;  %v5137_v46 = vpack.c.bf16 %v1052_v45, %v1036_v44  ;;  %v846_v45 = vld [vmem:[%s6885_s2 + $0x118] sm:$0xff] }
  0x3f   :  { %409 = vmatpush1.bf16.msra.mxu0 %v3676_v50  ;;  %7082 = vst [vmem:[#allocation8_spill] sm:$0xff] %v5113_v39  ;;  %v5127_v43 = vpack.c.bf16 %v1019_v42, %v1003_v41  ;;  %v1035_v47 = vld [vmem:[%s6885_s2 + $0x700] sm:$0xff]  ;;  %v814_v50 = vld [vmem:[%s6885_s2 + $0x18] sm:$0xff] }
  0x40   :  { %488 = vmatprep.subr.bf16.mxu0 %v3665_v53  ;;  %7085 = vst [vmem:[#allocation11_spill] sm:$0xff] %v5137_v46  ;;  %v1051_v48 = vld [vmem:[%s6885_s2 + $0x780] sm:$0xff]  ;;  %v5157_v52 = vpack.c.bf16 %v830_v51, %v814_v50 }
  0x41   :  { %450 = vmatpush1.bf16.msra.mxu1 %v3678_v54  ;;  %7084 = vst [vmem:[#allocation10_spill] sm:$0xff] %v5127_v43  ;;  %v5145_v49 = vpack.c.bf16 %v1051_v48, %v1035_v47 }
  0x42   :  { %3688 = vmatmul.mubr.msk.bf16.vlgmr.msra.gmra.mrb[8].mxu0 %vm238_vm0, %v4913_v25  ;;  %529 = vmatprep.subr.bf16.mxu1 %v3667_v57 }
  0x43   :  { %489 = vmatpush1.bf16.msra.mxu0 %v3664_v58  ;;  %520 = vmatprep.mubr.bf16.mxu0 %v4809_v0  ;;  %7086 = vst [vmem:[#allocation12_spill] sm:$0xff] %v5145_v49 }
  0x44   :  { %3689 = vmatmul.mubr.msk.bf16.vlgmr.msra.gmra.mrb[8].mxu1 %vm238_vm0, %v4913_v25  ;;  %490 = vmatprep.subr.bf16.mxu0 %v3681_v61 }
  0x45   :  { %530 = vmatpush1.bf16.msra.mxu1 %v3666_v62  ;;  %561 = vmatprep.mubr.bf16.mxu1 %v4809_v0  ;;  %v844_v0 = vld [vmem:[%s6885_s2 + $0x108] sm:$0xff] }
  0x46   :  { %531 = vmatprep.subr.bf16.mxu1 %v3683_v2  ;;  %v5015_v10 = vpack.c.bf16 %v860_v8, %v844_v0 }
  0x47   :  { %491 = vmatpush1.bf16.msra.mxu0 %v3680_v3 }
  0x48   :  { %3701 = vmatprep.subr.bf16.mxu0 %v4992_v4 }
  0x49   :  { %532 = vmatpush1.bf16.msra.mxu1 %v3682_v5 }
  0x4a   :  { %3690 = vmatmul.mubr.msk.bf16.vlgmr.msra.gmra.mrb[12].mxu0 %vm238_vm0, %v4913_v25  ;;  %3957 = vmatprep.subr.bf16.mxu1 %v4992_v4 }
  0x4c   :  { %3691 = vmatmul.mubr.msk.bf16.vlgmr.msra.gmra.mrb[12].mxu1 %vm238_vm0, %v4913_v25  ;;  %v940_v25 = vld [vmem:[%s6885_s2 + $0x408] sm:$0xff] }
  0x4d   :  { %v5075_v28 = vpack.c.bf16 %v956_v26, %v940_v25 }
  0x50   :  { %3703 = vmatpush1.bf16.xpose.msra.mxu0 %v5013_v9 }
  0x51   :  { %3705 = vmatprep.subr.bf16.mxu0 %v5015_v10 }
  0x52   :  { %3959 = vmatpush1.bf16.xpose.msra.mxu1 %v5013_v9 }
  0x53   :  { %3961 = vmatprep.subr.bf16.mxu1 %v5015_v10 }
  0x58   :  { %3707 = vmatpush1.bf16.xpose.msra.mxu0 %v5033_v15 }
  0x59   :  { %3709 = vmatprep.subr.bf16.mxu0 %v5035_v16 }
  0x5a   :  { %3963 = vmatpush1.bf16.xpose.msra.mxu1 %v5033_v15 }
  0x5b   :  { %3965 = vmatprep.subr.bf16.mxu1 %v5035_v16 }
  0x60   :  { %3711 = vmatpush1.bf16.xpose.msra.mxu0 %v5053_v21 }
  0x61   :  { %3713 = vmatprep.subr.bf16.mxu0 %v5055_v22 }
  0x62   :  { %3967 = vmatpush1.bf16.xpose.msra.mxu1 %v5053_v21 }
  0x63   :  { %3969 = vmatprep.subr.bf16.mxu1 %v5055_v22 }
  0x68   :  { %3715 = vmatpush1.bf16.xpose.msra.mxu0 %v5073_v27 }
  0x69   :  { %3717 = vmatprep.subr.bf16.mxu0 %v5075_v28 }
  0x6a   :  { %3971 = vmatpush1.bf16.xpose.msra.mxu1 %v5073_v27 }
  0x6b   :  { %3973 = vmatprep.subr.bf16.mxu1 %v5075_v28 }
  0x70   :  { %3719 = vmatpush1.bf16.xpose.msra.mxu0 %v5093_v33 }
  0x71   :  { %3721 = vmatprep.subr.bf16.mxu0 %v5095_v34 }
  0x72   :  { %3975 = vmatpush1.bf16.xpose.msra.mxu1 %v5093_v33 }
  0x73   :  { %3977 = vmatprep.subr.bf16.mxu1 %v5095_v34 }
  0x78   :  { %3723 = vmatpush1.bf16.xpose.msra.mxu0 %v5113_v39 }
  0x79   :  { %3725 = vmatprep.subr.bf16.mxu0 %v5115_v40 }
  0x7a   :  { %3979 = vmatpush1.bf16.xpose.msra.mxu1 %v5113_v39 }
  0x7b   :  { %3981 = vmatprep.subr.bf16.mxu1 %v5115_v40 }
  0x80   :  { %3727 = vmatpush1.bf16.xpose.msra.mxu0 %v5127_v43 }
  0x81   :  { %3729 = vmatprep.subr.bf16.mxu0 %v5137_v46 }
  0x82   :  { %3983 = vmatpush1.bf16.xpose.msra.mxu1 %v5127_v43 }
  0x83   :  { %3985 = vmatprep.subr.bf16.mxu1 %v5137_v46 }
  0x88   :  { %3731 = vmatpush1.bf16.xpose.msra.mxu0 %v5145_v49 }
  0x89   :  { %3733 = vmatprep.subr.bf16.mxu0 %v5157_v52 }
  0x8a   :  { %3987 = vmatpush1.bf16.xpose.msra.mxu1 %v5145_v49 }
  0x8b   :  { %3989 = vmatprep.subr.bf16.mxu1 %v5157_v52 }
 0x105   :  { %v5161_v53 = vpop.f32.mrb[0].mxu0  ;;  %v5173_v61 = vpop.f32.mrb[0].mxu1 }
 0x106   :  { %7087 = vst [vmem:[#allocation13_spill] sm:$0xff] %v5161_v53  ;;  %v571_v54 = vsel %vm570_vm1, %v5161_v53, 0.0  ;;  %v683_v55 = vmul.f32 %v5161_v53, %v5161_v53  ;;  %v5167_v56 = vpop.f32.mrb[1].mxu0  ;;  %7089 = vst [vmem:[#allocation15_spill] sm:$0xff] %v5173_v61  ;;  %v5178_v2 = vsel %vm570_vm1, %v5173_v61, 0.0  ;;  %v685_v3 = vmul.f32 %v5173_v61, %v5173_v61  ;;  %v5182_v5 = vpop.f32.mrb[1].mxu1 }
 0x107   :  { %7088 = vst [vmem:[#allocation14_spill] sm:$0xff] %v5167_v56  ;;  %v572_v57 = vrot.slane %v571_v54, 4  ;;  %v578_v58 = vsel %vm570_vm1, %v5167_v56, 0.0  ;;  %v684_v59 = vmul.f32 %v5167_v56, %v5167_v56  ;;  %v280_v60 = vpop.f32.mrb[2].mxu0  ;;  %7090 = vst [vmem:[#allocation16_spill] sm:$0xff] %v5182_v5  ;;  %v321_v8 = vpop.f32.mrb[2].mxu1  ;;  %v686_v25 = vmul.f32 %v5182_v5, %v5182_v5 }
 0x108   :  { %v699_v62 = vsel %vm570_vm1, %v683_v55, 0.0  ;;  %v579_v63 = vrot.slane %v578_v58, 4  ;;  %v281_v1 = vpop.f32.mrb[3].mxu0  ;;  %v5186_v13 = vsel %vm570_vm1, %v685_v3, 0.0  ;;  %v592_v14 = vsel %vm570_vm1, %v5182_v5, 0.0  ;;  %v322_v17 = vpop.f32.mrb[3].mxu1 }
 0x109   :  { %v573_v6 = vadd.f32 %v572_v57, %v571_v54  ;;  %v700_v7 = vrot.slane %v699_v62, 4  ;;  %v706_v0 = vsel %vm570_vm1, %v684_v59, 0.0  ;;  %v593_v24 = vrot.slane %v592_v14, 4  ;;  %v862_v54 = vld [vmem:[%s6885_s2 + $0x198] sm:$0xff]  ;;  %v1005_v61 = vld [vmem:[%s6885_s2 + $0x610] sm:$0xff] }
 0x10a   :  { %v580_v11 = vadd.f32 %v579_v63, %v578_v58  ;;  %v707_v12 = vrot.slane %v706_v0, 4  ;;  %v720_v38 = vsel %vm570_vm1, %v686_v25, 0.0  ;;  %v5213_v60 = vpack.c.bf16 %v829_v35, %v813_v32  ;;  %v845_v32 = vld [vmem:[%s6885_s2 + $0x110] sm:$0xff] }
 0x10b   :  { %v574_v18 = vrot.slane %v573_v6, 2  ;;  %v701_v19 = vadd.f32 %v700_v7, %v699_v62  ;;  %v594_v37 = vadd.f32 %v593_v24, %v592_v14  ;;  %v721_v57 = vrot.slane %v720_v38, 4  ;;  %v861_v35 = vld [vmem:[%s6885_s2 + $0x190] sm:$0xff] }
 0x10c   :  { %v581_v20 = vrot.slane %v580_v11, 2  ;;  %v708_v23 = vadd.f32 %v707_v12, %v706_v0  ;;  %v586_v56 = vrot.slane %v5178_v2, 4 }
 0x10d   :  { %v575_v26 = vadd.f32 %v574_v18, %v573_v6  ;;  %v702_v29 = vrot.slane %v701_v19, 2  ;;  %v5192_v30 = vpop.f32.mrb[4].mxu0  ;;  %v595_v55 = vrot.slane %v594_v37, 2  ;;  %v722_v6 = vadd.f32 %v721_v57, %v720_v38 }
 0x10e   :  { %7091 = vst [vmem:[#allocation17_spill] sm:$0xff] %v5192_v30  ;;  %v582_v31 = vadd.f32 %v581_v20, %v580_v11  ;;  %v709_v36 = vrot.slane %v708_v23, 2  ;;  %v5201_v41 = vpop.f32.mrb[5].mxu0  ;;  %v5215_v11 = vpack.c.bf16 %v862_v54, %v846_v45  ;;  %v5219_v12 = vsel %vm570_vm1, %v5192_v30, 0.0  ;;  %v894_v45 = vld [vmem:[%s6885_s2 + $0x298] sm:$0xff] }
 0x10f   :  { %7092 = vst [vmem:[#allocation18_spill] sm:$0xff] %v5201_v41  ;;  %v576_v42 = vrot.slane %v575_v26, 1  ;;  %v703_v44 = vadd.f32 %v702_v29, %v701_v19  ;;  %v362_v47 = vpop.f32.mrb[6].mxu0  ;;  %v5206_v48 = vpop.f32.mrb[4].mxu1  ;;  %v596_v7 = vadd.f32 %v595_v55, %v594_v37  ;;  %v723_v18 = vrot.slane %v722_v6, 2 }
 0x110   :  { %7093 = vst [vmem:[#allocation19_spill] sm:$0xff] %v5206_v48  ;;  %v583_v50 = vrot.slane %v582_v31, 1  ;;  %v710_v51 = vadd.f32 %v709_v36, %v708_v23  ;;  %v363_v58 = vpop.f32.mrb[7].mxu0  ;;  %v5211_v59 = vpop.f32.mrb[5].mxu1  ;;  %v687_v20 = vmul.f32 %v5192_v30, %v5192_v30  ;;  %v5225_v23 = vsel %vm570_vm1, %v5201_v41, 0.0 }
 0x111   :  { %7094 = vst [vmem:[#allocation20_spill] sm:$0xff] %v5211_v59  ;;  %v704_v62 = vrot.slane %v703_v44, 1  ;;  %v403_v63 = vpop.f32.mrb[6].mxu1  ;;  %v577_v8 = vadd.f32 %v576_v42, %v575_v26  ;;  %v597_v17 = vrot.slane %v596_v7, 1  ;;  %v688_v24 = vmul.f32 %v5201_v41, %v5201_v41 }
 0x112   :  { %v584_v1 = vadd.f32 %v583_v50, %v582_v31  ;;  %v711_v3 = vrot.slane %v710_v51, 1  ;;  %v404_v0 = vpop.f32.mrb[7].mxu1  ;;  %v724_v29 = vadd.f32 %v723_v18, %v722_v6  ;;  %v5242_v36 = vsel %vm570_vm1, %v687_v20, 0.0  ;;  %v910_v18 = vld [vmem:[%s6885_s2 + $0x318] sm:$0xff] }
 0x113   :  { %v705_v19 = vadd.f32 %v704_v62, %v703_v44  ;;  %v598_v26 = vadd.f32 %v597_v17, %v596_v7  ;;  %v5245_v37 = vsel %vm570_vm1, %v688_v24, 0.0  ;;  %v878_v44 = vld [vmem:[%s6885_s2 + $0x218] sm:$0xff]  ;;  %v5261_v54 = vsel %vm570_vm1, %v5206_v48, 0.0 }
 0x114   :  { %1131 = vmatprep.mubr.f32.mxu0 %v584_v1  ;;  %v712_v14 = vadd.f32 %v711_v3, %v710_v51  ;;  %v725_v47 = vrot.slane %v724_v29, 1  ;;  %v689_v55 = vmul.f32 %v5206_v48, %v5206_v48  ;;  %v5267_v57 = vsel %vm570_vm1, %v5211_v59, 0.0 }
 0x115   :  { %1132 = vmatmul.mubr.f32.vlgmr.msra.gmra.mrb[16].mxu0 %v577_v8  ;;  %v5229_v25 = vpop.f32.mrb[8].mxu0  ;;  %v5269_v62 = vpack.c.bf16 %v861_v35, %v845_v32  ;;  %v5271_v3 = vpack.c.bf16 %v894_v45, %v878_v44  ;;  %v690_v7 = vmul.f32 %v5211_v59, %v5211_v59  ;;  %v877_v8 = vld [vmem:[%s6885_s2 + $0x210] sm:$0xff]  ;;  %v587_v46 = vadd.f32 %v586_v56, %v5178_v2  ;;  %v816_v2 = vld [vmem:[%s6885_s2 + $0x28] sm:$0xff] }
 0x116   :  { %7095 = vst [vmem:[#allocation21_spill] sm:$0xff] %v5229_v25  ;;  %3735 = vmatpush1.bf16.xpose.msra.mxu0 %v5213_v60  ;;  %1691 = vmatprep.mubr.f32.mxu1 %v712_v14  ;;  %v5232_v31 = vpop.f32.mrb[9].mxu0  ;;  %v726_v63 = vadd.f32 %v725_v47, %v724_v29  ;;  %v5274_v6 = vsel %vm570_vm1, %v689_v55, 0.0  ;;  %v5281_v0 = vsel %vm570_vm1, %v5229_v25, 0.0  ;;  %v893_v14 = vld [vmem:[%s6885_s2 + $0x290] sm:$0xff] }
 0x117   :  { %7096 = vst [vmem:[#allocation22_spill] sm:$0xff] %v5232_v31  ;;  %1692 = vmatmul.mubr.f32.vlgmr.msra.gmra.mrb[16].mxu1 %v705_v19  ;;  %3737 = vmatprep.subr.bf16.mxu0 %v5215_v11  ;;  %v5247_v38 = vpop.f32.mrb[8].mxu1  ;;  %v444_v42 = vpop.f32.mrb[10].mxu0  ;;  %v5291_v17 = vsel %vm570_vm1, %v690_v7, 0.0  ;;  %v926_v19 = vld [vmem:[%s6885_s2 + $0x398] sm:$0xff]  ;;  %v5311_v35 = vpack.c.bf16 %v893_v14, %v877_v8  ;;  %v909_v14 = vld [vmem:[%s6885_s2 + $0x310] sm:$0xff] }
 0x118   :  { %7097 = vst [vmem:[#allocation23_spill] sm:$0xff] %v5247_v38  ;;  %3991 = vmatpush1.bf16.xpose.msra.mxu1 %v5213_v60  ;;  %1201 = vmatprep.mubr.f32.mxu0 %v598_v26  ;;  %v5256_v50 = vpop.f32.mrb[9].mxu1  ;;  %v445_v51 = vpop.f32.mrb[11].mxu0  ;;  %v691_v26 = vmul.f32 %v5229_v25, %v5229_v25  ;;  %v5313_v45 = vpack.c.bf16 %v926_v19, %v910_v18  ;;  %v925_v18 = vld [vmem:[%s6885_s2 + $0x390] sm:$0xff] }
 0x119   :  { %7098 = vst [vmem:[#allocation24_spill] sm:$0xff] %v5256_v50  ;;  %3993 = vmatprep.subr.bf16.mxu1 %v5215_v11  ;;  %v485_v58 = vpop.f32.mrb[10].mxu1  ;;  %1761 = vmatprep.mubr.f32.mxu1 %v726_v63  ;;  %v5320_v51 = vsel %vm570_vm1, %v5232_v31, 0.0  ;;  %v692_v63 = vmul.f32 %v5232_v31, %v5232_v31  ;;  %v693_v7 = vmul.f32 %v5247_v38, %v5247_v38  ;;  %v1053_v56 = vld [vmem:[%s6885_s2 + $0x790] sm:$0xff] }
 0x11a   :  { %v486_v1 = vpop.f32.mrb[11].mxu1  ;;  %v5316_v47 = vsel %vm570_vm1, %v691_v26, 0.0  ;;  %v942_v26 = vld [vmem:[%s6885_s2 + $0x418] sm:$0xff] }
 0x11b   :  { %v5326_v1 = vsel %vm570_vm1, %v5247_v38, 0.0  ;;  %v5332_v8 = vsel %vm570_vm1, %v692_v63, 0.0  ;;  %v5342_v19 = vsel %vm570_vm1, %v693_v7, 0.0 }
 0x11d   :  { %v5300_v20 = vpop.f32.mrb[12].mxu0 }
 0x11e   :  { %3739 = vmatpush1.bf16.xpose.msra.mxu0 %v5269_v62  ;;  %7099 = vst [vmem:[#allocation25_spill] sm:$0xff] %v5300_v20  ;;  %v5307_v29 = vpop.f32.mrb[13].mxu0  ;;  %v5367_v31 = vsel %vm570_vm1, %v5300_v20, 0.0  ;;  %v695_v38 = vmul.f32 %v5300_v20, %v5300_v20 }
 0x11f   :  { %3741 = vmatprep.subr.bf16.mxu0 %v5271_v3  ;;  %v5302_v24 = vpop.f32.mrb[12].mxu1  ;;  %7101 = vst [vmem:[#allocation27_spill] sm:$0xff] %v5307_v29  ;;  %v526_v42 = vpop.f32.mrb[14].mxu0  ;;  %v5391_v20 = vsel %vm570_vm1, %v5307_v29, 0.0 }
 0x120   :  { %3995 = vmatpush1.bf16.xpose.msra.mxu1 %v5269_v62  ;;  %7100 = vst [vmem:[#allocation26_spill] sm:$0xff] %v5302_v24  ;;  %v5309_v32 = vpop.f32.mrb[13].mxu1  ;;  %v527_v55 = vpop.f32.mrb[15].mxu0  ;;  %v958_v42 = vld [vmem:[%s6885_s2 + $0x498] sm:$0xff]  ;;  %v697_v25 = vmul.f32 %v5302_v24, %v5302_v24 }
 0x121   :  { %3997 = vmatprep.subr.bf16.mxu1 %v5271_v3  ;;  %7102 = vst [vmem:[#allocation28_spill] sm:$0xff] %v5309_v32  ;;  %v567_v44 = vpop.f32.mrb[14].mxu1  ;;  %v694_v55 = vmul.f32 %v5256_v50, %v5256_v50  ;;  %v5360_v63 = vpack.c.bf16 %v958_v42, %v942_v26  ;;  %v5380_v26 = vsel %vm570_vm1, %v695_v38, 0.0  ;;  %v974_v42 = vld [vmem:[%s6885_s2 + $0x518] sm:$0xff]  ;;  %v5398_v38 = vsel %vm570_vm1, %v5302_v24, 0.0 }
 0x122   :  { %v568_v58 = vpop.f32.mrb[15].mxu1  ;;  %v5354_v44 = vsel %vm570_vm1, %v5256_v50, 0.0  ;;  %v696_v50 = vmul.f32 %v5307_v29, %v5307_v29  ;;  %v5410_v30 = vsel %vm570_vm1, %v697_v25, 0.0  ;;  %v5414_v29 = vsel %vm570_vm1, %v5309_v32, 0.0  ;;  %v989_v25 = vld [vmem:[%s6885_s2 + $0x590] sm:$0xff] }
 0x123   :  { %v5358_v58 = vpack.c.bf16 %v925_v18, %v909_v14  ;;  %v5363_v7 = vsel %vm570_vm1, %v694_v55, 0.0  ;;  %v941_v14 = vld [vmem:[%s6885_s2 + $0x410] sm:$0xff]  ;;  %v990_v55 = vld [vmem:[%s6885_s2 + $0x598] sm:$0xff]  ;;  %v698_v5 = vmul.f32 %v5309_v32, %v5309_v32  ;;  %v607_v24 = vrot.slane %v5225_v23, 4 }
 0x124   :  { %v957_v18 = vld [vmem:[%s6885_s2 + $0x490] sm:$0xff]  ;;  %v5405_v41 = vsel %vm570_vm1, %v696_v50, 0.0  ;;  %v5407_v48 = vpack.c.bf16 %v990_v55, %v974_v42 }
 0x125   :  { %v5402_v59 = vpack.c.bf16 %v957_v18, %v941_v14  ;;  %v973_v50 = vld [vmem:[%s6885_s2 + $0x510] sm:$0xff]  ;;  %v1006_v14 = vld [vmem:[%s6885_s2 + $0x618] sm:$0xff]  ;;  %v5434_v42 = vsel %vm570_vm1, %v698_v5, 0.0  ;;  %v608_v49 = vadd.f32 %v607_v24, %v5225_v23 }
 0x126   :  { %3743 = vmatpush1.bf16.xpose.msra.mxu0 %v5311_v35  ;;  %7104 = vst [vmem:[#allocation30_spill] sm:$0xff] %v5407_v48  ;;  %v1022_v18 = vld [vmem:[%s6885_s2 + $0x698] sm:$0xff]  ;;  %v5437_v55 = vpack.c.bf16 %v989_v25, %v973_v50  ;;  %v1021_v5 = vld [vmem:[%s6885_s2 + $0x690] sm:$0xff] }
 0x127   :  { %3745 = vmatprep.subr.bf16.mxu0 %v5313_v45  ;;  %7103 = vst [vmem:[#allocation29_spill] sm:$0xff] %v5402_v59  ;;  %v5439_v32 = vpack.c.bf16 %v1022_v18, %v1006_v14  ;;  %v1038_v50 = vld [vmem:[%s6885_s2 + $0x718] sm:$0xff]  ;;  %v735_v14 = vrot.slane %v5245_v37, 4  ;;  %v714_v18 = vrot.slane %v5186_v13, 4  ;;  %v5461_v53 = vpack.c.bf16 %v1021_v5, %v1005_v61  ;;  %v1037_v61 = vld [vmem:[%s6885_s2 + $0x710] sm:$0xff] }
 0x128   :  { %3999 = vmatpush1.bf16.xpose.msra.mxu1 %v5311_v35  ;;  %7105 = vst [vmem:[#allocation31_spill] sm:$0xff] %v5437_v55  ;;  %v1054_v25 = vld [vmem:[%s6885_s2 + $0x798] sm:$0xff]  ;;  %v609_v39 = vrot.slane %v608_v49, 2  ;;  %v5485_v24 = vpack.c.bf16 %v1053_v56, %v1037_v61  ;;  %v831_v61 = vld [vmem:[%s6885_s2 + $0xa0] sm:$0xff] }
 0x129   :  { %4001 = vmatprep.subr.bf16.mxu1 %v5313_v45  ;;  %7106 = vst [vmem:[#allocation32_spill] sm:$0xff] %v5439_v32  ;;  %7107 = vst [vmem:[#allocation33_spill] sm:$0xff] %v5461_v53  ;;  %v5465_v43 = vpack.c.bf16 %v1054_v25, %v1038_v50  ;;  %v715_v40 = vadd.f32 %v714_v18, %v5186_v13  ;;  %v832_v13 = vld [vmem:[%s6885_s2 + $0xa8] sm:$0xff] }
 0x12a   :  { %7109 = vst [vmem:[#allocation35_spill] sm:$0xff] %v5485_v24  ;;  %v610_v5 = vadd.f32 %v609_v39, %v608_v49  ;;  %v5487_v25 = vpack.c.bf16 %v832_v13, %v816_v2  ;;  %v848_v39 = vld [vmem:[%s6885_s2 + $0x128] sm:$0xff] }
 0x12b   :  { %7108 = vst [vmem:[#allocation34_spill] sm:$0xff] %v5465_v43 }
 0x12c   :  { %7110 = vst [vmem:[#allocation36_spill] sm:$0xff] %v5487_v25 }
 0x12e   :  { %3747 = vmatpush1.bf16.xpose.msra.mxu0 %v5358_v58 }
 0x12f   :  { %3749 = vmatprep.subr.bf16.mxu0 %v5360_v63 }
 0x130   :  { %4003 = vmatpush1.bf16.xpose.msra.mxu1 %v5358_v58 }
 0x131   :  { %4005 = vmatprep.subr.bf16.mxu1 %v5360_v63 }
 0x136   :  { %3751 = vmatpush1.bf16.xpose.msra.mxu0 %v5402_v59 }
 0x137   :  { %3753 = vmatprep.subr.bf16.mxu0 %v5407_v48 }
 0x138   :  { %4007 = vmatpush1.bf16.xpose.msra.mxu1 %v5402_v59  ;;  %v815_v59 = vld [vmem:[%s6885_s2 + $0x20] sm:$0xff] }
 0x139   :  { %4009 = vmatprep.subr.bf16.mxu1 %v5407_v48  ;;  %v588_v48 = vrot.slane %v587_v46, 2 }
 0x13b   :  { %v589_v50 = vadd.f32 %v588_v48, %v587_v46  ;;  %v5505_v48 = vpack.c.bf16 %v831_v61, %v815_v59  ;;  %v880_v59 = vld [vmem:[%s6885_s2 + $0x228] sm:$0xff] }
 0x13c   :  { %v912_v61 = vld [vmem:[%s6885_s2 + $0x328] sm:$0xff] }
 0x13e   :  { %3755 = vmatpush1.bf16.xpose.msra.mxu0 %v5437_v55 }
 0x13f   :  { %3757 = vmatprep.subr.bf16.mxu0 %v5439_v32 }
 0x140   :  { %4011 = vmatpush1.bf16.xpose.msra.mxu1 %v5437_v55  ;;  %v736_v55 = vadd.f32 %v735_v14, %v5245_v37  ;;  %v716_v37 = vrot.slane %v715_v40, 2 }
 0x141   :  { %4013 = vmatprep.subr.bf16.mxu1 %v5439_v32  ;;  %v590_v32 = vrot.slane %v589_v50, 1 }
 0x142   :  { %v737_v23 = vrot.slane %v736_v55, 2  ;;  %v717_v18 = vadd.f32 %v716_v37, %v715_v40  ;;  %v864_v40 = vld [vmem:[%s6885_s2 + $0x1a8] sm:$0xff]  ;;  %v847_v37 = vld [vmem:[%s6885_s2 + $0x120] sm:$0xff] }
 0x143   :  { %v591_v56 = vadd.f32 %v590_v32, %v589_v50  ;;  %v5507_v2 = vpack.c.bf16 %v864_v40, %v848_v39  ;;  %v896_v32 = vld [vmem:[%s6885_s2 + $0x2a8] sm:$0xff] }
 0x144   :  { %v738_v14 = vadd.f32 %v737_v23, %v736_v55  ;;  %v718_v49 = vrot.slane %v717_v18, 1  ;;  %v5527_v50 = vpack.c.bf16 %v896_v32, %v880_v59  ;;  %v928_v39 = vld [vmem:[%s6885_s2 + $0x3a8] sm:$0xff]  ;;  %v959_v59 = vld [vmem:[%s6885_s2 + $0x4a0] sm:$0xff] }
 0x145   :  { %7111 = vst [vmem:[#allocation37_spill] sm:$0xff] %v5507_v2  ;;  %v976_v32 = vld [vmem:[%s6885_s2 + $0x528] sm:$0xff] }
 0x146   :  { %3759 = vmatpush1.bf16.xpose.msra.mxu0 %v5461_v53  ;;  %v739_v46 = vrot.slane %v738_v14, 1  ;;  %v719_v23 = vadd.f32 %v718_v49, %v717_v18  ;;  %7113 = vst [vmem:[#allocation39_spill] sm:$0xff] %v5527_v50  ;;  %v895_v18 = vld [vmem:[%s6885_s2 + $0x2a0] sm:$0xff] }
 0x147   :  { %3761 = vmatprep.subr.bf16.mxu0 %v5465_v43  ;;  %v911_v49 = vld [vmem:[%s6885_s2 + $0x320] sm:$0xff] }
 0x148   :  { %4015 = vmatpush1.bf16.xpose.msra.mxu1 %v5461_v53  ;;  %v611_v53 = vrot.slane %v610_v5, 1  ;;  %v740_v13 = vadd.f32 %v739_v46, %v738_v14  ;;  %v879_v14 = vld [vmem:[%s6885_s2 + $0x220] sm:$0xff]  ;;  %v5547_v46 = vpack.c.bf16 %v928_v39, %v912_v61 }
 0x149   :  { %4017 = vmatprep.subr.bf16.mxu1 %v5465_v43  ;;  %v5545_v40 = vpack.c.bf16 %v895_v18, %v879_v14  ;;  %v992_v14 = vld [vmem:[%s6885_s2 + $0x5a8] sm:$0xff]  ;;  %v975_v39 = vld [vmem:[%s6885_s2 + $0x520] sm:$0xff] }
 0x14a   :  { %v612_v55 = vadd.f32 %v611_v53, %v610_v5  ;;  %v863_v53 = vld [vmem:[%s6885_s2 + $0x1a0] sm:$0xff]  ;;  %7115 = vst [vmem:[#allocation41_spill] sm:$0xff] %v5547_v46  ;;  %v5587_v61 = vpack.c.bf16 %v992_v14, %v976_v32  ;;  %v600_v32 = vrot.slane %v5219_v12, 4 }
 0x14b   :  { %v5525_v5 = vpack.c.bf16 %v863_v53, %v847_v37  ;;  %7114 = vst [vmem:[#allocation40_spill] sm:$0xff] %v5545_v40  ;;  %v943_v53 = vld [vmem:[%s6885_s2 + $0x420] sm:$0xff] }
 0x14c   :  { %v5585_v18 = vpack.c.bf16 %v959_v59, %v943_v53  ;;  %7119 = vst [vmem:[#allocation45_spill] sm:$0xff] %v5587_v61  ;;  %v621_v59 = vrot.slane %v5267_v57, 4  ;;  %v1007_v14 = vld [vmem:[%s6885_s2 + $0x620] sm:$0xff] }
 0x14d   :  { %7112 = vst [vmem:[#allocation38_spill] sm:$0xff] %v5525_v5 }
 0x14e   :  { %3763 = vmatpush1.bf16.xpose.msra.mxu0 %v5485_v24  ;;  %7118 = vst [vmem:[#allocation44_spill] sm:$0xff] %v5585_v18 }
 0x14f   :  { %3765 = vmatprep.subr.bf16.mxu0 %v5487_v25 }
 0x150   :  { %4019 = vmatpush1.bf16.xpose.msra.mxu1 %v5485_v24 }
 0x151   :  { %4021 = vmatprep.subr.bf16.mxu1 %v5487_v25 }
 0x155   :  { %1202 = vmatmul.mubr.f32.vlgmr.msra.gmra.mrb[16].mxu0 %v591_v56  ;;  %v944_v56 = vld [vmem:[%s6885_s2 + $0x428] sm:$0xff] }
 0x156   :  { %3767 = vmatpush1.bf16.xpose.msra.mxu0 %v5505_v48  ;;  %1271 = vmatprep.mubr.f32.mxu0 %v612_v55  ;;  %v927_v55 = vld [vmem:[%s6885_s2 + $0x3a0] sm:$0xff] }
 0x157   :  { %1762 = vmatmul.mubr.f32.vlgmr.msra.gmra.mrb[16].mxu1 %v719_v23  ;;  %3769 = vmatprep.subr.bf16.mxu0 %v5507_v2  ;;  %v5565_v23 = vpack.c.bf16 %v927_v55, %v911_v49  ;;  %v991_v49 = vld [vmem:[%s6885_s2 + $0x5a0] sm:$0xff]  ;;  %v1008_v55 = vld [vmem:[%s6885_s2 + $0x628] sm:$0xff] }
 0x158   :  { %4023 = vmatpush1.bf16.xpose.msra.mxu1 %v5505_v48  ;;  %1831 = vmatprep.mubr.f32.mxu1 %v740_v13  ;;  %v960_v13 = vld [vmem:[%s6885_s2 + $0x4a8] sm:$0xff] }
 0x159   :  { %4025 = vmatprep.subr.bf16.mxu1 %v5507_v2  ;;  %7116 = vst [vmem:[#allocation42_spill] sm:$0xff] %v5565_v23  ;;  %v5567_v37 = vpack.c.bf16 %v960_v13, %v944_v56  ;;  %v1024_v56 = vld [vmem:[%s6885_s2 + $0x6a8] sm:$0xff]  ;;  %v5605_v13 = vpack.c.bf16 %v991_v49, %v975_v39  ;;  %v817_v2 = vld [vmem:[%s6885_s2 + $0x30] sm:$0xff] }
 0x15a   :  { %v5607_v53 = vpack.c.bf16 %v1024_v56, %v1008_v55  ;;  %v1040_v39 = vld [vmem:[%s6885_s2 + $0x728] sm:$0xff]  ;;  %v749_v55 = vrot.slane %v5291_v17, 4  ;;  %v728_v56 = vrot.slane %v5242_v36, 4 }
 0x15b   :  { %7117 = vst [vmem:[#allocation43_spill] sm:$0xff] %v5567_v37  ;;  %7120 = vst [vmem:[#allocation46_spill] sm:$0xff] %v5605_v13  ;;  %v1056_v49 = vld [vmem:[%s6885_s2 + $0x7a8] sm:$0xff] }
 0x15c   :  { %7121 = vst [vmem:[#allocation47_spill] sm:$0xff] %v5607_v53 }
 0x15e   :  { %3771 = vmatpush1.bf16.xpose.msra.mxu0 %v5525_v5 }
 0x15f   :  { %3773 = vmatprep.subr.bf16.mxu0 %v5527_v50 }
 0x160   :  { %4027 = vmatpush1.bf16.xpose.msra.mxu1 %v5525_v5 }
 0x161   :  { %4029 = vmatprep.subr.bf16.mxu1 %v5527_v50 }
 0x166   :  { %3775 = vmatpush1.bf16.xpose.msra.mxu0 %v5545_v40 }
 0x167   :  { %3777 = vmatprep.subr.bf16.mxu0 %v5547_v46 }
 0x168   :  { %4031 = vmatpush1.bf16.xpose.msra.mxu1 %v5545_v40  ;;  %v729_v40 = vadd.f32 %v728_v56, %v5242_v36  ;;  %v818_v36 = vld [vmem:[%s6885_s2 + $0x38] sm:$0xff] }
 0x169   :  { %4033 = vmatprep.subr.bf16.mxu1 %v5547_v46  ;;  %v750_v46 = vadd.f32 %v749_v55, %v5291_v17 }
 0x16b   :  { %v751_v17 = vrot.slane %v750_v46, 2 }
 0x16d   :  { %v752_v55 = vadd.f32 %v751_v17, %v750_v46 }
 0x16e   :  { %3779 = vmatpush1.bf16.xpose.msra.mxu0 %v5565_v23 }
 0x16f   :  { %3781 = vmatprep.subr.bf16.mxu0 %v5567_v37 }
 0x170   :  { %4035 = vmatpush1.bf16.xpose.msra.mxu1 %v5565_v23  ;;  %v5633_v23 = vpack.c.bf16 %v1056_v49, %v1040_v39 }
 0x171   :  { %4037 = vmatprep.subr.bf16.mxu1 %v5567_v37  ;;  %v622_v37 = vadd.f32 %v621_v59, %v5267_v57  ;;  %v834_v57 = vld [vmem:[%s6885_s2 + $0xb8] sm:$0xff]  ;;  %v730_v59 = vrot.slane %v729_v40, 2 }
 0x172   :  { %7123 = vst [vmem:[#allocation49_spill] sm:$0xff] %v5633_v23  ;;  %v5655_v49 = vpack.c.bf16 %v834_v57, %v818_v36 }
 0x173   :  { %v623_v50 = vrot.slane %v622_v37, 2  ;;  %v731_v56 = vadd.f32 %v730_v59, %v729_v40  ;;  %v753_v40 = vrot.slane %v752_v55, 1  ;;  %v849_v59 = vld [vmem:[%s6885_s2 + $0x130] sm:$0xff] }
 0x174   :  { %7125 = vst [vmem:[#allocation51_spill] sm:$0xff] %v5655_v49 }
 0x175   :  { %v732_v46 = vrot.slane %v731_v56, 1  ;;  %v754_v57 = vadd.f32 %v753_v40, %v752_v55  ;;  %v881_v55 = vld [vmem:[%s6885_s2 + $0x230] sm:$0xff] }
 0x176   :  { %3783 = vmatpush1.bf16.xpose.msra.mxu0 %v5585_v18 }
 0x177   :  { %3785 = vmatprep.subr.bf16.mxu0 %v5587_v61  ;;  %v733_v17 = vadd.f32 %v732_v46, %v731_v56  ;;  %v897_v56 = vld [vmem:[%s6885_s2 + $0x2b0] sm:$0xff] }
 0x178   :  { %4039 = vmatpush1.bf16.xpose.msra.mxu1 %v5585_v18  ;;  %v913_v46 = vld [vmem:[%s6885_s2 + $0x330] sm:$0xff] }
 0x179   :  { %4041 = vmatprep.subr.bf16.mxu1 %v5587_v61  ;;  %v1023_v61 = vld [vmem:[%s6885_s2 + $0x6a0] sm:$0xff] }
 0x17a   :  { %v5629_v18 = vpack.c.bf16 %v1023_v61, %v1007_v14  ;;  %v1039_v61 = vld [vmem:[%s6885_s2 + $0x720] sm:$0xff]  ;;  %v624_v14 = vadd.f32 %v623_v50, %v622_v37  ;;  %v866_v50 = vld [vmem:[%s6885_s2 + $0x1b8] sm:$0xff] }
 0x17c   :  { %7122 = vst [vmem:[#allocation48_spill] sm:$0xff] %v5629_v18 }
 0x17e   :  { %3787 = vmatpush1.bf16.xpose.msra.mxu0 %v5605_v13 }
 0x17f   :  { %3789 = vmatprep.subr.bf16.mxu0 %v5607_v53 }
 0x180   :  { %4043 = vmatpush1.bf16.xpose.msra.mxu1 %v5605_v13  ;;  %v601_v13 = vadd.f32 %v600_v32, %v5219_v12  ;;  %v1055_v12 = vld [vmem:[%s6885_s2 + $0x7a0] sm:$0xff] }
 0x181   :  { %4045 = vmatprep.subr.bf16.mxu1 %v5607_v53  ;;  %v5653_v32 = vpack.c.bf16 %v1055_v12, %v1039_v61  ;;  %v833_v61 = vld [vmem:[%s6885_s2 + $0xb0] sm:$0xff] }
 0x182   :  { %v602_v5 = vrot.slane %v601_v13, 2  ;;  %v5673_v37 = vpack.c.bf16 %v833_v61, %v817_v2  ;;  %v865_v2 = vld [vmem:[%s6885_s2 + $0x1b0] sm:$0xff]  ;;  %v914_v61 = vld [vmem:[%s6885_s2 + $0x338] sm:$0xff] }
 0x183   :  { %7124 = vst [vmem:[#allocation50_spill] sm:$0xff] %v5653_v32 }
 0x184   :  { %v603_v39 = vadd.f32 %v602_v5, %v601_v13  ;;  %v850_v5 = vld [vmem:[%s6885_s2 + $0x138] sm:$0xff] }
 0x185   :  { %v5675_v36 = vpack.c.bf16 %v866_v50, %v850_v5  ;;  %v930_v5 = vld [vmem:[%s6885_s2 + $0x3b8] sm:$0xff]  ;;  %v5713_v50 = vpack.c.bf16 %v897_v56, %v881_v55 }
 0x186   :  { %3791 = vmatpush1.bf16.xpose.msra.mxu0 %v5629_v18  ;;  %v604_v53 = vrot.slane %v603_v39, 1  ;;  %v5715_v40 = vpack.c.bf16 %v930_v5, %v914_v61  ;;  %v994_v55 = vld [vmem:[%s6885_s2 + $0x5b8] sm:$0xff]  ;;  %v977_v5 = vld [vmem:[%s6885_s2 + $0x530] sm:$0xff] }
 0x187   :  { %3793 = vmatprep.subr.bf16.mxu0 %v5633_v23  ;;  %7127 = vst [vmem:[#allocation53_spill] sm:$0xff] %v5713_v50 }
 0x188   :  { %4047 = vmatpush1.bf16.xpose.msra.mxu1 %v5629_v18  ;;  %v625_v18 = vrot.slane %v624_v14, 1  ;;  %v605_v12 = vadd.f32 %v604_v53, %v603_v39  ;;  %v898_v53 = vld [vmem:[%s6885_s2 + $0x2b8] sm:$0xff]  ;;  %7128 = vst [vmem:[#allocation54_spill] sm:$0xff] %v5715_v40 }
 0x189   :  { %4049 = vmatprep.subr.bf16.mxu1 %v5633_v23 }
 0x18a   :  { %v626_v13 = vadd.f32 %v625_v18, %v624_v14  ;;  %v882_v18 = vld [vmem:[%s6885_s2 + $0x238] sm:$0xff]  ;;  %v5693_v14 = vpack.c.bf16 %v865_v2, %v849_v59  ;;  %v945_v2 = vld [vmem:[%s6885_s2 + $0x430] sm:$0xff] }
 0x18b   :  { %v5695_v39 = vpack.c.bf16 %v898_v53, %v882_v18  ;;  %v961_v18 = vld [vmem:[%s6885_s2 + $0x4b0] sm:$0xff]  ;;  %v978_v53 = vld [vmem:[%s6885_s2 + $0x538] sm:$0xff] }
 0x18c   :  { %v5753_v56 = vpack.c.bf16 %v961_v18, %v945_v2  ;;  %v5755_v61 = vpack.c.bf16 %v994_v55, %v978_v53  ;;  %v614_v18 = vrot.slane %v5261_v54, 4  ;;  %v1009_v53 = vld [vmem:[%s6885_s2 + $0x630] sm:$0xff] }
 0x18d   :  { %7126 = vst [vmem:[#allocation52_spill] sm:$0xff] %v5695_v39  ;;  %v1025_v55 = vld [vmem:[%s6885_s2 + $0x6b0] sm:$0xff] }
 0x18e   :  { %3795 = vmatpush1.bf16.xpose.msra.mxu0 %v5653_v32  ;;  %7131 = vst [vmem:[#allocation57_spill] sm:$0xff] %v5753_v56  ;;  %7132 = vst [vmem:[#allocation58_spill] sm:$0xff] %v5755_v61  ;;  %v5797_v23 = vpack.c.bf16 %v1025_v55, %v1009_v53  ;;  %v1041_v53 = vld [vmem:[%s6885_s2 + $0x730] sm:$0xff] }
 0x18f   :  { %3797 = vmatprep.subr.bf16.mxu0 %v5655_v49 }
 0x190   :  { %4051 = vmatpush1.bf16.xpose.msra.mxu1 %v5653_v32  ;;  %v635_v32 = vrot.slane %v5320_v51, 4  ;;  %7135 = vst [vmem:[#allocation61_spill] sm:$0xff] %v5797_v23 }
 0x191   :  { %4053 = vmatprep.subr.bf16.mxu1 %v5655_v49 }
 0x195   :  { %1272 = vmatmul.mubr.f32.vlgmr.msra.gmra.mrb[16].mxu0 %v605_v12  ;;  %v946_v12 = vld [vmem:[%s6885_s2 + $0x438] sm:$0xff] }
 0x196   :  { %3799 = vmatpush1.bf16.xpose.msra.mxu0 %v5673_v37  ;;  %1341 = vmatprep.mubr.f32.mxu0 %v626_v13  ;;  %v929_v13 = vld [vmem:[%s6885_s2 + $0x3b0] sm:$0xff] }
 0x197   :  { %1832 = vmatmul.mubr.f32.vlgmr.msra.gmra.mrb[16].mxu1 %v733_v17  ;;  %3801 = vmatprep.subr.bf16.mxu0 %v5675_v36  ;;  %v5733_v17 = vpack.c.bf16 %v929_v13, %v913_v46  ;;  %v993_v46 = vld [vmem:[%s6885_s2 + $0x5b0] sm:$0xff]  ;;  %v1010_v13 = vld [vmem:[%s6885_s2 + $0x638] sm:$0xff] }
 0x198   :  { %4055 = vmatpush1.bf16.xpose.msra.mxu1 %v5673_v37  ;;  %1901 = vmatprep.mubr.f32.mxu1 %v754_v57  ;;  %v962_v57 = vld [vmem:[%s6885_s2 + $0x4b8] sm:$0xff] }
 0x199   :  { %4057 = vmatprep.subr.bf16.mxu1 %v5675_v36  ;;  %7129 = vst [vmem:[#allocation55_spill] sm:$0xff] %v5733_v17  ;;  %v5735_v59 = vpack.c.bf16 %v962_v57, %v946_v12  ;;  %v1026_v12 = vld [vmem:[%s6885_s2 + $0x6b8] sm:$0xff]  ;;  %v5773_v57 = vpack.c.bf16 %v993_v46, %v977_v5 }
 0x19a   :  { %v5775_v2 = vpack.c.bf16 %v1026_v12, %v1010_v13  ;;  %v1042_v5 = vld [vmem:[%s6885_s2 + $0x738] sm:$0xff]  ;;  %v742_v13 = vrot.slane %v5274_v6, 4  ;;  %v763_v12 = vrot.slane %v5332_v8, 4 }
 0x19b   :  { %7130 = vst [vmem:[#allocation56_spill] sm:$0xff] %v5735_v59  ;;  %7133 = vst [vmem:[#allocation59_spill] sm:$0xff] %v5773_v57  ;;  %v1058_v46 = vld [vmem:[%s6885_s2 + $0x7b8] sm:$0xff] }
 0x19c   :  { %7134 = vst [vmem:[#allocation60_spill] sm:$0xff] %v5775_v2 }
 0x19e   :  { %3803 = vmatpush1.bf16.xpose.msra.mxu0 %v5693_v14 }
 0x19f   :  { %3805 = vmatprep.subr.bf16.mxu0 %v5695_v39 }
 0x1a0   :  { %4059 = vmatpush1.bf16.xpose.msra.mxu1 %v5693_v14 }
 0x1a1   :  { %4061 = vmatprep.subr.bf16.mxu1 %v5695_v39 }
 0x1a6   :  { %3807 = vmatpush1.bf16.xpose.msra.mxu0 %v5713_v50 }
 0x1a7   :  { %3809 = vmatprep.subr.bf16.mxu0 %v5715_v40 }
 0x1a8   :  { %4063 = vmatpush1.bf16.xpose.msra.mxu1 %v5713_v50  ;;  %v819_v50 = vld [vmem:[%s6885_s2 + $0x40] sm:$0xff] }
 0x1a9   :  { %4065 = vmatprep.subr.bf16.mxu1 %v5715_v40 }
 0x1ae   :  { %3811 = vmatpush1.bf16.xpose.msra.mxu0 %v5733_v17 }
 0x1af   :  { %3813 = vmatprep.subr.bf16.mxu0 %v5735_v59 }
 0x1b0   :  { %4067 = vmatpush1.bf16.xpose.msra.mxu1 %v5733_v17  ;;  %v764_v17 = vadd.f32 %v763_v12, %v5332_v8 }
 0x1b1   :  { %4069 = vmatprep.subr.bf16.mxu1 %v5735_v59  ;;  %v743_v59 = vadd.f32 %v742_v13, %v5274_v6  ;;  %v820_v6 = vld [vmem:[%s6885_s2 + $0x48] sm:$0xff] }
 0x1b2   :  { %v765_v55 = vrot.slane %v764_v17, 2 }
 0x1b3   :  { %v744_v8 = vrot.slane %v743_v59, 2 }
 0x1b5   :  { %v745_v12 = vadd.f32 %v744_v8, %v743_v59  ;;  %v852_v59 = vld [vmem:[%s6885_s2 + $0x148] sm:$0xff] }
 0x1b6   :  { %3815 = vmatpush1.bf16.xpose.msra.mxu0 %v5753_v56 }
 0x1b7   :  { %3817 = vmatprep.subr.bf16.mxu0 %v5755_v61 }
 0x1b8   :  { %4071 = vmatpush1.bf16.xpose.msra.mxu1 %v5753_v56  ;;  %v5800_v56 = vpack.c.bf16 %v1058_v46, %v1042_v5 }
 0x1b9   :  { %4073 = vmatprep.subr.bf16.mxu1 %v5755_v61  ;;  %v615_v61 = vadd.f32 %v614_v18, %v5261_v54  ;;  %v1057_v54 = vld [vmem:[%s6885_s2 + $0x7b0] sm:$0xff] }
 0x1ba   :  { %7136 = vst [vmem:[#allocation62_spill] sm:$0xff] %v5800_v56 }
 0x1bb   :  { %v616_v40 = vrot.slane %v615_v61, 2 }
 0x1bd   :  { %v617_v5 = vadd.f32 %v616_v40, %v615_v61  ;;  %v746_v61 = vrot.slane %v745_v12, 1 }
 0x1be   :  { %3819 = vmatpush1.bf16.xpose.msra.mxu0 %v5773_v57 }
 0x1bf   :  { %3821 = vmatprep.subr.bf16.mxu0 %v5775_v2  ;;  %v747_v8 = vadd.f32 %v746_v61, %v745_v12  ;;  %v883_v12 = vld [vmem:[%s6885_s2 + $0x240] sm:$0xff] }
 0x1c0   :  { %4075 = vmatpush1.bf16.xpose.msra.mxu1 %v5773_v57  ;;  %v636_v57 = vadd.f32 %v635_v32, %v5320_v51  ;;  %v836_v51 = vld [vmem:[%s6885_s2 + $0xc8] sm:$0xff]  ;;  %v5821_v32 = vpack.c.bf16 %v1057_v54, %v1041_v53  ;;  %v835_v53 = vld [vmem:[%s6885_s2 + $0xc0] sm:$0xff] }
 0x1c1   :  { %4077 = vmatprep.subr.bf16.mxu1 %v5775_v2  ;;  %v5823_v46 = vpack.c.bf16 %v836_v51, %v820_v6  ;;  %v618_v2 = vrot.slane %v617_v5, 1  ;;  %v915_v61 = vld [vmem:[%s6885_s2 + $0x340] sm:$0xff] }
 0x1c2   :  { %v637_v18 = vrot.slane %v636_v57, 2  ;;  %7137 = vst [vmem:[#allocation63_spill] sm:$0xff] %v5821_v32 }
 0x1c3   :  { %7138 = vst [vmem:[#allocation64_spill] sm:$0xff] %v5823_v46 }
 0x1c4   :  { %v638_v13 = vadd.f32 %v637_v18, %v636_v57  ;;  %v5841_v57 = vpack.c.bf16 %v835_v53, %v819_v50  ;;  %v619_v18 = vadd.f32 %v618_v2, %v617_v5  ;;  %v867_v50 = vld [vmem:[%s6885_s2 + $0x1c0] sm:$0xff]  ;;  %v884_v2 = vld [vmem:[%s6885_s2 + $0x248] sm:$0xff] }
 0x1c5   :  { %v899_v53 = vld [vmem:[%s6885_s2 + $0x2c0] sm:$0xff] }
 0x1c6   :  { %3823 = vmatpush1.bf16.xpose.msra.mxu0 %v5797_v23  ;;  %v639_v40 = vrot.slane %v638_v13, 1  ;;  %7139 = vst [vmem:[#allocation65_spill] sm:$0xff] %v5841_v57 }
 0x1c7   :  { %3825 = vmatprep.subr.bf16.mxu0 %v5800_v56 }
 0x1c8   :  { %4079 = vmatpush1.bf16.xpose.msra.mxu1 %v5797_v23  ;;  %v766_v23 = vadd.f32 %v765_v55, %v764_v17  ;;  %v868_v17 = vld [vmem:[%s6885_s2 + $0x1c8] sm:$0xff]  ;;  %v640_v51 = vadd.f32 %v639_v40, %v638_v13 }
 0x1c9   :  { %4081 = vmatprep.subr.bf16.mxu1 %v5800_v56  ;;  %v5843_v6 = vpack.c.bf16 %v868_v17, %v852_v59  ;;  %v932_v40 = vld [vmem:[%s6885_s2 + $0x3c8] sm:$0xff]  ;;  %v5881_v59 = vpack.c.bf16 %v899_v53, %v883_v12 }
 0x1ca   :  { %v767_v54 = vrot.slane %v766_v23, 1  ;;  %v996_v12 = vld [vmem:[%s6885_s2 + $0x5c8] sm:$0xff] }
 0x1cb   :  { %7140 = vst [vmem:[#allocation66_spill] sm:$0xff] %v5843_v6  ;;  %7143 = vst [vmem:[#allocation69_spill] sm:$0xff] %v5881_v59 }
 0x1cc   :  { %v768_v55 = vadd.f32 %v767_v54, %v766_v23  ;;  %v900_v23 = vld [vmem:[%s6885_s2 + $0x2c8] sm:$0xff]  ;;  %v931_v54 = vld [vmem:[%s6885_s2 + $0x3c0] sm:$0xff] }
 0x1cd   :  { %v5863_v13 = vpack.c.bf16 %v900_v23, %v884_v2  ;;  %v963_v2 = vld [vmem:[%s6885_s2 + $0x4c0] sm:$0xff]  ;;  %v980_v23 = vld [vmem:[%s6885_s2 + $0x548] sm:$0xff] }
 0x1ce   :  { %3827 = vmatpush1.bf16.xpose.msra.mxu0 %v5821_v32 }
 0x1cf   :  { %3829 = vmatprep.subr.bf16.mxu0 %v5823_v46  ;;  %7142 = vst [vmem:[#allocation68_spill] sm:$0xff] %v5863_v13 }
 0x1d0   :  { %4083 = vmatpush1.bf16.xpose.msra.mxu1 %v5821_v32 }
 0x1d1   :  { %4085 = vmatprep.subr.bf16.mxu1 %v5823_v46  ;;  %v851_v46 = vld [vmem:[%s6885_s2 + $0x140] sm:$0xff] }
 0x1d2   :  { %v5861_v5 = vpack.c.bf16 %v867_v50, %v851_v46  ;;  %v916_v46 = vld [vmem:[%s6885_s2 + $0x348] sm:$0xff]  ;;  %v947_v50 = vld [vmem:[%s6885_s2 + $0x440] sm:$0xff] }
 0x1d3   :  { %v5883_v17 = vpack.c.bf16 %v932_v40, %v916_v46  ;;  %v5921_v53 = vpack.c.bf16 %v963_v2, %v947_v50  ;;  %v5923_v46 = vpack.c.bf16 %v996_v12, %v980_v23  ;;  %v979_v40 = vld [vmem:[%s6885_s2 + $0x540] sm:$0xff]  ;;  %v628_v2 = vrot.slane %v5281_v0, 4 }
 0x1d4   :  { %7141 = vst [vmem:[#allocation67_spill] sm:$0xff] %v5861_v5  ;;  %v1011_v23 = vld [vmem:[%s6885_s2 + $0x640] sm:$0xff] }
 0x1d5   :  { %1342 = vmatmul.mubr.f32.vlgmr.msra.gmra.mrb[16].mxu0 %v619_v18  ;;  %7144 = vst [vmem:[#allocation70_spill] sm:$0xff] %v5883_v17  ;;  %v948_v18 = vld [vmem:[%s6885_s2 + $0x448] sm:$0xff]  ;;  %7147 = vst [vmem:[#allocation73_spill] sm:$0xff] %v5921_v53  ;;  %v1027_v12 = vld [vmem:[%s6885_s2 + $0x6c0] sm:$0xff] }
 0x1d6   :  { %3831 = vmatpush1.bf16.xpose.msra.mxu0 %v5841_v57  ;;  %1411 = vmatprep.mubr.f32.mxu0 %v640_v51  ;;  %v964_v51 = vld [vmem:[%s6885_s2 + $0x4c8] sm:$0xff]  ;;  %7148 = vst [vmem:[#allocation74_spill] sm:$0xff] %v5923_v46 }
 0x1d7   :  { %1902 = vmatmul.mubr.f32.vlgmr.msra.gmra.mrb[16].mxu1 %v747_v8  ;;  %3833 = vmatprep.subr.bf16.mxu0 %v5843_v6  ;;  %v5901_v8 = vpack.c.bf16 %v931_v54, %v915_v61  ;;  %v995_v61 = vld [vmem:[%s6885_s2 + $0x5c0] sm:$0xff]  ;;  %v1012_v54 = vld [vmem:[%s6885_s2 + $0x648] sm:$0xff] }
 0x1d8   :  { %4087 = vmatpush1.bf16.xpose.msra.mxu1 %v5841_v57  ;;  %1971 = vmatprep.mubr.f32.mxu1 %v768_v55  ;;  %v5903_v55 = vpack.c.bf16 %v964_v51, %v948_v18  ;;  %v1028_v18 = vld [vmem:[%s6885_s2 + $0x6c8] sm:$0xff]  ;;  %v5941_v51 = vpack.c.bf16 %v995_v61, %v979_v40 }
 0x1d9   :  { %4089 = vmatprep.subr.bf16.mxu1 %v5843_v6  ;;  %7145 = vst [vmem:[#allocation71_spill] sm:$0xff] %v5901_v8  ;;  %v5943_v50 = vpack.c.bf16 %v1028_v18, %v1012_v54  ;;  %v1044_v40 = vld [vmem:[%s6885_s2 + $0x748] sm:$0xff]  ;;  %v756_v54 = vrot.slane %v5316_v47, 4  ;;  %v777_v18 = vrot.slane %v5363_v7, 4 }
 0x1da   :  { %7146 = vst [vmem:[#allocation72_spill] sm:$0xff] %v5903_v55  ;;  %7149 = vst [vmem:[#allocation75_spill] sm:$0xff] %v5941_v51  ;;  %v1060_v61 = vld [vmem:[%s6885_s2 + $0x7c8] sm:$0xff] }
 0x1db   :  { %7150 = vst [vmem:[#allocation76_spill] sm:$0xff] %v5943_v50 }
 0x1de   :  { %3835 = vmatpush1.bf16.xpose.msra.mxu0 %v5861_v5 }
 0x1df   :  { %3837 = vmatprep.subr.bf16.mxu0 %v5863_v13 }
 0x1e0   :  { %4091 = vmatpush1.bf16.xpose.msra.mxu1 %v5861_v5  ;;  %v821_v5 = vld [vmem:[%s6885_s2 + $0x50] sm:$0xff] }
 0x1e1   :  { %4093 = vmatprep.subr.bf16.mxu1 %v5863_v13 }
 0x1e6   :  { %3839 = vmatpush1.bf16.xpose.msra.mxu0 %v5881_v59 }
 0x1e7   :  { %3841 = vmatprep.subr.bf16.mxu0 %v5883_v17 }
 0x1e8   :  { %4095 = vmatpush1.bf16.xpose.msra.mxu1 %v5881_v59  ;;  %v778_v59 = vadd.f32 %v777_v18, %v5363_v7 }
 0x1e9   :  { %4097 = vmatprep.subr.bf16.mxu1 %v5883_v17  ;;  %v757_v17 = vadd.f32 %v756_v54, %v5316_v47  ;;  %v822_v47 = vld [vmem:[%s6885_s2 + $0x58] sm:$0xff] }
 0x1eb   :  { %v758_v7 = vrot.slane %v757_v17, 2 }
 0x1ed   :  { %v759_v18 = vadd.f32 %v758_v7, %v757_v17  ;;  %v854_v17 = vld [vmem:[%s6885_s2 + $0x158] sm:$0xff] }
 0x1ee   :  { %3843 = vmatpush1.bf16.xpose.msra.mxu0 %v5901_v8 }
 0x1ef   :  { %3845 = vmatprep.subr.bf16.mxu0 %v5903_v55 }
 0x1f0   :  { %4099 = vmatpush1.bf16.xpose.msra.mxu1 %v5901_v8  ;;  %v5968_v8 = vpack.c.bf16 %v1060_v61, %v1044_v40 }
 0x1f1   :  { %4101 = vmatprep.subr.bf16.mxu1 %v5903_v55  ;;  %v629_v55 = vadd.f32 %v628_v2, %v5281_v0  ;;  %v1059_v0 = vld [vmem:[%s6885_s2 + $0x7c0] sm:$0xff] }
 0x1f2   :  { %7152 = vst [vmem:[#allocation78_spill] sm:$0xff] %v5968_v8 }
 0x1f3   :  { %v630_v13 = vrot.slane %v629_v55, 2 }
 0x1f5   :  { %v631_v40 = vadd.f32 %v630_v13, %v629_v55  ;;  %v760_v55 = vrot.slane %v759_v18, 1 }
 0x1f6   :  { %3847 = vmatpush1.bf16.xpose.msra.mxu0 %v5921_v53 }
 0x1f7   :  { %3849 = vmatprep.subr.bf16.mxu0 %v5923_v46  ;;  %v761_v7 = vadd.f32 %v760_v55, %v759_v18  ;;  %v885_v18 = vld [vmem:[%s6885_s2 + $0x250] sm:$0xff] }
 0x1f8   :  { %4103 = vmatpush1.bf16.xpose.msra.mxu1 %v5921_v53  ;;  %v5965_v53 = vpack.c.bf16 %v1027_v12, %v1011_v23  ;;  %v1043_v23 = vld [vmem:[%s6885_s2 + $0x740] sm:$0xff]  ;;  %v779_v12 = vrot.slane %v778_v59, 2  ;;  %v917_v55 = vld [vmem:[%s6885_s2 + $0x350] sm:$0xff] }
 0x1f9   :  { %4105 = vmatprep.subr.bf16.mxu1 %v5923_v46  ;;  %v649_v46 = vrot.slane %v5354_v44, 4 }
 0x1fa   :  { %7151 = vst [vmem:[#allocation77_spill] sm:$0xff] %v5965_v53 }
 0x1fe   :  { %3851 = vmatpush1.bf16.xpose.msra.mxu0 %v5941_v51 }
 0x1ff   :  { %3853 = vmatprep.subr.bf16.mxu0 %v5943_v50 }
 0x200   :  { %4107 = vmatpush1.bf16.xpose.msra.mxu1 %v5941_v51  ;;  %v650_v51 = vadd.f32 %v649_v46, %v5354_v44  ;;  %v838_v44 = vld [vmem:[%s6885_s2 + $0xd8] sm:$0xff]  ;;  %v5989_v46 = vpack.c.bf16 %v1059_v0, %v1043_v23  ;;  %v837_v23 = vld [vmem:[%s6885_s2 + $0xd0] sm:$0xff] }
 0x201   :  { %4109 = vmatprep.subr.bf16.mxu1 %v5943_v50  ;;  %v5991_v61 = vpack.c.bf16 %v838_v44, %v822_v47  ;;  %v632_v50 = vrot.slane %v631_v40, 1 }
 0x202   :  { %v651_v2 = vrot.slane %v650_v51, 2  ;;  %7153 = vst [vmem:[#allocation79_spill] sm:$0xff] %v5989_v46 }
 0x203   :  { %7154 = vst [vmem:[#allocation80_spill] sm:$0xff] %v5991_v61 }
 0x204   :  { %v652_v54 = vadd.f32 %v651_v2, %v650_v51  ;;  %v6009_v51 = vpack.c.bf16 %v837_v23, %v821_v5  ;;  %v633_v2 = vadd.f32 %v632_v50, %v631_v40  ;;  %v869_v5 = vld [vmem:[%s6885_s2 + $0x1d0] sm:$0xff]  ;;  %v886_v50 = vld [vmem:[%s6885_s2 + $0x258] sm:$0xff] }
 0x205   :  { %v901_v23 = vld [vmem:[%s6885_s2 + $0x2d0] sm:$0xff] }
 0x206   :  { %3855 = vmatpush1.bf16.xpose.msra.mxu0 %v5965_v53  ;;  %v653_v13 = vrot.slane %v652_v54, 1  ;;  %7155 = vst [vmem:[#allocation81_spill] sm:$0xff] %v6009_v51 }
 0x207   :  { %3857 = vmatprep.subr.bf16.mxu0 %v5968_v8 }
 0x208   :  { %4111 = vmatpush1.bf16.xpose.msra.mxu1 %v5965_v53  ;;  %v780_v53 = vadd.f32 %v779_v12, %v778_v59  ;;  %v870_v59 = vld [vmem:[%s6885_s2 + $0x1d8] sm:$0xff]  ;;  %v654_v44 = vadd.f32 %v653_v13, %v652_v54 }
 0x209   :  { %4113 = vmatprep.subr.bf16.mxu1 %v5968_v8  ;;  %v6011_v47 = vpack.c.bf16 %v870_v59, %v854_v17  ;;  %v934_v13 = vld [vmem:[%s6885_s2 + $0x3d8] sm:$0xff]  ;;  %v6049_v17 = vpack.c.bf16 %v901_v23, %v885_v18  ;;  %v663_v8 = vrot.slane %v5391_v20, 4 }
 0x20a   :  { %v781_v0 = vrot.slane %v780_v53, 1  ;;  %v998_v18 = vld [vmem:[%s6885_s2 + $0x5d8] sm:$0xff] }
 0x20b   :  { %7156 = vst [vmem:[#allocation82_spill] sm:$0xff] %v6011_v47  ;;  %7159 = vst [vmem:[#allocation85_spill] sm:$0xff] %v6049_v17 }
 0x20c   :  { %v782_v12 = vadd.f32 %v781_v0, %v780_v53  ;;  %v902_v53 = vld [vmem:[%s6885_s2 + $0x2d8] sm:$0xff]  ;;  %v933_v0 = vld [vmem:[%s6885_s2 + $0x3d0] sm:$0xff] }
 0x20d   :  { %v6031_v54 = vpack.c.bf16 %v902_v53, %v886_v50  ;;  %v965_v50 = vld [vmem:[%s6885_s2 + $0x4d0] sm:$0xff]  ;;  %v982_v53 = vld [vmem:[%s6885_s2 + $0x558] sm:$0xff] }
 0x20e   :  { %3859 = vmatpush1.bf16.xpose.msra.mxu0 %v5989_v46 }
 0x20f   :  { %3861 = vmatprep.subr.bf16.mxu0 %v5991_v61  ;;  %7158 = vst [vmem:[#allocation84_spill] sm:$0xff] %v6031_v54 }
 0x210   :  { %4115 = vmatpush1.bf16.xpose.msra.mxu1 %v5989_v46  ;;  %v853_v46 = vld [vmem:[%s6885_s2 + $0x150] sm:$0xff] }
 0x211   :  { %4117 = vmatprep.subr.bf16.mxu1 %v5991_v61  ;;  %v6029_v40 = vpack.c.bf16 %v869_v5, %v853_v46  ;;  %v918_v46 = vld [vmem:[%s6885_s2 + $0x358] sm:$0xff]  ;;  %v949_v5 = vld [vmem:[%s6885_s2 + $0x450] sm:$0xff] }
 0x212   :  { %v6051_v59 = vpack.c.bf16 %v934_v13, %v918_v46  ;;  %v6089_v23 = vpack.c.bf16 %v965_v50, %v949_v5  ;;  %v6091_v46 = vpack.c.bf16 %v998_v18, %v982_v53  ;;  %v981_v13 = vld [vmem:[%s6885_s2 + $0x550] sm:$0xff]  ;;  %v642_v50 = vrot.slane %v5326_v1, 4 }
 0x213   :  { %7157 = vst [vmem:[#allocation83_spill] sm:$0xff] %v6029_v40  ;;  %v1013_v53 = vld [vmem:[%s6885_s2 + $0x650] sm:$0xff] }
 0x214   :  { %7160 = vst [vmem:[#allocation86_spill] sm:$0xff] %v6051_v59  ;;  %7163 = vst [vmem:[#allocation89_spill] sm:$0xff] %v6089_v23  ;;  %v1029_v18 = vld [vmem:[%s6885_s2 + $0x6d0] sm:$0xff] }
 0x215   :  { %1412 = vmatmul.mubr.f32.vlgmr.msra.gmra.mrb[16].mxu0 %v633_v2  ;;  %v950_v2 = vld [vmem:[%s6885_s2 + $0x458] sm:$0xff]  ;;  %7164 = vst [vmem:[#allocation90_spill] sm:$0xff] %v6091_v46 }
 0x216   :  { %3863 = vmatpush1.bf16.xpose.msra.mxu0 %v6009_v51  ;;  %1481 = vmatprep.mubr.f32.mxu0 %v654_v44  ;;  %v966_v44 = vld [vmem:[%s6885_s2 + $0x4d8] sm:$0xff] }
 0x217   :  { %1972 = vmatmul.mubr.f32.vlgmr.msra.gmra.mrb[16].mxu1 %v761_v7  ;;  %3865 = vmatprep.subr.bf16.mxu0 %v6011_v47  ;;  %v6069_v7 = vpack.c.bf16 %v933_v0, %v917_v55  ;;  %v997_v55 = vld [vmem:[%s6885_s2 + $0x5d0] sm:$0xff]  ;;  %v1014_v0 = vld [vmem:[%s6885_s2 + $0x658] sm:$0xff] }
 0x218   :  { %4119 = vmatpush1.bf16.xpose.msra.mxu1 %v6009_v51  ;;  %2041 = vmatprep.mubr.f32.mxu1 %v782_v12  ;;  %v6071_v12 = vpack.c.bf16 %v966_v44, %v950_v2  ;;  %v1030_v2 = vld [vmem:[%s6885_s2 + $0x6d8] sm:$0xff]  ;;  %v6109_v44 = vpack.c.bf16 %v997_v55, %v981_v13 }
 0x219   :  { %4121 = vmatprep.subr.bf16.mxu1 %v6011_v47  ;;  %7161 = vst [vmem:[#allocation87_spill] sm:$0xff] %v6069_v7  ;;  %v6111_v5 = vpack.c.bf16 %v1030_v2, %v1014_v0  ;;  %v1046_v13 = vld [vmem:[%s6885_s2 + $0x758] sm:$0xff]  ;;  %v770_v0 = vrot.slane %v5342_v19, 4  ;;  %v791_v2 = vrot.slane %v5405_v41, 4 }
 0x21a   :  { %7162 = vst [vmem:[#allocation88_spill] sm:$0xff] %v6071_v12  ;;  %7165 = vst [vmem:[#allocation91_spill] sm:$0xff] %v6109_v44  ;;  %v1062_v55 = vld [vmem:[%s6885_s2 + $0x7d8] sm:$0xff] }
 0x21b   :  { %7166 = vst [vmem:[#allocation92_spill] sm:$0xff] %v6111_v5 }
 0x21e   :  { %3867 = vmatpush1.bf16.xpose.msra.mxu0 %v6029_v40 }
 0x21f   :  { %3869 = vmatprep.subr.bf16.mxu0 %v6031_v54 }
 0x220   :  { %4123 = vmatpush1.bf16.xpose.msra.mxu1 %v6029_v40 }
 0x221   :  { %4125 = vmatprep.subr.bf16.mxu1 %v6031_v54  ;;  %v823_v54 = vld [vmem:[%s6885_s2 + $0x60] sm:$0xff] }
 0x226   :  { %3871 = vmatpush1.bf16.xpose.msra.mxu0 %v6049_v17 }
 0x227   :  { %3873 = vmatprep.subr.bf16.mxu0 %v6051_v59 }
 0x228   :  { %4127 = vmatpush1.bf16.xpose.msra.mxu1 %v6049_v17 }
 0x229   :  { %4129 = vmatprep.subr.bf16.mxu1 %v6051_v59  ;;  %v792_v59 = vadd.f32 %v791_v2, %v5405_v41  ;;  %v824_v41 = vld [vmem:[%s6885_s2 + $0x68] sm:$0xff] }
 0x22e   :  { %3875 = vmatpush1.bf16.xpose.msra.mxu0 %v6069_v7 }
 0x22f   :  { %3877 = vmatprep.subr.bf16.mxu0 %v6071_v12 }
 0x230   :  { %4131 = vmatpush1.bf16.xpose.msra.mxu1 %v6069_v7  ;;  %v771_v7 = vadd.f32 %v770_v0, %v5342_v19 }
 0x231   :  { %4133 = vmatprep.subr.bf16.mxu1 %v6071_v12  ;;  %v6136_v12 = vpack.c.bf16 %v1062_v55, %v1046_v13 }
 0x232   :  { %v772_v19 = vrot.slane %v771_v7, 2 }
 0x234   :  { %v773_v2 = vadd.f32 %v772_v19, %v771_v7  ;;  %v856_v7 = vld [vmem:[%s6885_s2 + $0x168] sm:$0xff] }
 0x236   :  { %3879 = vmatpush1.bf16.xpose.msra.mxu0 %v6089_v23 }
 0x237   :  { %3881 = vmatprep.subr.bf16.mxu0 %v6091_v46 }
 0x238   :  { %4135 = vmatpush1.bf16.xpose.msra.mxu1 %v6089_v23  ;;  %v643_v23 = vadd.f32 %v642_v50, %v5326_v1  ;;  %v1061_v1 = vld [vmem:[%s6885_s2 + $0x7d0] sm:$0xff] }
 0x239   :  { %4137 = vmatprep.subr.bf16.mxu1 %v6091_v46  ;;  %v6133_v46 = vpack.c.bf16 %v1029_v18, %v1013_v53  ;;  %v1045_v53 = vld [vmem:[%s6885_s2 + $0x750] sm:$0xff]  ;;  %v793_v18 = vrot.slane %v792_v59, 2 }
 0x23a   :  { %v644_v17 = vrot.slane %v643_v23, 2 }
 0x23b   :  { %7167 = vst [vmem:[#allocation93_spill] sm:$0xff] %v6133_v46 }
 0x23c   :  { %v645_v13 = vadd.f32 %v644_v17, %v643_v23  ;;  %v774_v23 = vrot.slane %v773_v2, 1 }
 0x23e   :  { %3883 = vmatpush1.bf16.xpose.msra.mxu0 %v6109_v44  ;;  %v775_v19 = vadd.f32 %v774_v23, %v773_v2  ;;  %v887_v2 = vld [vmem:[%s6885_s2 + $0x260] sm:$0xff] }
 0x23f   :  { %3885 = vmatprep.subr.bf16.mxu0 %v6111_v5  ;;  %v919_v23 = vld [vmem:[%s6885_s2 + $0x360] sm:$0xff] }
 0x240   :  { %4139 = vmatpush1.bf16.xpose.msra.mxu1 %v6109_v44  ;;  %v664_v44 = vadd.f32 %v663_v8, %v5391_v20  ;;  %v840_v20 = vld [vmem:[%s6885_s2 + $0xe8] sm:$0xff]  ;;  %v6157_v8 = vpack.c.bf16 %v1061_v1, %v1045_v53  ;;  %v839_v53 = vld [vmem:[%s6885_s2 + $0xe0] sm:$0xff] }
 0x241   :  { %4141 = vmatprep.subr.bf16.mxu1 %v6111_v5  ;;  %v6159_v55 = vpack.c.bf16 %v840_v20, %v824_v41  ;;  %v646_v5 = vrot.slane %v645_v13, 1 }
 0x242   :  { %v665_v50 = vrot.slane %v664_v44, 2  ;;  %7168 = vst [vmem:[#allocation94_spill] sm:$0xff] %v6157_v8 }
 0x243   :  { %7169 = vst [vmem:[#allocation95_spill] sm:$0xff] %v6159_v55 }
 0x244   :  { %v666_v0 = vadd.f32 %v665_v50, %v664_v44  ;;  %v6177_v44 = vpack.c.bf16 %v839_v53, %v823_v54  ;;  %v647_v50 = vadd.f32 %v646_v5, %v645_v13  ;;  %v871_v54 = vld [vmem:[%s6885_s2 + $0x1e0] sm:$0xff]  ;;  %v888_v5 = vld [vmem:[%s6885_s2 + $0x268] sm:$0xff] }
 0x245   :  { %v903_v53 = vld [vmem:[%s6885_s2 + $0x2e0] sm:$0xff] }
 0x246   :  { %3887 = vmatpush1.bf16.xpose.msra.mxu0 %v6133_v46  ;;  %v667_v17 = vrot.slane %v666_v0, 1 }
 0x247   :  { %3889 = vmatprep.subr.bf16.mxu0 %v6136_v12 }
 0x248   :  { %4143 = vmatpush1.bf16.xpose.msra.mxu1 %v6133_v46  ;;  %v794_v46 = vadd.f32 %v793_v18, %v792_v59  ;;  %v872_v59 = vld [vmem:[%s6885_s2 + $0x1e8] sm:$0xff]  ;;  %v668_v20 = vadd.f32 %v667_v17, %v666_v0 }
 0x249   :  { %4145 = vmatprep.subr.bf16.mxu1 %v6136_v12  ;;  %v6179_v41 = vpack.c.bf16 %v872_v59, %v856_v7  ;;  %v936_v17 = vld [vmem:[%s6885_s2 + $0x3e8] sm:$0xff]  ;;  %v6217_v7 = vpack.c.bf16 %v903_v53, %v887_v2 }
 0x24a   :  { %v795_v1 = vrot.slane %v794_v46, 1  ;;  %v1000_v2 = vld [vmem:[%s6885_s2 + $0x5e8] sm:$0xff] }
 0x24b   :  { %7170 = vst [vmem:[#allocation96_spill] sm:$0xff] %v6179_v41  ;;  %7173 = vst [vmem:[#allocation99_spill] sm:$0xff] %v6217_v7 }
 0x24c   :  { %v796_v18 = vadd.f32 %v795_v1, %v794_v46  ;;  %v904_v46 = vld [vmem:[%s6885_s2 + $0x2e8] sm:$0xff]  ;;  %v935_v1 = vld [vmem:[%s6885_s2 + $0x3e0] sm:$0xff] }
 0x24d   :  { %v6199_v0 = vpack.c.bf16 %v904_v46, %v888_v5  ;;  %v967_v5 = vld [vmem:[%s6885_s2 + $0x4e0] sm:$0xff]  ;;  %v984_v46 = vld [vmem:[%s6885_s2 + $0x568] sm:$0xff] }
 0x24e   :  { %3891 = vmatpush1.bf16.xpose.msra.mxu0 %v6157_v8 }
 0x24f   :  { %3893 = vmatprep.subr.bf16.mxu0 %v6159_v55  ;;  %7172 = vst [vmem:[#allocation98_spill] sm:$0xff] %v6199_v0 }
 0x250   :  { %4147 = vmatpush1.bf16.xpose.msra.mxu1 %v6157_v8 }
 0x251   :  { %4149 = vmatprep.subr.bf16.mxu1 %v6159_v55  ;;  %v855_v55 = vld [vmem:[%s6885_s2 + $0x160] sm:$0xff] }
 0x252   :  { %v6197_v13 = vpack.c.bf16 %v871_v54, %v855_v55  ;;  %v920_v55 = vld [vmem:[%s6885_s2 + $0x368] sm:$0xff]  ;;  %v951_v54 = vld [vmem:[%s6885_s2 + $0x460] sm:$0xff] }
 0x253   :  { %v6219_v59 = vpack.c.bf16 %v936_v17, %v920_v55  ;;  %v6257_v53 = vpack.c.bf16 %v967_v5, %v951_v54  ;;  %v6259_v55 = vpack.c.bf16 %v1000_v2, %v984_v46  ;;  %v983_v17 = vld [vmem:[%s6885_s2 + $0x560] sm:$0xff]  ;;  %v656_v5 = vrot.slane %v5367_v31, 4 }
 0x254   :  { %7171 = vst [vmem:[#allocation97_spill] sm:$0xff] %v6197_v13  ;;  %v1015_v46 = vld [vmem:[%s6885_s2 + $0x660] sm:$0xff] }
 0x255   :  { %1482 = vmatmul.mubr.f32.vlgmr.msra.gmra.mrb[16].mxu0 %v647_v50  ;;  %7174 = vst [vmem:[#allocation100_spill] sm:$0xff] %v6219_v59  ;;  %v952_v50 = vld [vmem:[%s6885_s2 + $0x468] sm:$0xff]  ;;  %7177 = vst [vmem:[#allocation103_spill] sm:$0xff] %v6257_v53  ;;  %v1031_v2 = vld [vmem:[%s6885_s2 + $0x6e0] sm:$0xff] }
 0x256   :  { %3895 = vmatpush1.bf16.xpose.msra.mxu0 %v6177_v44  ;;  %1551 = vmatprep.mubr.f32.mxu0 %v668_v20  ;;  %v968_v20 = vld [vmem:[%s6885_s2 + $0x4e8] sm:$0xff]  ;;  %7178 = vst [vmem:[#allocation104_spill] sm:$0xff] %v6259_v55 }
 0x257   :  { %2042 = vmatmul.mubr.f32.vlgmr.msra.gmra.mrb[16].mxu1 %v775_v19  ;;  %3897 = vmatprep.subr.bf16.mxu0 %v6179_v41  ;;  %v6237_v19 = vpack.c.bf16 %v935_v1, %v919_v23  ;;  %v999_v23 = vld [vmem:[%s6885_s2 + $0x5e0] sm:$0xff]  ;;  %v1016_v1 = vld [vmem:[%s6885_s2 + $0x668] sm:$0xff] }
 0x258   :  { %4151 = vmatpush1.bf16.xpose.msra.mxu1 %v6177_v44  ;;  %2111 = vmatprep.mubr.f32.mxu1 %v796_v18  ;;  %v6239_v18 = vpack.c.bf16 %v968_v20, %v952_v50  ;;  %v1032_v50 = vld [vmem:[%s6885_s2 + $0x6e8] sm:$0xff]  ;;  %v6277_v20 = vpack.c.bf16 %v999_v23, %v983_v17 }
 0x259   :  { %4153 = vmatprep.subr.bf16.mxu1 %v6179_v41  ;;  %7175 = vst [vmem:[#allocation101_spill] sm:$0xff] %v6237_v19  ;;  %v6279_v54 = vpack.c.bf16 %v1032_v50, %v1016_v1  ;;  %v1048_v17 = vld [vmem:[%s6885_s2 + $0x768] sm:$0xff]  ;;  %v784_v1 = vrot.slane %v5380_v26, 4  ;;  %v805_v50 = vrot.slane %v5434_v42, 4 }
 0x25a   :  { %7176 = vst [vmem:[#allocation102_spill] sm:$0xff] %v6239_v18  ;;  %7179 = vst [vmem:[#allocation105_spill] sm:$0xff] %v6277_v20  ;;  %v1064_v23 = vld [vmem:[%s6885_s2 + $0x7e8] sm:$0xff] }
 0x25b   :  { %7180 = vst [vmem:[#allocation106_spill] sm:$0xff] %v6279_v54 }
 0x25e   :  { %3899 = vmatpush1.bf16.xpose.msra.mxu0 %v6197_v13 }
 0x25f   :  { %3901 = vmatprep.subr.bf16.mxu0 %v6199_v0 }
 0x260   :  { %4155 = vmatpush1.bf16.xpose.msra.mxu1 %v6197_v13  ;;  %v825_v13 = vld [vmem:[%s6885_s2 + $0x70] sm:$0xff] }
 0x261   :  { %4157 = vmatprep.subr.bf16.mxu1 %v6199_v0 }
 0x266   :  { %3903 = vmatpush1.bf16.xpose.msra.mxu0 %v6217_v7 }
 0x267   :  { %3905 = vmatprep.subr.bf16.mxu0 %v6219_v59 }
 0x268   :  { %4159 = vmatpush1.bf16.xpose.msra.mxu1 %v6217_v7  ;;  %v806_v7 = vadd.f32 %v805_v50, %v5434_v42 }
 0x269   :  { %4161 = vmatprep.subr.bf16.mxu1 %v6219_v59  ;;  %v785_v59 = vadd.f32 %v784_v1, %v5380_v26  ;;  %v842_v26 = vld [vmem:[%s6885_s2 + $0xf8] sm:$0xff] }
 0x26b   :  { %v786_v42 = vrot.slane %v785_v59, 2 }
 0x26d   :  { %v787_v50 = vadd.f32 %v786_v42, %v785_v59  ;;  %v858_v59 = vld [vmem:[%s6885_s2 + $0x178] sm:$0xff] }
 0x26e   :  { %3907 = vmatpush1.bf16.xpose.msra.mxu0 %v6237_v19 }
 0x26f   :  { %3909 = vmatprep.subr.bf16.mxu0 %v6239_v18 }
 0x270   :  { %4163 = vmatpush1.bf16.xpose.msra.mxu1 %v6237_v19  ;;  %v6304_v19 = vpack.c.bf16 %v1064_v23, %v1048_v17 }
 0x271   :  { %4165 = vmatprep.subr.bf16.mxu1 %v6239_v18  ;;  %v657_v18 = vadd.f32 %v656_v5, %v5367_v31  ;;  %v1063_v31 = vld [vmem:[%s6885_s2 + $0x7e0] sm:$0xff] }
 0x272   :  { %7182 = vst [vmem:[#allocation108_spill] sm:$0xff] %v6304_v19 }
 0x273   :  { %v658_v0 = vrot.slane %v657_v18, 2 }
 0x275   :  { %v659_v17 = vadd.f32 %v658_v0, %v657_v18  ;;  %v788_v18 = vrot.slane %v787_v50, 1 }
 0x276   :  { %3911 = vmatpush1.bf16.xpose.msra.mxu0 %v6257_v53 }
 0x277   :  { %3913 = vmatprep.subr.bf16.mxu0 %v6259_v55  ;;  %v789_v42 = vadd.f32 %v788_v18, %v787_v50  ;;  %v889_v50 = vld [vmem:[%s6885_s2 + $0x270] sm:$0xff] }
 0x278   :  { %4167 = vmatpush1.bf16.xpose.msra.mxu1 %v6257_v53  ;;  %v6301_v53 = vpack.c.bf16 %v1031_v2, %v1015_v46  ;;  %v1047_v46 = vld [vmem:[%s6885_s2 + $0x760] sm:$0xff]  ;;  %v807_v2 = vrot.slane %v806_v7, 2  ;;  %v921_v18 = vld [vmem:[%s6885_s2 + $0x370] sm:$0xff] }
 0x279   :  { %4169 = vmatprep.subr.bf16.mxu1 %v6259_v55  ;;  %v677_v55 = vrot.slane %v5414_v29, 4 }
 0x27a   :  { %7181 = vst [vmem:[#allocation107_spill] sm:$0xff] %v6301_v53 }
 0x27e   :  { %3915 = vmatpush1.bf16.xpose.msra.mxu0 %v6277_v20 }
 0x27f   :  { %3917 = vmatprep.subr.bf16.mxu0 %v6279_v54 }
 0x280   :  { %4171 = vmatpush1.bf16.xpose.msra.mxu1 %v6277_v20  ;;  %v678_v20 = vadd.f32 %v677_v55, %v5414_v29  ;;  %v826_v29 = vld [vmem:[%s6885_s2 + $0x78] sm:$0xff]  ;;  %v6325_v55 = vpack.c.bf16 %v1063_v31, %v1047_v46  ;;  %v841_v46 = vld [vmem:[%s6885_s2 + $0xf0] sm:$0xff] }
 0x281   :  { %4173 = vmatprep.subr.bf16.mxu1 %v6279_v54  ;;  %v6327_v23 = vpack.c.bf16 %v842_v26, %v826_v29  ;;  %v660_v54 = vrot.slane %v659_v17, 1 }
 0x282   :  { %v679_v5 = vrot.slane %v678_v20, 2  ;;  %7183 = vst [vmem:[#allocation109_spill] sm:$0xff] %v6325_v55 }
 0x283   :  { %7184 = vst [vmem:[#allocation110_spill] sm:$0xff] %v6327_v23 }
 0x284   :  { %v680_v1 = vadd.f32 %v679_v5, %v678_v20  ;;  %v6345_v20 = vpack.c.bf16 %v841_v46, %v825_v13  ;;  %v661_v5 = vadd.f32 %v660_v54, %v659_v17  ;;  %v873_v13 = vld [vmem:[%s6885_s2 + $0x1f0] sm:$0xff]  ;;  %v890_v54 = vld [vmem:[%s6885_s2 + $0x278] sm:$0xff] }
 0x285   :  { %v905_v46 = vld [vmem:[%s6885_s2 + $0x2f0] sm:$0xff] }
 0x286   :  { %3919 = vmatpush1.bf16.xpose.msra.mxu0 %v6301_v53  ;;  %v681_v0 = vrot.slane %v680_v1, 1  ;;  %7185 = vst [vmem:[#allocation111_spill] sm:$0xff] %v6345_v20 }
 0x287   :  { %3921 = vmatprep.subr.bf16.mxu0 %v6304_v19 }
 0x288   :  { %4175 = vmatpush1.bf16.xpose.msra.mxu1 %v6301_v53  ;;  %v808_v53 = vadd.f32 %v807_v2, %v806_v7  ;;  %v874_v7 = vld [vmem:[%s6885_s2 + $0x1f8] sm:$0xff]  ;;  %v682_v26 = vadd.f32 %v681_v0, %v680_v1 }
 0x289   :  { %4177 = vmatprep.subr.bf16.mxu1 %v6304_v19  ;;  %v6347_v29 = vpack.c.bf16 %v874_v7, %v858_v59  ;;  %v938_v0 = vld [vmem:[%s6885_s2 + $0x3f8] sm:$0xff]  ;;  %v6385_v59 = vpack.c.bf16 %v905_v46, %v889_v50 }
 0x28a   :  { %v809_v31 = vrot.slane %v808_v53, 1  ;;  %v1002_v50 = vld [vmem:[%s6885_s2 + $0x5f8] sm:$0xff] }
 0x28b   :  { %7186 = vst [vmem:[#allocation112_spill] sm:$0xff] %v6347_v29  ;;  %7189 = vst [vmem:[#allocation115_spill] sm:$0xff] %v6385_v59 }
 0x28c   :  { %v810_v2 = vadd.f32 %v809_v31, %v808_v53  ;;  %v906_v53 = vld [vmem:[%s6885_s2 + $0x2f8] sm:$0xff]  ;;  %v937_v31 = vld [vmem:[%s6885_s2 + $0x3f0] sm:$0xff] }
 0x28d   :  { %v6367_v1 = vpack.c.bf16 %v906_v53, %v890_v54  ;;  %v969_v54 = vld [vmem:[%s6885_s2 + $0x4f0] sm:$0xff]  ;;  %v986_v53 = vld [vmem:[%s6885_s2 + $0x578] sm:$0xff] }
 0x28e   :  { %3923 = vmatpush1.bf16.xpose.msra.mxu0 %v6325_v55 }
 0x28f   :  { %3925 = vmatprep.subr.bf16.mxu0 %v6327_v23  ;;  %7188 = vst [vmem:[#allocation114_spill] sm:$0xff] %v6367_v1 }
 0x290   :  { %4179 = vmatpush1.bf16.xpose.msra.mxu1 %v6325_v55  ;;  %v857_v55 = vld [vmem:[%s6885_s2 + $0x170] sm:$0xff] }
 0x291   :  { %4181 = vmatprep.subr.bf16.mxu1 %v6327_v23  ;;  %v6365_v17 = vpack.c.bf16 %v873_v13, %v857_v55  ;;  %v922_v55 = vld [vmem:[%s6885_s2 + $0x378] sm:$0xff]  ;;  %v953_v13 = vld [vmem:[%s6885_s2 + $0x470] sm:$0xff] }
 0x292   :  { %v6387_v7 = vpack.c.bf16 %v938_v0, %v922_v55  ;;  %v6425_v46 = vpack.c.bf16 %v969_v54, %v953_v13  ;;  %v6427_v55 = vpack.c.bf16 %v1002_v50, %v986_v53  ;;  %v985_v0 = vld [vmem:[%s6885_s2 + $0x570] sm:$0xff]  ;;  %v670_v54 = vrot.slane %v5398_v38, 4 }
 0x293   :  { %7187 = vst [vmem:[#allocation113_spill] sm:$0xff] %v6365_v17  ;;  %v1017_v53 = vld [vmem:[%s6885_s2 + $0x670] sm:$0xff] }
 0x294   :  { %7190 = vst [vmem:[#allocation116_spill] sm:$0xff] %v6387_v7  ;;  %7193 = vst [vmem:[#allocation119_spill] sm:$0xff] %v6425_v46  ;;  %v1033_v50 = vld [vmem:[%s6885_s2 + $0x6f0] sm:$0xff]  ;;  %v671_v19 = vadd.f32 %v670_v54, %v5398_v38 }
 0x295   :  { %1552 = vmatmul.mubr.f32.vlgmr.msra.gmra.mrb[16].mxu0 %v661_v5  ;;  %v954_v5 = vld [vmem:[%s6885_s2 + $0x478] sm:$0xff]  ;;  %7194 = vst [vmem:[#allocation120_spill] sm:$0xff] %v6427_v55 }
 0x296   :  { %3927 = vmatpush1.bf16.xpose.msra.mxu0 %v6345_v20  ;;  %1621 = vmatprep.mubr.f32.mxu0 %v682_v26  ;;  %v970_v26 = vld [vmem:[%s6885_s2 + $0x4f8] sm:$0xff] }
 0x297   :  { %2112 = vmatmul.mubr.f32.vlgmr.msra.gmra.mrb[16].mxu1 %v789_v42  ;;  %3929 = vmatprep.subr.bf16.mxu0 %v6347_v29  ;;  %v6405_v42 = vpack.c.bf16 %v937_v31, %v921_v18  ;;  %v1001_v18 = vld [vmem:[%s6885_s2 + $0x5f0] sm:$0xff]  ;;  %v1018_v31 = vld [vmem:[%s6885_s2 + $0x678] sm:$0xff] }
 0x298   :  { %4183 = vmatpush1.bf16.xpose.msra.mxu1 %v6345_v20  ;;  %2181 = vmatprep.mubr.f32.mxu1 %v810_v2  ;;  %v6407_v2 = vpack.c.bf16 %v970_v26, %v954_v5  ;;  %v1034_v5 = vld [vmem:[%s6885_s2 + $0x6f8] sm:$0xff]  ;;  %v6445_v26 = vpack.c.bf16 %v1001_v18, %v985_v0 }
 0x299   :  { %4185 = vmatprep.subr.bf16.mxu1 %v6347_v29  ;;  %7191 = vst [vmem:[#allocation117_spill] sm:$0xff] %v6405_v42  ;;  %v6447_v13 = vpack.c.bf16 %v1034_v5, %v1018_v31  ;;  %v1050_v0 = vld [vmem:[%s6885_s2 + $0x778] sm:$0xff]  ;;  %v798_v31 = vrot.slane %v5410_v30, 4  ;;  %v6467_v5 = vpack.c.bf16 %v1033_v50, %v1017_v53  ;;  %v1065_v53 = vld [vmem:[%s6885_s2 + $0x7f0] sm:$0xff] }
 0x29a   :  { %7192 = vst [vmem:[#allocation118_spill] sm:$0xff] %v6407_v2  ;;  %7195 = vst [vmem:[#allocation121_spill] sm:$0xff] %v6445_v26  ;;  %v1066_v18 = vld [vmem:[%s6885_s2 + $0x7f8] sm:$0xff] }
 0x29b   :  { %7196 = vst [vmem:[#allocation122_spill] sm:$0xff] %v6467_v5 }
 0x29e   :  { %3931 = vmatpush1.bf16.xpose.msra.mxu0 %v6365_v17 }
 0x29f   :  { %3933 = vmatprep.subr.bf16.mxu0 %v6367_v1 }
 0x2a0   :  { %4187 = vmatpush1.bf16.xpose.msra.mxu1 %v6365_v17 }
 0x2a1   :  { %4189 = vmatprep.subr.bf16.mxu1 %v6367_v1 }
 0x2a6   :  { %3935 = vmatpush1.bf16.xpose.msra.mxu0 %v6385_v59 }
 0x2a7   :  { %3937 = vmatprep.subr.bf16.mxu0 %v6387_v7 }
 0x2a8   :  { %4191 = vmatpush1.bf16.xpose.msra.mxu1 %v6385_v59 }
 0x2a9   :  { %4193 = vmatprep.subr.bf16.mxu1 %v6387_v7 }
 0x2ae   :  { %3939 = vmatpush1.bf16.xpose.msra.mxu0 %v6405_v42 }
 0x2af   :  { %3941 = vmatprep.subr.bf16.mxu0 %v6407_v2 }
 0x2b0   :  { %4195 = vmatpush1.bf16.xpose.msra.mxu1 %v6405_v42 }
 0x2b1   :  { %4197 = vmatprep.subr.bf16.mxu1 %v6407_v2  ;;  %v1049_v2 = vld [vmem:[%s6885_s2 + $0x770] sm:$0xff] }
 0x2b2   :  { %v6483_v54 = vpack.c.bf16 %v1065_v53, %v1049_v2  ;;  %v7198_v2 = vld [vmem:[#allocation30_spill] sm:$0xff]  ;;  %v7202_v53 = vld [vmem:[#allocation32_spill] sm:$0xff] }
 0x2b6   :  { %3943 = vmatpush1.bf16.xpose.msra.mxu0 %v6425_v46 }
 0x2b7   :  { %3945 = vmatprep.subr.bf16.mxu0 %v6427_v55 }
 0x2b8   :  { %4199 = vmatpush1.bf16.xpose.msra.mxu1 %v6425_v46  ;;  %v672_v46 = vrot.slane %v671_v19, 2 }
 0x2b9   :  { %4201 = vmatprep.subr.bf16.mxu1 %v6427_v55  ;;  %v6470_v55 = vpack.c.bf16 %v1066_v18, %v1050_v0 }
 0x2be   :  { %3947 = vmatpush1.bf16.xpose.msra.mxu0 %v6445_v26 }
 0x2bf   :  { %3949 = vmatprep.subr.bf16.mxu0 %v6447_v13 }
 0x2c0   :  { %4203 = vmatpush1.bf16.xpose.msra.mxu1 %v6445_v26  ;;  %v799_v26 = vadd.f32 %v798_v31, %v5410_v30  ;;  %v673_v30 = vadd.f32 %v672_v46, %v671_v19  ;;  %v7197_v19 = vld [vmem:[#allocation29_spill] sm:$0xff]  ;;  %v7199_v46 = vld [vmem:[#allocation8_spill] sm:$0xff] }
 0x2c1   :  { %4205 = vmatprep.subr.bf16.mxu1 %v6447_v13 }
 0x2c2   :  { %v800_v38 = vrot.slane %v799_v26, 2  ;;  %v674_v0 = vrot.slane %v673_v30, 1 }
 0x2c4   :  { %v801_v50 = vadd.f32 %v800_v38, %v799_v26  ;;  %v675_v31 = vadd.f32 %v674_v0, %v673_v30  ;;  %v7200_v26 = vld [vmem:[#allocation9_spill] sm:$0xff]  ;;  %v7203_v38 = vld [vmem:[#allocation10_spill] sm:$0xff]  ;;  %v7204_v30 = vld [vmem:[#allocation11_spill] sm:$0xff] }
 0x2c5   :  { %v7206_v0 = vld [vmem:[#allocation12_spill] sm:$0xff] }
 0x2c6   :  { %3951 = vmatpush1.bf16.xpose.msra.mxu0 %v6467_v5  ;;  %v802_v18 = vrot.slane %v801_v50, 1 }
 0x2c7   :  { %3953 = vmatprep.subr.bf16.mxu0 %v6470_v55 }
 0x2c8   :  { %4207 = vmatpush1.bf16.xpose.msra.mxu1 %v6467_v5  ;;  %v803_v5 = vadd.f32 %v802_v18, %v801_v50  ;;  %v7205_v50 = vld [vmem:[#allocation33_spill] sm:$0xff]  ;;  %v7061_v18 = vmov 0.0  }
 0x2c9   :  { %4209 = vmatprep.subr.bf16.mxu1 %v6470_v55 }
 0x2ce   :  { %3955 = vmatpush1.bf16.xpose.msra.mxu0 %v6483_v54 }
 0x2cf   :  { %4213 = vmatprep.subr.bf16.mxu0 %v4992_v4 }
 0x2d0   :  { %4211 = vmatpush1.bf16.xpose.msra.mxu1 %v6483_v54 }
 0x2d1   :  { %4245 = vmatprep.subr.bf16.mxu1 %v5157_v52 }
 0x2d5   :  { %1622 = vmatmul.mubr.f32.vlgmr.msra.gmra.mrb[16].mxu0 %v675_v31 }
 0x2d6   :  { %4215 = vmatpush1.bf16.msra.mxu0 %v5013_v9  ;;  %2264 = vmatprep.mubr.f32.mxu0 %v7061_v18 }
 0x2d7   :  { %2182 = vmatmul.mubr.f32.vlgmr.msra.gmra.mrb[16].mxu1 %v803_v5  ;;  %4217 = vmatprep.subr.bf16.mxu0 %v5015_v10  ;;  %v7201_v5 = vld [vmem:[#allocation31_spill] sm:$0xff] }
 0x2d8   :  { %4247 = vmatpush1.bf16.msra.mxu1 %v5213_v60  ;;  %2335 = vmatprep.mubr.f32.mxu1 %v7061_v18 }
 0x2d9   :  { %4249 = vmatprep.subr.bf16.mxu1 %v5215_v11 }
 0x2da   :  { %4219 = vmatpush1.bf16.msra.mxu0 %v5033_v15 }
 0x2db   :  { %4221 = vmatprep.subr.bf16.mxu0 %v5035_v16 }
 0x2dc   :  { %4251 = vmatpush1.bf16.msra.mxu1 %v5269_v62 }
 0x2dd   :  { %4253 = vmatprep.subr.bf16.mxu1 %v5271_v3 }
 0x2de   :  { %4223 = vmatpush1.bf16.msra.mxu0 %v5053_v21 }
 0x2df   :  { %4225 = vmatprep.subr.bf16.mxu0 %v5055_v22 }
 0x2e0   :  { %4255 = vmatpush1.bf16.msra.mxu1 %v5311_v35 }
 0x2e1   :  { %4257 = vmatprep.subr.bf16.mxu1 %v5313_v45 }
 0x2e2   :  { %4227 = vmatpush1.bf16.msra.mxu0 %v5073_v27 }
 0x2e3   :  { %4229 = vmatprep.subr.bf16.mxu0 %v5075_v28 }
 0x2e4   :  { %4259 = vmatpush1.bf16.msra.mxu1 %v5358_v58 }
 0x2e5   :  { %4261 = vmatprep.subr.bf16.mxu1 %v5360_v63 }
 0x2e6   :  { %4231 = vmatpush1.bf16.msra.mxu0 %v5093_v33 }
 0x2e7   :  { %4233 = vmatprep.subr.bf16.mxu0 %v5095_v34 }
 0x2e8   :  { %4263 = vmatpush1.bf16.msra.mxu1 %v7197_v19 }
 0x2e9   :  { %4265 = vmatprep.subr.bf16.mxu1 %v7198_v2 }
 0x2ea   :  { %4235 = vmatpush1.bf16.msra.mxu0 %v7199_v46 }
 0x2eb   :  { %4237 = vmatprep.subr.bf16.mxu0 %v7200_v26 }
 0x2ec   :  { %4267 = vmatpush1.bf16.msra.mxu1 %v7201_v5 }
 0x2ed   :  { %4269 = vmatprep.subr.bf16.mxu1 %v7202_v53 }
 0x2ee   :  { %4239 = vmatpush1.bf16.msra.mxu0 %v7203_v38 }
 0x2ef   :  { %4241 = vmatprep.subr.bf16.mxu0 %v7204_v30 }
 0x2f0   :  { %4271 = vmatpush1.bf16.msra.mxu1 %v7205_v50 }
 0x2f1   :  { %4273 = vmatprep.subr.bf16.mxu1 %v5465_v43 }
 0x2f2   :  { %4243 = vmatpush1.bf16.msra.mxu0 %v7206_v0 }
 0x2f3   :  { %4277 = vmatprep.subr.bf16.mxu0 %v5487_v25 }
 0x2f4   :  { %4275 = vmatpush1.bf16.msra.mxu1 %v5485_v24 }
 0x2f5   :  { %4309 = vmatprep.subr.bf16.mxu1 %v5655_v49  ;;  %v2193_v49 = vld [vmem:[#allocation2] sm:$0x1] }
 0x3a8   :  { %v1623_v31 = vpop.f32.mrb[16].mxu0 }
 0x3a9   :  { %v6523_v38 = vmul.f32 0.03125, %v1623_v31  ;;  %v1625_v30 = vpop.f32.mrb[17].mxu0  ;;  %v7217_v31 = vld [vmem:[#allocation56_spill] sm:$0xff] }
 0x3aa   :  { %v2183_v50 = vpop.f32.mrb[16].mxu1  ;;  %v7207_v30 = vld [vmem:[#allocation37_spill] sm:$0xff] }
 0x3ab   :  { %v2190_v43 = vmul.f32 %v6523_v38, %v6523_v38  ;;  %v2189_v0 = vmul.f32 0.03125, %v2183_v50  ;;  %v2185_v53 = vpop.f32.mrb[17].mxu1  ;;  %v7215_v50 = vld [vmem:[#allocation55_spill] sm:$0xff] }
 0x3ac   :  { %v7214_v53 = vld [vmem:[#allocation42_spill] sm:$0xff] }
 0x3ad   :  { %v2191_v25 = vsub.f32 %v2189_v0, %v2190_v43  ;;  %v7208_v43 = vld [vmem:[#allocation38_spill] sm:$0xff]  ;;  %v7216_v0 = vld [vmem:[#allocation43_spill] sm:$0xff] }
 0x3af   :  { %v2192_v26 = vmax.f32 %v2191_v25, 0.0  ;;  %v7210_v25 = vld [vmem:[#allocation40_spill] sm:$0xff] }
 0x3b1   :  { %v2194_v24 = vadd.f32 1e-05, %v2192_v26  ;;  %v7212_v26 = vld [vmem:[#allocation41_spill] sm:$0xff] }
 0x3b3   :  { %4757 = vrsqrt.f32 %v2194_v24  ;;  %v7209_v24 = vld [vmem:[#allocation39_spill] sm:$0xff] }
 0x3bd   :  { %v4758_v5 = vpop.eup %4757 }
 0x3be   :  { %v6527_v46 = vmul.f32 %v4758_v5, %v2193_v49  ;;  %v7211_v49 = vld [vmem:[#allocation53_spill] sm:$0xff]  ;;  %v7213_v5 = vld [vmem:[#allocation54_spill] sm:$0xff] }
 0x3c0   :  { %2265 = vmatmul.mubr.f32.vlgmr.msra.gmra.mrb[18].mxu0 %v6527_v46  ;;  %2336 = vmatmul.mubr.f32.vlgmr.msra.gmra.mrb[18].mxu1 %v6527_v46 }
 0x3c1   :  { %4279 = vmatpush1.bf16.msra.mxu0 %v5505_v48  ;;  %4311 = vmatpush1.bf16.msra.mxu1 %v5673_v37 }
 0x3c2   :  { %4281 = vmatprep.subr.bf16.mxu0 %v7207_v30  ;;  %4313 = vmatprep.subr.bf16.mxu1 %v5675_v36 }
 0x3c3   :  { %2406 = vmatprep.mubr.f32.mxu0 %v7061_v18  ;;  %2477 = vmatprep.mubr.f32.mxu1 %v7061_v18  ;;  %v7218_v18 = vld [vmem:[#allocation44_spill] sm:$0xff] }
 0x3c5   :  { %4283 = vmatpush1.bf16.msra.mxu0 %v7208_v43  ;;  %4315 = vmatpush1.bf16.msra.mxu1 %v5693_v14 }
 0x3c6   :  { %4285 = vmatprep.subr.bf16.mxu0 %v7209_v24  ;;  %4317 = vmatprep.subr.bf16.mxu1 %v5695_v39  ;;  %v7219_v24 = vld [vmem:[#allocation57_spill] sm:$0xff] }
 0x3c7   :  { %v7220_v39 = vld [vmem:[#allocation45_spill] sm:$0xff] }
 0x3c9   :  { %4287 = vmatpush1.bf16.msra.mxu0 %v7210_v25  ;;  %4319 = vmatpush1.bf16.msra.mxu1 %v7211_v49  ;;  %v7221_v25 = vld [vmem:[#allocation58_spill] sm:$0xff] }
 0x3ca   :  { %4289 = vmatprep.subr.bf16.mxu0 %v7212_v26  ;;  %4321 = vmatprep.subr.bf16.mxu1 %v7213_v5  ;;  %v7222_v49 = vld [vmem:[#allocation46_spill] sm:$0xff]  ;;  %v7223_v26 = vld [vmem:[#allocation59_spill] sm:$0xff] }
 0x3cb   :  { %v7224_v5 = vld [vmem:[#allocation47_spill] sm:$0xff] }
 0x3cd   :  { %4291 = vmatpush1.bf16.msra.mxu0 %v7214_v53  ;;  %4323 = vmatpush1.bf16.msra.mxu1 %v7215_v50  ;;  %v7225_v53 = vld [vmem:[#allocation60_spill] sm:$0xff] }
 0x3ce   :  { %4293 = vmatprep.subr.bf16.mxu0 %v7216_v0  ;;  %4325 = vmatprep.subr.bf16.mxu1 %v7217_v31  ;;  %v7226_v50 = vld [vmem:[#allocation48_spill] sm:$0xff]  ;;  %v7227_v0 = vld [vmem:[#allocation61_spill] sm:$0xff] }
 0x3cf   :  { %v7228_v31 = vld [vmem:[#allocation49_spill] sm:$0xff] }
 0x3d1   :  { %4295 = vmatpush1.bf16.msra.mxu0 %v7218_v18  ;;  %4327 = vmatpush1.bf16.msra.mxu1 %v7219_v24  ;;  %v7229_v24 = vld [vmem:[#allocation50_spill] sm:$0xff] }
 0x3d2   :  { %4297 = vmatprep.subr.bf16.mxu0 %v7220_v39  ;;  %4329 = vmatprep.subr.bf16.mxu1 %v7221_v25  ;;  %v7230_v25 = vld [vmem:[#allocation64_spill] sm:$0xff] }
 0x3d5   :  { %4299 = vmatpush1.bf16.msra.mxu0 %v7222_v49  ;;  %4331 = vmatpush1.bf16.msra.mxu1 %v7223_v26 }
 0x3d6   :  { %4301 = vmatprep.subr.bf16.mxu0 %v7224_v5  ;;  %4333 = vmatprep.subr.bf16.mxu1 %v7225_v53 }
 0x3d9   :  { %4303 = vmatpush1.bf16.msra.mxu0 %v7226_v50  ;;  %4335 = vmatpush1.bf16.msra.mxu1 %v7227_v0  ;;  %v7241_v0 = vld [vmem:[#allocation72_spill] sm:$0xff] }
 0x3da   :  { %4305 = vmatprep.subr.bf16.mxu0 %v7228_v31  ;;  %4337 = vmatprep.subr.bf16.mxu1 %v5800_v56  ;;  %v7231_v56 = vmov 0.0   ;;  %v7240_v31 = vld [vmem:[#allocation87_spill] sm:$0xff] }
 0x3dd   :  { %4307 = vmatpush1.bf16.msra.mxu0 %v7229_v24  ;;  %4339 = vmatpush1.bf16.msra.mxu1 %v5821_v32  ;;  %v7232_v32 = vld [vmem:[#allocation67_spill] sm:$0xff]  ;;  %v7235_v24 = vld [vmem:[#allocation69_spill] sm:$0xff] }
 0x3de   :  { %4341 = vmatprep.subr.bf16.mxu0 %v7230_v25  ;;  %4373 = vmatprep.subr.bf16.mxu1 %v5991_v61  ;;  %v7233_v61 = vld [vmem:[#allocation68_spill] sm:$0xff] }
 0x3df   :  { %v7234_v25 = vld [vmem:[#allocation84_spill] sm:$0xff] }
 0x3e0   :  { %2407 = vmatmul.mubr.f32.vlgmr.msra.gmra.mrb[20].mxu0 %v6527_v46  ;;  %2478 = vmatmul.mubr.f32.vlgmr.msra.gmra.mrb[20].mxu1 %v6527_v46 }
 0x3e1   :  { %4343 = vmatpush1.bf16.msra.mxu0 %v5841_v57  ;;  %4375 = vmatpush1.bf16.msra.mxu1 %v6009_v51  ;;  %v7236_v57 = vld [vmem:[#allocation85_spill] sm:$0xff]  ;;  %v7237_v51 = vld [vmem:[#allocation70_spill] sm:$0xff] }
 0x3e2   :  { %4345 = vmatprep.subr.bf16.mxu0 %v5843_v6  ;;  %4377 = vmatprep.subr.bf16.mxu1 %v6011_v47  ;;  %v7238_v6 = vld [vmem:[#allocation86_spill] sm:$0xff]  ;;  %v7239_v47 = vld [vmem:[#allocation71_spill] sm:$0xff] }
 0x3e3   :  { %2548 = vmatprep.mubr.f32.mxu0 %v7231_v56  ;;  %2619 = vmatprep.mubr.f32.mxu1 %v7231_v56 }
 0x3e5   :  { %4347 = vmatpush1.bf16.msra.mxu0 %v7232_v32  ;;  %4379 = vmatpush1.bf16.msra.mxu1 %v6029_v40  ;;  %v7242_v32 = vld [vmem:[#allocation88_spill] sm:$0xff]  ;;  %v7243_v40 = vld [vmem:[#allocation73_spill] sm:$0xff] }
 0x3e6   :  { %4349 = vmatprep.subr.bf16.mxu0 %v7233_v61  ;;  %4381 = vmatprep.subr.bf16.mxu1 %v7234_v25  ;;  %v7244_v61 = vld [vmem:[#allocation89_spill] sm:$0xff]  ;;  %v7245_v25 = vld [vmem:[#allocation74_spill] sm:$0xff] }
 0x3e9   :  { %4351 = vmatpush1.bf16.msra.mxu0 %v7235_v24  ;;  %4383 = vmatpush1.bf16.msra.mxu1 %v7236_v57  ;;  %v7246_v24 = vld [vmem:[#allocation90_spill] sm:$0xff]  ;;  %v7247_v57 = vld [vmem:[#allocation75_spill] sm:$0xff] }
 0x3ea   :  { %4353 = vmatprep.subr.bf16.mxu0 %v7237_v51  ;;  %4385 = vmatprep.subr.bf16.mxu1 %v7238_v6  ;;  %v7248_v51 = vld [vmem:[#allocation91_spill] sm:$0xff]  ;;  %v7249_v6 = vld [vmem:[#allocation76_spill] sm:$0xff] }
 0x3ed   :  { %4355 = vmatpush1.bf16.msra.mxu0 %v7239_v47  ;;  %4387 = vmatpush1.bf16.msra.mxu1 %v7240_v31  ;;  %v7250_v47 = vld [vmem:[#allocation92_spill] sm:$0xff]  ;;  %v7251_v31 = vld [vmem:[#allocation77_spill] sm:$0xff] }
 0x3ee   :  { %4357 = vmatprep.subr.bf16.mxu0 %v7241_v0  ;;  %4389 = vmatprep.subr.bf16.mxu1 %v7242_v32  ;;  %v7252_v0 = vld [vmem:[#allocation93_spill] sm:$0xff]  ;;  %v7253_v32 = vld [vmem:[#allocation78_spill] sm:$0xff] }
 0x3f1   :  { %4359 = vmatpush1.bf16.msra.mxu0 %v7243_v40  ;;  %4391 = vmatpush1.bf16.msra.mxu1 %v7244_v61  ;;  %v7254_v61 = vld [vmem:[#allocation79_spill] sm:$0xff] }
 0x3f2   :  { %4361 = vmatprep.subr.bf16.mxu0 %v7245_v25  ;;  %4393 = vmatprep.subr.bf16.mxu1 %v7246_v24  ;;  %v7255_v24 = vld [vmem:[#allocation95_spill] sm:$0xff] }
 0x3f5   :  { %4363 = vmatpush1.bf16.msra.mxu0 %v7247_v57  ;;  %4395 = vmatpush1.bf16.msra.mxu1 %v7248_v51 }
 0x3f6   :  { %4365 = vmatprep.subr.bf16.mxu0 %v7249_v6  ;;  %4397 = vmatprep.subr.bf16.mxu1 %v7250_v47 }
 0x3f9   :  { %4367 = vmatpush1.bf16.msra.mxu0 %v7251_v31  ;;  %4399 = vmatpush1.bf16.msra.mxu1 %v7252_v0 }
 0x3fa   :  { %4369 = vmatprep.subr.bf16.mxu0 %v7253_v32  ;;  %4401 = vmatprep.subr.bf16.mxu1 %v6136_v12 }
 0x3fd   :  { %4371 = vmatpush1.bf16.msra.mxu0 %v7254_v61  ;;  %4403 = vmatpush1.bf16.msra.mxu1 %v6157_v8  ;;  %v7256_v8 = vld [vmem:[#allocation97_spill] sm:$0xff] }
 0x3fe   :  { %4405 = vmatprep.subr.bf16.mxu0 %v7255_v24  ;;  %4437 = vmatprep.subr.bf16.mxu1 %v6327_v23  ;;  %v7257_v23 = vld [vmem:[#allocation98_spill] sm:$0xff]  ;;  %v7258_v24 = vld [vmem:[#allocation99_spill] sm:$0xff] }
 0x400   :  { %2549 = vmatmul.mubr.f32.vlgmr.msra.gmra.mrb[22].mxu0 %v6527_v46  ;;  %2620 = vmatmul.mubr.f32.vlgmr.msra.gmra.mrb[22].mxu1 %v6527_v46 }
 0x401   :  { %4407 = vmatpush1.bf16.msra.mxu0 %v6177_v44  ;;  %4439 = vmatpush1.bf16.msra.mxu1 %v6345_v20  ;;  %v7259_v20 = vld [vmem:[#allocation100_spill] sm:$0xff] }
 0x402   :  { %4409 = vmatprep.subr.bf16.mxu0 %v6179_v41  ;;  %4441 = vmatprep.subr.bf16.mxu1 %v6347_v29  ;;  %v7260_v29 = vld [vmem:[#allocation101_spill] sm:$0xff]  ;;  %v7261_v41 = vld [vmem:[#allocation102_spill] sm:$0xff] }
 0x403   :  { %2690 = vmatprep.mubr.f32.mxu0 %v7231_v56  ;;  %2761 = vmatprep.mubr.f32.mxu1 %v7231_v56 }
 0x405   :  { %4411 = vmatpush1.bf16.msra.mxu0 %v7256_v8  ;;  %4443 = vmatpush1.bf16.msra.mxu1 %v6365_v17  ;;  %v7262_v8 = vld [vmem:[#allocation118_spill] sm:$0xff]  ;;  %v7263_v17 = vld [vmem:[#allocation103_spill] sm:$0xff] }
 0x406   :  { %4413 = vmatprep.subr.bf16.mxu0 %v7257_v23  ;;  %4445 = vmatprep.subr.bf16.mxu1 %v6367_v1  ;;  %v7264_v23 = vld [vmem:[#allocation119_spill] sm:$0xff]  ;;  %v7265_v1 = vld [vmem:[#allocation104_spill] sm:$0xff] }
 0x409   :  { %4415 = vmatpush1.bf16.msra.mxu0 %v7258_v24  ;;  %4447 = vmatpush1.bf16.msra.mxu1 %v6385_v59  ;;  %v7266_v24 = vld [vmem:[#allocation120_spill] sm:$0xff]  ;;  %v7267_v59 = vld [vmem:[#allocation105_spill] sm:$0xff] }
 0x40a   :  { %4417 = vmatprep.subr.bf16.mxu0 %v7259_v20  ;;  %4449 = vmatprep.subr.bf16.mxu1 %v6387_v7  ;;  %v7268_v20 = vld [vmem:[#allocation121_spill] sm:$0xff]  ;;  %v7269_v7 = vld [vmem:[#allocation106_spill] sm:$0xff] }
 0x40d   :  { %4419 = vmatpush1.bf16.msra.mxu0 %v7260_v29  ;;  %4451 = vmatpush1.bf16.msra.mxu1 %v6405_v42  ;;  %v7270_v42 = vld [vmem:[#allocation107_spill] sm:$0xff] }
 0x40e   :  { %4421 = vmatprep.subr.bf16.mxu0 %v7261_v41  ;;  %4453 = vmatprep.subr.bf16.mxu1 %v7262_v8  ;;  %v7271_v41 = vld [vmem:[#allocation122_spill] sm:$0xff]  ;;  %v7272_v8 = vld [vmem:[#allocation108_spill] sm:$0xff] }
 0x411   :  { %4423 = vmatpush1.bf16.msra.mxu0 %v7263_v17  ;;  %4455 = vmatpush1.bf16.msra.mxu1 %v7264_v23  ;;  %v7273_v23 = vld [vmem:[#allocation109_spill] sm:$0xff] }
 0x412   :  { %4425 = vmatprep.subr.bf16.mxu0 %v7265_v1  ;;  %4457 = vmatprep.subr.bf16.mxu1 %v7266_v24 }
 0x415   :  { %4427 = vmatpush1.bf16.msra.mxu0 %v7267_v59  ;;  %4459 = vmatpush1.bf16.msra.mxu1 %v7268_v20 }
 0x416   :  { %4429 = vmatprep.subr.bf16.mxu0 %v7269_v7  ;;  %4461 = vmatprep.subr.bf16.mxu1 %v6447_v13 }
 0x419   :  { %4431 = vmatpush1.bf16.msra.mxu0 %v7270_v42  ;;  %4463 = vmatpush1.bf16.msra.mxu1 %v7271_v41 }
 0x41a   :  { %4433 = vmatprep.subr.bf16.mxu0 %v7272_v8  ;;  %4465 = vmatprep.subr.bf16.mxu1 %v6470_v55 }
 0x41d   :  { %4435 = vmatpush1.bf16.msra.mxu0 %v7273_v23  ;;  %4467 = vmatpush1.bf16.msra.mxu1 %v6483_v54 }
 0x41e   :  { %4469 = vmatprep.subr.bf16.mxu0 %v4992_v4  ;;  %4501 = vmatprep.subr.bf16.mxu1 %v5157_v52  ;;  %v7274_v4 = vld [vmem:[#allocation8_spill] sm:$0xff]  ;;  %v7283_v52 = vld [vmem:[#allocation35_spill] sm:$0xff] }
 0x420   :  { %2691 = vmatmul.mubr.f32.vlgmr.msra.gmra.mrb[24].mxu0 %v6527_v46  ;;  %2762 = vmatmul.mubr.f32.vlgmr.msra.gmra.mrb[24].mxu1 %v6527_v46 }
 0x421   :  { %4471 = vmatpush1.bf16.msra.mxu0 %v5013_v9  ;;  %4503 = vmatpush1.bf16.msra.mxu1 %v5213_v60  ;;  %v7275_v9 = vld [vmem:[#allocation31_spill] sm:$0xff] }
 0x422   :  { %4473 = vmatprep.subr.bf16.mxu0 %v5015_v10  ;;  %4505 = vmatprep.subr.bf16.mxu1 %v5215_v11  ;;  %v7276_v10 = vld [vmem:[#allocation9_spill] sm:$0xff]  ;;  %v7284_v11 = vld [vmem:[#allocation36_spill] sm:$0xff] }
 0x423   :  { %2832 = vmatprep.mubr.f32.mxu0 %v7231_v56  ;;  %2903 = vmatprep.mubr.f32.mxu1 %v7231_v56 }
 0x425   :  { %4475 = vmatpush1.bf16.msra.mxu0 %v5033_v15  ;;  %4507 = vmatpush1.bf16.msra.mxu1 %v5269_v62  ;;  %v7277_v15 = vld [vmem:[#allocation32_spill] sm:$0xff]  ;;  %v7285_v62 = vld [vmem:[#allocation51_spill] sm:$0xff] }
 0x426   :  { %4477 = vmatprep.subr.bf16.mxu0 %v5035_v16  ;;  %4509 = vmatprep.subr.bf16.mxu1 %v5271_v3  ;;  %v7278_v16 = vld [vmem:[#allocation10_spill] sm:$0xff]  ;;  %v7286_v3 = vld [vmem:[#allocation39_spill] sm:$0xff] }
 0x429   :  { %4479 = vmatpush1.bf16.msra.mxu0 %v5053_v21  ;;  %4511 = vmatpush1.bf16.msra.mxu1 %v5311_v35  ;;  %v7279_v21 = vld [vmem:[#allocation33_spill] sm:$0xff]  ;;  %v7287_v35 = vld [vmem:[#allocation52_spill] sm:$0xff] }
 0x42a   :  { %4481 = vmatprep.subr.bf16.mxu0 %v5055_v22  ;;  %4513 = vmatprep.subr.bf16.mxu1 %v5313_v45  ;;  %v7280_v22 = vld [vmem:[#allocation11_spill] sm:$0xff]  ;;  %v7288_v45 = vld [vmem:[#allocation40_spill] sm:$0xff] }
 0x42d   :  { %4483 = vmatpush1.bf16.msra.mxu0 %v5073_v27  ;;  %4515 = vmatpush1.bf16.msra.mxu1 %v5358_v58  ;;  %v7281_v27 = vld [vmem:[#allocation34_spill] sm:$0xff]  ;;  %v7289_v58 = vld [vmem:[#allocation53_spill] sm:$0xff] }
 0x42e   :  { %4485 = vmatprep.subr.bf16.mxu0 %v5075_v28  ;;  %4517 = vmatprep.subr.bf16.mxu1 %v5360_v63  ;;  %v2198_v28 = vmul.f32 %v6527_v46, %v6523_v38  ;;  %v7290_v63 = vld [vmem:[#allocation41_spill] sm:$0xff]  ;;  %v7297_v46 = vld [vmem:[#allocation58_spill] sm:$0xff] }
 0x42f   :  { %v7298_v38 = vld [vmem:[#allocation61_spill] sm:$0xff] }
 0x431   :  { %4487 = vmatpush1.bf16.msra.mxu0 %v5093_v33  ;;  %4519 = vmatpush1.bf16.msra.mxu1 %v7197_v19  ;;  %v2197_v33 = vld [vmem:[#allocation4] sm:$0x1] }
 0x432   :  { %4489 = vmatprep.subr.bf16.mxu0 %v5095_v34  ;;  %4521 = vmatprep.subr.bf16.mxu1 %v7198_v2  ;;  %v7282_v34 = vld [vmem:[#allocation12_spill] sm:$0xff]  ;;  %v6673_v60 = vsub.f32 %v2197_v33, %v2198_v28  ;;  %v7294_v19 = vld [vmem:[#allocation43_spill] sm:$0xff]  ;;  %v7316_v28 = vld [vmem:[#allocation86_spill] sm:$0xff] }
 0x433   :  { %v7295_v2 = vld [vmem:[#allocation56_spill] sm:$0xff]  ;;  %v7317_v33 = vld [vmem:[#allocation71_spill] sm:$0xff] }
 0x435   :  { %4491 = vmatpush1.bf16.msra.mxu0 %v7274_v4  ;;  %4523 = vmatpush1.bf16.msra.mxu1 %v7275_v9  ;;  %v7303_v4 = vld [vmem:[#allocation64_spill] sm:$0xff]  ;;  %v7309_v9 = vld [vmem:[#allocation67_spill] sm:$0xff] }
 0x436   :  { %4493 = vmatprep.subr.bf16.mxu0 %v7276_v10  ;;  %4525 = vmatprep.subr.bf16.mxu1 %v7277_v15  ;;  %v7310_v10 = vld [vmem:[#allocation83_spill] sm:$0xff]  ;;  %v7311_v15 = vld [vmem:[#allocation68_spill] sm:$0xff] }
 0x439   :  { %4495 = vmatpush1.bf16.msra.mxu0 %v7278_v16  ;;  %4527 = vmatpush1.bf16.msra.mxu1 %v7279_v21  ;;  %v7312_v16 = vld [vmem:[#allocation84_spill] sm:$0xff]  ;;  %v7313_v21 = vld [vmem:[#allocation69_spill] sm:$0xff] }
 0x43a   :  { %4497 = vmatprep.subr.bf16.mxu0 %v7280_v22  ;;  %4529 = vmatprep.subr.bf16.mxu1 %v7281_v27  ;;  %v7314_v22 = vld [vmem:[#allocation85_spill] sm:$0xff]  ;;  %v7315_v27 = vld [vmem:[#allocation70_spill] sm:$0xff] }
 0x43d   :  { %4499 = vmatpush1.bf16.msra.mxu0 %v7282_v34  ;;  %4531 = vmatpush1.bf16.msra.mxu1 %v7283_v52  ;;  %v7318_v34 = vld [vmem:[#allocation87_spill] sm:$0xff]  ;;  %v7319_v52 = vld [vmem:[#allocation72_spill] sm:$0xff] }
 0x43e   :  { %4533 = vmatprep.subr.bf16.mxu0 %v7284_v11  ;;  %4565 = vmatprep.subr.bf16.mxu1 %v7285_v62  ;;  %v7320_v11 = vld [vmem:[#allocation88_spill] sm:$0xff]  ;;  %v7321_v62 = vld [vmem:[#allocation89_spill] sm:$0xff] }
 0x440   :  { %2833 = vmatmul.mubr.f32.vlgmr.msra.gmra.mrb[26].mxu0 %v6673_v60  ;;  %2904 = vmatmul.mubr.f32.vlgmr.msra.gmra.mrb[26].mxu1 %v6673_v60 }
 0x441   :  { %4535 = vmatpush1.bf16.msra.mxu0 %v5505_v48  ;;  %4567 = vmatpush1.bf16.msra.mxu1 %v5673_v37  ;;  %v7291_v48 = vld [vmem:[#allocation54_spill] sm:$0xff] }
 0x442   :  { %4537 = vmatprep.subr.bf16.mxu0 %v7207_v30  ;;  %4569 = vmatprep.subr.bf16.mxu1 %v5675_v36  ;;  %v7292_v37 = vld [vmem:[#allocation42_spill] sm:$0xff]  ;;  %v7293_v36 = vld [vmem:[#allocation55_spill] sm:$0xff]  ;;  %v7299_v30 = vld [vmem:[#allocation49_spill] sm:$0xff] }
 0x443   :  { %2974 = vmatprep.mubr.f32.mxu0 %v7231_v56  ;;  %3045 = vmatprep.mubr.f32.mxu1 %v7231_v56 }
 0x445   :  { %4539 = vmatpush1.bf16.msra.mxu0 %v7208_v43  ;;  %4571 = vmatpush1.bf16.msra.mxu1 %v5693_v14  ;;  %v7296_v14 = vld [vmem:[#allocation57_spill] sm:$0xff]  ;;  %v7301_v43 = vld [vmem:[#allocation50_spill] sm:$0xff] }
 0x446   :  { %4541 = vmatprep.subr.bf16.mxu0 %v7286_v3  ;;  %4573 = vmatprep.subr.bf16.mxu1 %v7287_v35  ;;  %v7322_v3 = vld [vmem:[#allocation90_spill] sm:$0xff]  ;;  %v7334_v35 = vld [vmem:[#allocation115_spill] sm:$0xff] }
 0x449   :  { %4543 = vmatpush1.bf16.msra.mxu0 %v7288_v45  ;;  %4575 = vmatpush1.bf16.msra.mxu1 %v7289_v58  ;;  %v7335_v45 = vld [vmem:[#allocation100_spill] sm:$0xff] }
 0x44a   :  { %4545 = vmatprep.subr.bf16.mxu0 %v7290_v63  ;;  %4577 = vmatprep.subr.bf16.mxu1 %v7291_v48  ;;  %v7336_v58 = vld [vmem:[#allocation116_spill] sm:$0xff]  ;;  %v7338_v48 = vld [vmem:[#allocation102_spill] sm:$0xff] }
 0x44d   :  { %4547 = vmatpush1.bf16.msra.mxu0 %v7292_v37  ;;  %4579 = vmatpush1.bf16.msra.mxu1 %v7293_v36  ;;  %v7339_v37 = vld [vmem:[#allocation118_spill] sm:$0xff] }
 0x44e   :  { %4549 = vmatprep.subr.bf16.mxu0 %v7294_v19  ;;  %4581 = vmatprep.subr.bf16.mxu1 %v7295_v2  ;;  %v7340_v19 = vld [vmem:[#allocation119_spill] sm:$0xff] }
 0x451   :  { %4551 = vmatpush1.bf16.msra.mxu0 %v7218_v18  ;;  %4583 = vmatpush1.bf16.msra.mxu1 %v7296_v14  ;;  %v7300_v18 = vld [vmem:[#allocation62_spill] sm:$0xff] }
 0x452   :  { %4553 = vmatprep.subr.bf16.mxu0 %v7220_v39  ;;  %4585 = vmatprep.subr.bf16.mxu1 %v7297_v46  ;;  %v7302_v39 = vld [vmem:[#allocation63_spill] sm:$0xff] }
 0x455   :  { %4555 = vmatpush1.bf16.msra.mxu0 %v7222_v49  ;;  %4587 = vmatpush1.bf16.msra.mxu1 %v7223_v26  ;;  %v7304_v49 = vld [vmem:[#allocation80_spill] sm:$0xff]  ;;  %v7305_v26 = vld [vmem:[#allocation65_spill] sm:$0xff] }
 0x456   :  { %4557 = vmatprep.subr.bf16.mxu0 %v7224_v5  ;;  %4589 = vmatprep.subr.bf16.mxu1 %v7225_v53  ;;  %v7306_v5 = vld [vmem:[#allocation81_spill] sm:$0xff]  ;;  %v7307_v53 = vld [vmem:[#allocation66_spill] sm:$0xff] }
 0x459   :  { %4559 = vmatpush1.bf16.msra.mxu0 %v7226_v50  ;;  %4591 = vmatpush1.bf16.msra.mxu1 %v7298_v38  ;;  %v7308_v50 = vld [vmem:[#allocation82_spill] sm:$0xff] }
 0x45a   :  { %4561 = vmatprep.subr.bf16.mxu0 %v7299_v30  ;;  %4593 = vmatprep.subr.bf16.mxu1 %v7300_v18 }
 0x45d   :  { %4563 = vmatpush1.bf16.msra.mxu0 %v7301_v43  ;;  %4595 = vmatpush1.bf16.msra.mxu1 %v7302_v39  ;;  %v7342_v39 = vld [vmem:[#allocation15_spill] sm:$0xff] }
 0x45e   :  { %4597 = vmatprep.subr.bf16.mxu0 %v7303_v4  ;;  %4629 = vmatprep.subr.bf16.mxu1 %v7304_v49  ;;  %v7343_v4 = vld [vmem:[#allocation14_spill] sm:$0xff] }
 0x460   :  { %2975 = vmatmul.mubr.f32.vlgmr.msra.gmra.mrb[28].mxu0 %v6673_v60  ;;  %3046 = vmatmul.mubr.f32.vlgmr.msra.gmra.mrb[28].mxu1 %v6673_v60 }
 0x461   :  { %4599 = vmatpush1.bf16.msra.mxu0 %v7305_v26  ;;  %4631 = vmatpush1.bf16.msra.mxu1 %v7306_v5  ;;  %v7344_v26 = vld [vmem:[#allocation16_spill] sm:$0xff] }
 0x462   :  { %4601 = vmatprep.subr.bf16.mxu0 %v7307_v53  ;;  %4633 = vmatprep.subr.bf16.mxu1 %v7308_v50  ;;  %v7345_v53 = vld [vmem:[#allocation17_spill] sm:$0xff]  ;;  %v7346_v50 = vld [vmem:[#allocation19_spill] sm:$0xff] }
 0x463   :  { %3116 = vmatprep.mubr.f32.mxu0 %v7231_v56  ;;  %3187 = vmatprep.mubr.f32.mxu1 %v7231_v56 }
 0x465   :  { %4603 = vmatpush1.bf16.msra.mxu0 %v7309_v9  ;;  %4635 = vmatpush1.bf16.msra.mxu1 %v7310_v10  ;;  %v7347_v9 = vld [vmem:[#allocation18_spill] sm:$0xff] }
 0x466   :  { %4605 = vmatprep.subr.bf16.mxu0 %v7311_v15  ;;  %4637 = vmatprep.subr.bf16.mxu1 %v7312_v16  ;;  %v7348_v15 = vld [vmem:[#allocation20_spill] sm:$0xff] }
 0x469   :  { %4607 = vmatpush1.bf16.msra.mxu0 %v7313_v21  ;;  %4639 = vmatpush1.bf16.msra.mxu1 %v7314_v22 }
 0x46a   :  { %4609 = vmatprep.subr.bf16.mxu0 %v7315_v27  ;;  %4641 = vmatprep.subr.bf16.mxu1 %v7316_v28 }
 0x46d   :  { %4611 = vmatpush1.bf16.msra.mxu0 %v7317_v33  ;;  %4643 = vmatpush1.bf16.msra.mxu1 %v7318_v34 }
 0x46e   :  { %4613 = vmatprep.subr.bf16.mxu0 %v7319_v52  ;;  %4645 = vmatprep.subr.bf16.mxu1 %v7320_v11  ;;  %v7349_v11 = vld [vmem:[#allocation21_spill] sm:$0xff] }
 0x471   :  { %4615 = vmatpush1.bf16.msra.mxu0 %v7243_v40  ;;  %4647 = vmatpush1.bf16.msra.mxu1 %v7321_v62  ;;  %v7323_v40 = vld [vmem:[#allocation94_spill] sm:$0xff] }
 0x472   :  { %4617 = vmatprep.subr.bf16.mxu0 %v7245_v25  ;;  %4649 = vmatprep.subr.bf16.mxu1 %v7322_v3  ;;  %v7324_v25 = vld [vmem:[#allocation95_spill] sm:$0xff] }
 0x473   :  { %v7350_v3 = vld [vmem:[#allocation23_spill] sm:$0xff] }
 0x475   :  { %4619 = vmatpush1.bf16.msra.mxu0 %v7247_v57  ;;  %4651 = vmatpush1.bf16.msra.mxu1 %v7248_v51  ;;  %v7325_v57 = vld [vmem:[#allocation110_spill] sm:$0xff]  ;;  %v7327_v51 = vld [vmem:[#allocation96_spill] sm:$0xff] }
 0x476   :  { %4621 = vmatprep.subr.bf16.mxu0 %v7249_v6  ;;  %4653 = vmatprep.subr.bf16.mxu1 %v7250_v47  ;;  %v7326_v6 = vld [vmem:[#allocation111_spill] sm:$0xff]  ;;  %v7330_v47 = vld [vmem:[#allocation113_spill] sm:$0xff] }
 0x479   :  { %4623 = vmatpush1.bf16.msra.mxu0 %v7251_v31  ;;  %4655 = vmatpush1.bf16.msra.mxu1 %v7252_v0  ;;  %v7332_v0 = vld [vmem:[#allocation114_spill] sm:$0xff]  ;;  %v3336_v31 = vlaneseq }
 0x47a   :  { %4625 = vmatprep.subr.bf16.mxu0 %v7253_v32  ;;  %4657 = vmatprep.subr.bf16.mxu1 %v6136_v12  ;;  %v7328_v32 = vld [vmem:[#allocation112_spill] sm:$0xff]  ;;  %v7331_v12 = vld [vmem:[#allocation98_spill] sm:$0xff] }
 0x47b   :  { %v6765_v63 = vshrl.u32 %v3336_v31, 7 }
 0x47d   :  { %4627 = vmatpush1.bf16.msra.mxu0 %v7254_v61  ;;  %4659 = vmatpush1.bf16.msra.mxu1 %v7323_v40  ;;  %v7329_v61 = vld [vmem:[#allocation97_spill] sm:$0xff]  ;;  %v6772_v36 = vsub.s32 0, %v6765_v63 }
 0x47e   :  { %4661 = vmatprep.subr.bf16.mxu0 %v7324_v25  ;;  %4693 = vmatprep.subr.bf16.mxu1 %v7325_v57  ;;  %v7351_v25 = vld [vmem:[#allocation22_spill] sm:$0xff] }
 0x480   :  { %3117 = vmatmul.mubr.f32.vlgmr.msra.gmra.mrb[30].mxu0 %v6673_v60  ;;  %3188 = vmatmul.mubr.f32.vlgmr.msra.gmra.mrb[30].mxu1 %v6673_v60 }
 0x481   :  { %4663 = vmatpush1.bf16.msra.mxu0 %v6177_v44  ;;  %4695 = vmatpush1.bf16.msra.mxu1 %v7326_v6  ;;  %v7333_v44 = vld [vmem:[#allocation99_spill] sm:$0xff]  ;;  %v7352_v6 = vld [vmem:[#allocation24_spill] sm:$0xff] }
 0x482   :  { %4665 = vmatprep.subr.bf16.mxu0 %v7327_v51  ;;  %4697 = vmatprep.subr.bf16.mxu1 %v7328_v32 }
 0x483   :  { %3258 = vmatprep.mubr.f32.mxu0 %v7231_v56  ;;  %3329 = vmatprep.mubr.f32.mxu1 %v7231_v56  ;;  %v7337_v56 = vld [vmem:[#allocation117_spill] sm:$0xff] }
 0x485   :  { %4667 = vmatpush1.bf16.msra.mxu0 %v7329_v61  ;;  %4699 = vmatpush1.bf16.msra.mxu1 %v7330_v47 }
 0x486   :  { %4669 = vmatprep.subr.bf16.mxu0 %v7331_v12  ;;  %4701 = vmatprep.subr.bf16.mxu1 %v7332_v0 }
 0x489   :  { %4671 = vmatpush1.bf16.msra.mxu0 %v7333_v44  ;;  %4703 = vmatpush1.bf16.msra.mxu1 %v7334_v35 }
 0x48a   :  { %4673 = vmatprep.subr.bf16.mxu0 %v7335_v45  ;;  %4705 = vmatprep.subr.bf16.mxu1 %v7336_v58  ;;  %v7353_v45 = vld [vmem:[#allocation25_spill] sm:$0xff] }
 0x48d   :  { %4675 = vmatpush1.bf16.msra.mxu0 %v7260_v29  ;;  %4707 = vmatpush1.bf16.msra.mxu1 %v7337_v56  ;;  %v7354_v56 = vld [vmem:[#allocation26_spill] sm:$0xff] }
 0x48e   :  { %4677 = vmatprep.subr.bf16.mxu0 %v7338_v48  ;;  %4709 = vmatprep.subr.bf16.mxu1 %v7339_v37  ;;  %v7355_v37 = vld [vmem:[#allocation27_spill] sm:$0xff] }
 0x491   :  { %4679 = vmatpush1.bf16.msra.mxu0 %v7263_v17  ;;  %4711 = vmatpush1.bf16.msra.mxu1 %v7340_v19  ;;  %v7341_v17 = vld [vmem:[#allocation13_spill] sm:$0xff] }
 0x492   :  { %4681 = vmatprep.subr.bf16.mxu0 %v7265_v1  ;;  %4713 = vmatprep.subr.bf16.mxu1 %v7266_v24 }
 0x493   :  { %v2266_v2 = vpop.f32.mrb[18].mxu0  ;;  %v2337_v14 = vpop.f32.mrb[18].mxu1 }
 0x494   :  { %v3339_v29 = vrot.slane %v2266_v2, %v6772_v36  ;;  %v3347_v46 = vrot.slane %v2337_v14, %v6772_v36  ;;  %v2268_v38 = vpop.f32.mrb[19].mxu0  ;;  %v2339_v30 = vpop.f32.mrb[19].mxu1  ;;  %v7356_v2 = vld [vmem:[#allocation28_spill] sm:$0xff] }
 0x495   :  { %v3343_v18 = vrot.slane %v2268_v38, %v6772_v36  ;;  %v3351_v43 = vrot.slane %v2339_v30, %v6772_v36  ;;  %4683 = vmatpush1.bf16.msra.mxu0 %v7267_v59  ;;  %4715 = vmatpush1.bf16.msra.mxu1 %v7268_v20 }
 0x496   :  { %v3400_v1 = vmul.f32 %v3339_v29, %v7341_v17  ;;  %v3402_v24 = vmul.f32 %v3347_v46, %v7342_v39  ;;  %4685 = vmatprep.subr.bf16.mxu0 %v7269_v7  ;;  %4717 = vmatprep.subr.bf16.mxu1 %v6447_v13  ;;  %v4811_v29 = vmov 1966171168  }
 0x497   :  { %v3401_v49 = vmul.f32 %v3343_v18, %v7343_v4  ;;  %v3403_v5 = vmul.f32 %v3351_v43, %v7344_v26  ;;  %v3549_v46 = vunpack.c.l.s4 %v4811_v29 }
 0x499   :  { %4687 = vmatpush1.bf16.msra.mxu0 %v7270_v42  ;;  %4719 = vmatpush1.bf16.msra.mxu1 %v7271_v41  ;;  %v3550_v26 = vunpack.c.0.s8 %v3549_v46 }
 0x49a   :  { %4689 = vmatprep.subr.bf16.mxu0 %v7272_v8  ;;  %4721 = vmatprep.subr.bf16.mxu1 %v6470_v55 }
 0x49d   :  { %4691 = vmatpush1.bf16.msra.mxu0 %v7273_v23  ;;  %4723 = vmatpush1.bf16.msra.mxu1 %v6483_v54 }
 0x4a0   :  { %3259 = vmatmul.mubr.f32.vlgmr.msra.gmra.mrb[32].mxu0 %v6673_v60  ;;  %3330 = vmatmul.mubr.f32.vlgmr.msra.gmra.mrb[32].mxu1 %v6673_v60 }
 0x4b3   :  { %v2408_v20 = vpop.f32.mrb[20].mxu0  ;;  %v2479_v59 = vpop.f32.mrb[20].mxu1 }
 0x4b4   :  { %v3355_v7 = vrot.slane %v2408_v20, %v6772_v36  ;;  %v3363_v42 = vrot.slane %v2479_v59, %v6772_v36  ;;  %v2410_v13 = vpop.f32.mrb[21].mxu0  ;;  %v2481_v41 = vpop.f32.mrb[21].mxu1 }
 0x4b5   :  { %v3359_v8 = vrot.slane %v2410_v13, %v6772_v36  ;;  %v3367_v55 = vrot.slane %v2481_v41, %v6772_v36 }
 0x4b6   :  { %v3404_v23 = vmul.f32 %v3355_v7, %v7345_v53  ;;  %v3406_v54 = vmul.f32 %v3363_v42, %v7346_v50  ;;  %v6843_v53 = vsub.s32 %v3550_v26, %v6765_v63 }
 0x4b7   :  { %v3405_v10 = vmul.f32 %v3359_v8, %v7347_v9  ;;  %v3407_v60 = vmul.f32 %v3367_v55, %v7348_v15 }
 0x4d3   :  { %v2550_v16 = vpop.f32.mrb[22].mxu0  ;;  %v2621_v21 = vpop.f32.mrb[22].mxu1 }
 0x4d4   :  { %v3371_v22 = vrot.slane %v2550_v16, %v6772_v36  ;;  %v3379_v27 = vrot.slane %v2621_v21, %v6772_v36  ;;  %v2552_v28 = vpop.f32.mrb[23].mxu0  ;;  %v2623_v33 = vpop.f32.mrb[23].mxu1 }
 0x4d5   :  { %v3375_v34 = vrot.slane %v2552_v28, %v6772_v36  ;;  %v3383_v52 = vrot.slane %v2623_v33, %v6772_v36 }
 0x4d6   :  { %v6811_v62 = vmul.f32 %v3371_v22, %v7349_v11  ;;  %v6814_v40 = vmul.f32 %v3379_v27, %v7350_v3 }
 0x4d7   :  { %v6817_v57 = vmul.f32 %v3375_v34, %v7351_v25  ;;  %v6820_v51 = vmul.f32 %v3383_v52, %v7352_v6 }
 0x4f3   :  { %v2692_v32 = vpop.f32.mrb[24].mxu0  ;;  %v2763_v61 = vpop.f32.mrb[24].mxu1 }
 0x4f4   :  { %v3387_v47 = vrot.slane %v2692_v32, %v6772_v36  ;;  %v3395_v12 = vrot.slane %v2763_v61, %v6772_v36  ;;  %v2694_v0 = vpop.f32.mrb[25].mxu0  ;;  %v2765_v31 = vpop.f32.mrb[25].mxu1 }
 0x4f5   :  { %v3391_v44 = vrot.slane %v2694_v0, %v6772_v36  ;;  %v3399_v35 = vrot.slane %v2765_v31, %v6772_v36 }
 0x4f6   :  { %v6827_v58 = vmul.f32 %v3387_v47, %v7353_v45  ;;  %v6830_v48 = vmul.f32 %v3395_v12, %v7354_v56 }
 0x4f7   :  { %v6833_v19 = vmul.f32 %v3391_v44, %v7355_v37  ;;  %v6836_v14 = vmul.f32 %v3399_v35, %v7356_v2 }
 0x513   :  { %v2834_v38 = vpop.f32.mrb[26].mxu0  ;;  %v2905_v30 = vpop.f32.mrb[26].mxu1 }
 0x514   :  { %v3419_v18 = vrot.slane %v2834_v38, %v6772_v36  ;;  %v3427_v43 = vrot.slane %v2905_v30, %v6772_v36  ;;  %v2836_v17 = vpop.f32.mrb[27].mxu0  ;;  %v2907_v39 = vpop.f32.mrb[27].mxu1 }
 0x515   :  { %v3423_v4 = vrot.slane %v2836_v17, %v6772_v36  ;;  %v3431_v20 = vrot.slane %v2907_v39, %v6772_v36 }
 0x516   :  { %v3480_v59 = vadd.f32 %v3419_v18, %v3400_v1  ;;  %v3482_v7 = vadd.f32 %v3427_v43, %v3402_v24 }
 0x517   :  { %v3481_v42 = vadd.f32 %v3423_v4, %v3401_v49  ;;  %v3483_v13 = vadd.f32 %v3431_v20, %v3403_v5 }
 0x518   :  { %v3496_v41 = vmax.f32 %v3480_v59, 0.0  ;;  %v3498_v8 = vmax.f32 %v3482_v7, 0.0 }
 0x519   :  { %v3497_v55 = vmax.f32 %v3481_v42, 0.0  ;;  %v3499_v50 = vmax.f32 %v3483_v13, 0.0 }
 0x51b   :  { %v3692_v9 = vpack.c.bf16 %v3497_v55, %v3496_v41  ;;  %v3693_v15 = vpack.c.bf16 %v3499_v50, %v3498_v8 }
 0x51d   :  { %v3554_v16 = vrot.slane %v3692_v9, %v6843_v53  ;;  %v3561_v21 = vrot.slane %v3693_v15, %v6843_v53 }
 0x51f   :  { %v3576_v22 = vcombine.low %v3554_v16, %v3561_v21 }
 0x521   :  { %v3584_v35 = vrot.slane %v3576_v22, %v6843_v53 }
 0x533   :  { %v2976_v27 = vpop.f32.mrb[28].mxu0  ;;  %v3047_v28 = vpop.f32.mrb[28].mxu1 }
 0x534   :  { %v3435_v1 = vrot.slane %v2976_v27, %v6772_v36  ;;  %v3443_v24 = vrot.slane %v3047_v28, %v6772_v36  ;;  %v2978_v49 = vpop.f32.mrb[29].mxu0  ;;  %v3049_v5 = vpop.f32.mrb[29].mxu1 }
 0x535   :  { %v3439_v33 = vrot.slane %v2978_v49, %v6772_v36  ;;  %v3447_v63 = vrot.slane %v3049_v5, %v6772_v36 }
 0x536   :  { %v3484_v34 = vadd.f32 %v3435_v1, %v3404_v23  ;;  %v3486_v52 = vadd.f32 %v3443_v24, %v3406_v54 }
 0x537   :  { %v3485_v11 = vadd.f32 %v3439_v33, %v3405_v10  ;;  %v3487_v3 = vadd.f32 %v3447_v63, %v3407_v60 }
 0x538   :  { %v3500_v25 = vmax.f32 %v3484_v34, 0.0  ;;  %v3502_v6 = vmax.f32 %v3486_v52, 0.0 }
 0x539   :  { %v3501_v32 = vmax.f32 %v3485_v11, 0.0  ;;  %v3503_v61 = vmax.f32 %v3487_v3, 0.0 }
 0x53b   :  { %v3694_v47 = vpack.c.bf16 %v3501_v32, %v3500_v25  ;;  %v3695_v12 = vpack.c.bf16 %v3503_v61, %v3502_v6 }
 0x53d   :  { %v3568_v0 = vrot.slane %v3694_v47, %v6843_v53  ;;  %v3575_v31 = vrot.slane %v3695_v12, %v6843_v53 }
 0x53f   :  { %v3577_v44 = vcombine.low %v3568_v0, %v3575_v31 }
 0x541   :  { %v3591_v45 = vrot.slane %v3577_v44, %v6843_v53 }
 0x543   :  { %v3592_v56 = vcombine.low %v3584_v35, %v3591_v45 }
 0x545   :  { %3644 = vst [vmem:[%s6888_s5] sm:$0xff] %v3592_v56 }
 0x553   :  { %v3118_v23 = vpop.f32.mrb[30].mxu0  ;;  %v3189_v54 = vpop.f32.mrb[30].mxu1 }
 0x554   :  { %v3451_v10 = vrot.slane %v3118_v23, %v6772_v36  ;;  %v3459_v60 = vrot.slane %v3189_v54, %v6772_v36  ;;  %v3120_v37 = vpop.f32.mrb[31].mxu0  ;;  %v3191_v2 = vpop.f32.mrb[31].mxu1 }
 0x555   :  { %v3455_v29 = vrot.slane %v3120_v37, %v6772_v36  ;;  %v3463_v46 = vrot.slane %v3191_v2, %v6772_v36 }
 0x556   :  { %v3488_v38 = vadd.f32 %v3451_v10, %v6811_v62  ;;  %v3490_v30 = vadd.f32 %v3459_v60, %v6814_v40 }
 0x557   :  { %v3489_v18 = vadd.f32 %v3455_v29, %v6817_v57  ;;  %v3491_v43 = vadd.f32 %v3463_v46, %v6820_v51 }
 0x558   :  { %v3504_v17 = vmax.f32 %v3488_v38, 0.0  ;;  %v3506_v39 = vmax.f32 %v3490_v30, 0.0 }
 0x559   :  { %v3505_v4 = vmax.f32 %v3489_v18, 0.0  ;;  %v3507_v26 = vmax.f32 %v3491_v43, 0.0 }
 0x55b   :  { %v3696_v20 = vpack.c.bf16 %v3505_v4, %v3504_v17  ;;  %v3697_v59 = vpack.c.bf16 %v3507_v26, %v3506_v39 }
 0x55d   :  { %v3603_v7 = vrot.slane %v3696_v20, %v6843_v53  ;;  %v3610_v42 = vrot.slane %v3697_v59, %v6843_v53 }
 0x55f   :  { %v3625_v13 = vcombine.low %v3603_v7, %v3610_v42 }
 0x573   :  { %v3260_v41 = vpop.f32.mrb[32].mxu0  ;;  %v3331_v8 = vpop.f32.mrb[32].mxu1 }
 0x574   :  { %v3467_v62 = vrot.slane %v3260_v41, %v6772_v36  ;;  %v3475_v40 = vrot.slane %v3331_v8, %v6772_v36  ;;  %v3262_v57 = vpop.f32.mrb[33].mxu0  ;;  %v3333_v55 = vpop.f32.mrb[33].mxu1 }
 0x575   :  { %v3471_v51 = vrot.slane %v3262_v57, %v6772_v36  ;;  %v3479_v50 = vrot.slane %v3333_v55, %v6772_v36  ;;  %v3633_v36 = vrot.slane %v3625_v13, %v6843_v53 }
 0x576   :  { %v3492_v9 = vadd.f32 %v3467_v62, %v6827_v58  ;;  %v3494_v15 = vadd.f32 %v3475_v40, %v6830_v48 }
 0x577   :  { %v3493_v16 = vadd.f32 %v3471_v51, %v6833_v19  ;;  %v3495_v21 = vadd.f32 %v3479_v50, %v6836_v14 }
 0x578   :  { %v3508_v22 = vmax.f32 %v3492_v9, 0.0  ;;  %v3510_v27 = vmax.f32 %v3494_v15, 0.0 }
 0x579   :  { %v3509_v28 = vmax.f32 %v3493_v16, 0.0  ;;  %v3511_v1 = vmax.f32 %v3495_v21, 0.0 }
 0x57b   :  { %v3698_v24 = vpack.c.bf16 %v3509_v28, %v3508_v22  ;;  %v3699_v49 = vpack.c.bf16 %v3511_v1, %v3510_v27 }
 0x57d   :  { %v3617_v5 = vrot.slane %v3698_v24, %v6843_v53  ;;  %v3624_v33 = vrot.slane %v3699_v49, %v6843_v53 }
 0x57f   :  { %v3626_v63 = vcombine.low %v3617_v5, %v3624_v33 }
 0x581   :  { %v3640_v58 = vrot.slane %v3626_v63, %v6843_v53 }
 0x583   :  { %v3641_v48 = vcombine.low %v3633_v36, %v3640_v58 }
 0x585   :  { %3645 = vst [vmem:[%s6888_s5 + $0x8] sm:$0xff] %v3641_v48 }
 0x586   :  { %3650 = vsyncpa [#allocation3], 1 }
 0x587   :  { %3651 = vsyncpa [#allocation5], 1 }

// kernel: _lambda_.6
= control target key start
LH: loop header
LB: loop body
LE: loop exit
PB: predicated region body
PF: predicated region fallthrough
CT: control target
= control target key end

     0   :  { %s4499_s15 = smov 0   ;;  %s4501_s16 = smov 0   ;;  %s6011_s0 = inlined_call_operand.vmem [shape: bf16[256,1152], index: 0, kind: input, shape index: {}]   ;;  %s6012_s1 = inlined_call_operand.vmem [shape: bf16[1152,32], index: 1, kind: input, shape index: {}]   ;;  %s6013_s2 = inlined_call_operand.vmem [shape: f32[64,1], index: 2, kind: input, shape index: {}]   ;;  %s6014_s3 = inlined_call_operand.vmem [shape: f32[64,1], index: 3, kind: input, shape index: {}]   ;;  %s6015_s4 = inlined_call_operand.vmem [shape: bf16[256,32], index: 4, kind: output, shape index: {}]  }
   0x1   :  { %s4503_s17 = smov 0  }
   0x2 LB: > { %s26_s18 = sadd.s32 1, %s4466_s16  ;;  %p3301_p0 = scmp.ge.s32.totalorder %s4470_s17, 1  ;;  %s4470_s17 = sphi %s4503_s17, %s14_s17   ;;  %s4466_s16 = sphi %s4501_s16, %s6017_s16   ;;  %s4462_s15 = sphi %s4499_s15, %s6016_s15  }
   0x3   : > { %p28_p1 = scmp.ge.s32.totalorder %s26_s18, 2  ;;  %p183_p2 = scmp.lt.s32.totalorder %s4470_s17, 3 }
   0x5   : > { %s6019_s18 = smov (%p28_p1, %s26_s18), 0  ;;  %p184_p3 = pnand %p3301_p0, %p183_p2 }
   0x6   : > { %p3302_p4 = scmp.ne.s32.totalorder (!%p184_p3), %s4462_s15, 0 }
   0x7   : > { %187 = sbr.rel (%p184_p3) target bundleno = 908 (0x38c), region = 36 }
   0xe   : > { %228 = sbr.rel (%p3302_p4) target bundleno = 710 (0x2c6), region = 40  ;;  %v4150_v0 = vld [vmem:[%s6012_s1 + $0x40] sm:$0xff] (!%p3302_p4)   ;;  %v4152_v2 = vld [vmem:[%s6012_s1 + $0x48] sm:$0xff] (!%p3302_p4)   ;;  %v4154_v4 = vld [vmem:[%s6012_s1 + $0x50] sm:$0xff] (!%p3302_p4)   ;;  %vm2529_vm0 = vcmask (!%p3302_p4), 261120   ;;  %vm233_vm1 = vcmask (!%p3302_p4), 7168  }
   0xf   : > { %v4151_v1 = vld [vmem:[%s6012_s1] sm:$0xff] (!%p3302_p4)   ;;  %3588 = vmatprep.subr.bf16.mxu0 (!%p3302_p4), %v4150_v0  ;;  %4108 = vmatprep.subr.bf16.mxu1 (!%p3302_p4), %v4150_v0  ;;  %v4153_v3 = vld [vmem:[%s6012_s1 + $0x8] sm:$0xff] (!%p3302_p4)   ;;  %v4155_v5 = vld [vmem:[%s6012_s1 + $0x10] sm:$0xff] (!%p3302_p4)  }
  0x10   : > { %3589 = vmatpush3.bf16.msra.mxu0 (!%p3302_p4), %v4151_v1  ;;  %4116 = vmatpush3.bf16.msra.mxu1 (!%p3302_p4), %v4151_v1  ;;  %v4156_v6 = vld [vmem:[%s6012_s1 + $0x58] sm:$0xff] (!%p3302_p4)   ;;  %v4158_v8 = vld [vmem:[%s6012_s1 + $0x60] sm:$0xff] (!%p3302_p4)   ;;  %v4160_v10 = vld [vmem:[%s6012_s1 + $0x68] sm:$0xff] (!%p3302_p4)  }
  0x11   : > { %3590 = vmatprep.subr.bf16.mxu0 (!%p3302_p4), %v4152_v2  ;;  %4109 = vmatprep.subr.bf16.mxu1 (!%p3302_p4), %v4152_v2  ;;  %v4157_v7 = vld [vmem:[%s6012_s1 + $0x18] sm:$0xff] (!%p3302_p4)   ;;  %v4159_v9 = vld [vmem:[%s6012_s1 + $0x20] sm:$0xff] (!%p3302_p4)   ;;  %v4161_v13 = vld [vmem:[%s6012_s1 + $0x28] sm:$0xff] (!%p3302_p4)  }
  0x12   : > { %v4168_v11 = vld [vmem:[%s6011_s0 + $0x4] ss:$36 sps:$4 sm:$0xff] (!%p3302_p4)   ;;  %v4162_v14 = vld [vmem:[%s6012_s1 + $0x70] sm:$0xff] (!%p3302_p4)   ;;  %v4164_v16 = vld [vmem:[%s6012_s1 + $0x78] sm:$0xff] (!%p3302_p4)  }
  0x13   : > { %v4171_v12 = vld [vmem:[%s6011_s0 + $0x364] ss:$36 sps:$4 sm:$0xff] (!%p3302_p4)   ;;  %1754 = vmatprep.mubr.bf16.mxu0 (!%p3302_p4), %v4168_v11  ;;  %v4163_v15 = vld [vmem:[%s6012_s1 + $0x30] sm:$0xff] (!%p3302_p4)   ;;  %v4165_v17 = vld [vmem:[%s6012_s1 + $0x38] sm:$0xff] (!%p3302_p4)  }
  0x14   : > { %3591 = vmatpush3.bf16.msra.mxu0 (!%p3302_p4), %v4153_v3  ;;  %4117 = vmatpush3.bf16.msra.mxu1 (!%p3302_p4), %v4153_v3  ;;  %v4172_v18 = vld [vmem:[%s6012_s1 + $0xc0] sm:$0xff] (!%p3302_p4)   ;;  %v4176_v24 = vld [vmem:[%s6012_s1 + $0xc8] sm:$0xff] (!%p3302_p4)   ;;  %v4184_v32 = vld [vmem:[%s6012_s1 + $0xd0] sm:$0xff] (!%p3302_p4)  }
  0x15   : > { %3592 = vmatprep.subr.bf16.mxu0 %v4154_v4  ;;  %4110 = vmatprep.subr.bf16.mxu1 %v4154_v4  ;;  %v4166_v19 = vld [vmem:[%s6011_s0] ss:$36 sps:$4 sm:$0xff]   ;;  %v4178_v25 = vld [vmem:[%s6011_s0 + $0x4c] ss:$36 sps:$4 sm:$0xff]   ;;  %v4186_v34 = vld [vmem:[%s6012_s1 + $0xd8] sm:$0xff]  }
  0x16   : > { %1850 = vmatprep.mubr.bf16.mxu1 %v4171_v12  ;;  %v4169_v20 = vld [vmem:[%s6011_s0 + $0x360] ss:$36 sps:$4 sm:$0xff]   ;;  %v4180_v26 = vld [vmem:[%s6011_s0 + $0x3ac] ss:$36 sps:$4 sm:$0xff]   ;;  %v4190_v35 = vld [vmem:[%s6011_s0 + $0x94] ss:$36 sps:$4 sm:$0xff]  }
  0x17   : > { %v4173_v21 = vld [vmem:[%s6012_s1 + $0x140] sm:$0xff]   ;;  %v4187_v27 = vld [vmem:[%s6012_s1 + $0x148] sm:$0xff]   ;;  %v4185_v33 = vld [vmem:[%s6012_s1 + $0x90] sm:$0xff]  }
  0x18   : > { %3593 = vmatpush3.bf16.msra.mxu0 %v4155_v5  ;;  %4118 = vmatpush3.bf16.msra.mxu1 %v4155_v5  ;;  %v4174_v22 = vld [vmem:[%s6012_s1 + $0x80] sm:$0xff]   ;;  %v4177_v28 = vld [vmem:[%s6012_s1 + $0x88] sm:$0xff]   ;;  %v4192_v36 = vld [vmem:[%s6011_s0 + $0x3f4] ss:$36 sps:$4 sm:$0xff]  }
  0x19   : > { %3594 = vmatprep.subr.bf16.mxu0 %v4156_v6  ;;  %4111 = vmatprep.subr.bf16.mxu1 %v4156_v6  ;;  %v4175_v23 = vld [vmem:[%s6012_s1 + $0x100] sm:$0xff]   ;;  %v4189_v29 = vld [vmem:[%s6012_s1 + $0x108] sm:$0xff]   ;;  %v4188_v37 = vld [vmem:[%s6012_s1 + $0x98] sm:$0xff]  }
  0x1a   : > { %v4182_v30 = vld [vmem:[%s6011_s0 + $0x48] ss:$36 sps:$4 sm:$0xff]   ;;  %v4196_v38 = vld [vmem:[%s6012_s1 + $0xe0] sm:$0xff]   ;;  %v4194_v39 = vld [vmem:[%s6011_s0 + $0x90] ss:$36 sps:$4 sm:$0xff]  }
  0x1b   : > { %v4183_v31 = vld [vmem:[%s6011_s0 + $0x3a8] ss:$36 sps:$4 sm:$0xff]   ;;  %v4195_v40 = vld [vmem:[%s6011_s0 + $0x3f0] ss:$36 sps:$4 sm:$0xff]   ;;  %v4197_v42 = vld [vmem:[%s6012_s1 + $0xa0] sm:$0xff]  }
  0x1c   : > { %3595 = vmatpush3.bf16.msra.mxu0 %v4157_v7  ;;  %4119 = vmatpush3.bf16.msra.mxu1 %v4157_v7  ;;  %v4207_v41 = vld [vmem:[%s6012_s1 + $0x150] sm:$0xff]   ;;  %v4198_v43 = vld [vmem:[%s6012_s1 + $0xe8] sm:$0xff]   ;;  %v4200_v45 = vld [vmem:[%s6011_s0 + $0xdc] ss:$36 sps:$4 sm:$0xff]  }
  0x1d   : > { %3596 = vmatprep.subr.bf16.mxu0 %v4158_v8  ;;  %4112 = vmatprep.subr.bf16.mxu1 %v4158_v8  ;;  %v4209_v44 = vld [vmem:[%s6012_s1 + $0x110] sm:$0xff]   ;;  %v4202_v46 = vld [vmem:[%s6011_s0 + $0x43c] ss:$36 sps:$4 sm:$0xff]   ;;  %v4199_v47 = vld [vmem:[%s6012_s1 + $0xa8] sm:$0xff]  }
  0x1e   : > { %v4206_v48 = vld [vmem:[%s6012_s1 + $0xf0] sm:$0xff]   ;;  %v4204_v49 = vld [vmem:[%s6011_s0 + $0xd8] ss:$36 sps:$4 sm:$0xff]   ;;  %v4212_v55 = vld [vmem:[%s6011_s0 + $0x124] ss:$36 sps:$4 sm:$0xff]  }
  0x1f   : > { %v4205_v50 = vld [vmem:[%s6011_s0 + $0x438] ss:$36 sps:$4 sm:$0xff]   ;;  %v4208_v52 = vld [vmem:[%s6012_s1 + $0xb0] sm:$0xff]   ;;  %v4214_v58 = vld [vmem:[%s6011_s0 + $0x8] ss:$36 sps:$4 sm:$0xff]  }
  0x20   : > { %3597 = vmatpush3.bf16.msra.mxu0 %v4159_v9  ;;  %4120 = vmatpush3.bf16.msra.mxu1 %v4159_v9  ;;  %v4218_v51 = vld [vmem:[%s6012_s1 + $0x158] sm:$0xff]   ;;  %v4216_v56 = vld [vmem:[%s6011_s0 + $0xc] ss:$36 sps:$4 sm:$0xff]   ;;  %v4217_v59 = vld [vmem:[%s6011_s0 + $0x120] ss:$36 sps:$4 sm:$0xff]  }
  0x21   : > { %3598 = vmatprep.subr.bf16.mxu0 %v4160_v10  ;;  %4113 = vmatprep.subr.bf16.mxu1 %v4160_v10  ;;  %v4210_v53 = vld [vmem:[%s6012_s1 + $0xf8] sm:$0xff]   ;;  %v4219_v60 = vld [vmem:[%s6012_s1 + $0x1c0] sm:$0xff]   ;;  %v4222_v62 = vld [vmem:[%s6011_s0 + $0x16c] ss:$36 sps:$4 sm:$0xff]  }
  0x22   : > { %v4220_v54 = vld [vmem:[%s6012_s1 + $0x118] sm:$0xff]   ;;  %v4221_v61 = vld [vmem:[%s6012_s1 + $0x180] sm:$0xff]   ;;  %v4236_v2 = vld [vmem:[%s6012_s1 + $0x1c8] sm:$0xff]  }
  0x23   : > { %v4211_v57 = vld [vmem:[%s6012_s1 + $0xb8] sm:$0xff]   ;;  %v4234_v63 = vld [vmem:[%s6012_s1 + $0x160] sm:$0xff]   ;;  %v4237_v3 = vld [vmem:[%s6012_s1 + $0x188] sm:$0xff]  }
  0x24   : > { %3599 = vmatpush3.bf16.msra.mxu0 %v4161_v13  ;;  %4121 = vmatpush3.bf16.msra.mxu1 %v4161_v13  ;;  %v4235_v0 = vld [vmem:[%s6012_s1 + $0x120] sm:$0xff]   ;;  %v4224_v1 = vld [vmem:[%s6011_s0 + $0x54] ss:$36 sps:$4 sm:$0xff]   ;;  %v4226_v4 = vld [vmem:[%s6011_s0 + $0x168] ss:$36 sps:$4 sm:$0xff]  }
  0x25   : > { %3600 = vmatprep.subr.bf16.mxu0 %v4162_v14  ;;  %4114 = vmatprep.subr.bf16.mxu1 %v4162_v14  ;;  %v4244_v5 = vld [vmem:[%s6012_s1 + $0x168] sm:$0xff]   ;;  %v4227_v7 = vld [vmem:[%s6011_s0 + $0x50] ss:$36 sps:$4 sm:$0xff]   ;;  %v4230_v9 = vld [vmem:[%s6011_s0 + $0x9c] ss:$36 sps:$4 sm:$0xff]  }
  0x26   : > { %v4245_v6 = vld [vmem:[%s6012_s1 + $0x128] sm:$0xff]   ;;  %v4228_v8 = vld [vmem:[%s6011_s0 + $0x1b4] ss:$36 sps:$4 sm:$0xff]   ;;  %v4238_v14 = vld [vmem:[%s6011_s0 + $0x1fc] ss:$36 sps:$4 sm:$0xff]  }
  0x27   : > { %v4252_v10 = vld [vmem:[%s6012_s1 + $0x1d0] sm:$0xff]   ;;  %v4233_v13 = vld [vmem:[%s6011_s0 + $0x98] ss:$36 sps:$4 sm:$0xff]  }
  0x28   : > { %3601 = vmatpush3.bf16.msra.mxu0 %v4163_v15  ;;  %4122 = vmatpush3.bf16.msra.mxu1 %v4163_v15  ;;  %v4253_v11 = vld [vmem:[%s6012_s1 + $0x190] sm:$0xff]  }
  0x29   : > { %3602 = vmatprep.subr.bf16.mxu0 %v4164_v16  ;;  %4115 = vmatprep.subr.bf16.mxu1 %v4164_v16  ;;  %v4232_v12 = vld [vmem:[%s6011_s0 + $0x1b0] ss:$36 sps:$4 sm:$0xff]  }
  0x2a   : > { %v4260_v15 = vld [vmem:[%s6012_s1 + $0x170] sm:$0xff]  }
  0x2b   : > { %v4261_v16 = vld [vmem:[%s6012_s1 + $0x130] sm:$0xff]  }
  0x2c   : > { %3603 = vmatpush3.bf16.msra.mxu0 %v4165_v17  ;;  %4123 = vmatpush3.bf16.msra.mxu1 %v4165_v17  ;;  %v4240_v17 = vld [vmem:[%s6011_s0 + $0xe4] ss:$36 sps:$4 sm:$0xff]  }
  0x2d   : > { %3700 = vmatprep.subr.bf16.mxu1 %v4172_v18  ;;  %3812 = vmatprep.subr.bf16.mxu0 %v4173_v21  ;;  %v4268_v18 = vld [vmem:[%s6012_s1 + $0x178] sm:$0xff]  }
  0x2e   : > { %v4270_v21 = vld [vmem:[%s6012_s1 + $0x138] sm:$0xff]  }
  0x2f   : > { %1755 = vmatmul.mubr.bf16.vlgmr.msra.gmra.mrb[0].mxu0 %v4166_v19  ;;  %1851 = vmatmul.mubr.bf16.vlgmr.msra.gmra.mrb[0].mxu1 %v4169_v20  ;;  %v4269_v19 = vld [vmem:[%s6012_s1 + $0x1d8] sm:$0xff]  }
  0x30   : > { %3701 = vmatpush3.bf16.msra.mxu1 %v4174_v22  ;;  %3813 = vmatpush3.bf16.msra.mxu0 %v4175_v23  ;;  %v4242_v20 = vld [vmem:[%s6011_s0 + $0x1f8] ss:$36 sps:$4 sm:$0xff]   ;;  %v4243_v23 = vld [vmem:[%s6011_s0 + $0xe0] ss:$36 sps:$4 sm:$0xff]  }
  0x31   : > { %3702 = vmatprep.subr.bf16.mxu1 %v4176_v24  ;;  %1762 = vmatprep.mubr.bf16.mxu0 %v4178_v25  ;;  %v4271_v22 = vld [vmem:[%s6012_s1 + $0x198] sm:$0xff]   ;;  %v4246_v24 = vld [vmem:[%s6011_s0 + $0x244] ss:$36 sps:$4 sm:$0xff]   ;;  %v4248_v25 = vld [vmem:[%s6011_s0 + $0x12c] ss:$36 sps:$4 sm:$0xff]  }
  0x32   : > { %1858 = vmatprep.mubr.bf16.mxu1 %v4180_v26  ;;  %3814 = vmatprep.subr.bf16.mxu0 %v4187_v27  ;;  %v4284_v26 = vld [vmem:[%s6012_s1 + $0x200] sm:$0xff]  }
  0x33   : > { %v4250_v27 = vld [vmem:[%s6011_s0 + $0x240] ss:$36 sps:$4 sm:$0xff]  }
  0x34   : > { %3703 = vmatpush3.bf16.msra.mxu1 %v4177_v28  ;;  %3815 = vmatpush3.bf16.msra.mxu0 %v4189_v29  ;;  %v4285_v28 = vld [vmem:[%s6012_s1 + $0x1e0] sm:$0xff]  }
  0x35   : > { %3704 = vmatprep.subr.bf16.mxu1 %v4184_v32  ;;  %3816 = vmatprep.subr.bf16.mxu0 %v4207_v41  ;;  %v4286_v29 = vld [vmem:[%s6012_s1 + $0x1a0] sm:$0xff]   ;;  %v4256_v32 = vld [vmem:[%s6011_s0 + $0x174] ss:$36 sps:$4 sm:$0xff]  }
  0x36   : > { %v4272_v41 = vld [vmem:[%s6011_s0 + $0x31c] ss:$36 sps:$4 sm:$0xff]  }
  0x37   : > { %1763 = vmatmul.mubr.bf16.gmra.mrb[4].mxu0 %v4182_v30  ;;  %1859 = vmatmul.mubr.bf16.gmra.mrb[4].mxu1 %v4183_v31  ;;  %v4251_v30 = vld [vmem:[%s6011_s0 + $0x128] ss:$36 sps:$4 sm:$0xff]  }
  0x38   : > { %3705 = vmatpush3.bf16.msra.mxu1 %v4185_v33  ;;  %1770 = vmatprep.mubr.bf16.mxu0 %v4190_v35  ;;  %v4254_v31 = vld [vmem:[%s6011_s0 + $0x28c] ss:$36 sps:$4 sm:$0xff]  }
  0x39   : > { %3706 = vmatprep.subr.bf16.mxu1 %v4186_v34  ;;  %1866 = vmatprep.mubr.bf16.mxu1 %v4192_v36  ;;  %v4258_v33 = vld [vmem:[%s6011_s0 + $0x288] ss:$36 sps:$4 sm:$0xff]   ;;  %v4259_v34 = vld [vmem:[%s6011_s0 + $0x170] ss:$36 sps:$4 sm:$0xff]  }
  0x3a   : > { %3817 = vmatpush3.bf16.msra.mxu0 %v4209_v44  ;;  %v4300_v35 = vld [vmem:[%s6012_s1 + $0x1e8] sm:$0xff]  }
  0x3b   : > { %3818 = vmatprep.subr.bf16.mxu0 %v4218_v51  ;;  %v4301_v36 = vld [vmem:[%s6012_s1 + $0x1a8] sm:$0xff]   ;;  %v4280_v51 = vld [vmem:[%s6011_s0 + $0x10] ss:$36 sps:$4 sm:$0xff]  }
  0x3c   : > { %3707 = vmatpush3.bf16.msra.mxu1 %v4188_v37  ;;  %v4262_v37 = vld [vmem:[%s6011_s0 + $0x2d4] ss:$36 sps:$4 sm:$0xff]   ;;  %v4274_v44 = vld [vmem:[%s6011_s0 + $0x204] ss:$36 sps:$4 sm:$0xff]  }
  0x3d   : > { %3708 = vmatprep.subr.bf16.mxu1 %v4196_v38  ;;  %v4264_v38 = vld [vmem:[%s6011_s0 + $0x1bc] ss:$36 sps:$4 sm:$0xff]  }
  0x3e   : > { %3819 = vmatpush3.bf16.msra.mxu0 %v4220_v54  ;;  %v4289_v54 = vld [vmem:[%s6011_s0 + $0x5c] ss:$36 sps:$4 sm:$0xff]  }
  0x3f   : > { %1771 = vmatmul.mubr.bf16.gmra.mrb[8].mxu0 %v4194_v39  ;;  %1867 = vmatmul.mubr.bf16.gmra.mrb[8].mxu1 %v4195_v40  ;;  %v4266_v39 = vld [vmem:[%s6011_s0 + $0x2d0] ss:$36 sps:$4 sm:$0xff]   ;;  %v4267_v40 = vld [vmem:[%s6011_s0 + $0x1b8] ss:$36 sps:$4 sm:$0xff]  }
  0x40   : > { %3709 = vmatpush3.bf16.msra.mxu1 %v4197_v42  ;;  %1778 = vmatprep.mubr.bf16.mxu0 %v4200_v45  ;;  %v4315_v42 = vld [vmem:[%s6012_s1 + $0x1f0] sm:$0xff]   ;;  %v4276_v45 = vld [vmem:[%s6011_s0 + $0x318] ss:$36 sps:$4 sm:$0xff]  }
  0x41   : > { %3710 = vmatprep.subr.bf16.mxu1 %v4198_v43  ;;  %1874 = vmatprep.mubr.bf16.mxu1 %v4202_v46  ;;  %v4316_v43 = vld [vmem:[%s6012_s1 + $0x1b0] sm:$0xff]   ;;  %v4277_v46 = vld [vmem:[%s6011_s0 + $0x200] ss:$36 sps:$4 sm:$0xff]  }
  0x42   : > { %3820 = vmatprep.subr.bf16.mxu0 %v4234_v63  ;;  %v4297_v63 = vld [vmem:[%s6011_s0 + $0x2d8] ss:$36 sps:$4 sm:$0xff]  }
  0x43   : > { %3821 = vmatpush3.bf16.msra.mxu0 %v4235_v0  ;;  %v4298_v0 = vld [vmem:[%s6011_s0 + $0xa0] ss:$36 sps:$4 sm:$0xff]  }
  0x44   : > { %3711 = vmatpush3.bf16.msra.mxu1 %v4199_v47  ;;  %3822 = vmatprep.subr.bf16.mxu0 %v4244_v5  ;;  %v4278_v47 = vld [vmem:[%s6011_s0 + $0x24c] ss:$36 sps:$4 sm:$0xff]  }
  0x45   : > { %3712 = vmatprep.subr.bf16.mxu1 %v4206_v48  ;;  %v4330_v48 = vld [vmem:[%s6012_s1 + $0x1f8] sm:$0xff]   ;;  %v4307_v5 = vld [vmem:[%s6011_s0 + $0xe8] ss:$36 sps:$4 sm:$0xff]  }
  0x47   : > { %1779 = vmatmul.mubr.bf16.gmra.mrb[12].mxu0 %v4204_v49  ;;  %1875 = vmatmul.mubr.bf16.gmra.mrb[12].mxu1 %v4205_v50  ;;  %v4331_v49 = vld [vmem:[%s6012_s1 + $0x1b8] sm:$0xff]  }
  0x48   : > { %3713 = vmatpush3.bf16.msra.mxu1 %v4208_v52  ;;  %1786 = vmatprep.mubr.bf16.mxu0 %v4212_v55  ;;  %v4282_v50 = vld [vmem:[%s6011_s0 + $0x14] ss:$36 sps:$4 sm:$0xff]   ;;  %v4283_v52 = vld [vmem:[%s6011_s0 + $0x248] ss:$36 sps:$4 sm:$0xff]  }
  0x49   : > { %3714 = vmatprep.subr.bf16.mxu1 %v4210_v53  ;;  %1915 = vmatprep.mubr.bf16.mxu1 %v4216_v56  ;;  %v4287_v53 = vld [vmem:[%s6011_s0 + $0x294] ss:$36 sps:$4 sm:$0xff]   ;;  %v4299_v55 = vld [vmem:[%s6012_s1 + $0x208] sm:$0xff]  }
  0x4a   : > { %3823 = vmatpush3.bf16.msra.mxu0 %v4245_v6  ;;  %v4314_v56 = vld [vmem:[%s6012_s1 + $0x210] sm:$0xff]  }
  0x4b   : > { %3824 = vmatprep.subr.bf16.mxu0 %v4260_v15  ;;  %v4370_v6 = vld [vmem:[%s6012_s1 + $0x230] sm:$0xff]   ;;  %v4322_v15 = vld [vmem:[%s6011_s0 + $0x178] ss:$36 sps:$4 sm:$0xff]  }
  0x4c   : > { %3715 = vmatpush3.bf16.msra.mxu1 %v4211_v57  ;;  %v4291_v57 = vld [vmem:[%s6011_s0 + $0x290] ss:$36 sps:$4 sm:$0xff]  }
  0x4d   : > { %3924 = vmatprep.subr.bf16.mxu1 %v4219_v60  ;;  %v4295_v60 = vld [vmem:[%s6011_s0 + $0xa4] ss:$36 sps:$4 sm:$0xff]  }
  0x4e   : > { %3825 = vmatpush3.bf16.msra.mxu0 %v4261_v16  ;;  %v4323_v16 = vld [vmem:[%s6011_s0 + $0x3fc] ss:$36 sps:$4 sm:$0xff]  }
  0x4f   : > { %1787 = vmatmul.mubr.bf16.gmra.mrb[16].mxu0 %v4217_v59  ;;  %1916 = vmatmul.mubr.bf16.vlgmr.msra.gmra.mrb[16].mxu1 %v4214_v58  ;;  %v4292_v58 = vld [vmem:[%s6011_s0 + $0x58] ss:$36 sps:$4 sm:$0xff]  }
  0x50   : > { %3925 = vmatpush3.bf16.msra.mxu1 %v4221_v61  ;;  %1794 = vmatprep.mubr.bf16.mxu0 %v4222_v62  ;;  %v4293_v59 = vld [vmem:[%s6011_s0 + $0x2dc] ss:$36 sps:$4 sm:$0xff]  }
  0x51   : > { %1923 = vmatprep.mubr.bf16.mxu1 %v4224_v1  ;;  %3926 = vmatprep.subr.bf16.mxu1 %v4236_v2  ;;  %v4329_v61 = vld [vmem:[%s6012_s1 + $0x218] sm:$0xff]   ;;  %v4344_v62 = vld [vmem:[%s6012_s1 + $0x220] sm:$0xff]   ;;  %v4304_v2 = vld [vmem:[%s6011_s0 + $0xec] ss:$36 sps:$4 sm:$0xff]  }
  0x52   : > { %3826 = vmatprep.subr.bf16.mxu0 %v4268_v18  ;;  %v4302_v1 = vld [vmem:[%s6011_s0 + $0x324] ss:$36 sps:$4 sm:$0xff]   ;;  %v4327_v18 = vld [vmem:[%s6011_s0 + $0x3f8] ss:$36 sps:$4 sm:$0xff]  }
  0x53   : > { %3827 = vmatpush3.bf16.msra.mxu0 %v4270_v21  ;;  %v4334_v21 = vld [vmem:[%s6011_s0 + $0x20c] ss:$36 sps:$4 sm:$0xff]  }
  0x54   : > { %3927 = vmatpush3.bf16.msra.mxu1 %v4237_v3  ;;  %4060 = vmatprep.subr.bf16.mxu0 %v4284_v26  ;;  %v4357_v3 = vld [vmem:[%s6012_s1 + $0x228] sm:$0xff]  }
  0x55   : > { %3928 = vmatprep.subr.bf16.mxu1 %v4252_v10  ;;  %v4312_v10 = vld [vmem:[%s6011_s0 + $0x368] ss:$36 sps:$4 sm:$0xff]  }
  0x57   : > { %1795 = vmatmul.mubr.bf16.gmra.mrb[20].mxu0 %v4226_v4  ;;  %1924 = vmatmul.mubr.bf16.gmra.mrb[20].mxu1 %v4227_v7  ;;  %v4306_v4 = vld [vmem:[%s6011_s0 + $0x320] ss:$36 sps:$4 sm:$0xff]   ;;  %v4308_v7 = vld [vmem:[%s6011_s0 + $0x36c] ss:$36 sps:$4 sm:$0xff]  }
  0x58   : > { %1802 = vmatprep.mubr.bf16.mxu0 %v4228_v8  ;;  %1931 = vmatprep.mubr.bf16.mxu1 %v4230_v9  ;;  %v4310_v8 = vld [vmem:[%s6011_s0 + $0x134] ss:$36 sps:$4 sm:$0xff]  }
  0x59   : > { %3929 = vmatpush3.bf16.msra.mxu1 %v4253_v11  ;;  %v4383_v9 = vld [vmem:[%s6012_s1 + $0x238] sm:$0xff]   ;;  %v4313_v11 = vld [vmem:[%s6011_s0 + $0x130] ss:$36 sps:$4 sm:$0xff]  }
  0x5a   : > { %3930 = vmatprep.subr.bf16.mxu1 %v4269_v19  ;;  %v4328_v19 = vld [vmem:[%s6011_s0 + $0x1c0] ss:$36 sps:$4 sm:$0xff]  }
  0x5d   : > { %3931 = vmatpush3.bf16.msra.mxu1 %v4271_v22  ;;  %v4336_v22 = vld [vmem:[%s6011_s0 + $0x440] ss:$36 sps:$4 sm:$0xff]  }
  0x5e   : > { %3932 = vmatprep.subr.bf16.mxu1 %v4285_v28  ;;  %v4345_v28 = vld [vmem:[%s6011_s0 + $0x29c] ss:$36 sps:$4 sm:$0xff]  }
  0x5f   : > { %1803 = vmatmul.mubr.bf16.gmra.mrb[24].mxu0 %v4232_v12  ;;  %1932 = vmatmul.mubr.bf16.gmra.mrb[24].mxu1 %v4233_v13  ;;  %v4317_v12 = vld [vmem:[%s6011_s0 + $0x3b4] ss:$36 sps:$4 sm:$0xff]   ;;  %v4319_v13 = vld [vmem:[%s6011_s0 + $0x17c] ss:$36 sps:$4 sm:$0xff]  }
  0x60   : > { %1810 = vmatprep.mubr.bf16.mxu0 %v4238_v14  ;;  %1939 = vmatprep.mubr.bf16.mxu1 %v4240_v17  ;;  %v4321_v14 = vld [vmem:[%s6011_s0 + $0x3b0] ss:$36 sps:$4 sm:$0xff]   ;;  %v4325_v17 = vld [vmem:[%s6011_s0 + $0x1c4] ss:$36 sps:$4 sm:$0xff]  }
  0x61   : > { %3933 = vmatpush3.bf16.msra.mxu1 %v4286_v29  ;;  %v4347_v29 = vld [vmem:[%s6011_s0 + $0x64] ss:$36 sps:$4 sm:$0xff]  }
  0x62   : > { %3934 = vmatprep.subr.bf16.mxu1 %v4300_v35  ;;  %v4356_v35 = vld [vmem:[%s6011_s0 + $0xa8] ss:$36 sps:$4 sm:$0xff]  }
  0x65   : > { %3935 = vmatpush3.bf16.msra.mxu1 %v4301_v36  ;;  %v4358_v36 = vld [vmem:[%s6011_s0 + $0x32c] ss:$36 sps:$4 sm:$0xff]  }
  0x66   : > { %3936 = vmatprep.subr.bf16.mxu1 %v4315_v42  ;;  %v4368_v42 = vld [vmem:[%s6011_s0 + $0x370] ss:$36 sps:$4 sm:$0xff]  }
  0x67   : > { %1811 = vmatmul.mubr.bf16.gmra.mrb[28].mxu0 %v4242_v20  ;;  %1940 = vmatmul.mubr.bf16.gmra.mrb[28].mxu1 %v4243_v23  ;;  %v4332_v20 = vld [vmem:[%s6011_s0 + $0x444] ss:$36 sps:$4 sm:$0xff]  }
  0x68   : > { %1818 = vmatprep.mubr.bf16.mxu0 %v4246_v24  ;;  %1947 = vmatprep.mubr.bf16.mxu1 %v4248_v25  ;;  %v4337_v23 = vld [vmem:[%s6011_s0 + $0x208] ss:$36 sps:$4 sm:$0xff]   ;;  %v4338_v24 = vld [vmem:[%s6011_s0 + $0x254] ss:$36 sps:$4 sm:$0xff]   ;;  %v4342_v25 = vld [vmem:[%s6011_s0 + $0x1c] ss:$36 sps:$4 sm:$0xff]  }
  0x69   : > { %3937 = vmatpush3.bf16.msra.mxu1 %v4316_v43  ;;  %v4369_v43 = vld [vmem:[%s6011_s0 + $0x138] ss:$36 sps:$4 sm:$0xff]  }
  0x6a   : > { %3938 = vmatprep.subr.bf16.mxu1 %v4330_v48  ;;  %v4377_v48 = vld [vmem:[%s6011_s0 + $0x404] ss:$36 sps:$4 sm:$0xff]  }
  0x6d   : > { %3939 = vmatpush3.bf16.msra.mxu1 %v4331_v49  ;;  %v4379_v49 = vld [vmem:[%s6011_s0 + $0x1cc] ss:$36 sps:$4 sm:$0xff]  }
  0x6f   : > { %1819 = vmatmul.mubr.bf16.gmra.mrb[32].mxu0 %v4250_v27  ;;  %1948 = vmatmul.mubr.bf16.gmra.mrb[32].mxu1 %v4251_v30  ;;  %v4343_v27 = vld [vmem:[%s6011_s0 + $0x250] ss:$36 sps:$4 sm:$0xff]   ;;  %v4349_v30 = vld [vmem:[%s6011_s0 + $0x298] ss:$36 sps:$4 sm:$0xff]  }
  0x70   : > { %1826 = vmatprep.mubr.bf16.mxu0 %v4254_v31  ;;  %1955 = vmatprep.mubr.bf16.mxu1 %v4256_v32  ;;  %v4350_v31 = vld [vmem:[%s6011_s0 + $0x60] ss:$36 sps:$4 sm:$0xff]  }
  0x71   : > { %v4351_v32 = vld [vmem:[%s6011_s0 + $0x2e4] ss:$36 sps:$4 sm:$0xff]  }
  0x77   : > { %1827 = vmatmul.mubr.bf16.gmra.mrb[36].mxu0 %v4258_v33  ;;  %1956 = vmatmul.mubr.bf16.gmra.mrb[36].mxu1 %v4259_v34  ;;  %v4353_v33 = vld [vmem:[%s6011_s0 + $0xac] ss:$36 sps:$4 sm:$0xff]   ;;  %v4355_v34 = vld [vmem:[%s6011_s0 + $0x2e0] ss:$36 sps:$4 sm:$0xff]  }
  0x78   : > { %1834 = vmatprep.mubr.bf16.mxu0 %v4262_v37  ;;  %1963 = vmatprep.mubr.bf16.mxu1 %v4264_v38  ;;  %v4360_v37 = vld [vmem:[%s6011_s0 + $0xf4] ss:$36 sps:$4 sm:$0xff]   ;;  %v4362_v38 = vld [vmem:[%s6011_s0 + $0x328] ss:$36 sps:$4 sm:$0xff]  }
  0x7f   : > { %1835 = vmatmul.mubr.bf16.gmra.mrb[40].mxu0 %v4266_v39  ;;  %1964 = vmatmul.mubr.bf16.gmra.mrb[40].mxu1 %v4267_v40  ;;  %v4363_v39 = vld [vmem:[%s6011_s0 + $0xf0] ss:$36 sps:$4 sm:$0xff]  }
  0x80   : > { %1842 = vmatprep.mubr.bf16.mxu0 %v4272_v41  ;;  %1971 = vmatprep.mubr.bf16.mxu1 %v4274_v44  ;;  %v4364_v40 = vld [vmem:[%s6011_s0 + $0x374] ss:$36 sps:$4 sm:$0xff]   ;;  %v4366_v41 = vld [vmem:[%s6011_s0 + $0x13c] ss:$36 sps:$4 sm:$0xff]  }
  0x81   : > { %v4371_v44 = vld [vmem:[%s6011_s0 + $0x3bc] ss:$36 sps:$4 sm:$0xff]  }
  0x87   : > { %1843 = vmatmul.mubr.bf16.gmra.mrb[44].mxu0 %v4276_v45  ;;  %1972 = vmatmul.mubr.bf16.gmra.mrb[44].mxu1 %v4277_v46  ;;  %v4373_v45 = vld [vmem:[%s6011_s0 + $0x184] ss:$36 sps:$4 sm:$0xff]   ;;  %v4375_v46 = vld [vmem:[%s6011_s0 + $0x3b8] ss:$36 sps:$4 sm:$0xff]  }
  0x88   : > { %1979 = vmatprep.mubr.bf16.mxu1 %v4278_v47  ;;  %2076 = vmatprep.mubr.bf16.mxu0 %v4282_v50  ;;  %v4376_v47 = vld [vmem:[%s6011_s0 + $0x180] ss:$36 sps:$4 sm:$0xff]  }
  0x89   : > { %v4381_v50 = vld [vmem:[%s6011_s0 + $0x400] ss:$36 sps:$4 sm:$0xff]  }
  0x8f   : > { %1980 = vmatmul.mubr.bf16.gmra.mrb[48].mxu1 %v4283_v52  ;;  %2077 = vmatmul.mubr.bf16.vlgmr.msra.gmra.mrb[48].mxu0 %v4280_v51  ;;  %v4382_v51 = vld [vmem:[%s6011_s0 + $0x1c8] ss:$36 sps:$4 sm:$0xff]  }
  0x90   : > { %4061 = vmatpush3.bf16.msra.mxu0 %v4284_v26  ;;  %1987 = vmatprep.mubr.bf16.mxu1 %v4287_v53  ;;  %v4340_v26 = vld [vmem:[%s6011_s0 + $0x18] ss:$36 sps:$4 sm:$0xff]   ;;  %v4384_v52 = vld [vmem:[%s6011_s0 + $0x44c] ss:$36 sps:$4 sm:$0xff]  }
  0x91   : > { %2084 = vmatprep.mubr.bf16.mxu0 %v4289_v54  ;;  %4062 = vmatprep.subr.bf16.mxu0 %v4299_v55  ;;  %v4386_v53 = vld [vmem:[%s6011_s0 + $0x214] ss:$36 sps:$4 sm:$0xff]  }
  0x94   : > { %4063 = vmatpush3.bf16.msra.mxu0 %v4299_v55 }
  0x95   : > { %4064 = vmatprep.subr.bf16.mxu0 %v4314_v56 }
  0x97   : > { %1988 = vmatmul.mubr.bf16.gmra.mrb[52].mxu1 %v4291_v57  ;;  %2085 = vmatmul.mubr.bf16.gmra.mrb[52].mxu0 %v4292_v58  ;;  %v4388_v58 = vld [vmem:[%s6011_s0 + $0x448] ss:$36 sps:$4 sm:$0xff]  }
  0x98   : > { %1995 = vmatprep.mubr.bf16.mxu1 %v4293_v59  ;;  %2092 = vmatprep.mubr.bf16.mxu0 %v4295_v60  ;;  %v4389_v59 = vld [vmem:[%s6011_s0 + $0x210] ss:$36 sps:$4 sm:$0xff]  }
  0x99   : > { %4065 = vmatpush3.bf16.msra.mxu0 %v4314_v56 }
  0x9a   : > { %4066 = vmatprep.subr.bf16.mxu0 %v4329_v61 }
  0x9d   : > { %4067 = vmatpush3.bf16.msra.mxu0 %v4329_v61 }
  0x9e   : > { %4068 = vmatprep.subr.bf16.mxu0 %v4344_v62 }
  0x9f   : > { %1996 = vmatmul.mubr.bf16.gmra.mrb[56].mxu1 %v4297_v63  ;;  %2093 = vmatmul.mubr.bf16.gmra.mrb[56].mxu0 %v4298_v0  ;;  %v4390_v0 = vld [vmem:[%s6011_s0 + $0x25c] ss:$36 sps:$4 sm:$0xff]  }
  0xa0   : > { %2003 = vmatprep.mubr.bf16.mxu1 %v4302_v1  ;;  %2100 = vmatprep.mubr.bf16.mxu0 %v4304_v2  ;;  %v4392_v1 = vld [vmem:[%s6011_s0 + $0x20] ss:$36 sps:$4 sm:$0xff]  }
  0xa1   : > { %4069 = vmatpush3.bf16.msra.mxu0 %v4344_v62 }
  0xa2   : > { %4070 = vmatprep.subr.bf16.mxu0 %v4357_v3 }
  0xa5   : > { %4071 = vmatpush3.bf16.msra.mxu0 %v4357_v3 }
  0xa6   : > { %4072 = vmatprep.subr.bf16.mxu0 %v4370_v6 }
  0xa7   : > { %2004 = vmatmul.mubr.bf16.gmra.mrb[60].mxu1 %v4306_v4  ;;  %2101 = vmatmul.mubr.bf16.gmra.mrb[60].mxu0 %v4307_v5 }
  0xa8   : > { %2011 = vmatprep.mubr.bf16.mxu1 %v4308_v7  ;;  %2108 = vmatprep.mubr.bf16.mxu0 %v4310_v8 }
  0xa9   : > { %4073 = vmatpush3.bf16.msra.mxu0 %v4370_v6 }
  0xaa   : > { %4074 = vmatprep.subr.bf16.mxu0 %v4383_v9 }
  0xad   : > { %4075 = vmatpush3.bf16.msra.mxu0 %v4383_v9 }
  0xaf   : > { %2012 = vmatmul.mubr.bf16.gmra.mrb[64].mxu1 %v4312_v10  ;;  %2109 = vmatmul.mubr.bf16.gmra.mrb[64].mxu0 %v4313_v11  ;;  %v4393_v10 = vld [vmem:[%s6011_s0 + $0x258] ss:$36 sps:$4 sm:$0xff]   ;;  %v4394_v11 = vld [vmem:[%s6011_s0 + $0x68] ss:$36 sps:$4 sm:$0xff]  }
  0xb0   : > { %2019 = vmatprep.mubr.bf16.mxu1 %v4317_v12  ;;  %2116 = vmatprep.mubr.bf16.mxu0 %v4319_v13 }
  0xb7   : > { %2020 = vmatmul.mubr.bf16.gmra.mrb[68].mxu1 %v4321_v14  ;;  %2117 = vmatmul.mubr.bf16.gmra.mrb[68].mxu0 %v4322_v15 }
  0xb8   : > { %2027 = vmatprep.mubr.bf16.mxu1 %v4323_v16  ;;  %2124 = vmatprep.mubr.bf16.mxu0 %v4325_v17  ;;  %v4395_v16 = vld [vmem:[%s6011_s0 + $0x2a4] ss:$36 sps:$4 sm:$0xff]   ;;  %v4397_v17 = vld [vmem:[%s6011_s0 + $0xb0] ss:$36 sps:$4 sm:$0xff]  }
  0xbf   : > { %2028 = vmatmul.mubr.bf16.gmra.mrb[72].mxu1 %v4327_v18  ;;  %2125 = vmatmul.mubr.bf16.gmra.mrb[72].mxu0 %v4328_v19 }
  0xc0   : > { %2035 = vmatprep.mubr.bf16.mxu1 %v4332_v20  ;;  %2132 = vmatprep.mubr.bf16.mxu0 %v4334_v21 }
  0xc7   : > { %2036 = vmatmul.mubr.bf16.gmra.mrb[76].mxu1 %v4336_v22  ;;  %2133 = vmatmul.mubr.bf16.gmra.mrb[76].mxu0 %v4337_v23 }
  0xc8   : > { %2140 = vmatprep.mubr.bf16.mxu0 %v4338_v24  ;;  %2237 = vmatprep.mubr.bf16.mxu1 %v4342_v25 }
  0xcf   : > { %2141 = vmatmul.mubr.bf16.gmra.mrb[80].mxu0 %v4343_v27  ;;  %2238 = vmatmul.mubr.bf16.vlgmr.msra.gmra.mrb[80].mxu1 %v4340_v26  ;;  %v4398_v26 = vld [vmem:[%s6011_s0 + $0x2a0] ss:$36 sps:$4 sm:$0xff]   ;;  %v4399_v27 = vld [vmem:[%s6011_s0 + $0xf8] ss:$36 sps:$4 sm:$0xff]  }
  0xd0   : > { %2148 = vmatprep.mubr.bf16.mxu0 %v4345_v28  ;;  %2245 = vmatprep.mubr.bf16.mxu1 %v4347_v29 }
  0xd7   : > { %2149 = vmatmul.mubr.bf16.gmra.mrb[84].mxu0 %v4349_v30  ;;  %2246 = vmatmul.mubr.bf16.gmra.mrb[84].mxu1 %v4350_v31 }
  0xd8   : > { %2156 = vmatprep.mubr.bf16.mxu0 %v4351_v32  ;;  %2253 = vmatprep.mubr.bf16.mxu1 %v4353_v33  ;;  %v4400_v32 = vld [vmem:[%s6011_s0 + $0x2ec] ss:$36 sps:$4 sm:$0xff]   ;;  %v4402_v33 = vld [vmem:[%s6011_s0 + $0x140] ss:$36 sps:$4 sm:$0xff]  }
  0xdf   : > { %2157 = vmatmul.mubr.bf16.gmra.mrb[88].mxu0 %v4355_v34  ;;  %2254 = vmatmul.mubr.bf16.gmra.mrb[88].mxu1 %v4356_v35 }
  0xe0   : > { %2164 = vmatprep.mubr.bf16.mxu0 %v4358_v36  ;;  %2261 = vmatprep.mubr.bf16.mxu1 %v4360_v37 }
  0xe7   : > { %2165 = vmatmul.mubr.bf16.gmra.mrb[92].mxu0 %v4362_v38  ;;  %2262 = vmatmul.mubr.bf16.gmra.mrb[92].mxu1 %v4363_v39 }
  0xe8   : > { %2172 = vmatprep.mubr.bf16.mxu0 %v4364_v40  ;;  %2269 = vmatprep.mubr.bf16.mxu1 %v4366_v41 }
  0xef   : > { %2173 = vmatmul.mubr.bf16.gmra.mrb[96].mxu0 %v4368_v42  ;;  %2270 = vmatmul.mubr.bf16.gmra.mrb[96].mxu1 %v4369_v43  ;;  %v4403_v42 = vld [vmem:[%s6011_s0 + $0x2e8] ss:$36 sps:$4 sm:$0xff]  }
  0xf0   : > { %2180 = vmatprep.mubr.bf16.mxu0 %v4371_v44  ;;  %2277 = vmatprep.mubr.bf16.mxu1 %v4373_v45  ;;  %v4404_v43 = vld [vmem:[%s6011_s0 + $0x188] ss:$36 sps:$4 sm:$0xff]  }
  0xf7   : > { %2181 = vmatmul.mubr.bf16.gmra.mrb[100].mxu0 %v4375_v46  ;;  %2278 = vmatmul.mubr.bf16.gmra.mrb[100].mxu1 %v4376_v47 }
  0xf8   : > { %2188 = vmatprep.mubr.bf16.mxu0 %v4377_v48  ;;  %2285 = vmatprep.mubr.bf16.mxu1 %v4379_v49  ;;  %v4405_v48 = vld [vmem:[%s6011_s0 + $0x334] ss:$36 sps:$4 sm:$0xff]  }
  0xf9   : > { %v4407_v49 = vld [vmem:[%s6011_s0 + $0x1d0] ss:$36 sps:$4 sm:$0xff]  }
  0xff   : > { %2189 = vmatmul.mubr.bf16.gmra.mrb[104].mxu0 %v4381_v50  ;;  %2286 = vmatmul.mubr.bf16.gmra.mrb[104].mxu1 %v4382_v51 }
 0x100   : > { %2196 = vmatprep.mubr.bf16.mxu0 %v4384_v52  ;;  %2293 = vmatprep.mubr.bf16.mxu1 %v4386_v53 }
 0x102   : > { %v3604_v54 = vpop.f32.mrb[0].mxu0  ;;  %v3676_v55 = vpop.f32.mrb[0].mxu1 }
 0x103   : > { %v3605_v56 = vpop.f32.mrb[1].mxu0  ;;  %v3677_v57 = vpop.f32.mrb[1].mxu1 }
 0x104   : > { %v5072_v60 = vadd.f32 %v3605_v56, %v3604_v54  ;;  %v3607_v61 = vpop.f32.mrb[2].mxu0  ;;  %v5074_v62 = vadd.f32 %v3677_v57, %v3676_v55  ;;  %v3679_v63 = vpop.f32.mrb[2].mxu1 }
 0x105   : > { %v3608_v2 = vpop.f32.mrb[3].mxu0  ;;  %v3680_v3 = vpop.f32.mrb[3].mxu1 }
 0x106   : > { %v5082_v4 = vadd.f32 %v3608_v2, %v3607_v61  ;;  %v5084_v5 = vadd.f32 %v3680_v3, %v3679_v63  ;;  %v4410_v2 = vld [vmem:[%s6011_s0 + $0x37c] ss:$36 sps:$4 sm:$0xff]  }
 0x107   : > { %2197 = vmatmul.mubr.bf16.gmra.mrb[108].mxu0 %v4388_v58  ;;  %2294 = vmatmul.mubr.bf16.gmra.mrb[108].mxu1 %v4389_v59  ;;  %v4408_v58 = vld [vmem:[%s6011_s0 + $0x330] ss:$36 sps:$4 sm:$0xff]   ;;  %v4409_v59 = vld [vmem:[%s6011_s0 + $0x218] ss:$36 sps:$4 sm:$0xff]   ;;  %v4412_v3 = vld [vmem:[%s6011_s0 + $0x260] ss:$36 sps:$4 sm:$0xff]  }
 0x108   : > { %2301 = vmatprep.mubr.bf16.mxu1 %v4390_v0  ;;  %4076 = vmatprep.mubr.bf16.mxu0 %v4392_v1 }
 0x10a   : > { %v3610_v6 = vpop.f32.mrb[4].mxu0  ;;  %v3682_v7 = vpop.f32.mrb[4].mxu1 }
 0x10b   : > { %v3611_v8 = vpop.f32.mrb[5].mxu0  ;;  %v3683_v9 = vpop.f32.mrb[5].mxu1 }
 0x10c   : > { %v5092_v12 = vadd.f32 %v3611_v8, %v3610_v6  ;;  %v3613_v13 = vpop.f32.mrb[6].mxu0  ;;  %v5094_v14 = vadd.f32 %v3683_v9, %v3682_v7  ;;  %v3685_v15 = vpop.f32.mrb[6].mxu1 }
 0x10d   : > { %v3614_v18 = vpop.f32.mrb[7].mxu0  ;;  %v3686_v19 = vpop.f32.mrb[7].mxu1 }
 0x10e   : > { %v5102_v20 = vadd.f32 %v3614_v18, %v3613_v13  ;;  %v5104_v21 = vadd.f32 %v3686_v19, %v3685_v15  ;;  %v4413_v18 = vld [vmem:[%s6011_s0 + $0x378] ss:$36 sps:$4 sm:$0xff]  }
 0x10f   : > { %2302 = vmatmul.mubr.bf16.gmra.mrb[112].mxu1 %v4393_v10  ;;  %4077 = vmatmul.mubr.bf16.vlgmr.msra.gmra.mrb[112].mxu0 %v4394_v11 }
 0x110   : > { %2309 = vmatprep.mubr.bf16.mxu1 %v4395_v16  ;;  %4080 = vmatprep.mubr.bf16.mxu0 %v4397_v17 }
 0x112   : > { %v3616_v22 = vpop.f32.mrb[8].mxu0  ;;  %v3688_v23 = vpop.f32.mrb[8].mxu1 }
 0x113   : > { %v3617_v24 = vpop.f32.mrb[9].mxu0  ;;  %v3689_v25 = vpop.f32.mrb[9].mxu1 }
 0x114   : > { %v5112_v28 = vadd.f32 %v3617_v24, %v3616_v22  ;;  %v3619_v29 = vpop.f32.mrb[10].mxu0  ;;  %v5114_v30 = vadd.f32 %v3689_v25, %v3688_v23  ;;  %v3691_v31 = vpop.f32.mrb[10].mxu1  ;;  %v4415_v24 = vld [vmem:[%s6011_s0 + $0x3c4] ss:$36 sps:$4 sm:$0xff]   ;;  %v4417_v25 = vld [vmem:[%s6011_s0 + $0x2f0] ss:$36 sps:$4 sm:$0xff]  }
 0x115   : > { %v3620_v34 = vpop.f32.mrb[11].mxu0  ;;  %v3692_v35 = vpop.f32.mrb[11].mxu1 }
 0x116   : > { %v5122_v36 = vadd.f32 %v3620_v34, %v3619_v29  ;;  %v5124_v37 = vadd.f32 %v3692_v35, %v3691_v31 }
 0x117   : > { %2310 = vmatmul.mubr.bf16.gmra.mrb[116].mxu1 %v4398_v26  ;;  %4081 = vmatmul.mubr.bf16.gmra.mrb[116].mxu0 %v4399_v27 }
 0x118   : > { %2317 = vmatprep.mubr.bf16.mxu1 %v4400_v32  ;;  %4084 = vmatprep.mubr.bf16.mxu0 %v4402_v33 }
 0x11a   : > { %v3622_v38 = vpop.f32.mrb[12].mxu0  ;;  %v3694_v39 = vpop.f32.mrb[12].mxu1 }
 0x11b   : > { %v3623_v40 = vpop.f32.mrb[13].mxu0  ;;  %v3695_v41 = vpop.f32.mrb[13].mxu1 }
 0x11c   : > { %v5132_v44 = vadd.f32 %v3623_v40, %v3622_v38  ;;  %v3625_v45 = vpop.f32.mrb[14].mxu0  ;;  %v5134_v46 = vadd.f32 %v3695_v41, %v3694_v39  ;;  %v3697_v47 = vpop.f32.mrb[14].mxu1  ;;  %v4418_v40 = vld [vmem:[%s6011_s0 + $0x3c0] ss:$36 sps:$4 sm:$0xff]  }
 0x11d   : > { %v3626_v50 = vpop.f32.mrb[15].mxu0  ;;  %v3698_v51 = vpop.f32.mrb[15].mxu1 }
 0x11e   : > { %v5142_v52 = vadd.f32 %v3626_v50, %v3625_v45  ;;  %v5144_v53 = vadd.f32 %v3698_v51, %v3697_v47  ;;  %v4420_v45 = vld [vmem:[%s6011_s0 + $0x40c] ss:$36 sps:$4 sm:$0xff]   ;;  %v4422_v47 = vld [vmem:[%s6011_s0 + $0x380] ss:$36 sps:$4 sm:$0xff]  }
 0x11f   : > { %2318 = vmatmul.mubr.bf16.gmra.mrb[120].mxu1 %v4403_v42  ;;  %4085 = vmatmul.mubr.bf16.gmra.mrb[120].mxu0 %v4404_v43 }
 0x120   : > { %2325 = vmatprep.mubr.bf16.mxu1 %v4405_v48  ;;  %4088 = vmatprep.mubr.bf16.mxu0 %v4407_v49 }
 0x122   : > { %v3628_v54 = vpop.f32.mrb[16].mxu0  ;;  %v3716_v55 = vpop.f32.mrb[16].mxu1 }
 0x123   : > { %v3629_v56 = vpop.f32.mrb[17].mxu0  ;;  %v3717_v57 = vpop.f32.mrb[17].mxu1 }
 0x124   : > { %v5152_v61 = vadd.f32 %v3629_v56, %v3628_v54  ;;  %v3718_v63 = vadd.f32 %v3717_v57, %v3716_v55  ;;  %v3631_v0 = vpop.f32.mrb[18].mxu0  ;;  %v3719_v1 = vpop.f32.mrb[18].mxu1 }
 0x125   : > { %v3632_v6 = vpop.f32.mrb[19].mxu0  ;;  %v3720_v7 = vpop.f32.mrb[19].mxu1 }
 0x126   : > { %v5161_v8 = vadd.f32 %v3718_v63, %v5072_v60  ;;  %v5163_v9 = vadd.f32 %v3632_v6, %v3631_v0  ;;  %v3721_v10 = vadd.f32 %v3720_v7, %v3719_v1  ;;  %v4414_v60 = vld [vmem:[%s6011_s0 + $0x2a8] ss:$36 sps:$4 sm:$0xff]   ;;  %v4427_v6 = vld [vmem:[%s6011_s0 + $0x410] ss:$36 sps:$4 sm:$0xff]  }
 0x127   : > { %2326 = vmatmul.mubr.bf16.gmra.mrb[124].mxu1 %v4408_v58  ;;  %4089 = vmatmul.mubr.bf16.gmra.mrb[124].mxu0 %v4409_v59  ;;  %v4423_v63 = vld [vmem:[%s6011_s0 + $0x408] ss:$36 sps:$4 sm:$0xff]  }
 0x128   : > { %v5166_v11 = vadd.f32 %v3721_v10, %v5082_v4  ;;  %2333 = vmatprep.mubr.bf16.mxu1 %v4410_v2  ;;  %4092 = vmatprep.mubr.bf16.mxu0 %v4412_v3  ;;  %v4425_v3 = vld [vmem:[%s6011_s0 + $0x454] ss:$36 sps:$4 sm:$0xff]  }
 0x12a   : > { %v3634_v13 = vpop.f32.mrb[20].mxu0  ;;  %v3722_v15 = vpop.f32.mrb[20].mxu1 }
 0x12b   : > { %v3635_v16 = vpop.f32.mrb[21].mxu0  ;;  %v3723_v17 = vpop.f32.mrb[21].mxu1 }
 0x12c   : > { %v5174_v19 = vadd.f32 %v3635_v16, %v3634_v13  ;;  %v3724_v22 = vadd.f32 %v3723_v17, %v3722_v15  ;;  %v3637_v23 = vpop.f32.mrb[22].mxu0  ;;  %v3725_v4 = vpop.f32.mrb[22].mxu1 }
 0x12d   : > { %v3638_v26 = vpop.f32.mrb[23].mxu0  ;;  %v3726_v27 = vpop.f32.mrb[23].mxu1 }
 0x12e   : > { %v5183_v29 = vadd.f32 %v3724_v22, %v5092_v12  ;;  %v5185_v31 = vadd.f32 %v3638_v26, %v3637_v23  ;;  %v3727_v32 = vadd.f32 %v3726_v27, %v3725_v4  ;;  %v4419_v12 = vld [vmem:[%s6011_s0 + $0x338] ss:$36 sps:$4 sm:$0xff]   ;;  %v4428_v4 = vld [vmem:[%s6011_s0 + $0x450] ss:$36 sps:$4 sm:$0xff]  }
 0x12f   : > { %2334 = vmatmul.mubr.bf16.gmra.mrb[128].mxu1 %v4413_v18  ;;  %4093 = vmatmul.mubr.bf16.gmra.mrb[128].mxu0 %v4414_v60 }
 0x130   : > { %v5188_v33 = vadd.f32 %v3727_v32, %v5102_v20  ;;  %2341 = vmatprep.mubr.bf16.mxu1 %v4415_v24  ;;  %4096 = vmatprep.mubr.bf16.mxu0 %v4417_v25 }
 0x132   : > { %v3640_v34 = vpop.f32.mrb[24].mxu0  ;;  %v3728_v35 = vpop.f32.mrb[24].mxu1 }
 0x133   : > { %v3641_v38 = vpop.f32.mrb[25].mxu0  ;;  %v3729_v39 = vpop.f32.mrb[25].mxu1 }
 0x134   : > { %v5196_v41 = vadd.f32 %v3641_v38, %v3640_v34  ;;  %v3730_v42 = vadd.f32 %v3729_v39, %v3728_v35  ;;  %v3643_v43 = vpop.f32.mrb[26].mxu0  ;;  %v3731_v20 = vpop.f32.mrb[26].mxu1 }
 0x135   : > { %v3644_v48 = vpop.f32.mrb[27].mxu0  ;;  %v3732_v49 = vpop.f32.mrb[27].mxu1 }
 0x136   : > { %v5205_v50 = vadd.f32 %v3730_v42, %v5112_v28  ;;  %v5207_v51 = vadd.f32 %v3644_v48, %v3643_v43  ;;  %v3733_v54 = vadd.f32 %v3732_v49, %v3731_v20  ;;  %v4424_v28 = vld [vmem:[%s6011_s0 + $0x3c8] ss:$36 sps:$4 sm:$0xff]  }
 0x137   : > { %2342 = vmatmul.mubr.bf16.gmra.mrb[132].mxu1 %v4418_v40  ;;  %4097 = vmatmul.mubr.bf16.gmra.mrb[132].mxu0 %v4419_v12 }
 0x138   : > { %v5210_v55 = vadd.f32 %v3733_v54, %v5122_v36  ;;  %2349 = vmatprep.mubr.bf16.mxu1 %v4420_v45  ;;  %4100 = vmatprep.mubr.bf16.mxu0 %v4422_v47 }
 0x13a   : > { %v3646_v56 = vpop.f32.mrb[28].mxu0  ;;  %v3734_v57 = vpop.f32.mrb[28].mxu1 }
 0x13b   : > { %v3647_v58 = vpop.f32.mrb[29].mxu0  ;;  %v3735_v59 = vpop.f32.mrb[29].mxu1 }
 0x13c   : > { %v5218_v0 = vadd.f32 %v3647_v58, %v3646_v56  ;;  %v3736_v1 = vadd.f32 %v3735_v59, %v3734_v57  ;;  %v3649_v2 = vpop.f32.mrb[30].mxu0  ;;  %v3737_v36 = vpop.f32.mrb[30].mxu1 }
 0x13d   : > { %v3650_v7 = vpop.f32.mrb[31].mxu0  ;;  %v3738_v10 = vpop.f32.mrb[31].mxu1 }
 0x13e   : > { %v5227_v13 = vadd.f32 %v3736_v1, %v5132_v44  ;;  %v5229_v15 = vadd.f32 %v3650_v7, %v3649_v2  ;;  %v3739_v16 = vadd.f32 %v3738_v10, %v3737_v36  ;;  %v4429_v44 = vld [vmem:[%s6011_s0 + $0x458] ss:$36 sps:$4 sm:$0xff]  }
 0x13f   : > { %2350 = vmatmul.mubr.bf16.gmra.mrb[136].mxu1 %v4423_v63  ;;  %4101 = vmatmul.mubr.bf16.gmra.mrb[136].mxu0 %v4424_v28 }
 0x140   : > { %v5232_v17 = vadd.f32 %v3739_v16, %v5142_v52  ;;  %2357 = vmatprep.mubr.bf16.mxu1 %v4425_v3  ;;  %4104 = vmatprep.mubr.bf16.mxu0 %v4427_v6 }
 0x142   : > { %v3652_v18 = vpop.f32.mrb[32].mxu0  ;;  %v3740_v60 = vpop.f32.mrb[32].mxu1 }
 0x143   : > { %v3653_v22 = vpop.f32.mrb[33].mxu0  ;;  %v3741_v23 = vpop.f32.mrb[33].mxu1 }
 0x144   : > { %v5240_v24 = vadd.f32 %v3653_v22, %v3652_v18  ;;  %v3742_v25 = vadd.f32 %v3741_v23, %v3740_v60  ;;  %v3655_v26 = vpop.f32.mrb[34].mxu0  ;;  %v3743_v52 = vpop.f32.mrb[34].mxu1 }
 0x145   : > { %v3656_v27 = vpop.f32.mrb[35].mxu0  ;;  %v3744_v32 = vpop.f32.mrb[35].mxu1 }
 0x146   : > { %v5243_v34 = vadd.f32 %v3742_v25, %v5152_v61  ;;  %v3657_v35 = vadd.f32 %v3656_v27, %v3655_v26  ;;  %v3745_v38 = vadd.f32 %v3744_v32, %v3743_v52 }
 0x147   : > { %2358 = vmatmul.mubr.bf16.gmra.mrb[140].mxu1 %v4428_v4  ;;  %4105 = vmatmul.mubr.bf16.gmra.mrb[140].mxu0 %v4429_v44 }
 0x148   : > { %v5246_v39 = vadd.f32 %v3745_v38, %v5163_v9 }
 0x14a   : > { %v3658_v40 = vpop.f32.mrb[36].mxu0  ;;  %v3746_v12 = vpop.f32.mrb[36].mxu1 }
 0x14b   : > { %v3659_v42 = vpop.f32.mrb[37].mxu0  ;;  %v3747_v43 = vpop.f32.mrb[37].mxu1 }
 0x14c   : > { %v5248_v20 = vadd.f32 %v3659_v42, %v3658_v40  ;;  %v3748_v45 = vadd.f32 %v3747_v43, %v3746_v12  ;;  %v3661_v47 = vpop.f32.mrb[38].mxu0  ;;  %v3749_v48 = vpop.f32.mrb[38].mxu1 }
 0x14d   : > { %v3662_v49 = vpop.f32.mrb[39].mxu0  ;;  %v3750_v54 = vpop.f32.mrb[39].mxu1 }
 0x14e   : > { %v5251_v61 = vadd.f32 %v3748_v45, %v5174_v19  ;;  %v3663_v56 = vadd.f32 %v3662_v49, %v3661_v47  ;;  %v3751_v57 = vadd.f32 %v3750_v54, %v3749_v48 }
 0x150   : > { %v5254_v58 = vadd.f32 %v3751_v57, %v5185_v31 }
 0x152   : > { %v3664_v9 = vpop.f32.mrb[40].mxu0  ;;  %v3752_v59 = vpop.f32.mrb[40].mxu1 }
 0x153   : > { %v3665_v63 = vpop.f32.mrb[41].mxu0  ;;  %v3753_v28 = vpop.f32.mrb[41].mxu1 }
 0x154   : > { %v5256_v1 = vadd.f32 %v3665_v63, %v3664_v9  ;;  %v3754_v2 = vadd.f32 %v3753_v28, %v3752_v59  ;;  %v3667_v36 = vpop.f32.mrb[42].mxu0  ;;  %v3755_v3 = vpop.f32.mrb[42].mxu1 }
 0x155   : > { %v3668_v6 = vpop.f32.mrb[43].mxu0  ;;  %v3756_v7 = vpop.f32.mrb[43].mxu1 }
 0x156   : > { %v5259_v10 = vadd.f32 %v3754_v2, %v5196_v41  ;;  %v5261_v19 = vadd.f32 %v3668_v6, %v3667_v36  ;;  %v3757_v16 = vadd.f32 %v3756_v7, %v3755_v3 }
 0x158   : > { %v5264_v31 = vadd.f32 %v3757_v16, %v5207_v51 }
 0x15a   : > { %v3670_v18 = vpop.f32.mrb[44].mxu0  ;;  %v3758_v60 = vpop.f32.mrb[44].mxu1 }
 0x15b   : > { %v3671_v22 = vpop.f32.mrb[45].mxu0  ;;  %v3759_v23 = vpop.f32.mrb[45].mxu1 }
 0x15c   : > { %v5266_v4 = vadd.f32 %v3671_v22, %v3670_v18  ;;  %v3760_v44 = vadd.f32 %v3759_v23, %v3758_v60  ;;  %v3673_v25 = vpop.f32.mrb[46].mxu0  ;;  %v3761_v26 = vpop.f32.mrb[46].mxu1 }
 0x15d   : > { %v3674_v52 = vpop.f32.mrb[47].mxu0  ;;  %v3762_v27 = vpop.f32.mrb[47].mxu1 }
 0x15e   : > { %v5269_v41 = vadd.f32 %v3760_v44, %v5218_v0  ;;  %v5271_v32 = vadd.f32 %v3674_v52, %v3673_v25  ;;  %v3763_v38 = vadd.f32 %v3762_v27, %v3761_v26 }
 0x160   : > { %v5274_v51 = vadd.f32 %v3763_v38, %v5229_v15 }
 0x162   : > { %v3764_v40 = vpop.f32.mrb[48].mxu1  ;;  %v3828_v12 = vpop.f32.mrb[48].mxu0 }
 0x163   : > { %v3765_v42 = vpop.f32.mrb[49].mxu1  ;;  %v3829_v43 = vpop.f32.mrb[49].mxu0 }
 0x164   : > { %v3766_v45 = vadd.f32 %v3765_v42, %v3764_v40  ;;  %v3830_v47 = vadd.f32 %v3829_v43, %v3828_v12  ;;  %v3767_v48 = vpop.f32.mrb[50].mxu1  ;;  %v3831_v49 = vpop.f32.mrb[50].mxu0 }
 0x165   : > { %v3768_v54 = vpop.f32.mrb[51].mxu1  ;;  %v3832_v57 = vpop.f32.mrb[51].mxu0 }
 0x166   : > { %v5277_v9 = vadd.f32 %v3766_v45, %v5240_v24  ;;  %v5280_v0 = vadd.f32 %v3830_v47, %v5161_v8  ;;  %v3769_v59 = vadd.f32 %v3768_v54, %v3767_v48  ;;  %v3833_v63 = vadd.f32 %v3832_v57, %v3831_v49 }
 0x168   : > { %v5282_v15 = vadd.f32 %v3769_v59, %v3657_v35  ;;  %v5285_v28 = vadd.f32 %v3833_v63, %v5166_v11 }
 0x16a   : > { %v3770_v2 = vpop.f32.mrb[52].mxu1  ;;  %v3834_v36 = vpop.f32.mrb[52].mxu0 }
 0x16b   : > { %v3771_v3 = vpop.f32.mrb[53].mxu1  ;;  %v3835_v6 = vpop.f32.mrb[53].mxu0 }
 0x16c   : > { %v3772_v7 = vadd.f32 %v3771_v3, %v3770_v2  ;;  %v3836_v16 = vadd.f32 %v3835_v6, %v3834_v36  ;;  %v3773_v18 = vpop.f32.mrb[54].mxu1  ;;  %v3837_v60 = vpop.f32.mrb[54].mxu0 }
 0x16d   : > { %v3774_v24 = vpop.f32.mrb[55].mxu1  ;;  %v3838_v22 = vpop.f32.mrb[55].mxu0 }
 0x16e   : > { %v5288_v8 = vadd.f32 %v3772_v7, %v5248_v20  ;;  %v5291_v23 = vadd.f32 %v3836_v16, %v5183_v29  ;;  %v3775_v35 = vadd.f32 %v3774_v24, %v3773_v18  ;;  %v3839_v44 = vadd.f32 %v3838_v22, %v3837_v60 }
 0x170   : > { %v5293_v11 = vadd.f32 %v3775_v35, %v3663_v56  ;;  %v5296_v25 = vadd.f32 %v3839_v44, %v5188_v33 }
 0x172   : > { %v3776_v26 = vpop.f32.mrb[56].mxu1  ;;  %v3840_v52 = vpop.f32.mrb[56].mxu0 }
 0x173   : > { %v3777_v27 = vpop.f32.mrb[57].mxu1  ;;  %v3841_v38 = vpop.f32.mrb[57].mxu0 }
 0x174   : > { %v3778_v40 = vadd.f32 %v3777_v27, %v3776_v26  ;;  %v3842_v12 = vadd.f32 %v3841_v38, %v3840_v52  ;;  %v3779_v42 = vpop.f32.mrb[58].mxu1  ;;  %v3843_v43 = vpop.f32.mrb[58].mxu0 }
 0x175   : > { %v3780_v20 = vpop.f32.mrb[59].mxu1  ;;  %v3844_v45 = vpop.f32.mrb[59].mxu0 }
 0x176   : > { %v5299_v29 = vadd.f32 %v3778_v40, %v5256_v1  ;;  %v5302_v47 = vadd.f32 %v3842_v12, %v5205_v50  ;;  %v3781_v56 = vadd.f32 %v3780_v20, %v3779_v42  ;;  %v3845_v48 = vadd.f32 %v3844_v45, %v3843_v43 }
 0x178   : > { %v5305_v33 = vadd.f32 %v3781_v56, %v5261_v19  ;;  %v5308_v49 = vadd.f32 %v3845_v48, %v5210_v55 }
 0x17a   : > { %v3782_v54 = vpop.f32.mrb[60].mxu1  ;;  %v3846_v57 = vpop.f32.mrb[60].mxu0 }
 0x17b   : > { %v3783_v59 = vpop.f32.mrb[61].mxu1  ;;  %v3847_v63 = vpop.f32.mrb[61].mxu0 }
 0x17c   : > { %v3784_v2 = vadd.f32 %v3783_v59, %v3782_v54  ;;  %v3848_v36 = vadd.f32 %v3847_v63, %v3846_v57  ;;  %v3785_v3 = vpop.f32.mrb[62].mxu1  ;;  %v3849_v1 = vpop.f32.mrb[62].mxu0 }
 0x17d   : > { %v3786_v6 = vpop.f32.mrb[63].mxu1  ;;  %v3850_v7 = vpop.f32.mrb[63].mxu0 }
 0x17e   : > { %v5311_v50 = vadd.f32 %v3784_v2, %v5266_v4  ;;  %v5314_v16 = vadd.f32 %v3848_v36, %v5227_v13  ;;  %v3787_v19 = vadd.f32 %v3786_v6, %v3785_v3  ;;  %v3851_v18 = vadd.f32 %v3850_v7, %v3849_v1 }
 0x180   : > { %v5317_v55 = vadd.f32 %v3787_v19, %v5271_v32  ;;  %v5320_v60 = vadd.f32 %v3851_v18, %v5232_v17 }
 0x182   : > { %v3788_v24 = vpop.f32.mrb[64].mxu1  ;;  %v3852_v22 = vpop.f32.mrb[64].mxu0 }
 0x183   : > { %v3789_v35 = vpop.f32.mrb[65].mxu1  ;;  %v3853_v44 = vpop.f32.mrb[65].mxu0 }
 0x184   : > { %v3790_v26 = vadd.f32 %v3789_v35, %v3788_v24  ;;  %v3854_v52 = vadd.f32 %v3853_v44, %v3852_v22  ;;  %v3791_v27 = vpop.f32.mrb[66].mxu1  ;;  %v3855_v4 = vpop.f32.mrb[66].mxu0 }
 0x185   : > { %v3792_v38 = vpop.f32.mrb[67].mxu1  ;;  %v3856_v40 = vpop.f32.mrb[67].mxu0 }
 0x186   : > { %v5323_v13 = vadd.f32 %v3790_v26, %v5074_v62  ;;  %v5326_v12 = vadd.f32 %v3854_v52, %v5243_v34  ;;  %v3793_v32 = vadd.f32 %v3792_v38, %v3791_v27  ;;  %v3857_v42 = vadd.f32 %v3856_v40, %v3855_v4 }
 0x188   : > { %v5329_v17 = vadd.f32 %v3793_v32, %v5084_v5  ;;  %v5332_v43 = vadd.f32 %v3857_v42, %v5246_v39 }
 0x18a   : > { %v3794_v20 = vpop.f32.mrb[68].mxu1  ;;  %v3858_v45 = vpop.f32.mrb[68].mxu0 }
 0x18b   : > { %v3795_v56 = vpop.f32.mrb[69].mxu1  ;;  %v3859_v48 = vpop.f32.mrb[69].mxu0 }
 0x18c   : > { %v3796_v54 = vadd.f32 %v3795_v56, %v3794_v20  ;;  %v3860_v57 = vadd.f32 %v3859_v48, %v3858_v45  ;;  %v3797_v59 = vpop.f32.mrb[70].mxu1  ;;  %v3861_v62 = vpop.f32.mrb[70].mxu0 }
 0x18d   : > { %v3798_v63 = vpop.f32.mrb[71].mxu1  ;;  %v3862_v2 = vpop.f32.mrb[71].mxu0 }
 0x18e   : > { %v5335_v34 = vadd.f32 %v3796_v54, %v5094_v14  ;;  %v5338_v36 = vadd.f32 %v3860_v57, %v5251_v61  ;;  %v3799_v5 = vadd.f32 %v3798_v63, %v3797_v59  ;;  %v3863_v3 = vadd.f32 %v3862_v2, %v3861_v62 }
 0x190   : > { %v5341_v39 = vadd.f32 %v3799_v5, %v5104_v21  ;;  %v5344_v1 = vadd.f32 %v3863_v3, %v5254_v58 }
 0x192   : > { %v3800_v6 = vpop.f32.mrb[72].mxu1  ;;  %v3864_v7 = vpop.f32.mrb[72].mxu0 }
 0x193   : > { %v3801_v19 = vpop.f32.mrb[73].mxu1  ;;  %v3865_v18 = vpop.f32.mrb[73].mxu0 }
 0x194   : > { %v3802_v24 = vadd.f32 %v3801_v19, %v3800_v6  ;;  %v3866_v22 = vadd.f32 %v3865_v18, %v3864_v7  ;;  %v3803_v35 = vpop.f32.mrb[74].mxu1  ;;  %v3867_v14 = vpop.f32.mrb[74].mxu0 }
 0x195   : > { %v3804_v44 = vpop.f32.mrb[75].mxu1  ;;  %v3868_v26 = vpop.f32.mrb[75].mxu0 }
 0x196   : > { %v5347_v61 = vadd.f32 %v3802_v24, %v5114_v30  ;;  %v5350_v52 = vadd.f32 %v3866_v22, %v5259_v10  ;;  %v3805_v21 = vadd.f32 %v3804_v44, %v3803_v35  ;;  %v3869_v27 = vadd.f32 %v3868_v26, %v3867_v14 }
 0x198   : > { %v5353_v58 = vadd.f32 %v3805_v21, %v5124_v37  ;;  %v5356_v4 = vadd.f32 %v3869_v27, %v5264_v31 }
 0x19a   : > { %v3806_v38 = vpop.f32.mrb[76].mxu1  ;;  %v3870_v40 = vpop.f32.mrb[76].mxu0 }
 0x19b   : > { %v3807_v32 = vpop.f32.mrb[77].mxu1  ;;  %v3871_v42 = vpop.f32.mrb[77].mxu0 }
 0x19c   : > { %v3808_v20 = vadd.f32 %v3807_v32, %v3806_v38  ;;  %v3872_v45 = vadd.f32 %v3871_v42, %v3870_v40  ;;  %v3809_v56 = vpop.f32.mrb[78].mxu1  ;;  %v3873_v30 = vpop.f32.mrb[78].mxu0 }
 0x19d   : > { %v3810_v48 = vpop.f32.mrb[79].mxu1  ;;  %v3874_v54 = vpop.f32.mrb[79].mxu0 }
 0x19e   : > { %v5359_v10 = vadd.f32 %v3808_v20, %v5134_v46  ;;  %v5362_v57 = vadd.f32 %v3872_v45, %v5269_v41  ;;  %v3811_v37 = vadd.f32 %v3810_v48, %v3809_v56  ;;  %v3875_v59 = vadd.f32 %v3874_v54, %v3873_v30 }
 0x1a0   : > { %v5365_v31 = vadd.f32 %v3811_v37, %v5144_v53  ;;  %v5368_v62 = vadd.f32 %v3875_v59, %v5274_v51 }
 0x1a2   : > { %v3876_v63 = vpop.f32.mrb[80].mxu0  ;;  %v3940_v2 = vpop.f32.mrb[80].mxu1 }
 0x1a3   : > { %v3877_v5 = vpop.f32.mrb[81].mxu0  ;;  %v3941_v3 = vpop.f32.mrb[81].mxu1 }
 0x1a4   : > { %v3878_v6 = vadd.f32 %v3877_v5, %v3876_v63  ;;  %v3942_v7 = vadd.f32 %v3941_v3, %v3940_v2  ;;  %v3879_v19 = vpop.f32.mrb[82].mxu0  ;;  %v3943_v46 = vpop.f32.mrb[82].mxu1 }
 0x1a5   : > { %v3880_v18 = vpop.f32.mrb[83].mxu0  ;;  %v3944_v24 = vpop.f32.mrb[83].mxu1 }
 0x1a6   : > { %v5371_v41 = vadd.f32 %v3878_v6, %v5277_v9  ;;  %v3881_v22 = vadd.f32 %v3880_v18, %v3879_v19  ;;  %v3945_v35 = vadd.f32 %v3944_v24, %v3943_v46  ;;  %v5374_v53 = vadd.f32 %v3942_v7, %v5280_v0 }
 0x1a8   : > { %v5377_v51 = vadd.f32 %v3881_v22, %v5282_v15  ;;  %v5380_v14 = vadd.f32 %v3945_v35, %v5285_v28 }
 0x1aa   : > { %v3882_v44 = vpop.f32.mrb[84].mxu0  ;;  %v3946_v26 = vpop.f32.mrb[84].mxu1 }
 0x1ab   : > { %v3883_v21 = vpop.f32.mrb[85].mxu0  ;;  %v3947_v27 = vpop.f32.mrb[85].mxu1 }
 0x1ac   : > { %v3884_v38 = vadd.f32 %v3883_v21, %v3882_v44  ;;  %v3948_v40 = vadd.f32 %v3947_v27, %v3946_v26  ;;  %v3885_v32 = vpop.f32.mrb[86].mxu0  ;;  %v3949_v9 = vpop.f32.mrb[86].mxu1 }
 0x1ad   : > { %v3886_v42 = vpop.f32.mrb[87].mxu0  ;;  %v3950_v20 = vpop.f32.mrb[87].mxu1 }
 0x1ae   : > { %v5383_v45 = vadd.f32 %v3884_v38, %v5288_v8  ;;  %v3887_v0 = vadd.f32 %v3886_v42, %v3885_v32  ;;  %v3951_v56 = vadd.f32 %v3950_v20, %v3949_v9  ;;  %v5386_v15 = vadd.f32 %v3948_v40, %v5291_v23 }
 0x1b0   : > { %v5389_v28 = vadd.f32 %v3887_v0, %v5293_v11  ;;  %v5392_v30 = vadd.f32 %v3951_v56, %v5296_v25 }
 0x1b2   : > { %v3888_v48 = vpop.f32.mrb[88].mxu0  ;;  %v3952_v54 = vpop.f32.mrb[88].mxu1 }
 0x1b3   : > { %v3889_v37 = vpop.f32.mrb[89].mxu0  ;;  %v3953_v59 = vpop.f32.mrb[89].mxu1 }
 0x1b4   : > { %v3890_v63 = vadd.f32 %v3889_v37, %v3888_v48  ;;  %v3954_v2 = vadd.f32 %v3953_v59, %v3952_v54  ;;  %v3891_v5 = vpop.f32.mrb[90].mxu0  ;;  %v3955_v8 = vpop.f32.mrb[90].mxu1 }
 0x1b5   : > { %v3892_v3 = vpop.f32.mrb[91].mxu0  ;;  %v3956_v6 = vpop.f32.mrb[91].mxu1 }
 0x1b6   : > { %v5395_v7 = vadd.f32 %v3890_v63, %v5299_v29  ;;  %v3893_v23 = vadd.f32 %v3892_v3, %v3891_v5  ;;  %v3957_v19 = vadd.f32 %v3956_v6, %v3955_v8  ;;  %v5398_v11 = vadd.f32 %v3954_v2, %v5302_v47 }
 0x1b8   : > { %v5401_v25 = vadd.f32 %v3893_v23, %v5305_v33  ;;  %v5404_v46 = vadd.f32 %v3957_v19, %v5308_v49 }
 0x1ba   : > { %v3894_v18 = vpop.f32.mrb[92].mxu0  ;;  %v3958_v24 = vpop.f32.mrb[92].mxu1 }
 0x1bb   : > { %v3895_v22 = vpop.f32.mrb[93].mxu0  ;;  %v3959_v35 = vpop.f32.mrb[93].mxu1 }
 0x1bc   : > { %v3896_v44 = vadd.f32 %v3895_v22, %v3894_v18  ;;  %v3960_v26 = vadd.f32 %v3959_v35, %v3958_v24  ;;  %v3897_v21 = vpop.f32.mrb[94].mxu0  ;;  %v3961_v29 = vpop.f32.mrb[94].mxu1 }
 0x1bd   : > { %v3898_v27 = vpop.f32.mrb[95].mxu0  ;;  %v3962_v38 = vpop.f32.mrb[95].mxu1 }
 0x1be   : > { %v5407_v40 = vadd.f32 %v3896_v44, %v5311_v50  ;;  %v3899_v47 = vadd.f32 %v3898_v27, %v3897_v21  ;;  %v3963_v32 = vadd.f32 %v3962_v38, %v3961_v29  ;;  %v5410_v33 = vadd.f32 %v3960_v26, %v5314_v16 }
 0x1c0   : > { %v5413_v49 = vadd.f32 %v3899_v47, %v5317_v55  ;;  %v5416_v9 = vadd.f32 %v3963_v32, %v5320_v60 }
 0x1c2   : > { %v3900_v42 = vpop.f32.mrb[96].mxu0  ;;  %v3964_v20 = vpop.f32.mrb[96].mxu1 }
 0x1c3   : > { %v3901_v0 = vpop.f32.mrb[97].mxu0  ;;  %v3965_v56 = vpop.f32.mrb[97].mxu1 }
 0x1c4   : > { %v3902_v48 = vadd.f32 %v3901_v0, %v3900_v42  ;;  %v3966_v54 = vadd.f32 %v3965_v56, %v3964_v20  ;;  %v3903_v37 = vpop.f32.mrb[98].mxu0  ;;  %v3967_v50 = vpop.f32.mrb[98].mxu1 }
 0x1c5   : > { %v3904_v59 = vpop.f32.mrb[99].mxu0  ;;  %v3968_v63 = vpop.f32.mrb[99].mxu1 }
 0x1c6   : > { %v5419_v2 = vadd.f32 %v3902_v48, %v5323_v13  ;;  %v3905_v16 = vadd.f32 %v3904_v59, %v3903_v37  ;;  %v3969_v5 = vadd.f32 %v3968_v63, %v3967_v50  ;;  %v5422_v55 = vadd.f32 %v3966_v54, %v5326_v12 }
 0x1c8   : > { %v5425_v60 = vadd.f32 %v3905_v16, %v5329_v17  ;;  %v5428_v8 = vadd.f32 %v3969_v5, %v5332_v43 }
 0x1ca   : > { %v3906_v3 = vpop.f32.mrb[100].mxu0  ;;  %v3970_v6 = vpop.f32.mrb[100].mxu1 }
 0x1cb   : > { %v3907_v23 = vpop.f32.mrb[101].mxu0  ;;  %v3971_v19 = vpop.f32.mrb[101].mxu1 }
 0x1cc   : > { %v3908_v18 = vadd.f32 %v3907_v23, %v3906_v3  ;;  %v3972_v24 = vadd.f32 %v3971_v19, %v3970_v6  ;;  %v3909_v22 = vpop.f32.mrb[102].mxu0  ;;  %v3973_v13 = vpop.f32.mrb[102].mxu1 }
 0x1cd   : > { %v3910_v35 = vpop.f32.mrb[103].mxu0  ;;  %v3974_v44 = vpop.f32.mrb[103].mxu1 }
 0x1ce   : > { %v5431_v26 = vadd.f32 %v3908_v18, %v5335_v34  ;;  %v3911_v12 = vadd.f32 %v3910_v35, %v3909_v22  ;;  %v3975_v21 = vadd.f32 %v3974_v44, %v3973_v13  ;;  %v5434_v17 = vadd.f32 %v3972_v24, %v5338_v36 }
 0x1d0   : > { %v5437_v43 = vadd.f32 %v3911_v12, %v5341_v39  ;;  %v5440_v29 = vadd.f32 %v3975_v21, %v5344_v1 }
 0x1d2   : > { %v3912_v27 = vpop.f32.mrb[104].mxu0  ;;  %v3976_v38 = vpop.f32.mrb[104].mxu1 }
 0x1d3   : > { %v3913_v47 = vpop.f32.mrb[105].mxu0  ;;  %v3977_v32 = vpop.f32.mrb[105].mxu1 }
 0x1d4   : > { %v3914_v42 = vadd.f32 %v3913_v47, %v3912_v27  ;;  %v3978_v20 = vadd.f32 %v3977_v32, %v3976_v38  ;;  %v3915_v0 = vpop.f32.mrb[106].mxu0  ;;  %v3979_v34 = vpop.f32.mrb[106].mxu1 }
 0x1d5   : > { %v3916_v56 = vpop.f32.mrb[107].mxu0  ;;  %v3980_v48 = vpop.f32.mrb[107].mxu1 }
 0x1d6   : > { %v5443_v54 = vadd.f32 %v3914_v42, %v5347_v61  ;;  %v3917_v36 = vadd.f32 %v3916_v56, %v3915_v0  ;;  %v3981_v37 = vadd.f32 %v3980_v48, %v3979_v34  ;;  %v5446_v39 = vadd.f32 %v3978_v20, %v5350_v52 }
 0x1d8   : > { %v5449_v1 = vadd.f32 %v3917_v36, %v5353_v58  ;;  %v5452_v50 = vadd.f32 %v3981_v37, %v5356_v4 }
 0x1da   : > { %v3918_v59 = vpop.f32.mrb[108].mxu0  ;;  %v3982_v63 = vpop.f32.mrb[108].mxu1 }
 0x1db   : > { %v3919_v16 = vpop.f32.mrb[109].mxu0  ;;  %v3983_v5 = vpop.f32.mrb[109].mxu1 }
 0x1dc   : > { %v3920_v3 = vadd.f32 %v3919_v16, %v3918_v59  ;;  %v3984_v6 = vadd.f32 %v3983_v5, %v3982_v63  ;;  %v3921_v23 = vpop.f32.mrb[110].mxu0  ;;  %v3985_v61 = vpop.f32.mrb[110].mxu1 }
 0x1dd   : > { %v3922_v19 = vpop.f32.mrb[111].mxu0  ;;  %v3986_v18 = vpop.f32.mrb[111].mxu1 }
 0x1de   : > { %v5455_v24 = vadd.f32 %v3920_v3, %v5359_v10  ;;  %v3923_v52 = vadd.f32 %v3922_v19, %v3921_v23  ;;  %v3987_v22 = vadd.f32 %v3986_v18, %v3985_v61  ;;  %v5458_v58 = vadd.f32 %v3984_v6, %v5362_v57 }
 0x1e0   : > { %v5461_v4 = vadd.f32 %v3923_v52, %v5365_v31  ;;  %v5464_v13 = vadd.f32 %v3987_v22, %v5368_v62 }
 0x1e2   : > { %v3988_v35 = vpop.f32.mrb[112].mxu1  ;;  %v4078_v44 = vpop.f32.mrb[112].mxu0 }
 0x1e3   : > { %v2409_v12 = vadd.f32 %v4078_v44, %v5386_v15  ;;  %v3989_v21 = vpop.f32.mrb[113].mxu1  ;;  %v2400_v27 = vpop.f32.mrb[113].mxu0 }
 0x1e4   : > { %v3990_v10 = vadd.f32 %v3989_v21, %v3988_v35  ;;  %v2401_v38 = vadd.f32 %v2400_v27, %v5374_v53  ;;  %v3991_v47 = vpop.f32.mrb[114].mxu1  ;;  %v4079_v32 = vpop.f32.mrb[114].mxu0 }
 0x1e5   : > { %2532 = vst.msk [vmem:[#allocation2 + $0x10] sm:$0xff] %vm2529_vm0, %v2409_v12  ;;  %v2412_v57 = vadd.f32 %v4079_v32, %v5392_v30  ;;  %v3992_v31 = vpop.f32.mrb[115].mxu1  ;;  %v2403_v42 = vpop.f32.mrb[115].mxu0  ;;  %v2564_v6 = vmul.f32 %v2409_v12, %v2409_v12 }
 0x1e6   : > { %2530 = vst.msk [vmem:[#allocation2] sm:$0xff] %vm2529_vm0, %v2401_v38  ;;  %v3993_v62 = vadd.f32 %v3992_v31, %v3991_v47  ;;  %v2404_v20 = vadd.f32 %v2403_v42, %v5380_v14  ;;  %v5473_v15 = vadd.f32 %v3990_v10, %v5371_v41  ;;  %v2562_v19 = vmul.f32 %v2401_v38, %v2401_v38 }
 0x1e7   : > { %2533 = vst.msk [vmem:[#allocation2 + $0x18] sm:$0xff] %vm2529_vm0, %v2412_v57  ;;  %v2565_v18 = vmul.f32 %v2412_v57, %v2412_v57 }
 0x1e8   : > { %2531 = vst.msk [vmem:[#allocation2 + $0x8] sm:$0xff] %vm2529_vm0, %v2404_v20  ;;  %v5478_v53 = vadd.f32 %v3993_v62, %v5377_v51  ;;  %v2563_v44 = vmul.f32 %v2404_v20, %v2404_v20 }
 0x1ea   : > { %v3994_v0 = vpop.f32.mrb[116].mxu1  ;;  %v4082_v34 = vpop.f32.mrb[116].mxu0 }
 0x1eb   : > { %v5481_v30 = vadd.f32 %v4082_v34, %v5410_v33  ;;  %v3995_v56 = vpop.f32.mrb[117].mxu1  ;;  %v2416_v48 = vpop.f32.mrb[117].mxu0 }
 0x1ec   : > { %v3996_v36 = vadd.f32 %v3995_v56, %v3994_v0  ;;  %v5484_v14 = vadd.f32 %v2416_v48, %v5398_v11  ;;  %v3997_v41 = vpop.f32.mrb[118].mxu1  ;;  %v4083_v37 = vpop.f32.mrb[118].mxu0 }
 0x1ed   : > { %2536 = vst.msk [vmem:[#allocation2 + $0x30] sm:$0xff] %vm2529_vm0, %v5481_v30  ;;  %v5489_v59 = vadd.f32 %v4083_v37, %v5416_v9  ;;  %v3998_v51 = vpop.f32.mrb[119].mxu1  ;;  %v2419_v63 = vpop.f32.mrb[119].mxu0 }
 0x1ee   : > { %2534 = vst.msk [vmem:[#allocation2 + $0x20] sm:$0xff] %vm2529_vm0, %v5484_v14  ;;  %v3999_v33 = vadd.f32 %v3998_v51, %v3997_v41  ;;  %v5494_v16 = vadd.f32 %v2419_v63, %v5404_v46  ;;  %v5497_v11 = vadd.f32 %v3996_v36, %v5383_v45 }
 0x1ef   : > { %2537 = vst.msk [vmem:[#allocation2 + $0x38] sm:$0xff] %vm2529_vm0, %v5489_v59 }
 0x1f0   : > { %2535 = vst.msk [vmem:[#allocation2 + $0x28] sm:$0xff] %vm2529_vm0, %v5494_v16  ;;  %v5504_v9 = vadd.f32 %v3999_v33, %v5389_v28 }
 0x1f2   : > { %v4000_v5 = vpop.f32.mrb[120].mxu1  ;;  %v4086_v3 = vpop.f32.mrb[120].mxu0 }
 0x1f3   : > { %v2441_v23 = vadd.f32 %v4086_v3, %v5434_v17  ;;  %v4001_v61 = vpop.f32.mrb[121].mxu1  ;;  %v2432_v46 = vpop.f32.mrb[121].mxu0 }
 0x1f4   : > { %v4002_v45 = vadd.f32 %v4001_v61, %v4000_v5  ;;  %v2433_v52 = vadd.f32 %v2432_v46, %v5422_v55  ;;  %v4003_v22 = vpop.f32.mrb[122].mxu1  ;;  %v4087_v35 = vpop.f32.mrb[122].mxu0 }
 0x1f5   : > { %2540 = vst.msk [vmem:[#allocation2 + $0x50] sm:$0xff] %vm2529_vm0, %v2441_v23  ;;  %v2572_v21 = vmul.f32 %v2441_v23, %v2441_v23  ;;  %v5509_v28 = vadd.f32 %v2441_v23, %v2409_v12  ;;  %v2444_v27 = vadd.f32 %v4087_v35, %v5440_v29  ;;  %v4004_v10 = vpop.f32.mrb[123].mxu1  ;;  %v2435_v47 = vpop.f32.mrb[123].mxu0 }
 0x1f6   : > { %2538 = vst.msk [vmem:[#allocation2 + $0x40] sm:$0xff] %vm2529_vm0, %v2433_v52  ;;  %v2570_v17 = vmul.f32 %v2433_v52, %v2433_v52  ;;  %v5513_v32 = vadd.f32 %v2433_v52, %v2401_v38  ;;  %v4005_v31 = vadd.f32 %v4004_v10, %v4003_v22  ;;  %v2436_v55 = vadd.f32 %v2435_v47, %v5428_v8 }
 0x1f7   : > { %2541 = vst.msk [vmem:[#allocation2 + $0x58] sm:$0xff] %vm2529_vm0, %v2444_v27  ;;  %v2573_v42 = vmul.f32 %v2444_v27, %v2444_v27  ;;  %v5517_v62 = vadd.f32 %v2444_v27, %v2412_v57  ;;  %v5520_v12 = vadd.f32 %v4002_v45, %v5395_v7  ;;  %v5522_v0 = vadd.f32 %v2572_v21, %v2564_v6 }
 0x1f8   : > { %2539 = vst.msk [vmem:[#allocation2 + $0x48] sm:$0xff] %vm2529_vm0, %v2436_v55  ;;  %v2571_v29 = vmul.f32 %v2436_v55, %v2436_v55  ;;  %v5525_v34 = vadd.f32 %v2436_v55, %v2404_v20  ;;  %v5528_v38 = vadd.f32 %v4005_v31, %v5401_v25  ;;  %v5530_v56 = vadd.f32 %v2570_v17, %v2562_v19 }
 0x1f9   : > { %v5532_v8 = vadd.f32 %v2573_v42, %v2565_v18  ;;  %v2568_v7 = vmul.f32 %v5481_v30, %v5481_v30  ;;  %v2566_v20 = vmul.f32 %v5484_v14, %v5484_v14  ;;  %v2569_v25 = vmul.f32 %v5489_v59, %v5489_v59 }
 0x1fa   : > { %v4006_v48 = vpop.f32.mrb[124].mxu1  ;;  %v4090_v57 = vpop.f32.mrb[124].mxu0  ;;  %v5534_v36 = vadd.f32 %v2571_v29, %v2563_v44  ;;  %v2567_v6 = vmul.f32 %v5494_v16, %v5494_v16 }
 0x1fb   : > { %v2457_v41 = vadd.f32 %v4090_v57, %v5458_v58  ;;  %v4007_v37 = vpop.f32.mrb[125].mxu1  ;;  %v2448_v51 = vpop.f32.mrb[125].mxu0 }
 0x1fc   : > { %v4008_v63 = vadd.f32 %v4007_v37, %v4006_v48  ;;  %v2449_v33 = vadd.f32 %v2448_v51, %v5446_v39  ;;  %v4009_v5 = vpop.f32.mrb[126].mxu1  ;;  %v4091_v3 = vpop.f32.mrb[126].mxu0 }
 0x1fd   : > { %2544 = vst.msk [vmem:[#allocation2 + $0x70] sm:$0xff] %vm2529_vm0, %v2457_v41  ;;  %v2576_v23 = vmul.f32 %v2457_v41, %v2457_v41  ;;  %v5548_v58 = vadd.f32 %v2457_v41, %v5481_v30  ;;  %v2460_v61 = vadd.f32 %v4091_v3, %v5464_v13  ;;  %v4010_v46 = vpop.f32.mrb[127].mxu1  ;;  %v2451_v19 = vpop.f32.mrb[127].mxu0 }
 0x1fe   : > { %2542 = vst.msk [vmem:[#allocation2 + $0x60] sm:$0xff] %vm2529_vm0, %v2449_v33  ;;  %v2574_v18 = vmul.f32 %v2449_v33, %v2449_v33  ;;  %v5553_v39 = vadd.f32 %v2449_v33, %v5484_v14  ;;  %v4011_v45 = vadd.f32 %v4010_v46, %v4009_v5  ;;  %v2452_v52 = vadd.f32 %v2451_v19, %v5452_v50 }
 0x1ff   : > { %2545 = vst.msk [vmem:[#allocation2 + $0x78] sm:$0xff] %vm2529_vm0, %v2460_v61  ;;  %v2577_v22 = vmul.f32 %v2460_v61, %v2460_v61  ;;  %v5558_v35 = vadd.f32 %v2460_v61, %v5489_v59  ;;  %v2328_v30 = vadd.f32 %v4008_v63, %v5407_v40  ;;  %v5561_v13 = vadd.f32 %v2576_v23, %v2568_v7 }
 0x200   : > { %2543 = vst.msk [vmem:[#allocation2 + $0x68] sm:$0xff] %vm2529_vm0, %v2452_v52  ;;  %v2575_v44 = vmul.f32 %v2452_v52, %v2452_v52  ;;  %v5565_v21 = vadd.f32 %v2452_v52, %v5494_v16  ;;  %v2331_v14 = vadd.f32 %v4011_v45, %v5413_v49  ;;  %v5568_v27 = vadd.f32 %v2574_v18, %v2566_v20 }
 0x201   : > { %v5570_v50 = vadd.f32 %v2577_v22, %v2569_v25 }
 0x202   : > { %v4012_v10 = vpop.f32.mrb[128].mxu1  ;;  %v4094_v47 = vpop.f32.mrb[128].mxu0  ;;  %v5572_v59 = vadd.f32 %v2575_v44, %v2567_v6 }
 0x203   : > { %v2473_v40 = vadd.f32 %v4094_v47, %v5497_v11  ;;  %v4013_v17 = vpop.f32.mrb[129].mxu1  ;;  %v2464_v31 = vpop.f32.mrb[129].mxu0 }
 0x204   : > { %v4014_v55 = vadd.f32 %v4013_v17, %v4012_v10  ;;  %v2465_v42 = vadd.f32 %v2464_v31, %v5473_v15  ;;  %v4015_v29 = vpop.f32.mrb[130].mxu1  ;;  %v4095_v16 = vpop.f32.mrb[130].mxu0 }
 0x205   : > { %2548 = vst.msk [vmem:[#allocation2 + $0x90] sm:$0xff] %vm2529_vm0, %v2473_v40  ;;  %v2580_v49 = vmul.f32 %v2473_v40, %v2473_v40  ;;  %v2476_v48 = vadd.f32 %v4095_v16, %v5504_v9  ;;  %v4016_v57 = vpop.f32.mrb[131].mxu1  ;;  %v2467_v7 = vpop.f32.mrb[131].mxu0  ;;  %v5579_v41 = vadd.f32 %v5509_v28, %v2473_v40 }
 0x206   : > { %2546 = vst.msk [vmem:[#allocation2 + $0x80] sm:$0xff] %vm2529_vm0, %v2465_v42  ;;  %v2578_v11 = vmul.f32 %v2465_v42, %v2465_v42  ;;  %v4017_v37 = vadd.f32 %v4016_v57, %v4015_v29  ;;  %v2468_v51 = vadd.f32 %v2467_v7, %v5478_v53  ;;  %v2336_v15 = vadd.f32 %v4014_v55, %v5419_v2 }
 0x207   : > { %2549 = vst.msk [vmem:[#allocation2 + $0x98] sm:$0xff] %vm2529_vm0, %v2476_v48  ;;  %v2581_v20 = vmul.f32 %v2476_v48, %v2476_v48  ;;  %v2602_v25 = vadd.f32 %v5513_v32, %v2465_v42  ;;  %v5587_v9 = vadd.f32 %v5517_v62, %v2476_v48  ;;  %v5590_v63 = vadd.f32 %v5522_v0, %v2580_v49 }
 0x208   : > { %2547 = vst.msk [vmem:[#allocation2 + $0x88] sm:$0xff] %vm2529_vm0, %v2468_v51  ;;  %v2579_v28 = vmul.f32 %v2468_v51, %v2468_v51  ;;  %v2339_v33 = vadd.f32 %v4017_v37, %v5425_v60  ;;  %v5595_v53 = vadd.f32 %v5525_v34, %v2468_v51  ;;  %v5598_v2 = vadd.f32 %v5530_v56, %v2578_v11 }
 0x209   : > { %v5601_v5 = vadd.f32 %v5532_v8, %v2581_v20 }
 0x20a   : > { %v4018_v32 = vpop.f32.mrb[132].mxu1  ;;  %v4098_v62 = vpop.f32.mrb[132].mxu0  ;;  %v5604_v3 = vadd.f32 %v5534_v36, %v2579_v28 }
 0x20b   : > { %v2489_v0 = vadd.f32 %v4098_v62, %v2328_v30  ;;  %v4019_v6 = vpop.f32.mrb[133].mxu1  ;;  %v2480_v23 = vpop.f32.mrb[133].mxu0 }
 0x20c   : > { %v4020_v61 = vadd.f32 %v4019_v6, %v4018_v32  ;;  %v2481_v60 = vadd.f32 %v2480_v23, %v5520_v12  ;;  %v4021_v46 = vpop.f32.mrb[134].mxu1  ;;  %v4099_v34 = vpop.f32.mrb[134].mxu0 }
 0x20d   : > { %2552 = vst.msk [vmem:[#allocation2 + $0xb0] sm:$0xff] %vm2529_vm0, %v2489_v0  ;;  %v2584_v56 = vmul.f32 %v2489_v0, %v2489_v0  ;;  %v2492_v19 = vadd.f32 %v4099_v34, %v2331_v14  ;;  %v4022_v18 = vpop.f32.mrb[135].mxu1  ;;  %v2483_v8 = vpop.f32.mrb[135].mxu0  ;;  %v5609_v45 = vadd.f32 %v5548_v58, %v2489_v0 }
 0x20e   : > { %2550 = vst.msk [vmem:[#allocation2 + $0xa0] sm:$0xff] %vm2529_vm0, %v2481_v60  ;;  %v2582_v36 = vmul.f32 %v2481_v60, %v2481_v60  ;;  %v4023_v52 = vadd.f32 %v4022_v18, %v4021_v46  ;;  %v2484_v22 = vadd.f32 %v2483_v8, %v5528_v38  ;;  %v2344_v30 = vadd.f32 %v4020_v61, %v5431_v26 }
 0x20f   : > { %2553 = vst.msk [vmem:[#allocation2 + $0xb8] sm:$0xff] %vm2529_vm0, %v2492_v19  ;;  %v2585_v12 = vmul.f32 %v2492_v19, %v2492_v19  ;;  %v5616_v44 = vadd.f32 %v5553_v39, %v2481_v60  ;;  %v5619_v14 = vadd.f32 %v5558_v35, %v2492_v19  ;;  %v5622_v58 = vadd.f32 %v5561_v13, %v2584_v56 }
 0x210   : > { %2551 = vst.msk [vmem:[#allocation2 + $0xa8] sm:$0xff] %vm2529_vm0, %v2484_v22  ;;  %v2583_v10 = vmul.f32 %v2484_v22, %v2484_v22  ;;  %v2347_v47 = vadd.f32 %v4023_v52, %v5437_v43  ;;  %v5627_v38 = vadd.f32 %v5565_v21, %v2484_v22  ;;  %v5630_v26 = vadd.f32 %v5568_v27, %v2582_v36 }
 0x211   : > { %v5633_v39 = vadd.f32 %v5570_v50, %v2585_v12 }
 0x212   : > { %v4024_v40 = vpop.f32.mrb[136].mxu1  ;;  %v4102_v35 = vpop.f32.mrb[136].mxu0  ;;  %v5636_v17 = vadd.f32 %v5572_v59, %v2583_v10 }
 0x213   : > { %v2505_v13 = vadd.f32 %v4102_v35, %v2344_v30  ;;  %v4025_v31 = vpop.f32.mrb[137].mxu1  ;;  %v2496_v55 = vpop.f32.mrb[137].mxu0  ;;  %v4472_v35 = vmov 0.0  }
 0x214   : > { %v4026_v42 = vadd.f32 %v4025_v31, %v4024_v40  ;;  %v2497_v29 = vadd.f32 %v2496_v55, %v2336_v15  ;;  %v4027_v43 = vpop.f32.mrb[138].mxu1  ;;  %v4103_v16 = vpop.f32.mrb[138].mxu0  ;;  %236 = vst.msk [vmem:[#allocation3 + $0x10] sm:$0xff] %vm233_vm1, %v4472_v35  ;;  %234 = vst.msk [vmem:[#allocation3] sm:$0xff] %vm233_vm1, %v4472_v35 }
 0x215   : > { %2556 = vst.msk [vmem:[#allocation2 + $0xd0] sm:$0xff] %vm2529_vm0, %v2505_v13  ;;  %v2508_v21 = vadd.f32 %v4103_v16, %v2347_v47  ;;  %v4028_v27 = vpop.f32.mrb[139].mxu1  ;;  %v2499_v49 = vpop.f32.mrb[139].mxu0  ;;  %v2612_v50 = vadd.f32 %v5579_v41, %v2505_v13  ;;  %v2588_v48 = vmul.f32 %v2505_v13, %v2505_v13 }
 0x216   : > { %2554 = vst.msk [vmem:[#allocation2 + $0xc0] sm:$0xff] %vm2529_vm0, %v2497_v29  ;;  %v4029_v57 = vadd.f32 %v4028_v27, %v4027_v43  ;;  %v2500_v59 = vadd.f32 %v2499_v49, %v2339_v33  ;;  %v2610_v7 = vadd.f32 %v2602_v25, %v2497_v29  ;;  %v2352_v11 = vadd.f32 %v4026_v42, %v5443_v54 }
 0x217   : > { %2557 = vst.msk [vmem:[#allocation2 + $0xd8] sm:$0xff] %vm2529_vm0, %v2508_v21  ;;  %v2656_v37 = vsel %vm2529_vm0, %v2612_v50, 0.0  ;;  %v2613_v51 = vadd.f32 %v5587_v9, %v2508_v21  ;;  %v2636_v15 = vadd.f32 %v5590_v63, %v2588_v48  ;;  %v2589_v20 = vmul.f32 %v2508_v21, %v2508_v21 }
 0x218   : > { %2555 = vst.msk [vmem:[#allocation2 + $0xc8] sm:$0xff] %vm2529_vm0, %v2500_v59  ;;  %2657 = vadd.xlane.f32.xlu1 %v2656_v37  ;;  %v2650_v41 = vsel %vm2529_vm0, %v2610_v7, 0.0  ;;  %v2355_v28 = vadd.f32 %v4029_v57, %v5449_v1  ;;  %v2611_v25 = vadd.f32 %v5595_v53, %v2500_v59  ;;  %v2587_v33 = vmul.f32 %v2500_v59, %v2500_v59 }
 0x219   : > { %2651 = vadd.xlane.f32.xlu0 %v2650_v41  ;;  %v2637_v54 = vadd.f32 %v5601_v5, %v2589_v20  ;;  %v2586_v32 = vmul.f32 %v2497_v29, %v2497_v29  ;;  %v2659_v23 = vsel %vm2529_vm0, %v2613_v51, 0.0  ;;  %v2705_v53 = vsel %vm2529_vm0, %v2636_v15, 0.0  ;;  %235 = vst.msk [vmem:[#allocation3 + $0x8] sm:$0xff] %vm233_vm1, %v4472_v35  ;;  %237 = vst.msk [vmem:[#allocation3 + $0x18] sm:$0xff] %vm233_vm1, %v4472_v35 }
 0x21a   : > { %v4030_v62 = vpop.f32.mrb[140].mxu1  ;;  %v4106_v0 = vpop.f32.mrb[140].mxu0  ;;  %v2635_v9 = vadd.f32 %v5604_v3, %v2587_v33  ;;  %v2653_v30 = vsel %vm2529_vm0, %v2611_v25, 0.0  ;;  %238 = vst.msk [vmem:[#allocation3 + $0x20] sm:$0xff] %vm233_vm1, %v4472_v35  ;;  %239 = vst.msk [vmem:[#allocation3 + $0x28] sm:$0xff] %vm233_vm1, %v4472_v35 }
 0x21b   : > { %v4031_v63 = vpop.f32.mrb[141].mxu1  ;;  %v2512_v6 = vpop.f32.mrb[141].mxu0  ;;  %v2634_v61 = vadd.f32 %v5598_v2, %v2586_v32  ;;  %v2708_v2 = vsel %vm2529_vm0, %v2637_v54, 0.0  ;;  %240 = vst.msk [vmem:[#allocation3 + $0x30] sm:$0xff] %vm233_vm1, %v4472_v35  ;;  %241 = vst.msk [vmem:[#allocation3 + $0x38] sm:$0xff] %vm233_vm1, %v4472_v35  ;;  %v2644_v21 = vld [vmem:[#allocation3 + $0x10] sm:$0xff] }
 0x21c   : > { %v4032_v60 = vadd.f32 %v4031_v63, %v4030_v62  ;;  %v2513_v46 = vadd.f32 %v2512_v6, %v2352_v11  ;;  %v4033_v1 = vpop.f32.mrb[142].mxu1  ;;  %v4107_v34 = vpop.f32.mrb[142].mxu0  ;;  %2660 = vadd.xlane.f32.xlu1 %v2659_v23  ;;  %242 = vst.msk [vmem:[#allocation4] sm:$0xff] %vm233_vm1, %v4472_v35  ;;  %243 = vst.msk [vmem:[#allocation4 + $0x8] sm:$0xff] %vm233_vm1, %v4472_v35  ;;  %v2642_v27 = vld [vmem:[#allocation3] sm:$0xff] }
 0x21d   : > { %v4034_v56 = vpop.f32.mrb[143].mxu1  ;;  %v2515_v5 = vpop.f32.mrb[143].mxu0  ;;  %2706 = vadd.xlane.f32.xlu0 %v2705_v53  ;;  %244 = vst.msk [vmem:[#allocation4 + $0x10] sm:$0xff] %vm233_vm1, %v4472_v35  ;;  %245 = vst.msk [vmem:[#allocation4 + $0x18] sm:$0xff] %vm233_vm1, %v4472_v35 }
 0x21e   : > { %v2360_v19 = vadd.f32 %v4032_v60, %v5455_v24  ;;  %2558 = vst.msk [vmem:[#allocation2 + $0xe0] sm:$0xff] %vm2529_vm0, %v2513_v46  ;;  %v4035_v3 = vadd.f32 %v4034_v56, %v4033_v1  ;;  %v2516_v18 = vadd.f32 %v2515_v5, %v2355_v28  ;;  %v2614_v8 = vadd.f32 %v5616_v44, %v2513_v46 }
 0x21f   : > { %v2590_v36 = vmul.f32 %v2513_v46, %v2513_v46  ;;  %246 = vst.msk [vmem:[#allocation4 + $0x20] sm:$0xff] %vm233_vm1, %v4472_v35  ;;  %247 = vst.msk [vmem:[#allocation4 + $0x28] sm:$0xff] %vm233_vm1, %v4472_v35 }
 0x220   : > { %v2521_v52 = vadd.f32 %v4106_v0, %v2360_v19  ;;  %v2363_v22 = vadd.f32 %v4035_v3, %v5461_v4  ;;  %2559 = vst.msk [vmem:[#allocation2 + $0xe8] sm:$0xff] %vm2529_vm0, %v2516_v18  ;;  %2709 = vadd.xlane.f32.xlu1 %v2708_v2  ;;  %v2615_v12 = vadd.f32 %v5627_v38, %v2516_v18  ;;  %v2702_v4 = vsel %vm2529_vm0, %v2635_v9, 0.0  ;;  %v2645_v59 = vld [vmem:[#allocation3 + $0x18] sm:$0xff]  ;;  %v2643_v41 = vld [vmem:[#allocation3 + $0x8] sm:$0xff] }
 0x221   : > { %2654 = vadd.xlane.f32.xlu0 %v2653_v30  ;;  %v2591_v24 = vmul.f32 %v2516_v18, %v2516_v18  ;;  %v2638_v10 = vadd.f32 %v5630_v26, %v2590_v36  ;;  %248 = vst.msk [vmem:[#allocation4 + $0x30] sm:$0xff] %vm233_vm1, %v4472_v35  ;;  %249 = vst.msk [vmem:[#allocation4 + $0x38] sm:$0xff] %vm233_vm1, %v4472_v35  ;;  %v2699_v38 = vsel %vm2529_vm0, %v2634_v61, 0.0  ;;  %v2662_v29 = vsel %vm2529_vm0, %v2614_v8, 0.0  ;;  %v2647_v23 = vld [vmem:[#allocation3 + $0x28] sm:$0xff]  ;;  %v2646_v61 = vld [vmem:[#allocation3 + $0x20] sm:$0xff] }
 0x222   : > { %2560 = vst.msk [vmem:[#allocation2 + $0xf0] sm:$0xff] %vm2529_vm0, %v2521_v52  ;;  %v2524_v44 = vadd.f32 %v4107_v34, %v2363_v22  ;;  %v2616_v47 = vadd.f32 %v5609_v45, %v2521_v52  ;;  %v2592_v40 = vmul.f32 %v2521_v52, %v2521_v52  ;;  %v2665_v42 = vsel %vm2529_vm0, %v2615_v12, 0.0  ;;  %v2649_v8 = vld [vmem:[#allocation3 + $0x38] sm:$0xff]  ;;  %v2648_v2 = vld [vmem:[#allocation3 + $0x30] sm:$0xff] }
 0x223   : > { %v2639_v45 = vadd.f32 %v5636_v17, %v2591_v24  ;;  %v2711_v43 = vsel %vm2529_vm0, %v2638_v10, 0.0  ;;  %v2692_v32 = vld [vmem:[#allocation4 + $0x8] sm:$0xff]  ;;  %v2691_v62 = vld [vmem:[#allocation4] sm:$0xff] }
 0x224   : > { %2561 = vst.msk [vmem:[#allocation2 + $0xf8] sm:$0xff] %vm2529_vm0, %v2524_v44  ;;  %2703 = vadd.xlane.f32.xlu1 %v2702_v4  ;;  %v2617_v26 = vadd.f32 %v5619_v14, %v2524_v44  ;;  %v2593_v13 = vmul.f32 %v2524_v44, %v2524_v44  ;;  %v2640_v31 = vadd.f32 %v5622_v58, %v2592_v40  ;;  %v2668_v58 = vsel %vm2529_vm0, %v2616_v47, 0.0  ;;  %v2693_v7 = vld [vmem:[#allocation4 + $0x10] sm:$0xff]  ;;  %v2694_v20 = vld [vmem:[#allocation4 + $0x18] sm:$0xff] }
 0x225   : > { %2700 = vadd.xlane.f32.xlu0 %v2699_v38  ;;  %v2714_v17 = vsel %vm2529_vm0, %v2639_v45, 0.0 }
 0x226   : > { %v2641_v55 = vadd.f32 %v5633_v39, %v2593_v13  ;;  %v2671_v14 = vsel %vm2529_vm0, %v2617_v26, 0.0  ;;  %v2717_v16 = vsel %vm2529_vm0, %v2640_v31, 0.0  ;;  %v2696_v53 = vld [vmem:[#allocation4 + $0x28] sm:$0xff]  ;;  %v2695_v56 = vld [vmem:[#allocation4 + $0x20] sm:$0xff] }
 0x228   : > { %2666 = vadd.xlane.f32.xlu1 %v2665_v42  ;;  %v2720_v39 = vsel %vm2529_vm0, %v2641_v55, 0.0  ;;  %v2698_v12 = vld [vmem:[#allocation4 + $0x38] sm:$0xff]  ;;  %v2697_v24 = vld [vmem:[#allocation4 + $0x30] sm:$0xff] }
 0x229   : > { %2663 = vadd.xlane.f32.xlu0 %v2662_v29 }
 0x22c   : > { %2715 = vadd.xlane.f32.xlu1 %v2714_v17 }
 0x22d   : > { %2712 = vadd.xlane.f32.xlu0 %v2711_v43 }
 0x230   : > { %2672 = vadd.xlane.f32.xlu1 %v2671_v14 }
 0x231   : > { %2669 = vadd.xlane.f32.xlu0 %v2668_v58 }
 0x234   : > { %2721 = vadd.xlane.f32.xlu1 %v2720_v39 }
 0x235   : > { %2718 = vadd.xlane.f32.xlu0 %v2717_v16 }
 0x2a5   : > { %v2658_v49 = vpop.xlane.xlu1 %2657 }
 0x2a6   : > { %v2676_v50 = vadd.f32 %v2658_v49, %v2644_v21  ;;  %v2652_v48 = vpop.xlane.xlu0 %2651 }
 0x2a7   : > { %v2674_v57 = vadd.f32 %v2652_v48, %v2642_v27 }
 0x2a8   : > { %2685 = vst.msk [vmem:[#allocation3 + $0x10] sm:$0xff] %vm233_vm1, %v2676_v50 }
 0x2a9   : > { %2683 = vst.msk [vmem:[#allocation3] sm:$0xff] %vm233_vm1, %v2674_v57  ;;  %v2661_v11 = vpop.xlane.xlu1 %2660 }
 0x2aa   : > { %v2677_v37 = vadd.f32 %v2661_v11, %v2645_v59  ;;  %v2707_v51 = vpop.xlane.xlu0 %2706 }
 0x2ab   : > { %v2725_v15 = vadd.f32 %v2707_v51, %v2693_v7 }
 0x2ac   : > { %2686 = vst.msk [vmem:[#allocation3 + $0x18] sm:$0xff] %vm233_vm1, %v2677_v37 }
 0x2ad   : > { %2733 = vst.msk [vmem:[#allocation4 + $0x10] sm:$0xff] %vm233_vm1, %v2725_v15  ;;  %v2710_v28 = vpop.xlane.xlu1 %2709 }
 0x2ae   : > { %v2726_v25 = vadd.f32 %v2710_v28, %v2694_v20  ;;  %v2655_v33 = vpop.xlane.xlu0 %2654 }
 0x2af   : > { %v2675_v54 = vadd.f32 %v2655_v33, %v2643_v41 }
 0x2b0   : > { %2734 = vst.msk [vmem:[#allocation4 + $0x18] sm:$0xff] %vm233_vm1, %v2726_v25 }
 0x2b1   : > { %2684 = vst.msk [vmem:[#allocation3 + $0x8] sm:$0xff] %vm233_vm1, %v2675_v54  ;;  %v2704_v0 = vpop.xlane.xlu1 %2703 }
 0x2b2   : > { %v2724_v9 = vadd.f32 %v2704_v0, %v2692_v32  ;;  %v2701_v63 = vpop.xlane.xlu0 %2700 }
 0x2b3   : > { %v2723_v6 = vadd.f32 %v2701_v63, %v2691_v62 }
 0x2b4   : > { %2732 = vst.msk [vmem:[#allocation4 + $0x8] sm:$0xff] %vm233_vm1, %v2724_v9 }
 0x2b5   : > { %2731 = vst.msk [vmem:[#allocation4] sm:$0xff] %vm233_vm1, %v2723_v6  ;;  %v2667_v60 = vpop.xlane.xlu1 %2666 }
 0x2b6   : > { %v2679_v46 = vadd.f32 %v2667_v60, %v2647_v23  ;;  %v2664_v1 = vpop.xlane.xlu0 %2663 }
 0x2b7   : > { %v2678_v34 = vadd.f32 %v2664_v1, %v2646_v61 }
 0x2b8   : > { %2688 = vst.msk [vmem:[#allocation3 + $0x28] sm:$0xff] %vm233_vm1, %v2679_v46 }
 0x2b9   : > { %2687 = vst.msk [vmem:[#allocation3 + $0x20] sm:$0xff] %vm233_vm1, %v2678_v34  ;;  %v2716_v5 = vpop.xlane.xlu1 %2715 }
 0x2ba   : > { %v2728_v19 = vadd.f32 %v2716_v5, %v2696_v53  ;;  %v2713_v3 = vpop.xlane.xlu0 %2712 }
 0x2bb   : > { %v2727_v18 = vadd.f32 %v2713_v3, %v2695_v56 }
 0x2bc   : > { %2736 = vst.msk [vmem:[#allocation4 + $0x28] sm:$0xff] %vm233_vm1, %v2728_v19 }
 0x2bd   : > { %2735 = vst.msk [vmem:[#allocation4 + $0x20] sm:$0xff] %vm233_vm1, %v2727_v18  ;;  %v2673_v36 = vpop.xlane.xlu1 %2672 }
 0x2be   : > { %v2681_v52 = vadd.f32 %v2673_v36, %v2649_v8  ;;  %v2670_v22 = vpop.xlane.xlu0 %2669 }
 0x2bf   : > { %v2680_v30 = vadd.f32 %v2670_v22, %v2648_v2 }
 0x2c0   : > { %2690 = vst.msk [vmem:[#allocation3 + $0x38] sm:$0xff] %vm233_vm1, %v2681_v52 }
 0x2c1   : > { %2689 = vst.msk [vmem:[#allocation3 + $0x30] sm:$0xff] %vm233_vm1, %v2680_v30  ;;  %v2722_v10 = vpop.xlane.xlu1 %2721 }
 0x2c2   : > { %v2730_v44 = vadd.f32 %v2722_v10, %v2698_v12  ;;  %v2719_v47 = vpop.xlane.xlu0 %2718 }
 0x2c3   : > { %v2729_v40 = vadd.f32 %v2719_v47, %v2697_v24 }
 0x2c4   : > { %2738 = vst.msk [vmem:[#allocation4 + $0x38] sm:$0xff] %vm233_vm1, %v2730_v44 }
 0x2c5   : > { %2737 = vst.msk [vmem:[#allocation4 + $0x30] sm:$0xff] %vm233_vm1, %v2729_v40 }
 0x2c6 PF: > { %p3519_p5 = scmp.ne.s32.totalorder %s4462_s15, 1 }
 0x2c7   : > { %v2745_v35 = vld [vmem:[#allocation3 + $0x10] sm:$0xff] (!%p3519_p5)  ;;  %v4473_v45 = vmov (!%p3519_p5), 0   ;;  %v2743_v13 = vld [vmem:[#allocation3] sm:$0xff] (!%p3519_p5)  ;;  %v2746_v29 = vld [vmem:[#allocation3 + $0x18] sm:$0xff] (!%p3519_p5)  ;;  %vm3194_vm2 = vcmask (!%p3519_p5), 257024  }
 0x2c8   : > { %2742 = sbr.rel (%p3519_p5) target bundleno = 908 (0x38c), region = 48  ;;  %v2762_v4 = vld [vmem:[#allocation4 + $0x10] sm:$0xff] (!%p3519_p5)  ;;  %4431 = vset.pattern.permute.xlu1 (!%p3519_p5), %v4473_v45  ;;  %4430 = vset.pattern.permute.xlu0 (!%p3519_p5), %v4473_v45  ;;  %v5714_v38 = vmul.f32 (!%p3519_p5), 0.0078125, %v2745_v35  ;;  %v2760_v31 = vld [vmem:[#allocation4] sm:$0xff] (!%p3519_p5)  ;;  %v5716_v55 = vmul.f32 (!%p3519_p5), 0.0078125, %v2743_v13  ;;  %v2763_v17 = vld [vmem:[#allocation4 + $0x18] sm:$0xff] (!%p3519_p5) }
 0x2c9   : > { %v2770_v26 = vmul.f32 (!%p3519_p5), 0.0078125, %v2762_v4  ;;  %v2768_v42 = vmul.f32 (!%p3519_p5), 0.0078125, %v2760_v31  ;;  %v5720_v14 = vmul.f32 (!%p3519_p5), 0.0078125, %v2746_v29  ;;  %v2771_v58 = vmul.f32 (!%p3519_p5), 0.0078125, %v2763_v17  ;;  %v2744_v39 = vld [vmem:[#allocation3 + $0x8] sm:$0xff] (!%p3519_p5)  ;;  %v2747_v37 = vld [vmem:[#allocation3 + $0x20] sm:$0xff] (!%p3519_p5) }
 0x2ca   : > { %v2778_v43 = vmul.f32 (!%p3519_p5), %v5714_v38, %v5714_v38  ;;  %v2761_v16 = vld [vmem:[#allocation4 + $0x8] sm:$0xff] (!%p3519_p5)  ;;  %v2776_v21 = vmul.f32 (!%p3519_p5), %v5716_v55, %v5716_v55  ;;  %v5724_v27 = vmul.f32 (!%p3519_p5), 0.0078125, %v2744_v39  ;;  %v2764_v51 = vld [vmem:[#allocation4 + $0x20] sm:$0xff] (!%p3519_p5)  ;;  %v5732_v41 = vmul.f32 (!%p3519_p5), 0.0078125, %v2747_v37  ;;  %v2750_v25 = vld [vmem:[#allocation3 + $0x38] sm:$0xff] (!%p3519_p5) }
 0x2cb   : > { %v2769_v49 = vmul.f32 (!%p3519_p5), 0.0078125, %v2761_v16  ;;  %v2748_v50 = vld [vmem:[#allocation3 + $0x28] sm:$0xff] (!%p3519_p5)  ;;  %v2779_v59 = vmul.f32 (!%p3519_p5), %v5720_v14, %v5720_v14  ;;  %v2772_v28 = vmul.f32 (!%p3519_p5), 0.0078125, %v2764_v51  ;;  %v2767_v33 = vld [vmem:[#allocation4 + $0x38] sm:$0xff] (!%p3519_p5)  ;;  %v5736_v0 = vmul.f32 (!%p3519_p5), 0.0078125, %v2750_v25  ;;  %v2749_v9 = vld [vmem:[#allocation3 + $0x30] sm:$0xff] (!%p3519_p5) }
 0x2cc   : > { %v2765_v48 = vld [vmem:[#allocation4 + $0x28] sm:$0xff] (!%p3519_p5)  ;;  %v2786_v57 = vsub.f32 (!%p3519_p5), %v2770_v26, %v2778_v43  ;;  %v5728_v7 = vmul.f32 (!%p3519_p5), 0.0078125, %v2748_v50  ;;  %v2784_v15 = vsub.f32 (!%p3519_p5), %v2768_v42, %v2776_v21  ;;  %v2777_v20 = vmul.f32 (!%p3519_p5), %v5724_v27, %v5724_v27  ;;  %v2766_v53 = vld [vmem:[#allocation4 + $0x30] sm:$0xff] (!%p3519_p5)  ;;  %v2800_v45 = vld [vmem:[%s6013_s2] sm:$0xff] (!%p3519_p5) }
 0x2cd   : > { %v2773_v11 = vmul.f32 (!%p3519_p5), 0.0078125, %v2765_v48  ;;  %v2787_v32 = vsub.f32 (!%p3519_p5), %v2771_v58, %v2779_v59  ;;  %v2780_v23 = vmul.f32 (!%p3519_p5), %v5732_v41, %v5732_v41  ;;  %v2775_v61 = vmul.f32 (!%p3519_p5), 0.0078125, %v2767_v33  ;;  %v2802_v35 = vld [vmem:[%s6013_s2 + $0x10] sm:$0xff] (!%p3519_p5)  ;;  %v2803_v13 = vld [vmem:[%s6013_s2 + $0x18] sm:$0xff] (!%p3519_p5)  ;;  %v2801_v29 = vld [vmem:[%s6013_s2 + $0x8] sm:$0xff] (!%p3519_p5) }
 0x2ce   : > { %v2794_v54 = vmax.f32 (!%p3519_p5), %v2786_v57, 0.0  ;;  %v2781_v62 = vmul.f32 (!%p3519_p5), %v5728_v7, %v5728_v7  ;;  %v2792_v63 = vmax.f32 (!%p3519_p5), %v2784_v15, 0.0  ;;  %v2785_v6 = vsub.f32 (!%p3519_p5), %v2769_v49, %v2777_v20  ;;  %v2805_v49 = vld [vmem:[%s6013_s2 + $0x28] sm:$0xff] (!%p3519_p5)  ;;  %v2804_v48 = vld [vmem:[%s6013_s2 + $0x20] sm:$0xff] (!%p3519_p5)  ;;  %v2807_v37 = vld [vmem:[%s6013_s2 + $0x38] sm:$0xff] (!%p3519_p5) }
 0x2cf   : > { %v2795_v46 = vmax.f32 %v2787_v32, 0.0  ;;  %v2783_v34 = vmul.f32 %v5736_v0, %v5736_v0  ;;  %v2788_v19 = vsub.f32 %v2772_v28, %v2780_v23  ;;  %v5742_v3 = vmul.f32 0.0078125, %v2749_v9  ;;  %v2806_v51 = vld [vmem:[%s6013_s2 + $0x30] sm:$0xff]  ;;  %v2832_v32 = vld [vmem:[%s6014_s3] sm:$0xff] }
 0x2d0   : > { %v2810_v60 = vadd.f32 1e-05, %v2794_v54  ;;  %v2789_v1 = vsub.f32 %v2773_v11, %v2781_v62  ;;  %v2808_v56 = vadd.f32 1e-05, %v2792_v63  ;;  %v2793_v5 = vmax.f32 %v2785_v6, 0.0  ;;  %v2833_v54 = vld [vmem:[%s6014_s3 + $0x8] sm:$0xff] }
 0x2d1   : > { %v2811_v18 = vadd.f32 1e-05, %v2795_v46  ;;  %v2791_v2 = vsub.f32 %v2775_v61, %v2783_v34  ;;  %v2796_v52 = vmax.f32 %v2788_v19, 0.0  ;;  %v2774_v22 = vmul.f32 0.0078125, %v2766_v53  ;;  %v2834_v6 = vld [vmem:[%s6014_s3 + $0x10] sm:$0xff]  ;;  %v2836_v46 = vld [vmem:[%s6014_s3 + $0x20] sm:$0xff] }
 0x2d2   : > { %4432 = vrsqrt.f32 %v2810_v60  ;;  %v2797_v8 = vmax.f32 %v2789_v1, 0.0  ;;  %v2809_v36 = vadd.f32 1e-05, %v2793_v5  ;;  %v2782_v24 = vmul.f32 %v5742_v3, %v5742_v3 }
 0x2d3   : > { %4434 = vrsqrt.f32 %v2808_v56  ;;  %v2799_v12 = vmax.f32 %v2791_v2, 0.0  ;;  %v2812_v10 = vadd.f32 1e-05, %v2796_v52  ;;  %v2868_v2 = vld [vmem:[#allocation2 + $0x50] sm:$0xff] }
 0x2d4   : > { %4436 = vrsqrt.f32 %v2811_v18  ;;  %v2813_v30 = vadd.f32 1e-05, %v2797_v8  ;;  %v2790_v47 = vsub.f32 %v2774_v22, %v2782_v24  ;;  %v2860_v8 = vld [vmem:[#allocation2 + $0x10] sm:$0xff]  ;;  %v2882_v24 = vld [vmem:[#allocation2 + $0xc0] sm:$0xff] }
 0x2d5   : > { %4438 = vrsqrt.f32 %v2809_v36  ;;  %v2815_v44 = vadd.f32 1e-05, %v2799_v12  ;;  %v2876_v36 = vld [vmem:[#allocation2 + $0x90] sm:$0xff]  ;;  %v2866_v12 = vld [vmem:[#allocation2 + $0x40] sm:$0xff] }
 0x2d6   : > { %4440 = vrsqrt.f32 %v2813_v30  ;;  %v2798_v40 = vmax.f32 %v2790_v47, 0.0  ;;  %v2884_v52 = vld [vmem:[#allocation2 + $0xd0] sm:$0xff]  ;;  %v2858_v30 = vld [vmem:[#allocation2] sm:$0xff]  ;;  %v2869_v47 = vld [vmem:[#allocation2 + $0x58] sm:$0xff] }
 0x2d7   : > { %4442 = vrsqrt.f32 %v2812_v10 }
 0x2d8   : > { %4444 = vrsqrt.f32 %v2815_v44  ;;  %v2814_v4 = vadd.f32 1e-05, %v2798_v40  ;;  %v2861_v44 = vld [vmem:[#allocation2 + $0x18] sm:$0xff] }
 0x2d9   : > { %v2877_v40 = vld [vmem:[#allocation2 + $0x98] sm:$0xff] }
 0x2da   : > { %4446 = vrsqrt.f32 %v2814_v4  ;;  %v2859_v4 = vld [vmem:[#allocation2 + $0x8] sm:$0xff] }
 0x2dc   : > { %v4433_v26 = vpop.eup %4432 }
 0x2dd   : > { %v4435_v31 = vpop.eup %4434  ;;  %v2826_v42 = vmul.f32 %v4433_v26, %v2802_v35  ;;  %v2885_v35 = vld [vmem:[#allocation2 + $0xd8] sm:$0xff]  ;;  %v2875_v26 = vld [vmem:[#allocation2 + $0x88] sm:$0xff] }
 0x2de   : > { %v4437_v17 = vpop.eup %4436  ;;  %v2824_v43 = vmul.f32 %v4435_v31, %v2800_v45  ;;  %v2867_v45 = vld [vmem:[#allocation2 + $0x48] sm:$0xff] }
 0x2df   : > { %v4439_v58 = vpop.eup %4438  ;;  %2902 = vperm.xlu1 %4431, %v2826_v42   ;;  %v2827_v39 = vmul.f32 %v4437_v17, %v2803_v13  ;;  %v2842_v63 = vmul.f32 %v2826_v42, %v5714_v38  ;;  %v2837_v38 = vld [vmem:[%s6014_s3 + $0x28] sm:$0xff] }
 0x2e0   : > { %v4441_v16 = vpop.eup %4440  ;;  %2892 = vperm.xlu0 %4430, %v2824_v43   ;;  %v2825_v21 = vmul.f32 %v4439_v58, %v2801_v29  ;;  %v2840_v25 = vmul.f32 %v2824_v43, %v5716_v55  ;;  %v2835_v55 = vld [vmem:[%s6014_s3 + $0x18] sm:$0xff]  ;;  %v2883_v13 = vld [vmem:[#allocation2 + $0xc8] sm:$0xff] }
 0x2e1   : > { %v4443_v50 = vpop.eup %4442  ;;  %v2829_v57 = vmul.f32 %v4441_v16, %v2805_v49  ;;  %v2843_v9 = vmul.f32 %v2827_v39, %v5720_v14  ;;  %v2850_v60 = vsub.f32 %v2834_v6, %v2842_v63  ;;  %v2863_v31 = vld [vmem:[#allocation2 + $0x28] sm:$0xff]  ;;  %v2881_v6 = vld [vmem:[#allocation2 + $0xb8] sm:$0xff] }
 0x2e2   : > { %v4445_v59 = vpop.eup %4444  ;;  %v2828_v11 = vmul.f32 %v4443_v50, %v2804_v48  ;;  %v2841_v28 = vmul.f32 %v2825_v21, %v5724_v27  ;;  %v2848_v27 = vsub.f32 %v2832_v32, %v2840_v25  ;;  %v2879_v16 = vld [vmem:[#allocation2 + $0xa8] sm:$0xff]  ;;  %v2873_v32 = vld [vmem:[#allocation2 + $0x78] sm:$0xff] }
 0x2e3   : > { %2907 = vperm.xlu1 %4431, %v2827_v39   ;;  %v2831_v20 = vmul.f32 %v4445_v59, %v2807_v37  ;;  %v2851_v23 = vsub.f32 %v2835_v55, %v2843_v9  ;;  %v2845_v61 = vmul.f32 %v2829_v57, %v5728_v7  ;;  %v2839_v7 = vld [vmem:[%s6014_s3 + $0x38] sm:$0xff]  ;;  %v2871_v39 = vld [vmem:[#allocation2 + $0x68] sm:$0xff]  ;;  %v2870_v37 = vld [vmem:[#allocation2 + $0x60] sm:$0xff] }
 0x2e4   : > { %2897 = vperm.xlu0 %4430, %v2825_v21   ;;  %v4447_v15 = vpop.eup %4446  ;;  %v2849_v62 = vsub.f32 %v2833_v54, %v2841_v28  ;;  %v2844_v14 = vmul.f32 %v2828_v11, %v5732_v41  ;;  %v2838_v41 = vld [vmem:[%s6014_s3 + $0x30] sm:$0xff]  ;;  %v2887_v21 = vld [vmem:[#allocation2 + $0xe8] sm:$0xff]  ;;  %v2865_v54 = vld [vmem:[#allocation2 + $0x38] sm:$0xff] }
 0x2e5   : > { %v2830_v33 = vmul.f32 %v4447_v15, %v2806_v51  ;;  %v2853_v1 = vsub.f32 %v2837_v38, %v2845_v61  ;;  %v2847_v34 = vmul.f32 %v2831_v20, %v5736_v0  ;;  %v2878_v51 = vld [vmem:[#allocation2 + $0xa0] sm:$0xff]  ;;  %v2864_v61 = vld [vmem:[#allocation2 + $0x30] sm:$0xff] }
 0x2e6   : > { %v2852_v53 = vsub.f32 %v2836_v46, %v2844_v14 }
 0x2e7   : > { %2917 = vperm.xlu1 %4431, %v2829_v57   ;;  %v2846_v56 = vmul.f32 %v2830_v33, %v5742_v3  ;;  %v2855_v5 = vsub.f32 %v2839_v7, %v2847_v34  ;;  %v2874_v3 = vld [vmem:[#allocation2 + $0x80] sm:$0xff]  ;;  %v2872_v34 = vld [vmem:[#allocation2 + $0x70] sm:$0xff] }
 0x2e8   : > { %2912 = vperm.xlu0 %4430, %v2828_v11   ;;  %v2862_v11 = vld [vmem:[#allocation2 + $0x20] sm:$0xff]  ;;  %v2888_v7 = vld [vmem:[#allocation2 + $0xf0] sm:$0xff] }
 0x2e9   : > { %v2854_v19 = vsub.f32 %v2838_v41, %v2846_v56 }
 0x2eb   : > { %2927 = vperm.xlu1 %4431, %v2831_v20  }
 0x2ec   : > { %2922 = vperm.xlu0 %4430, %v2830_v33   ;;  %v2886_v33 = vld [vmem:[#allocation2 + $0xe0] sm:$0xff] }
 0x2ef   : > { %2969 = vperm.xlu1 %4431, %v2849_v62  }
 0x2f0   : > { %2964 = vperm.xlu0 %4430, %v2848_v27  }
 0x2f3   : > { %2979 = vperm.xlu1 %4431, %v2851_v23   ;;  %v2889_v23 = vld [vmem:[#allocation2 + $0xf8] sm:$0xff] }
 0x2f4   : > { %2974 = vperm.xlu0 %4430, %v2850_v60  }
 0x2f7   : > { %2989 = vperm.xlu1 %4431, %v2853_v1  }
 0x2f8   : > { %2984 = vperm.xlu0 %4430, %v2852_v53   ;;  %v2880_v53 = vld [vmem:[#allocation2 + $0xb0] sm:$0xff] }
 0x2fb   : > { %2999 = vperm.xlu1 %4431, %v2855_v5  }
 0x2fc   : > { %2994 = vperm.xlu0 %4430, %v2854_v19  }
 0x35e   : > { %v2903_v18 = vpop.permute.xlu1 %2902 }
 0x35f   : > { %v2893_v0 = vpop.permute.xlu0 %2892  ;;  %v5802_v29 = vmul.f32 %v2903_v18, %v2860_v8  ;;  %v5804_v17 = vmul.f32 %v2903_v18, %v2868_v2  ;;  %v5806_v43 = vmul.f32 %v2903_v18, %v2876_v36  ;;  %v5808_v58 = vmul.f32 %v2903_v18, %v2884_v52 }
 0x360   : > { %v2930_v50 = vmul.f32 %v2893_v0, %v2858_v30  ;;  %v2938_v48 = vmul.f32 %v2893_v0, %v2866_v12  ;;  %v2946_v57 = vmul.f32 %v2893_v0, %v2874_v3  ;;  %v2954_v59 = vmul.f32 %v2893_v0, %v2882_v24 }
 0x362   : > { %v2908_v22 = vpop.permute.xlu1 %2907 }
 0x363   : > { %v2898_v10 = vpop.permute.xlu0 %2897  ;;  %v5810_v15 = vmul.f32 %v2908_v22, %v2861_v44  ;;  %v5812_v20 = vmul.f32 %v2908_v22, %v2869_v47  ;;  %v5814_v28 = vmul.f32 %v2908_v22, %v2877_v40  ;;  %v5816_v25 = vmul.f32 %v2908_v22, %v2885_v35 }
 0x364   : > { %v2931_v62 = vmul.f32 %v2898_v10, %v2859_v4  ;;  %v2939_v9 = vmul.f32 %v2898_v10, %v2867_v45  ;;  %v2947_v63 = vmul.f32 %v2898_v10, %v2875_v26  ;;  %v2955_v27 = vmul.f32 %v2898_v10, %v2883_v13 }
 0x366   : > { %v2918_v42 = vpop.permute.xlu1 %2917 }
 0x367   : > { %v2913_v49 = vpop.permute.xlu0 %2912  ;;  %v5818_v60 = vmul.f32 %v2918_v42, %v2863_v31  ;;  %v5820_v38 = vmul.f32 %v2918_v42, %v2871_v39  ;;  %v5822_v14 = vmul.f32 %v2918_v42, %v2879_v16  ;;  %v5824_v46 = vmul.f32 %v2918_v42, %v2887_v21 }
 0x368   : > { %v5826_v56 = vmul.f32 %v2913_v49, %v2862_v11  ;;  %v5828_v41 = vmul.f32 %v2913_v49, %v2870_v37  ;;  %v5830_v5 = vmul.f32 %v2913_v49, %v2878_v51  ;;  %v5832_v19 = vmul.f32 %v2913_v49, %v2886_v33 }
 0x36a   : > { %v2928_v55 = vpop.permute.xlu1 %2927 }
 0x36b   : > { %v2923_v1 = vpop.permute.xlu0 %2922  ;;  %v5834_v18 = vmul.f32 %v2928_v55, %v2865_v54  ;;  %v5836_v0 = vmul.f32 %v2928_v55, %v2873_v32  ;;  %v5838_v8 = vmul.f32 %v2928_v55, %v2881_v6  ;;  %v5840_v2 = vmul.f32 %v2928_v55, %v2889_v23 }
 0x36c   : > { %v5842_v52 = vmul.f32 %v2923_v1, %v2864_v61  ;;  %v5844_v22 = vmul.f32 %v2923_v1, %v2872_v34  ;;  %v5846_v30 = vmul.f32 %v2923_v1, %v2880_v53  ;;  %v5848_v12 = vmul.f32 %v2923_v1, %v2888_v7 }
 0x36e   : > { %v2970_v36 = vpop.permute.xlu1 %2969 }
 0x36f   : > { %v3003_v3 = vadd.f32 %v2970_v36, %v2931_v62  ;;  %v3011_v24 = vadd.f32 %v2970_v36, %v2939_v9  ;;  %v3019_v10 = vadd.f32 %v2970_v36, %v2947_v63  ;;  %v3027_v44 = vadd.f32 %v2970_v36, %v2955_v27  ;;  %v2965_v47 = vpop.permute.xlu0 %2964 }
 0x370   : > { %v3002_v40 = vadd.f32 %v2965_v47, %v2930_v50  ;;  %v3010_v35 = vadd.f32 %v2965_v47, %v2938_v48  ;;  %v3018_v4 = vadd.f32 %v2965_v47, %v2946_v57  ;;  %v3026_v45 = vadd.f32 %v2965_v47, %v2954_v59 }
 0x371   : > { %v3035_v26 = vmax.f32 %v3003_v3, 0.0  ;;  %v3043_v13 = vmax.f32 %v3011_v24, 0.0  ;;  %v3051_v31 = vmax.f32 %v3019_v10, 0.0  ;;  %v3059_v42 = vmax.f32 %v3027_v44, 0.0 }
 0x372   : > { %v3034_v39 = vmax.f32 %v3002_v40, 0.0  ;;  %v3042_v16 = vmax.f32 %v3010_v35, 0.0  ;;  %v3050_v21 = vmax.f32 %v3018_v4, 0.0  ;;  %v3058_v49 = vmax.f32 %v3026_v45, 0.0  ;;  %v2980_v11 = vpop.permute.xlu1 %2979 }
 0x373   : > { %v3557_v37 = vpack.c.bf16 %v3035_v26, %v3035_v26  ;;  %v3565_v51 = vpack.c.bf16 %v3043_v13, %v3043_v13  ;;  %v3573_v33 = vpack.c.bf16 %v3051_v31, %v3051_v31  ;;  %v3581_v54 = vpack.c.bf16 %v3059_v42, %v3059_v42  ;;  %v2975_v32 = vpop.permute.xlu0 %2974 }
 0x374   : > { %v3556_v62 = vpack.c.bf16 %v3034_v39, %v3034_v39  ;;  %v3564_v9 = vpack.c.bf16 %v3042_v16, %v3042_v16  ;;  %v3572_v50 = vpack.c.bf16 %v3050_v21, %v3050_v21  ;;  %v3580_v48 = vpack.c.bf16 %v3058_v49, %v3058_v49 }
 0x375   : > { %3196 = vst.msk [vmem:[%s6015_s4 + $0x4] sm:$0xf] %vm3194_vm2, %v3557_v37  ;;  %3204 = vst.msk [vmem:[%s6015_s4 + $0x24] sm:$0xf] %vm3194_vm2, %v3565_v51  ;;  %v3005_v57 = vadd.f32 %v2980_v11, %v5810_v15  ;;  %v3013_v59 = vadd.f32 %v2980_v11, %v5812_v20  ;;  %v3021_v63 = vadd.f32 %v2980_v11, %v5814_v28 }
 0x376   : > { %3212 = vst.msk [vmem:[%s6015_s4 + $0x44] sm:$0xf] %vm3194_vm2, %v3573_v33  ;;  %3220 = vst.msk [vmem:[%s6015_s4 + $0x64] sm:$0xf] %vm3194_vm2, %v3581_v54  ;;  %v3029_v27 = vadd.f32 %v2980_v11, %v5816_v25  ;;  %v3004_v15 = vadd.f32 %v2975_v32, %v5802_v29  ;;  %v3012_v20 = vadd.f32 %v2975_v32, %v5804_v17  ;;  %v2990_v36 = vpop.permute.xlu1 %2989 }
 0x377   : > { %3195 = vst.msk [vmem:[%s6015_s4] sm:$0xf] %vm3194_vm2, %v3556_v62  ;;  %3203 = vst.msk [vmem:[%s6015_s4 + $0x20] sm:$0xf] %vm3194_vm2, %v3564_v9  ;;  %v3020_v28 = vadd.f32 %v2975_v32, %v5806_v43  ;;  %v3028_v25 = vadd.f32 %v2975_v32, %v5808_v58  ;;  %v3037_v55 = vmax.f32 %v3005_v57, 0.0  ;;  %v3045_v6 = vmax.f32 %v3013_v59, 0.0  ;;  %v2985_v29 = vpop.permute.xlu0 %2984 }
 0x378   : > { %3211 = vst.msk [vmem:[%s6015_s4 + $0x40] sm:$0xf] %vm3194_vm2, %v3572_v50  ;;  %3219 = vst.msk [vmem:[%s6015_s4 + $0x60] sm:$0xf] %vm3194_vm2, %v3580_v48  ;;  %v3053_v23 = vmax.f32 %v3021_v63, 0.0  ;;  %v3061_v61 = vmax.f32 %v3029_v27, 0.0  ;;  %v3007_v58 = vadd.f32 %v2990_v36, %v5818_v60  ;;  %v3015_v35 = vadd.f32 %v2990_v36, %v5820_v38 }
 0x379   : > { %v3036_v1 = vmax.f32 %v3004_v15, 0.0  ;;  %v3044_v34 = vmax.f32 %v3012_v20, 0.0  ;;  %v3052_v53 = vmax.f32 %v3020_v28, 0.0  ;;  %v3060_v7 = vmax.f32 %v3028_v25, 0.0 }
 0x37a   : > { %v3559_v3 = vpack.c.bf16 %v3037_v55, %v3037_v55  ;;  %v3567_v24 = vpack.c.bf16 %v3045_v6, %v3045_v6  ;;  %v3575_v10 = vpack.c.bf16 %v3053_v23, %v3053_v23  ;;  %v3583_v44 = vpack.c.bf16 %v3061_v61, %v3061_v61  ;;  %v3000_v11 = vpop.permute.xlu1 %2999 }
 0x37b   : > { %v3558_v47 = vpack.c.bf16 %v3036_v1, %v3036_v1  ;;  %v3566_v17 = vpack.c.bf16 %v3044_v34, %v3044_v34  ;;  %v3574_v40 = vpack.c.bf16 %v3052_v53, %v3052_v53  ;;  %v3582_v43 = vpack.c.bf16 %v3060_v7, %v3060_v7 }
 0x37c   : > { %3198 = vst.msk [vmem:[%s6015_s4 + $0xc] sm:$0xf] %vm3194_vm2, %v3559_v3  ;;  %3206 = vst.msk [vmem:[%s6015_s4 + $0x2c] sm:$0xf] %vm3194_vm2, %v3567_v24  ;;  %v3023_v4 = vadd.f32 %v2990_v36, %v5822_v14  ;;  %v3031_v45 = vadd.f32 %v2990_v36, %v5824_v46  ;;  %v3006_v60 = vadd.f32 %v2985_v29, %v5826_v56  ;;  %v3039_v26 = vmax.f32 %v3007_v58, 0.0  ;;  %v2995_v56 = vpop.permute.xlu0 %2994 }
 0x37d   : > { %3214 = vst.msk [vmem:[%s6015_s4 + $0x4c] sm:$0xf] %vm3194_vm2, %v3575_v10  ;;  %3222 = vst.msk [vmem:[%s6015_s4 + $0x6c] sm:$0xf] %vm3194_vm2, %v3583_v44  ;;  %v3014_v38 = vadd.f32 %v2985_v29, %v5828_v41  ;;  %v3022_v14 = vadd.f32 %v2985_v29, %v5830_v5  ;;  %v3030_v46 = vadd.f32 %v2985_v29, %v5832_v19  ;;  %v3047_v13 = vmax.f32 %v3015_v35, 0.0 }
 0x37e   : > { %3197 = vst.msk [vmem:[%s6015_s4 + $0x8] sm:$0xf] %vm3194_vm2, %v3558_v47  ;;  %3205 = vst.msk [vmem:[%s6015_s4 + $0x28] sm:$0xf] %vm3194_vm2, %v3566_v17  ;;  %v3055_v31 = vmax.f32 %v3023_v4, 0.0  ;;  %v3063_v42 = vmax.f32 %v3031_v45, 0.0  ;;  %v3561_v37 = vpack.c.bf16 %v3039_v26, %v3039_v26  ;;  %v3009_v19 = vadd.f32 %v3000_v11, %v5834_v18 }
 0x37f   : > { %3213 = vst.msk [vmem:[%s6015_s4 + $0x48] sm:$0xf] %vm3194_vm2, %v3574_v40  ;;  %3221 = vst.msk [vmem:[%s6015_s4 + $0x68] sm:$0xf] %vm3194_vm2, %v3582_v43  ;;  %v3038_v39 = vmax.f32 %v3006_v60, 0.0  ;;  %v3046_v16 = vmax.f32 %v3014_v38, 0.0  ;;  %v3569_v51 = vpack.c.bf16 %v3047_v13, %v3047_v13  ;;  %v3017_v9 = vadd.f32 %v3000_v11, %v5836_v0 }
 0x380   : > { %v3054_v21 = vmax.f32 %v3022_v14, 0.0  ;;  %v3062_v49 = vmax.f32 %v3030_v46, 0.0  ;;  %v3577_v33 = vpack.c.bf16 %v3055_v31, %v3055_v31  ;;  %v3585_v54 = vpack.c.bf16 %v3063_v42, %v3063_v42  ;;  %3200 = vst.msk [vmem:[%s6015_s4 + $0x14] sm:$0xf] %vm3194_vm2, %v3561_v37 }
 0x381   : > { %v3560_v32 = vpack.c.bf16 %v3038_v39, %v3038_v39  ;;  %v3568_v41 = vpack.c.bf16 %v3046_v16, %v3046_v16  ;;  %3208 = vst.msk [vmem:[%s6015_s4 + $0x34] sm:$0xf] %vm3194_vm2, %v3569_v51  ;;  %v3025_v50 = vadd.f32 %v3000_v11, %v5838_v8  ;;  %v3033_v48 = vadd.f32 %v3000_v11, %v5840_v2 }
 0x382   : > { %v3576_v62 = vpack.c.bf16 %v3054_v21, %v3054_v21  ;;  %v3584_v5 = vpack.c.bf16 %v3062_v49, %v3062_v49  ;;  %3216 = vst.msk [vmem:[%s6015_s4 + $0x54] sm:$0xf] %vm3194_vm2, %v3577_v33  ;;  %3224 = vst.msk [vmem:[%s6015_s4 + $0x74] sm:$0xf] %vm3194_vm2, %v3585_v54  ;;  %v3008_v18 = vadd.f32 %v2995_v56, %v5842_v52  ;;  %v3041_v57 = vmax.f32 %v3009_v19, 0.0 }
 0x383   : > { %3199 = vst.msk [vmem:[%s6015_s4 + $0x10] sm:$0xf] %vm3194_vm2, %v3560_v32  ;;  %3207 = vst.msk [vmem:[%s6015_s4 + $0x30] sm:$0xf] %vm3194_vm2, %v3568_v41  ;;  %v3016_v0 = vadd.f32 %v2995_v56, %v5844_v22  ;;  %v3024_v8 = vadd.f32 %v2995_v56, %v5846_v30  ;;  %v3032_v2 = vadd.f32 %v2995_v56, %v5848_v12  ;;  %v3049_v59 = vmax.f32 %v3017_v9, 0.0 }
 0x384   : > { %3215 = vst.msk [vmem:[%s6015_s4 + $0x50] sm:$0xf] %vm3194_vm2, %v3576_v62  ;;  %3223 = vst.msk [vmem:[%s6015_s4 + $0x70] sm:$0xf] %vm3194_vm2, %v3584_v5  ;;  %v3057_v63 = vmax.f32 %v3025_v50, 0.0  ;;  %v3065_v27 = vmax.f32 %v3033_v48, 0.0  ;;  %v3563_v55 = vpack.c.bf16 %v3041_v57, %v3041_v57 }
 0x385   : > { %v3040_v15 = vmax.f32 %v3008_v18, 0.0  ;;  %v3048_v20 = vmax.f32 %v3016_v0, 0.0  ;;  %v3056_v28 = vmax.f32 %v3024_v8, 0.0  ;;  %v3064_v25 = vmax.f32 %v3032_v2, 0.0 }
 0x386   : > { %v3571_v6 = vpack.c.bf16 %v3049_v59, %v3049_v59  ;;  %v3579_v23 = vpack.c.bf16 %v3057_v63, %v3057_v63  ;;  %v3587_v61 = vpack.c.bf16 %v3065_v27, %v3065_v27  ;;  %3202 = vst.msk [vmem:[%s6015_s4 + $0x1c] sm:$0xf] %vm3194_vm2, %v3563_v55 }
 0x387   : > { %v3562_v1 = vpack.c.bf16 %v3040_v15, %v3040_v15  ;;  %v3570_v52 = vpack.c.bf16 %v3048_v20, %v3048_v20  ;;  %v3578_v34 = vpack.c.bf16 %v3056_v28, %v3056_v28  ;;  %v3586_v22 = vpack.c.bf16 %v3064_v25, %v3064_v25 }
 0x388   : > { %3210 = vst.msk [vmem:[%s6015_s4 + $0x3c] sm:$0xf] %vm3194_vm2, %v3571_v6  ;;  %3218 = vst.msk [vmem:[%s6015_s4 + $0x5c] sm:$0xf] %vm3194_vm2, %v3579_v23 }
 0x389   : > { %3226 = vst.msk [vmem:[%s6015_s4 + $0x7c] sm:$0xf] %vm3194_vm2, %v3587_v61  ;;  %3201 = vst.msk [vmem:[%s6015_s4 + $0x18] sm:$0xf] %vm3194_vm2, %v3562_v1 }
 0x38a   : > { %3209 = vst.msk [vmem:[%s6015_s4 + $0x38] sm:$0xf] %vm3194_vm2, %v3570_v52  ;;  %3217 = vst.msk [vmem:[%s6015_s4 + $0x58] sm:$0xf] %vm3194_vm2, %v3578_v34 }
 0x38b   : > { %3225 = vst.msk [vmem:[%s6015_s4 + $0x78] sm:$0xf] %vm3194_vm2, %v3586_v22 }
 0x38c PF: > { %s14_s17 = sadd.s32 1, %s4470_s17   ;;  %s6016_s15 = smov %s4466_s16 }
 0x38d   : > { %p11_p6 = scmp.ge.s32.totalorder %s14_s17, 4   ;;  %s6017_s16 = smov %s6019_s18 }
 0x38f   :  { %13 = sbr.rel (!%p11_p6) target bundleno = 2 (0x2), region = 80 }

// kernel: _lambda_.7
= control target key start
LH: loop header
LB: loop body
LE: loop exit
PB: predicated region body
PF: predicated region fallthrough
CT: control target
= control target key end

     0   :  { %s2035_s15 = smov 0   ;;  %s2037_s16 = smov 0   ;;  %s2396_s0 = inlined_call_operand.vmem [shape: bf16[128,576], index: 0, kind: input, shape index: {}]   ;;  %s2397_s1 = inlined_call_operand.vmem [shape: bf16[576,128], index: 1, kind: input, shape index: {}]   ;;  %s2398_s2 = inlined_call_operand.vmem [shape: f32[32,1], index: 2, kind: input, shape index: {}]   ;;  %s2399_s3 = inlined_call_operand.vmem [shape: f32[32,1], index: 3, kind: input, shape index: {}]   ;;  %s2400_s4 = inlined_call_operand.vmem [shape: bf16[128,128], index: 4, kind: output, shape index: {}]  }
   0x1   :  { %s2039_s17 = smov 0  }
   0x2 LB: > { %s26_s18 = sadd.s32 1, %s2002_s16  ;;  %p1514_p0 = scmp.ge.s32.totalorder %s2006_s17, 1  ;;  %s2006_s17 = sphi %s2039_s17, %s14_s17   ;;  %s2002_s16 = sphi %s2037_s16, %s2402_s16   ;;  %s1998_s15 = sphi %s2035_s15, %s2401_s15  }
   0x3   : > { %p28_p1 = scmp.ge.s32.totalorder %s26_s18, 2  ;;  %p183_p2 = scmp.lt.s32.totalorder %s2006_s17, 3 }
   0x5   : > { %s2404_s18 = smov (%p28_p1, %s26_s18), 0  ;;  %p184_p3 = pnand %p1514_p0, %p183_p2 }
   0x6   : > { %p1515_p4 = scmp.ne.s32.totalorder (!%p184_p3), %s1998_s15, 0 }
   0x7   : > { %187 = sbr.rel (%p184_p3) target bundleno = 678 (0x2a6), region = 36 }
   0xe   : > { %228 = sbr.rel (%p1515_p4) target bundleno = 499 (0x1f3), region = 40  ;;  %v1882_v0 = vld [vmem:[%s2397_s1 + $0x40] sm:$0xff] (!%p1515_p4)   ;;  %v1886_v4 = vld [vmem:[%s2397_s1 + $0x48] sm:$0xff] (!%p1515_p4)   ;;  %v1890_v8 = vld [vmem:[%s2397_s1 + $0x50] sm:$0xff] (!%p1515_p4)   ;;  %vm778_vm0 = vcmask (!%p1515_p4), 523264   ;;  %vm233_vm1 = vcmask (!%p1515_p4), 7168  }
   0xf   : > { %v1883_v1 = vld [vmem:[%s2397_s1 + $0xc0] sm:$0xff] (!%p1515_p4)   ;;  %1684 = vmatprep.subr.bf16.mxu0 (!%p1515_p4), %v1882_v0  ;;  %v1887_v5 = vld [vmem:[%s2397_s1 + $0xc8] sm:$0xff] (!%p1515_p4)   ;;  %v1891_v9 = vld [vmem:[%s2397_s1 + $0xd0] sm:$0xff] (!%p1515_p4)  }
  0x10   : > { %v1884_v2 = vld [vmem:[%s2397_s1] sm:$0xff] (!%p1515_p4)   ;;  %1748 = vmatprep.subr.bf16.mxu1 (!%p1515_p4), %v1883_v1  ;;  %v1888_v6 = vld [vmem:[%s2397_s1 + $0x8] sm:$0xff] (!%p1515_p4)   ;;  %v1892_v10 = vld [vmem:[%s2397_s1 + $0x10] sm:$0xff] (!%p1515_p4)  }
  0x11   : > { %v1885_v3 = vld [vmem:[%s2397_s1 + $0x80] sm:$0xff] (!%p1515_p4)   ;;  %1685 = vmatpush3.bf16.msra.mxu0 (!%p1515_p4), %v1884_v2  ;;  %v1889_v7 = vld [vmem:[%s2397_s1 + $0x88] sm:$0xff] (!%p1515_p4)   ;;  %v1893_v11 = vld [vmem:[%s2397_s1 + $0x90] sm:$0xff] (!%p1515_p4)  }
  0x12   : > { %1749 = vmatpush3.bf16.msra.mxu1 (!%p1515_p4), %v1885_v3  ;;  %1686 = vmatprep.subr.bf16.mxu0 (!%p1515_p4), %v1886_v4  ;;  %v1894_v12 = vld [vmem:[%s2397_s1 + $0x58] sm:$0xff] (!%p1515_p4)   ;;  %v1898_v16 = vld [vmem:[%s2397_s1 + $0x60] sm:$0xff] (!%p1515_p4)   ;;  %v1902_v20 = vld [vmem:[%s2397_s1 + $0x68] sm:$0xff] (!%p1515_p4)  }
  0x13   : > { %1750 = vmatprep.subr.bf16.mxu1 (!%p1515_p4), %v1887_v5  ;;  %v1895_v13 = vld [vmem:[%s2397_s1 + $0xd8] sm:$0xff] (!%p1515_p4)   ;;  %v1899_v17 = vld [vmem:[%s2397_s1 + $0xe0] sm:$0xff] (!%p1515_p4)   ;;  %v1903_v21 = vld [vmem:[%s2397_s1 + $0xe8] sm:$0xff] (!%p1515_p4)  }
  0x14   : > { %v1896_v14 = vld [vmem:[%s2397_s1 + $0x18] sm:$0xff] (!%p1515_p4)   ;;  %v1900_v18 = vld [vmem:[%s2397_s1 + $0x20] sm:$0xff] (!%p1515_p4)   ;;  %v1904_v22 = vld [vmem:[%s2397_s1 + $0x28] sm:$0xff] (!%p1515_p4)  }
  0x15   : > { %1687 = vmatpush3.bf16.msra.mxu0 %v1888_v6  ;;  %v1897_v15 = vld [vmem:[%s2397_s1 + $0x98] sm:$0xff]   ;;  %v1901_v19 = vld [vmem:[%s2397_s1 + $0xa0] sm:$0xff]   ;;  %v1905_v23 = vld [vmem:[%s2397_s1 + $0xa8] sm:$0xff]  }
  0x16   : > { %1751 = vmatpush3.bf16.msra.mxu1 %v1889_v7  ;;  %1688 = vmatprep.subr.bf16.mxu0 %v1890_v8  ;;  %v1906_v24 = vld [vmem:[%s2397_s1 + $0x70] sm:$0xff]   ;;  %v1910_v28 = vld [vmem:[%s2397_s1 + $0x78] sm:$0xff]   ;;  %v1919_v35 = vld [vmem:[%s2396_s0 + $0xc] ss:$20 sps:$4 sm:$0xff]  }
  0x17   : > { %1752 = vmatprep.subr.bf16.mxu1 %v1891_v9  ;;  %v1907_v25 = vld [vmem:[%s2397_s1 + $0xf0] sm:$0xff]   ;;  %v1911_v29 = vld [vmem:[%s2397_s1 + $0xf8] sm:$0xff]   ;;  %v1920_v36 = vld [vmem:[%s2397_s1 + $0x100] sm:$0xff]   ;;  %932 = vmatprep.mubr.bf16.mxu1 %v1919_v35 }
  0x18   : > { %v1908_v26 = vld [vmem:[%s2397_s1 + $0x30] sm:$0xff]   ;;  %v1912_v30 = vld [vmem:[%s2397_s1 + $0x38] sm:$0xff]   ;;  %v1921_v37 = vld [vmem:[%s2396_s0 + $0x2c] ss:$20 sps:$4 sm:$0xff]  }
  0x19   : > { %1689 = vmatpush3.bf16.msra.mxu0 %v1892_v10  ;;  %v1909_v27 = vld [vmem:[%s2397_s1 + $0xb0] sm:$0xff]   ;;  %v1913_v31 = vld [vmem:[%s2397_s1 + $0xb8] sm:$0xff]   ;;  %v1933_v42 = vld [vmem:[%s2397_s1 + $0x108] sm:$0xff]  }
  0x1a   : > { %1753 = vmatpush3.bf16.msra.mxu1 %v1893_v11  ;;  %1690 = vmatprep.subr.bf16.mxu0 %v1894_v12  ;;  %v1914_v32 = vld [vmem:[%s2396_s0] ss:$20 sps:$4 sm:$0xff]   ;;  %v1916_v33 = vld [vmem:[%s2396_s0 + $0x4] ss:$20 sps:$4 sm:$0xff]   ;;  %v1917_v34 = vld [vmem:[%s2396_s0 + $0x8] ss:$20 sps:$4 sm:$0xff]  }
  0x1b   : > { %1754 = vmatprep.subr.bf16.mxu1 %v1895_v13  ;;  %835 = vmatprep.mubr.bf16.mxu0 %v1916_v33  ;;  %v1923_v38 = vld [vmem:[%s2396_s0 + $0x34] ss:$20 sps:$4 sm:$0xff]   ;;  %v1926_v40 = vld [vmem:[%s2396_s0 + $0x30] ss:$20 sps:$4 sm:$0xff]   ;;  %v1932_v45 = vld [vmem:[%s2396_s0 + $0x58] ss:$20 sps:$4 sm:$0xff]  }
  0x1c   : > { %v1925_v39 = vld [vmem:[%s2396_s0 + $0x28] ss:$20 sps:$4 sm:$0xff]   ;;  %v1931_v44 = vld [vmem:[%s2396_s0 + $0x50] ss:$20 sps:$4 sm:$0xff]   ;;  %v1938_v50 = vld [vmem:[%s2396_s0 + $0x78] ss:$20 sps:$4 sm:$0xff]  }
  0x1d   : > { %1691 = vmatpush3.bf16.msra.mxu0 %v1896_v14  ;;  %v1927_v41 = vld [vmem:[%s2396_s0 + $0x54] ss:$20 sps:$4 sm:$0xff]   ;;  %v1929_v43 = vld [vmem:[%s2396_s0 + $0x5c] ss:$20 sps:$4 sm:$0xff]   ;;  %v1936_v48 = vld [vmem:[%s2396_s0 + $0x84] ss:$20 sps:$4 sm:$0xff]  }
  0x1e   : > { %1755 = vmatpush3.bf16.msra.mxu1 %v1897_v15  ;;  %1692 = vmatprep.subr.bf16.mxu0 %v1898_v16  ;;  %v1946_v46 = vld [vmem:[%s2397_s1 + $0x110] sm:$0xff]   ;;  %v1959_v49 = vld [vmem:[%s2397_s1 + $0x118] sm:$0xff]   ;;  %v1942_v53 = vld [vmem:[%s2396_s0 + $0xac] ss:$20 sps:$4 sm:$0xff]  }
  0x1f   : > { %1756 = vmatprep.subr.bf16.mxu1 %v1899_v17  ;;  %v1934_v47 = vld [vmem:[%s2396_s0 + $0x7c] ss:$20 sps:$4 sm:$0xff]   ;;  %v1939_v51 = vld [vmem:[%s2396_s0 + $0x80] ss:$20 sps:$4 sm:$0xff]   ;;  %v1940_v52 = vld [vmem:[%s2396_s0 + $0xa4] ss:$20 sps:$4 sm:$0xff]  }
  0x20   : > { %v1944_v54 = vld [vmem:[%s2396_s0 + $0xa0] ss:$20 sps:$4 sm:$0xff]   ;;  %v1945_v55 = vld [vmem:[%s2396_s0 + $0xa8] ss:$20 sps:$4 sm:$0xff]   ;;  %v1952_v59 = vld [vmem:[%s2396_s0 + $0xd0] ss:$20 sps:$4 sm:$0xff]  }
  0x21   : > { %1693 = vmatpush3.bf16.msra.mxu0 %v1900_v18  ;;  %v1947_v56 = vld [vmem:[%s2396_s0 + $0xcc] ss:$20 sps:$4 sm:$0xff]   ;;  %v1949_v57 = vld [vmem:[%s2396_s0 + $0xd4] ss:$20 sps:$4 sm:$0xff]   ;;  %v1955_v61 = vld [vmem:[%s2396_s0 + $0xfc] ss:$20 sps:$4 sm:$0xff]  }
  0x22   : > { %1757 = vmatpush3.bf16.msra.mxu1 %v1901_v19  ;;  %1694 = vmatprep.subr.bf16.mxu0 %v1902_v20  ;;  %v1951_v58 = vld [vmem:[%s2396_s0 + $0xc8] ss:$20 sps:$4 sm:$0xff]   ;;  %v1957_v62 = vld [vmem:[%s2396_s0 + $0xf0] ss:$20 sps:$4 sm:$0xff]   ;;  %v1958_v63 = vld [vmem:[%s2396_s0 + $0xf8] ss:$20 sps:$4 sm:$0xff]  }
  0x23   : > { %1758 = vmatprep.subr.bf16.mxu1 %v1903_v21  ;;  %v1953_v60 = vld [vmem:[%s2396_s0 + $0xf4] ss:$20 sps:$4 sm:$0xff]   ;;  %v1960_v0 = vld [vmem:[%s2396_s0 + $0x11c] ss:$20 sps:$4 sm:$0xff]   ;;  %v1962_v1 = vld [vmem:[%s2396_s0 + $0x124] ss:$20 sps:$4 sm:$0xff]  }
  0x24   : > { %v1964_v2 = vld [vmem:[%s2396_s0 + $0x118] ss:$20 sps:$4 sm:$0xff]   ;;  %v1965_v3 = vld [vmem:[%s2396_s0 + $0x120] ss:$20 sps:$4 sm:$0xff]   ;;  %v1966_v4 = vld [vmem:[%s2396_s0 + $0x10] ss:$20 sps:$4 sm:$0xff]  }
  0x25   : > { %1695 = vmatpush3.bf16.msra.mxu0 %v1904_v22  ;;  %v1967_v5 = vld [vmem:[%s2396_s0 + $0xb0] ss:$20 sps:$4 sm:$0xff]   ;;  %v1968_v6 = vld [vmem:[%s2396_s0 + $0x38] ss:$20 sps:$4 sm:$0xff]   ;;  %v1970_v8 = vld [vmem:[%s2396_s0 + $0x60] ss:$20 sps:$4 sm:$0xff]  }
  0x26   : > { %1759 = vmatpush3.bf16.msra.mxu1 %v1905_v23  ;;  %1696 = vmatprep.subr.bf16.mxu0 %v1906_v24  ;;  %v1969_v7 = vld [vmem:[%s2396_s0 + $0xd8] ss:$20 sps:$4 sm:$0xff]   ;;  %v1971_v9 = vld [vmem:[%s2396_s0 + $0x100] ss:$20 sps:$4 sm:$0xff]   ;;  %v1972_v10 = vld [vmem:[%s2396_s0 + $0x88] ss:$20 sps:$4 sm:$0xff]  }
  0x27   : > { %1760 = vmatprep.subr.bf16.mxu1 %v1907_v25  ;;  %v1973_v11 = vld [vmem:[%s2396_s0 + $0x128] ss:$20 sps:$4 sm:$0xff]  }
  0x29   : > { %1697 = vmatpush3.bf16.msra.mxu0 %v1908_v26 }
  0x2a   : > { %1761 = vmatpush3.bf16.msra.mxu1 %v1909_v27  ;;  %1698 = vmatprep.subr.bf16.mxu0 %v1910_v28 }
  0x2b   : > { %1762 = vmatprep.subr.bf16.mxu1 %v1911_v29 }
  0x2d   : > { %1699 = vmatpush3.bf16.msra.mxu0 %v1912_v30 }
  0x2e   : > { %1763 = vmatpush3.bf16.msra.mxu1 %v1913_v31  ;;  %1824 = vmatprep.subr.bf16.mxu0 %v1920_v36 }
  0x2f   : > { %1848 = vmatprep.subr.bf16.mxu1 %v1920_v36 }
  0x30   : > { %836 = vmatmul.mubr.bf16.vlgmr.msra.gmra.mrb[0].mxu0 %v1914_v32 }
  0x31   : > { %933 = vmatmul.mubr.bf16.vlgmr.msra.gmra.mrb[0].mxu1 %v1917_v34  ;;  %1825 = vmatpush3.bf16.msra.mxu0 %v1920_v36 }
  0x32   : > { %1852 = vmatpush3.bf16.msra.mxu1 %v1920_v36  ;;  %843 = vmatprep.mubr.bf16.mxu0 %v1921_v37 }
  0x33   : > { %940 = vmatprep.mubr.bf16.mxu1 %v1923_v38  ;;  %1826 = vmatprep.subr.bf16.mxu0 %v1933_v42 }
  0x34   : > { %1849 = vmatprep.subr.bf16.mxu1 %v1933_v42 }
  0x35   : > { %1827 = vmatpush3.bf16.msra.mxu0 %v1933_v42 }
  0x36   : > { %1853 = vmatpush3.bf16.msra.mxu1 %v1933_v42  ;;  %1828 = vmatprep.subr.bf16.mxu0 %v1946_v46 }
  0x37   : > { %1850 = vmatprep.subr.bf16.mxu1 %v1946_v46 }
  0x38   : > { %844 = vmatmul.mubr.bf16.gmra.mrb[4].mxu0 %v1925_v39 }
  0x39   : > { %941 = vmatmul.mubr.bf16.gmra.mrb[4].mxu1 %v1926_v40  ;;  %851 = vmatprep.mubr.bf16.mxu0 %v1927_v41 }
  0x3a   : > { %948 = vmatprep.mubr.bf16.mxu1 %v1929_v43  ;;  %1829 = vmatpush3.bf16.msra.mxu0 %v1946_v46 }
  0x3b   : > { %1854 = vmatpush3.bf16.msra.mxu1 %v1946_v46  ;;  %1830 = vmatprep.subr.bf16.mxu0 %v1959_v49 }
  0x3c   : > { %1851 = vmatprep.subr.bf16.mxu1 %v1959_v49 }
  0x3e   : > { %1831 = vmatpush3.bf16.msra.mxu0 %v1959_v49 }
  0x3f   : > { %1855 = vmatpush3.bf16.msra.mxu1 %v1959_v49 }
  0x40   : > { %852 = vmatmul.mubr.bf16.gmra.mrb[8].mxu0 %v1931_v44 }
  0x41   : > { %949 = vmatmul.mubr.bf16.gmra.mrb[8].mxu1 %v1932_v45  ;;  %859 = vmatprep.mubr.bf16.mxu0 %v1934_v47 }
  0x42   : > { %956 = vmatprep.mubr.bf16.mxu1 %v1936_v48 }
  0x48   : > { %860 = vmatmul.mubr.bf16.gmra.mrb[12].mxu0 %v1938_v50 }
  0x49   : > { %957 = vmatmul.mubr.bf16.gmra.mrb[12].mxu1 %v1939_v51  ;;  %867 = vmatprep.mubr.bf16.mxu0 %v1940_v52 }
  0x4a   : > { %964 = vmatprep.mubr.bf16.mxu1 %v1942_v53 }
  0x50   : > { %868 = vmatmul.mubr.bf16.gmra.mrb[16].mxu0 %v1944_v54 }
  0x51   : > { %965 = vmatmul.mubr.bf16.gmra.mrb[16].mxu1 %v1945_v55  ;;  %875 = vmatprep.mubr.bf16.mxu0 %v1947_v56 }
  0x52   : > { %972 = vmatprep.mubr.bf16.mxu1 %v1949_v57 }
  0x58   : > { %876 = vmatmul.mubr.bf16.gmra.mrb[20].mxu0 %v1951_v58 }
  0x59   : > { %973 = vmatmul.mubr.bf16.gmra.mrb[20].mxu1 %v1952_v59  ;;  %883 = vmatprep.mubr.bf16.mxu0 %v1953_v60 }
  0x5a   : > { %980 = vmatprep.mubr.bf16.mxu1 %v1955_v61 }
  0x60   : > { %884 = vmatmul.mubr.bf16.gmra.mrb[24].mxu0 %v1957_v62 }
  0x61   : > { %981 = vmatmul.mubr.bf16.gmra.mrb[24].mxu1 %v1958_v63  ;;  %891 = vmatprep.mubr.bf16.mxu0 %v1960_v0 }
  0x62   : > { %988 = vmatprep.mubr.bf16.mxu1 %v1962_v1 }
  0x68   : > { %892 = vmatmul.mubr.bf16.gmra.mrb[28].mxu0 %v1964_v2 }
  0x69   : > { %989 = vmatmul.mubr.bf16.gmra.mrb[28].mxu1 %v1965_v3  ;;  %1832 = vmatprep.mubr.msk.bf16.mxu0 %vm778_vm0, %v1966_v4 }
  0x6a   : > { %1840 = vmatprep.mubr.msk.bf16.mxu1 %vm778_vm0, %v1967_v5 }
  0x70   : > { %1833 = vmatmul.mubr.msk.bf16.vlgmr.msra.gmra.mrb[32].mxu0 %vm778_vm0, %v1968_v6 }
  0x71   : > { %1841 = vmatmul.mubr.msk.bf16.vlgmr.msra.gmra.mrb[32].mxu1 %vm778_vm0, %v1969_v7  ;;  %1836 = vmatprep.mubr.msk.bf16.mxu0 %vm778_vm0, %v1970_v8 }
  0x72   : > { %1844 = vmatprep.mubr.msk.bf16.mxu1 %vm778_vm0, %v1971_v9 }
  0x78   : > { %1837 = vmatmul.mubr.msk.bf16.gmra.mrb[36].mxu0 %vm778_vm0, %v1972_v10 }
  0x79   : > { %1845 = vmatmul.mubr.msk.bf16.gmra.mrb[36].mxu1 %vm778_vm0, %v1973_v11 }
 0x103   : > { %v1700_v12 = vpop.f32.mrb[0].mxu0 }
 0x104   : > { %v1764_v13 = vpop.f32.mrb[0].mxu1  ;;  %v1701_v14 = vpop.f32.mrb[1].mxu0 }
 0x105   : > { %v1702_v15 = vadd.f32 %v1701_v14, %v1700_v12  ;;  %v1765_v16 = vpop.f32.mrb[1].mxu1  ;;  %v1703_v17 = vpop.f32.mrb[2].mxu0 }
 0x106   : > { %v1766_v18 = vadd.f32 %v1765_v16, %v1764_v13  ;;  %v1767_v19 = vpop.f32.mrb[2].mxu1  ;;  %v1704_v20 = vpop.f32.mrb[3].mxu0 }
 0x107   : > { %v1705_v21 = vadd.f32 %v1704_v20, %v1703_v17  ;;  %v1768_v22 = vpop.f32.mrb[3].mxu1 }
 0x108   : > { %v1769_v23 = vadd.f32 %v1768_v22, %v1767_v19  ;;  %v2292_v24 = vadd.f32 %v1766_v18, %v1702_v15 }
 0x10a   : > { %v2294_v25 = vadd.f32 %v1769_v23, %v1705_v21 }
 0x10b   : > { %v1706_v26 = vpop.f32.mrb[4].mxu0 }
 0x10c   : > { %v1770_v27 = vpop.f32.mrb[4].mxu1  ;;  %v1707_v28 = vpop.f32.mrb[5].mxu0 }
 0x10d   : > { %v1708_v29 = vadd.f32 %v1707_v28, %v1706_v26  ;;  %v1771_v30 = vpop.f32.mrb[5].mxu1  ;;  %v1709_v31 = vpop.f32.mrb[6].mxu0 }
 0x10e   : > { %v1772_v32 = vadd.f32 %v1771_v30, %v1770_v27  ;;  %v1773_v33 = vpop.f32.mrb[6].mxu1  ;;  %v1710_v34 = vpop.f32.mrb[7].mxu0 }
 0x10f   : > { %v1711_v35 = vadd.f32 %v1710_v34, %v1709_v31  ;;  %v1774_v36 = vpop.f32.mrb[7].mxu1 }
 0x110   : > { %v1775_v37 = vadd.f32 %v1774_v36, %v1773_v33  ;;  %v2296_v38 = vadd.f32 %v1772_v32, %v1708_v29 }
 0x112   : > { %v2298_v39 = vadd.f32 %v1775_v37, %v1711_v35 }
 0x113   : > { %v1712_v40 = vpop.f32.mrb[8].mxu0 }
 0x114   : > { %v1776_v41 = vpop.f32.mrb[8].mxu1  ;;  %v1713_v42 = vpop.f32.mrb[9].mxu0 }
 0x115   : > { %v1714_v43 = vadd.f32 %v1713_v42, %v1712_v40  ;;  %v1777_v44 = vpop.f32.mrb[9].mxu1  ;;  %v1715_v45 = vpop.f32.mrb[10].mxu0 }
 0x116   : > { %v1778_v46 = vadd.f32 %v1777_v44, %v1776_v41  ;;  %v1779_v47 = vpop.f32.mrb[10].mxu1  ;;  %v1716_v48 = vpop.f32.mrb[11].mxu0 }
 0x117   : > { %v1717_v49 = vadd.f32 %v1716_v48, %v1715_v45  ;;  %v1780_v50 = vpop.f32.mrb[11].mxu1 }
 0x118   : > { %v1781_v51 = vadd.f32 %v1780_v50, %v1779_v47  ;;  %v2300_v52 = vadd.f32 %v1778_v46, %v1714_v43 }
 0x11a   : > { %v2302_v53 = vadd.f32 %v1781_v51, %v1717_v49 }
 0x11b   : > { %v1718_v54 = vpop.f32.mrb[12].mxu0 }
 0x11c   : > { %v1782_v55 = vpop.f32.mrb[12].mxu1  ;;  %v1719_v56 = vpop.f32.mrb[13].mxu0 }
 0x11d   : > { %v1720_v57 = vadd.f32 %v1719_v56, %v1718_v54  ;;  %v1783_v58 = vpop.f32.mrb[13].mxu1  ;;  %v1721_v59 = vpop.f32.mrb[14].mxu0 }
 0x11e   : > { %v1784_v60 = vadd.f32 %v1783_v58, %v1782_v55  ;;  %v1785_v61 = vpop.f32.mrb[14].mxu1  ;;  %v1722_v62 = vpop.f32.mrb[15].mxu0 }
 0x11f   : > { %v1723_v63 = vadd.f32 %v1722_v62, %v1721_v59  ;;  %v1786_v0 = vpop.f32.mrb[15].mxu1 }
 0x120   : > { %v1787_v1 = vadd.f32 %v1786_v0, %v1785_v61  ;;  %v2304_v2 = vadd.f32 %v1784_v60, %v1720_v57 }
 0x122   : > { %v2306_v3 = vadd.f32 %v1787_v1, %v1723_v63 }
 0x123   : > { %v1724_v4 = vpop.f32.mrb[16].mxu0 }
 0x124   : > { %v1788_v5 = vpop.f32.mrb[16].mxu1  ;;  %v1725_v6 = vpop.f32.mrb[17].mxu0 }
 0x125   : > { %v1726_v7 = vadd.f32 %v1725_v6, %v1724_v4  ;;  %v1789_v8 = vpop.f32.mrb[17].mxu1  ;;  %v1727_v9 = vpop.f32.mrb[18].mxu0 }
 0x126   : > { %v1790_v10 = vadd.f32 %v1789_v8, %v1788_v5  ;;  %v1791_v11 = vpop.f32.mrb[18].mxu1  ;;  %v1728_v12 = vpop.f32.mrb[19].mxu0 }
 0x127   : > { %v1729_v13 = vadd.f32 %v1728_v12, %v1727_v9  ;;  %v1792_v14 = vpop.f32.mrb[19].mxu1 }
 0x128   : > { %v1793_v15 = vadd.f32 %v1792_v14, %v1791_v11  ;;  %v967_v16 = vadd.f32 %v1790_v10, %v1726_v7 }
 0x12a   : > { %v2308_v17 = vadd.f32 %v1793_v15, %v1729_v13 }
 0x12b   : > { %v1730_v18 = vpop.f32.mrb[20].mxu0 }
 0x12c   : > { %v1794_v19 = vpop.f32.mrb[20].mxu1  ;;  %v1731_v20 = vpop.f32.mrb[21].mxu0 }
 0x12d   : > { %v1732_v21 = vadd.f32 %v1731_v20, %v1730_v18  ;;  %v1795_v22 = vpop.f32.mrb[21].mxu1  ;;  %v1733_v23 = vpop.f32.mrb[22].mxu0 }
 0x12e   : > { %v1796_v26 = vadd.f32 %v1795_v22, %v1794_v19  ;;  %v1797_v27 = vpop.f32.mrb[22].mxu1  ;;  %v1734_v28 = vpop.f32.mrb[23].mxu0 }
 0x12f   : > { %v1735_v29 = vadd.f32 %v1734_v28, %v1733_v23  ;;  %v1798_v30 = vpop.f32.mrb[23].mxu1 }
 0x130   : > { %v1799_v31 = vadd.f32 %v1798_v30, %v1797_v27  ;;  %v975_v32 = vadd.f32 %v1796_v26, %v1732_v21 }
 0x132   : > { %v978_v33 = vadd.f32 %v1799_v31, %v1735_v29 }
 0x133   : > { %v1736_v34 = vpop.f32.mrb[24].mxu0 }
 0x134   : > { %v1800_v35 = vpop.f32.mrb[24].mxu1  ;;  %v1737_v36 = vpop.f32.mrb[25].mxu0 }
 0x135   : > { %v1738_v37 = vadd.f32 %v1737_v36, %v1736_v34  ;;  %v1801_v40 = vpop.f32.mrb[25].mxu1  ;;  %v1739_v41 = vpop.f32.mrb[26].mxu0 }
 0x136   : > { %v1802_v42 = vadd.f32 %v1801_v40, %v1800_v35  ;;  %v1803_v43 = vpop.f32.mrb[26].mxu1  ;;  %v1740_v44 = vpop.f32.mrb[27].mxu0 }
 0x137   : > { %v1741_v45 = vadd.f32 %v1740_v44, %v1739_v41  ;;  %v1804_v46 = vpop.f32.mrb[27].mxu1 }
 0x138   : > { %v1805_v47 = vadd.f32 %v1804_v46, %v1803_v43  ;;  %v983_v48 = vadd.f32 %v1802_v42, %v1738_v37 }
 0x13a   : > { %v2310_v49 = vadd.f32 %v1805_v47, %v1741_v45 }
 0x13b   : > { %v1742_v50 = vpop.f32.mrb[28].mxu0 }
 0x13c   : > { %v1806_v51 = vpop.f32.mrb[28].mxu1  ;;  %v1743_v54 = vpop.f32.mrb[29].mxu0 }
 0x13d   : > { %v1744_v55 = vadd.f32 %v1743_v54, %v1742_v50  ;;  %v1807_v56 = vpop.f32.mrb[29].mxu1  ;;  %v1745_v57 = vpop.f32.mrb[30].mxu0 }
 0x13e   : > { %v1808_v58 = vadd.f32 %v1807_v56, %v1806_v51  ;;  %v1809_v59 = vpop.f32.mrb[30].mxu1  ;;  %v1746_v60 = vpop.f32.mrb[31].mxu0 }
 0x13f   : > { %v1747_v61 = vadd.f32 %v1746_v60, %v1745_v57  ;;  %v1810_v62 = vpop.f32.mrb[31].mxu1 }
 0x140   : > { %v1811_v63 = vadd.f32 %v1810_v62, %v1809_v59  ;;  %v991_v0 = vadd.f32 %v1808_v58, %v1744_v55 }
 0x142   : > { %v994_v1 = vadd.f32 %v1811_v63, %v1747_v61 }
 0x143   : > { %v1834_v4 = vpop.f32.mrb[32].mxu0 }
 0x144   : > { %v1040_v5 = vadd.f32 %v1834_v4, %v2296_v38  ;;  %v1842_v6 = vpop.f32.mrb[32].mxu1  ;;  %v1031_v7 = vpop.f32.mrb[33].mxu0 }
 0x145   : > { %v1072_v8 = vadd.f32 %v1842_v6, %v975_v32  ;;  %v1032_v9 = vadd.f32 %v1031_v7, %v2292_v24  ;;  %v1063_v10 = vpop.f32.mrb[33].mxu1  ;;  %v1835_v11 = vpop.f32.mrb[34].mxu0 }
 0x146   : > { %1098 = vst [vmem:[#allocation2 + $0x10] sm:$0xff] %v1040_v5  ;;  %v1064_v12 = vadd.f32 %v1063_v10, %v967_v16  ;;  %v1043_v13 = vadd.f32 %v1835_v11, %v2298_v39  ;;  %v1843_v14 = vpop.f32.mrb[34].mxu1  ;;  %v1034_v15 = vpop.f32.mrb[35].mxu0  ;;  %v1114_v21 = vmul.f32 %v1040_v5, %v1040_v5 }
 0x147   : > { %1106 = vst [vmem:[#allocation2 + $0x50] sm:$0xff] %v1072_v8  ;;  %1096 = vst [vmem:[#allocation2] sm:$0xff] %v1032_v9  ;;  %v1075_v18 = vadd.f32 %v1843_v14, %v978_v33  ;;  %v1035_v19 = vadd.f32 %v1034_v15, %v2294_v25  ;;  %v1066_v20 = vpop.f32.mrb[35].mxu1  ;;  %v1122_v16 = vmul.f32 %v1072_v8, %v1072_v8 }
 0x148   : > { %1104 = vst [vmem:[#allocation2 + $0x40] sm:$0xff] %v1064_v12  ;;  %1099 = vst [vmem:[#allocation2 + $0x18] sm:$0xff] %v1043_v13  ;;  %v1067_v38 = vadd.f32 %v1066_v20, %v2308_v17  ;;  %v1112_v22 = vmul.f32 %v1032_v9, %v1032_v9  ;;  %v1120_v27 = vmul.f32 %v1064_v12, %v1064_v12 }
 0x149   : > { %1107 = vst [vmem:[#allocation2 + $0x58] sm:$0xff] %v1075_v18  ;;  %1097 = vst [vmem:[#allocation2 + $0x8] sm:$0xff] %v1035_v19  ;;  %v1115_v28 = vmul.f32 %v1043_v13, %v1043_v13  ;;  %v1113_v32 = vmul.f32 %v1035_v19, %v1035_v19  ;;  %v1123_v50 = vmul.f32 %v1075_v18, %v1075_v18 }
 0x14a   : > { %1105 = vst [vmem:[#allocation2 + $0x48] sm:$0xff] %v1067_v38  ;;  %v1121_v55 = vmul.f32 %v1067_v38, %v1067_v38 }
 0x14b   : > { %v1838_v24 = vpop.f32.mrb[36].mxu0 }
 0x14c   : > { %v1056_v39 = vadd.f32 %v1838_v24, %v2304_v2  ;;  %v1846_v23 = vpop.f32.mrb[36].mxu1  ;;  %v1047_v26 = vpop.f32.mrb[37].mxu0 }
 0x14d   : > { %v1088_v29 = vadd.f32 %v1846_v23, %v991_v0  ;;  %v1048_v25 = vadd.f32 %v1047_v26, %v2300_v52  ;;  %v1079_v30 = vpop.f32.mrb[37].mxu1  ;;  %v1839_v31 = vpop.f32.mrb[38].mxu0 }
 0x14e   : > { %1102 = vst [vmem:[#allocation2 + $0x30] sm:$0xff] %v1056_v39  ;;  %v1080_v17 = vadd.f32 %v1079_v30, %v983_v48  ;;  %v1059_v33 = vadd.f32 %v1839_v31, %v2306_v3  ;;  %v1847_v34 = vpop.f32.mrb[38].mxu1  ;;  %v1050_v35 = vpop.f32.mrb[39].mxu0  ;;  %v1130_v36 = vadd.f32 %v1056_v39, %v1040_v5  ;;  %v1118_v46 = vmul.f32 %v1056_v39, %v1056_v39 }
 0x14f   : > { %1110 = vst [vmem:[#allocation2 + $0x70] sm:$0xff] %v1088_v29  ;;  %1100 = vst [vmem:[#allocation2 + $0x20] sm:$0xff] %v1048_v25  ;;  %v1116_v2 = vmul.f32 %v1048_v25, %v1048_v25  ;;  %v1091_v37 = vadd.f32 %v1847_v34, %v994_v1  ;;  %v1051_v40 = vadd.f32 %v1050_v35, %v2302_v53  ;;  %v1082_v41 = vpop.f32.mrb[39].mxu1 }
 0x150   : > { %v1128_v42 = vadd.f32 %v1048_v25, %v1032_v9  ;;  %1108 = vst [vmem:[#allocation2 + $0x60] sm:$0xff] %v1080_v17  ;;  %1103 = vst [vmem:[#allocation2 + $0x38] sm:$0xff] %v1059_v33  ;;  %v1119_v52 = vmul.f32 %v1059_v33, %v1059_v33  ;;  %v1131_v43 = vadd.f32 %v1059_v33, %v1043_v13 }
 0x151   : > { %v1083_v44 = vadd.f32 %v1082_v41, %v2310_v49  ;;  %v1134_v45 = vadd.f32 %v1130_v36, %v1072_v8  ;;  %1111 = vst [vmem:[#allocation2 + $0x78] sm:$0xff] %v1091_v37  ;;  %1101 = vst [vmem:[#allocation2 + $0x28] sm:$0xff] %v1051_v40  ;;  %v1117_v3 = vmul.f32 %v1051_v40, %v1051_v40 }
 0x152   : > { %v1129_v47 = vadd.f32 %v1051_v40, %v1035_v19  ;;  %v1132_v48 = vadd.f32 %v1128_v42, %v1064_v12  ;;  %v1135_v54 = vadd.f32 %v1131_v43, %v1075_v18  ;;  %v1140_v53 = vadd.f32 %v1116_v2, %v1112_v22 }
 0x153   : > { %1109 = vst [vmem:[#allocation2 + $0x68] sm:$0xff] %v1083_v44  ;;  %v1138_v51 = vadd.f32 %v1134_v45, %v1088_v29  ;;  %v1141_v58 = vadd.f32 %v1117_v3, %v1113_v32  ;;  %v1124_v60 = vmul.f32 %v1080_v17, %v1080_v17  ;;  %v1143_v61 = vadd.f32 %v1119_v52, %v1115_v28 }
 0x154   : > { %v1136_v56 = vadd.f32 %v1132_v48, %v1080_v17  ;;  %v1133_v57 = vadd.f32 %v1129_v47, %v1067_v38  ;;  %v1139_v59 = vadd.f32 %v1135_v54, %v1091_v37  ;;  %v1144_v49 = vadd.f32 %v1140_v53, %v1120_v27 }
 0x155   : > { %1160 = vadd.xlane.f32.xlu1 %v1138_v51  ;;  %v1125_v63 = vmul.f32 %v1083_v44, %v1083_v44  ;;  %v1145_v0 = vadd.f32 %v1141_v58, %v1121_v55  ;;  %v1142_v1 = vadd.f32 %v1118_v46, %v1114_v21  ;;  %v1127_v5 = vmul.f32 %v1091_v37, %v1091_v37 }
 0x156   : > { %1156 = vadd.xlane.f32.xlu0 %v1136_v56  ;;  %v1137_v62 = vadd.f32 %v1133_v57, %v1083_v44  ;;  %v1148_v4 = vadd.f32 %v1144_v49, %v1124_v60  ;;  %v1147_v6 = vadd.f32 %v1143_v61, %v1123_v50  ;;  %v1126_v8 = vmul.f32 %v1088_v29, %v1088_v29 }
 0x157   : > { %v1149_v7 = vadd.f32 %v1145_v0, %v1125_v63  ;;  %v1146_v9 = vadd.f32 %v1142_v1, %v1122_v16  ;;  %v2008_v12 = vmov 0.0  }
 0x158   : > { %v1151_v10 = vadd.f32 %v1147_v6, %v1127_v5  ;;  %236 = vst.msk [vmem:[#allocation3 + $0x10] sm:$0xff] %vm233_vm1, %v2008_v12  ;;  %234 = vst.msk [vmem:[#allocation3] sm:$0xff] %vm233_vm1, %v2008_v12 }
 0x159   : > { %1162 = vadd.xlane.f32.xlu1 %v1139_v59  ;;  %v1150_v11 = vadd.f32 %v1146_v9, %v1126_v8  ;;  %235 = vst.msk [vmem:[#allocation3 + $0x8] sm:$0xff] %vm233_vm1, %v2008_v12  ;;  %237 = vst.msk [vmem:[#allocation3 + $0x18] sm:$0xff] %vm233_vm1, %v2008_v12 }
 0x15a   : > { %1158 = vadd.xlane.f32.xlu0 %v1137_v62  ;;  %238 = vst.msk [vmem:[#allocation4] sm:$0xff] %vm233_vm1, %v2008_v12  ;;  %239 = vst.msk [vmem:[#allocation4 + $0x8] sm:$0xff] %vm233_vm1, %v2008_v12 }
 0x15b   : > { %240 = vst.msk [vmem:[#allocation4 + $0x10] sm:$0xff] %vm233_vm1, %v2008_v12  ;;  %241 = vst.msk [vmem:[#allocation4 + $0x18] sm:$0xff] %vm233_vm1, %v2008_v12 }
 0x15d   : > { %1179 = vadd.xlane.f32.xlu1 %v1149_v7 }
 0x15e   : > { %1177 = vadd.xlane.f32.xlu0 %v1148_v4 }
 0x15f   : > { %v1154_v13 = vld [vmem:[#allocation3 + $0x10] sm:$0xff]  ;;  %v1152_v14 = vld [vmem:[#allocation3] sm:$0xff] }
 0x160   : > { %v1155_v38 = vld [vmem:[#allocation3 + $0x18] sm:$0xff]  ;;  %v1153_v24 = vld [vmem:[#allocation3 + $0x8] sm:$0xff] }
 0x161   : > { %1183 = vadd.xlane.f32.xlu1 %v1151_v10  ;;  %v1174_v23 = vld [vmem:[#allocation4 + $0x8] sm:$0xff]  ;;  %v1173_v26 = vld [vmem:[#allocation4] sm:$0xff] }
 0x162   : > { %1181 = vadd.xlane.f32.xlu0 %v1150_v11  ;;  %v1176_v30 = vld [vmem:[#allocation4 + $0x18] sm:$0xff]  ;;  %v1175_v31 = vld [vmem:[#allocation4 + $0x10] sm:$0xff] }
 0x1e2   : > { %v1161_v15 = vpop.xlane.xlu1 %1160 }
 0x1e3   : > { %v1166_v18 = vadd.f32 %v1161_v15, %v1154_v13  ;;  %v1157_v19 = vpop.xlane.xlu0 %1156 }
 0x1e4   : > { %v1164_v20 = vadd.f32 %v1157_v19, %v1152_v14 }
 0x1e5   : > { %1171 = vst.msk [vmem:[#allocation3 + $0x10] sm:$0xff] %vm233_vm1, %v1166_v18 }
 0x1e6   : > { %1169 = vst.msk [vmem:[#allocation3] sm:$0xff] %vm233_vm1, %v1164_v20  ;;  %v1163_v21 = vpop.xlane.xlu1 %1162 }
 0x1e7   : > { %v1167_v16 = vadd.f32 %v1163_v21, %v1155_v38  ;;  %v1159_v22 = vpop.xlane.xlu0 %1158 }
 0x1e8   : > { %v1165_v39 = vadd.f32 %v1159_v22, %v1153_v24 }
 0x1e9   : > { %1172 = vst.msk [vmem:[#allocation3 + $0x18] sm:$0xff] %vm233_vm1, %v1167_v16 }
 0x1ea   : > { %1170 = vst.msk [vmem:[#allocation3 + $0x8] sm:$0xff] %vm233_vm1, %v1165_v39  ;;  %v1180_v27 = vpop.xlane.xlu1 %1179 }
 0x1eb   : > { %v1186_v28 = vadd.f32 %v1180_v27, %v1174_v23  ;;  %v1178_v29 = vpop.xlane.xlu0 %1177 }
 0x1ec   : > { %v1185_v25 = vadd.f32 %v1178_v29, %v1173_v26 }
 0x1ed   : > { %1190 = vst.msk [vmem:[#allocation4 + $0x8] sm:$0xff] %vm233_vm1, %v1186_v28 }
 0x1ee   : > { %1189 = vst.msk [vmem:[#allocation4] sm:$0xff] %vm233_vm1, %v1185_v25  ;;  %v1184_v32 = vpop.xlane.xlu1 %1183 }
 0x1ef   : > { %v1188_v17 = vadd.f32 %v1184_v32, %v1176_v30  ;;  %v1182_v33 = vpop.xlane.xlu0 %1181 }
 0x1f0   : > { %v1187_v34 = vadd.f32 %v1182_v33, %v1175_v31 }
 0x1f1   : > { %1192 = vst.msk [vmem:[#allocation4 + $0x18] sm:$0xff] %vm233_vm1, %v1188_v17 }
 0x1f2   : > { %1191 = vst.msk [vmem:[#allocation4 + $0x10] sm:$0xff] %vm233_vm1, %v1187_v34 }
 0x1f3 PF: > { %p1600_p5 = scmp.ne.s32.totalorder %s1998_s15, 1 }
 0x1f4   : > { %v1199_v35 = vld [vmem:[#allocation3 + $0x10] sm:$0xff] (!%p1600_p5)  ;;  %v2009_v2 = vmov (!%p1600_p5), 0   ;;  %v1197_v41 = vld [vmem:[#allocation3] sm:$0xff] (!%p1600_p5)  ;;  %v1200_v44 = vld [vmem:[#allocation3 + $0x18] sm:$0xff] (!%p1600_p5) }
 0x1f5   : > { %1196 = sbr.rel (%p1600_p5) target bundleno = 678 (0x2a6), region = 48  ;;  %1975 = vset.pattern.permute.xlu1 (!%p1600_p5), %v2009_v2  ;;  %1974 = vset.pattern.permute.xlu0 (!%p1600_p5), %v2009_v2  ;;  %v1204_v37 = vmul.f32 (!%p1600_p5), 0.001953125, %v1199_v35  ;;  %v1206_v42 = vld [vmem:[#allocation4] sm:$0xff] (!%p1600_p5)  ;;  %v1202_v52 = vmul.f32 (!%p1600_p5), 0.001953125, %v1197_v41  ;;  %v1205_v3 = vmul.f32 (!%p1600_p5), 0.001953125, %v1200_v44  ;;  %v1198_v48 = vld [vmem:[#allocation3 + $0x8] sm:$0xff] (!%p1600_p5) }
 0x1f6   : > { %v1210_v43 = vmul.f32 (!%p1600_p5), 0.001953125, %v1206_v42  ;;  %v1207_v50 = vld [vmem:[#allocation4 + $0x8] sm:$0xff] (!%p1600_p5)  ;;  %v1203_v54 = vmul.f32 (!%p1600_p5), 0.001953125, %v1198_v48  ;;  %v1228_v6 = vld [vmem:[%s2398_s2 + $0x10] sm:$0xff] (!%p1600_p5)  ;;  %v1226_v7 = vld [vmem:[%s2398_s2] sm:$0xff] (!%p1600_p5) }
 0x1f7   : > { %v1216_v46 = vmul.f32 (!%p1600_p5), %v1204_v37, %v1204_v37  ;;  %v1214_v51 = vmul.f32 (!%p1600_p5), %v1202_v52, %v1202_v52  ;;  %v1211_v53 = vmul.f32 (!%p1600_p5), 0.001953125, %v1207_v50  ;;  %v1217_v56 = vmul.f32 (!%p1600_p5), %v1205_v3, %v1205_v3  ;;  %v1229_v9 = vld [vmem:[%s2398_s2 + $0x18] sm:$0xff] (!%p1600_p5)  ;;  %v1227_v12 = vld [vmem:[%s2398_s2 + $0x8] sm:$0xff] (!%p1600_p5)  ;;  %v1242_v24 = vld [vmem:[%s2399_s3] sm:$0xff] (!%p1600_p5) }
 0x1f8   : > { %v1209_v45 = vld [vmem:[#allocation4 + $0x18] sm:$0xff] (!%p1600_p5)  ;;  %v1215_v58 = vmul.f32 (!%p1600_p5), %v1203_v54, %v1203_v54  ;;  %v1243_v38 = vld [vmem:[%s2399_s3 + $0x8] sm:$0xff] (!%p1600_p5)  ;;  %v1244_v27 = vld [vmem:[%s2399_s3 + $0x10] sm:$0xff] (!%p1600_p5) }
 0x1f9   : > { %v1208_v36 = vld [vmem:[#allocation4 + $0x10] sm:$0xff] (!%p1600_p5)  ;;  %v1213_v47 = vmul.f32 (!%p1600_p5), 0.001953125, %v1209_v45  ;;  %v1218_v57 = vsub.f32 (!%p1600_p5), %v1210_v43, %v1214_v51  ;;  %v1245_v26 = vld [vmem:[%s2399_s3 + $0x18] sm:$0xff] (!%p1600_p5)  ;;  %v1256_v30 = vld [vmem:[#allocation2] sm:$0xff] (!%p1600_p5) }
 0x1fa   : > { %v1212_v40 = vmul.f32 (!%p1600_p5), 0.001953125, %v1208_v36  ;;  %v1219_v61 = vsub.f32 (!%p1600_p5), %v1211_v53, %v1215_v58  ;;  %v1260_v31 = vld [vmem:[#allocation2 + $0x20] sm:$0xff] (!%p1600_p5)  ;;  %v1258_v33 = vld [vmem:[#allocation2 + $0x10] sm:$0xff] (!%p1600_p5)  ;;  %v1265_v42 = vld [vmem:[#allocation2 + $0x48] sm:$0xff] (!%p1600_p5) }
 0x1fb   : > { %v1221_v60 = vsub.f32 (!%p1600_p5), %v1213_v47, %v1217_v56  ;;  %v1222_v49 = vmax.f32 (!%p1600_p5), %v1218_v57, 0.0  ;;  %v1264_v32 = vld [vmem:[#allocation2 + $0x40] sm:$0xff] (!%p1600_p5)  ;;  %v1262_v34 = vld [vmem:[#allocation2 + $0x30] sm:$0xff] (!%p1600_p5)  ;;  %v1259_v43 = vld [vmem:[#allocation2 + $0x18] sm:$0xff] (!%p1600_p5) }
 0x1fc   : > { %v1220_v55 = vsub.f32 %v1212_v40, %v1216_v46  ;;  %v1223_v1 = vmax.f32 %v1219_v61, 0.0  ;;  %v1266_v35 = vld [vmem:[#allocation2 + $0x50] sm:$0xff]  ;;  %v1268_v2 = vld [vmem:[#allocation2 + $0x60] sm:$0xff]  ;;  %v1261_v40 = vld [vmem:[#allocation2 + $0x28] sm:$0xff] }
 0x1fd   : > { %v1225_v63 = vmax.f32 %v1221_v60, 0.0  ;;  %v1230_v0 = vadd.f32 1e-05, %v1222_v49  ;;  %v1270_v36 = vld [vmem:[#allocation2 + $0x70] sm:$0xff]  ;;  %v1263_v45 = vld [vmem:[#allocation2 + $0x38] sm:$0xff] }
 0x1fe   : > { %v1224_v59 = vmax.f32 %v1220_v55, 0.0  ;;  %v1231_v5 = vadd.f32 1e-05, %v1223_v1  ;;  %v1267_v46 = vld [vmem:[#allocation2 + $0x58] sm:$0xff] }
 0x1ff   : > { %v1233_v4 = vadd.f32 1e-05, %v1225_v63 }
 0x200   : > { %v1232_v62 = vadd.f32 1e-05, %v1224_v59 }
 0x202   : > { %1976 = vrsqrt.f32 %v1232_v62 }
 0x203   : > { %1978 = vrsqrt.f32 %v1230_v0 }
 0x204   : > { %1980 = vrsqrt.f32 %v1233_v4 }
 0x205   : > { %1982 = vrsqrt.f32 %v1231_v5 }
 0x20c   : > { %v1977_v8 = vpop.eup %1976 }
 0x20d   : > { %v1979_v10 = vpop.eup %1978  ;;  %v1240_v11 = vmul.f32 %v1977_v8, %v1228_v6 }
 0x20e   : > { %v1981_v13 = vpop.eup %1980  ;;  %v1238_v14 = vmul.f32 %v1979_v10, %v1226_v7 }
 0x20f   : > { %v1983_v15 = vpop.eup %1982  ;;  %1284 = vperm.xlu1 %1975, %v1240_v11   ;;  %v1241_v18 = vmul.f32 %v1981_v13, %v1229_v9  ;;  %v1248_v22 = vmul.f32 %v1240_v11, %v1204_v37  ;;  %v1257_v37 = vld [vmem:[#allocation2 + $0x8] sm:$0xff] }
 0x210   : > { %1274 = vperm.xlu0 %1974, %v1238_v14   ;;  %v1246_v19 = vmul.f32 %v1238_v14, %v1202_v52  ;;  %v1239_v20 = vmul.f32 %v1983_v15, %v1227_v12  ;;  %v1269_v52 = vld [vmem:[#allocation2 + $0x68] sm:$0xff] }
 0x211   : > { %v1249_v16 = vmul.f32 %v1241_v18, %v1205_v3  ;;  %v1252_v29 = vsub.f32 %v1244_v27, %v1248_v22  ;;  %v1271_v3 = vld [vmem:[#allocation2 + $0x78] sm:$0xff] }
 0x212   : > { %v1247_v21 = vmul.f32 %v1239_v20, %v1203_v54  ;;  %v1250_v23 = vsub.f32 %v1242_v24, %v1246_v19 }
 0x213   : > { %1289 = vperm.xlu1 %1975, %v1241_v18   ;;  %v1253_v28 = vsub.f32 %v1245_v26, %v1249_v16 }
 0x214   : > { %1279 = vperm.xlu0 %1974, %v1239_v20   ;;  %v1251_v39 = vsub.f32 %v1243_v38, %v1247_v21 }
 0x217   : > { %1315 = vperm.xlu1 %1975, %v1251_v39  }
 0x218   : > { %1310 = vperm.xlu0 %1974, %v1250_v23  }
 0x21b   : > { %1325 = vperm.xlu1 %1975, %v1253_v28  }
 0x21c   : > { %1320 = vperm.xlu0 %1974, %v1252_v29  }
 0x28e   : > { %v1285_v25 = vpop.permute.xlu1 %1284 }
 0x28f   : > { %v1275_v17 = vpop.permute.xlu0 %1274  ;;  %v1294_v47 = vmul.f32 %v1285_v25, %v1258_v33  ;;  %v1298_v48 = vmul.f32 %v1285_v25, %v1262_v34  ;;  %v1302_v50 = vmul.f32 %v1285_v25, %v1266_v35  ;;  %v1306_v51 = vmul.f32 %v1285_v25, %v1270_v36 }
 0x290   : > { %v1292_v54 = vmul.f32 %v1275_v17, %v1256_v30  ;;  %v1296_v53 = vmul.f32 %v1275_v17, %v1260_v31  ;;  %v1300_v55 = vmul.f32 %v1275_v17, %v1264_v32  ;;  %v1304_v56 = vmul.f32 %v1275_v17, %v1268_v2 }
 0x292   : > { %v1290_v41 = vpop.permute.xlu1 %1289 }
 0x293   : > { %v1280_v44 = vpop.permute.xlu0 %1279  ;;  %v1295_v61 = vmul.f32 %v1290_v41, %v1259_v43  ;;  %v1299_v62 = vmul.f32 %v1290_v41, %v1263_v45  ;;  %v1303_v63 = vmul.f32 %v1290_v41, %v1267_v46  ;;  %v1307_v0 = vmul.f32 %v1290_v41, %v1271_v3 }
 0x294   : > { %v1293_v57 = vmul.f32 %v1280_v44, %v1257_v37  ;;  %v1297_v58 = vmul.f32 %v1280_v44, %v1261_v40  ;;  %v1301_v59 = vmul.f32 %v1280_v44, %v1265_v42  ;;  %v1305_v60 = vmul.f32 %v1280_v44, %v1269_v52 }
 0x296   : > { %v1316_v49 = vpop.permute.xlu1 %1315 }
 0x297   : > { %v1329_v1 = vadd.f32 %v1316_v49, %v1293_v57  ;;  %v1333_v4 = vadd.f32 %v1316_v49, %v1297_v58  ;;  %v1337_v5 = vadd.f32 %v1316_v49, %v1301_v59  ;;  %v1341_v6 = vadd.f32 %v1316_v49, %v1305_v60  ;;  %v1311_v7 = vpop.permute.xlu0 %1310 }
 0x298   : > { %v1328_v8 = vadd.f32 %v1311_v7, %v1292_v54  ;;  %v1332_v9 = vadd.f32 %v1311_v7, %v1296_v53  ;;  %v1336_v10 = vadd.f32 %v1311_v7, %v1300_v55  ;;  %v1340_v11 = vadd.f32 %v1311_v7, %v1304_v56 }
 0x299   : > { %v1345_v12 = vmax.f32 %v1329_v1, 0.0  ;;  %v1349_v13 = vmax.f32 %v1333_v4, 0.0  ;;  %v1353_v14 = vmax.f32 %v1337_v5, 0.0  ;;  %v1357_v15 = vmax.f32 %v1341_v6, 0.0 }
 0x29a   : > { %v1344_v18 = vmax.f32 %v1328_v8, 0.0  ;;  %v1348_v19 = vmax.f32 %v1332_v9, 0.0  ;;  %v1352_v20 = vmax.f32 %v1336_v10, 0.0  ;;  %v1356_v38 = vmax.f32 %v1340_v11, 0.0  ;;  %v1326_v24 = vpop.permute.xlu1 %1325 }
 0x29b   : > { %v1331_v21 = vadd.f32 %v1326_v24, %v1295_v61  ;;  %v1335_v16 = vadd.f32 %v1326_v24, %v1299_v62  ;;  %v1339_v22 = vadd.f32 %v1326_v24, %v1303_v63  ;;  %v1343_v39 = vadd.f32 %v1326_v24, %v1307_v0  ;;  %v1321_v23 = vpop.permute.xlu0 %1320 }
 0x29c   : > { %v1640_v26 = vpack.c.bf16 %v1345_v12, %v1344_v18  ;;  %v1650_v27 = vpack.c.bf16 %v1349_v13, %v1348_v19  ;;  %v1660_v28 = vpack.c.bf16 %v1353_v14, %v1352_v20  ;;  %v1670_v29 = vpack.c.bf16 %v1357_v15, %v1356_v38 }
 0x29d   : > { %v1347_v25 = vmax.f32 %v1331_v21, 0.0  ;;  %v1351_v30 = vmax.f32 %v1335_v16, 0.0  ;;  %v1355_v31 = vmax.f32 %v1339_v22, 0.0  ;;  %v1359_v32 = vmax.f32 %v1343_v39, 0.0 }
 0x29e   : > { %1641 = vst [vmem:[%s2400_s4] sm:$0xff] %v1640_v26   ;;  %1678 = vst [vmem:[%s2400_s4 + $0x10] sm:$0xff] %v1650_v27   ;;  %v1330_v17 = vadd.f32 %v1321_v23, %v1294_v47  ;;  %v1334_v33 = vadd.f32 %v1321_v23, %v1298_v48  ;;  %v1338_v34 = vadd.f32 %v1321_v23, %v1302_v50 }
 0x29f   : > { %1680 = vst [vmem:[%s2400_s4 + $0x20] sm:$0xff] %v1660_v28   ;;  %1682 = vst [vmem:[%s2400_s4 + $0x30] sm:$0xff] %v1670_v29   ;;  %v1342_v35 = vadd.f32 %v1321_v23, %v1306_v51 }
 0x2a0   : > { %v1346_v36 = vmax.f32 %v1330_v17, 0.0  ;;  %v1350_v2 = vmax.f32 %v1334_v33, 0.0  ;;  %v1354_v37 = vmax.f32 %v1338_v34, 0.0 }
 0x2a1   : > { %v1358_v40 = vmax.f32 %v1342_v35, 0.0 }
 0x2a2   : > { %v1645_v41 = vpack.c.bf16 %v1347_v25, %v1346_v36  ;;  %v1655_v42 = vpack.c.bf16 %v1351_v30, %v1350_v2  ;;  %v1665_v52 = vpack.c.bf16 %v1355_v31, %v1354_v37 }
 0x2a3   : > { %v1675_v43 = vpack.c.bf16 %v1359_v32, %v1358_v40 }
 0x2a4   : > { %1677 = vst [vmem:[%s2400_s4 + $0x8] sm:$0xff] %v1645_v41   ;;  %1679 = vst [vmem:[%s2400_s4 + $0x18] sm:$0xff] %v1655_v42  }
 0x2a5   : > { %1681 = vst [vmem:[%s2400_s4 + $0x28] sm:$0xff] %v1665_v52   ;;  %1683 = vst [vmem:[%s2400_s4 + $0x38] sm:$0xff] %v1675_v43  }
 0x2a6 PF: > { %s14_s17 = sadd.s32 1, %s2006_s17   ;;  %s2401_s15 = smov %s2002_s16 }
 0x2a7   : > { %p11_p6 = scmp.ge.s32.totalorder %s14_s17, 4   ;;  %s2402_s16 = smov %s2404_s18 }
 0x2a9   :  { %13 = sbr.rel (!%p11_p6) target bundleno = 2 (0x2), region = 80 }

// kernel: _lambda_.8
= control target key start
LH: loop header
LB: loop body
LE: loop exit
PB: predicated region body
PF: predicated region fallthrough
CT: control target
= control target key end

     0   :  { %s1952_s15 = smov 0   ;;  %s1954_s16 = smov 0   ;;  %s2347_s0 = inlined_call_operand.vmem [shape: bf16[64,288], index: 0, kind: input, shape index: {}]   ;;  %s2348_s1 = inlined_call_operand.vmem [shape: bf16[288,512], index: 1, kind: input, shape index: {}]   ;;  %s2349_s2 = inlined_call_operand.vmem [shape: f32[16,1], index: 2, kind: input, shape index: {}]   ;;  %s2350_s3 = inlined_call_operand.vmem [shape: f32[16,1], index: 3, kind: input, shape index: {}]   ;;  %s2351_s4 = inlined_call_operand.vmem [shape: bf16[64,512], index: 4, kind: output, shape index: {}]  }
   0x1   :  { %s1956_s17 = smov 0  }
   0x2 LB: > { %s26_s18 = sadd.s32 1, %s1918_s16  ;;  %p1580_p0 = scmp.ge.s32.totalorder %s1922_s17, 1  ;;  %s1922_s17 = sphi %s1956_s17, %s14_s17   ;;  %s1918_s16 = sphi %s1954_s16, %s2353_s16   ;;  %s1914_s15 = sphi %s1952_s15, %s2352_s15  }
   0x3   : > { %p28_p1 = scmp.ge.s32.totalorder %s26_s18, 2  ;;  %p185_p2 = scmp.lt.s32.totalorder %s1922_s17, 3 }
   0x5   : > { %s2355_s18 = smov (%p28_p1, %s26_s18), 0  ;;  %p186_p3 = pnand %p1580_p0, %p185_p2 }
   0x6   : > { %p1581_p4 = scmp.ne.s32.totalorder (!%p186_p3), %s1914_s15, 0 }
   0x7   : > { %189 = sbr.rel (%p186_p3) target bundleno = 693 (0x2b5), region = 36 }
   0xe   : > { %236 = sbr.rel (%p1581_p4) target bundleno = 508 (0x1fc), region = 40  ;;  %v1770_v0 = vld [vmem:[%s2348_s1 + $0x4] ss:$16 sps:$4 sm:$0xff] (!%p1581_p4)   ;;  %v1772_v1 = vld [vmem:[%s2348_s1 + $0xc] ss:$16 sps:$4 sm:$0xff] (!%p1581_p4)   ;;  %vm754_vm0 = vcmask (!%p1581_p4), 261120  }
   0xf   : > { %767 = vmatprep.subr.bf16.mxu0 (!%p1581_p4), %v1770_v0  ;;  %v1774_v2 = vld [vmem:[%s2348_s1] ss:$16 sps:$4 sm:$0xff] (!%p1581_p4)   ;;  %v1775_v3 = vld [vmem:[%s2348_s1 + $0x8] ss:$16 sps:$4 sm:$0xff] (!%p1581_p4)   ;;  %913 = vmatprep.subr.bf16.mxu1 (!%p1581_p4), %v1772_v1  ;;  %v1776_v4 = vld [vmem:[%s2348_s1 + $0x24] ss:$16 sps:$4 sm:$0xff] (!%p1581_p4)  }
  0x10   : > { %768 = vmatpush1.bf16.msra.mxu0 (!%p1581_p4), %v1774_v2  ;;  %914 = vmatpush1.bf16.msra.mxu1 (!%p1581_p4), %v1775_v3  ;;  %v1778_v5 = vld [vmem:[%s2348_s1 + $0x2c] ss:$16 sps:$4 sm:$0xff] (!%p1581_p4)   ;;  %v1780_v6 = vld [vmem:[%s2348_s1 + $0x20] ss:$16 sps:$4 sm:$0xff] (!%p1581_p4)   ;;  %v1781_v7 = vld [vmem:[%s2348_s1 + $0x28] ss:$16 sps:$4 sm:$0xff] (!%p1581_p4)  }
  0x11   : > { %769 = vmatprep.subr.bf16.mxu0 (!%p1581_p4), %v1776_v4  ;;  %915 = vmatprep.subr.bf16.mxu1 (!%p1581_p4), %v1778_v5  ;;  %v1782_v8 = vld [vmem:[%s2348_s1 + $0x44] ss:$16 sps:$4 sm:$0xff] (!%p1581_p4)   ;;  %v1784_v9 = vld [vmem:[%s2348_s1 + $0x4c] ss:$16 sps:$4 sm:$0xff] (!%p1581_p4)   ;;  %v1786_v10 = vld [vmem:[%s2348_s1 + $0x40] ss:$16 sps:$4 sm:$0xff] (!%p1581_p4)  }
  0x12   : > { %v1787_v11 = vld [vmem:[%s2348_s1 + $0x48] ss:$16 sps:$4 sm:$0xff] (!%p1581_p4)   ;;  %v1788_v12 = vld [vmem:[%s2348_s1 + $0x64] ss:$16 sps:$4 sm:$0xff] (!%p1581_p4)   ;;  %v1790_v13 = vld [vmem:[%s2348_s1 + $0x6c] ss:$16 sps:$4 sm:$0xff] (!%p1581_p4)  }
  0x13   : > { %v1792_v14 = vld [vmem:[%s2348_s1 + $0x60] ss:$16 sps:$4 sm:$0xff] (!%p1581_p4)   ;;  %v1793_v15 = vld [vmem:[%s2348_s1 + $0x68] ss:$16 sps:$4 sm:$0xff] (!%p1581_p4)   ;;  %v1794_v16 = vld [vmem:[%s2348_s1 + $0x84] ss:$16 sps:$4 sm:$0xff] (!%p1581_p4)  }
  0x14   : > { %770 = vmatpush1.bf16.msra.mxu0 (!%p1581_p4), %v1780_v6  ;;  %916 = vmatpush1.bf16.msra.mxu1 (!%p1581_p4), %v1781_v7  ;;  %v1796_v17 = vld [vmem:[%s2348_s1 + $0x8c] ss:$16 sps:$4 sm:$0xff] (!%p1581_p4)   ;;  %v1798_v18 = vld [vmem:[%s2348_s1 + $0x80] ss:$16 sps:$4 sm:$0xff] (!%p1581_p4)   ;;  %v1799_v19 = vld [vmem:[%s2348_s1 + $0x88] ss:$16 sps:$4 sm:$0xff] (!%p1581_p4)  }
  0x15   : > { %771 = vmatprep.subr.bf16.mxu0 %v1782_v8  ;;  %917 = vmatprep.subr.bf16.mxu1 %v1784_v9  ;;  %v1800_v20 = vld [vmem:[%s2348_s1 + $0xa4] ss:$16 sps:$4 sm:$0xff]   ;;  %v1802_v21 = vld [vmem:[%s2348_s1 + $0xac] ss:$16 sps:$4 sm:$0xff]   ;;  %v1804_v22 = vld [vmem:[%s2348_s1 + $0xa0] ss:$16 sps:$4 sm:$0xff]  }
  0x16   : > { %v1805_v23 = vld [vmem:[%s2348_s1 + $0xa8] ss:$16 sps:$4 sm:$0xff]   ;;  %v1806_v24 = vld [vmem:[%s2348_s1 + $0xc4] ss:$16 sps:$4 sm:$0xff]   ;;  %v1808_v25 = vld [vmem:[%s2348_s1 + $0xcc] ss:$16 sps:$4 sm:$0xff]  }
  0x17   : > { %v1810_v26 = vld [vmem:[%s2348_s1 + $0xc0] ss:$16 sps:$4 sm:$0xff]   ;;  %v1811_v27 = vld [vmem:[%s2348_s1 + $0xc8] ss:$16 sps:$4 sm:$0xff]   ;;  %v1812_v28 = vld [vmem:[%s2348_s1 + $0xe4] ss:$16 sps:$4 sm:$0xff]  }
  0x18   : > { %772 = vmatpush1.bf16.msra.mxu0 %v1786_v10  ;;  %918 = vmatpush1.bf16.msra.mxu1 %v1787_v11  ;;  %v1814_v29 = vld [vmem:[%s2348_s1 + $0xec] ss:$16 sps:$4 sm:$0xff]   ;;  %v1816_v30 = vld [vmem:[%s2348_s1 + $0xe0] ss:$16 sps:$4 sm:$0xff]   ;;  %v1817_v31 = vld [vmem:[%s2348_s1 + $0xe8] ss:$16 sps:$4 sm:$0xff]  }
  0x19   : > { %773 = vmatprep.subr.bf16.mxu0 %v1788_v12  ;;  %919 = vmatprep.subr.bf16.mxu1 %v1790_v13  ;;  %v1818_v32 = vld [vmem:[%s2348_s1 + $0x104] ss:$16 sps:$4 sm:$0xff]   ;;  %v1820_v33 = vld [vmem:[%s2348_s1 + $0x10c] ss:$16 sps:$4 sm:$0xff]   ;;  %v1822_v34 = vld [vmem:[%s2348_s1 + $0x100] ss:$16 sps:$4 sm:$0xff]  }
  0x1a   : > { %v1823_v35 = vld [vmem:[%s2348_s1 + $0x108] ss:$16 sps:$4 sm:$0xff]   ;;  %v1824_v36 = vld [vmem:[%s2348_s1 + $0x124] ss:$16 sps:$4 sm:$0xff]   ;;  %v1826_v37 = vld [vmem:[%s2348_s1 + $0x12c] ss:$16 sps:$4 sm:$0xff]  }
  0x1b   : > { %v1828_v38 = vld [vmem:[%s2348_s1 + $0x120] ss:$16 sps:$4 sm:$0xff]   ;;  %v1829_v39 = vld [vmem:[%s2348_s1 + $0x128] ss:$16 sps:$4 sm:$0xff]   ;;  %v1830_v40 = vld [vmem:[%s2348_s1 + $0x144] ss:$16 sps:$4 sm:$0xff]  }
  0x1c   : > { %774 = vmatpush1.bf16.msra.mxu0 %v1792_v14  ;;  %920 = vmatpush1.bf16.msra.mxu1 %v1793_v15  ;;  %v1832_v41 = vld [vmem:[%s2348_s1 + $0x14c] ss:$16 sps:$4 sm:$0xff]   ;;  %v1834_v42 = vld [vmem:[%s2348_s1 + $0x140] ss:$16 sps:$4 sm:$0xff]   ;;  %v1835_v43 = vld [vmem:[%s2348_s1 + $0x148] ss:$16 sps:$4 sm:$0xff]  }
  0x1d   : > { %775 = vmatprep.subr.bf16.mxu0 %v1794_v16  ;;  %921 = vmatprep.subr.bf16.mxu1 %v1796_v17  ;;  %v1836_v44 = vld [vmem:[%s2348_s1 + $0x164] ss:$16 sps:$4 sm:$0xff]   ;;  %v1838_v45 = vld [vmem:[%s2348_s1 + $0x16c] ss:$16 sps:$4 sm:$0xff]   ;;  %v1840_v46 = vld [vmem:[%s2348_s1 + $0x160] ss:$16 sps:$4 sm:$0xff]  }
  0x1e   : > { %v1841_v47 = vld [vmem:[%s2348_s1 + $0x168] ss:$16 sps:$4 sm:$0xff]   ;;  %v1868_v48 = vld [vmem:[%s2347_s0 + $0x4] ss:$12 sps:$4 sm:$0xff]   ;;  %v1844_v50 = vld [vmem:[%s2348_s1 + $0x18c] ss:$16 sps:$4 sm:$0xff]  }
  0x1f   : > { %v1842_v49 = vld [vmem:[%s2348_s1 + $0x184] ss:$16 sps:$4 sm:$0xff]   ;;  %799 = vmatprep.mubr.bf16.mxu0 %v1868_v48  ;;  %945 = vmatprep.mubr.bf16.mxu1 %v1868_v48  ;;  %v1846_v51 = vld [vmem:[%s2348_s1 + $0x180] ss:$16 sps:$4 sm:$0xff]   ;;  %v1847_v52 = vld [vmem:[%s2348_s1 + $0x188] ss:$16 sps:$4 sm:$0xff]  }
  0x20   : > { %776 = vmatpush1.bf16.msra.mxu0 %v1798_v18  ;;  %922 = vmatpush1.bf16.msra.mxu1 %v1799_v19  ;;  %v1848_v53 = vld [vmem:[%s2348_s1 + $0x1a4] ss:$16 sps:$4 sm:$0xff]   ;;  %v1850_v54 = vld [vmem:[%s2348_s1 + $0x1ac] ss:$16 sps:$4 sm:$0xff]   ;;  %v1852_v55 = vld [vmem:[%s2348_s1 + $0x1a0] ss:$16 sps:$4 sm:$0xff]  }
  0x21   : > { %777 = vmatprep.subr.bf16.mxu0 %v1800_v20  ;;  %923 = vmatprep.subr.bf16.mxu1 %v1802_v21  ;;  %v1853_v56 = vld [vmem:[%s2348_s1 + $0x1a8] ss:$16 sps:$4 sm:$0xff]   ;;  %v1854_v57 = vld [vmem:[%s2348_s1 + $0x1c4] ss:$16 sps:$4 sm:$0xff]   ;;  %v1856_v58 = vld [vmem:[%s2348_s1 + $0x1cc] ss:$16 sps:$4 sm:$0xff]  }
  0x22   : > { %v1858_v59 = vld [vmem:[%s2348_s1 + $0x1c0] ss:$16 sps:$4 sm:$0xff]   ;;  %v1859_v60 = vld [vmem:[%s2348_s1 + $0x1c8] ss:$16 sps:$4 sm:$0xff]   ;;  %v1860_v61 = vld [vmem:[%s2348_s1 + $0x1e4] ss:$16 sps:$4 sm:$0xff]  }
  0x23   : > { %v1862_v62 = vld [vmem:[%s2348_s1 + $0x1ec] ss:$16 sps:$4 sm:$0xff]   ;;  %v1864_v63 = vld [vmem:[%s2348_s1 + $0x1e0] ss:$16 sps:$4 sm:$0xff]   ;;  %v1865_v0 = vld [vmem:[%s2348_s1 + $0x1e8] ss:$16 sps:$4 sm:$0xff]  }
  0x24   : > { %778 = vmatpush1.bf16.msra.mxu0 %v1804_v22  ;;  %924 = vmatpush1.bf16.msra.mxu1 %v1805_v23  ;;  %v1871_v1 = vld [vmem:[%s2348_s1 + $0x204] ss:$16 sps:$4 sm:$0xff]   ;;  %v1874_v2 = vld [vmem:[%s2348_s1 + $0x20c] ss:$16 sps:$4 sm:$0xff]   ;;  %v1869_v4 = vld [vmem:[%s2348_s1 + $0x200] ss:$16 sps:$4 sm:$0xff]  }
  0x25   : > { %779 = vmatprep.subr.bf16.mxu0 %v1806_v24  ;;  %925 = vmatprep.subr.bf16.mxu1 %v1808_v25  ;;  %v1866_v3 = vld [vmem:[%s2347_s0] ss:$12 sps:$4 sm:$0xff]   ;;  %v1872_v5 = vld [vmem:[%s2348_s1 + $0x208] ss:$16 sps:$4 sm:$0xff]   ;;  %v1883_v7 = vld [vmem:[%s2348_s1 + $0x224] ss:$16 sps:$4 sm:$0xff]  }
  0x26   : > { %v1875_v6 = vld [vmem:[%s2347_s0 + $0x1c] ss:$12 sps:$4 sm:$0xff]   ;;  %v1881_v9 = vld [vmem:[%s2348_s1 + $0x220] ss:$16 sps:$4 sm:$0xff]   ;;  %v1877_v11 = vld [vmem:[%s2347_s0 + $0x18] ss:$12 sps:$4 sm:$0xff]  }
  0x27   : > { %v1886_v8 = vld [vmem:[%s2348_s1 + $0x22c] ss:$16 sps:$4 sm:$0xff]   ;;  %v1884_v10 = vld [vmem:[%s2348_s1 + $0x228] ss:$16 sps:$4 sm:$0xff]   ;;  %v1878_v12 = vld [vmem:[%s2347_s0 + $0x34] ss:$12 sps:$4 sm:$0xff]  }
  0x28   : > { %780 = vmatpush1.bf16.msra.mxu0 %v1810_v26  ;;  %926 = vmatpush1.bf16.msra.mxu1 %v1811_v27  ;;  %v1880_v13 = vld [vmem:[%s2347_s0 + $0x30] ss:$12 sps:$4 sm:$0xff]   ;;  %v1887_v14 = vld [vmem:[%s2347_s0 + $0x4c] ss:$12 sps:$4 sm:$0xff]   ;;  %v1889_v15 = vld [vmem:[%s2347_s0 + $0x48] ss:$12 sps:$4 sm:$0xff]  }
  0x29   : > { %781 = vmatprep.subr.bf16.mxu0 %v1812_v28  ;;  %927 = vmatprep.subr.bf16.mxu1 %v1814_v29  ;;  %v1924_v16 = vmov 0   ;;  %v1890_v17 = vld [vmem:[%s2347_s0 + $0x8] ss:$12 sps:$4 sm:$0xff]   ;;  %v1891_v18 = vld [vmem:[%s2347_s0 + $0x20] ss:$12 sps:$4 sm:$0xff]   ;;  %vm241_vm1 = vcmask 7168  }
  0x2a   : > { %v1892_v19 = vld [vmem:[%s2347_s0 + $0x38] ss:$12 sps:$4 sm:$0xff]   ;;  %v1893_v20 = vld [vmem:[%s2347_s0 + $0x50] ss:$12 sps:$4 sm:$0xff]  }
  0x2c   : > { %782 = vmatpush1.bf16.msra.mxu0 %v1816_v30  ;;  %928 = vmatpush1.bf16.msra.mxu1 %v1817_v31 }
  0x2d   : > { %783 = vmatprep.subr.bf16.mxu0 %v1818_v32  ;;  %929 = vmatprep.subr.bf16.mxu1 %v1820_v33 }
  0x30   : > { %784 = vmatpush1.bf16.msra.mxu0 %v1822_v34  ;;  %930 = vmatpush1.bf16.msra.mxu1 %v1823_v35 }
  0x31   : > { %785 = vmatprep.subr.bf16.mxu0 %v1824_v36  ;;  %931 = vmatprep.subr.bf16.mxu1 %v1826_v37 }
  0x34   : > { %786 = vmatpush1.bf16.msra.mxu0 %v1828_v38  ;;  %932 = vmatpush1.bf16.msra.mxu1 %v1829_v39 }
  0x35   : > { %787 = vmatprep.subr.bf16.mxu0 %v1830_v40  ;;  %933 = vmatprep.subr.bf16.mxu1 %v1832_v41 }
  0x38   : > { %788 = vmatpush1.bf16.msra.mxu0 %v1834_v42  ;;  %934 = vmatpush1.bf16.msra.mxu1 %v1835_v43 }
  0x39   : > { %789 = vmatprep.subr.bf16.mxu0 %v1836_v44  ;;  %935 = vmatprep.subr.bf16.mxu1 %v1838_v45 }
  0x3c   : > { %790 = vmatpush1.bf16.msra.mxu0 %v1840_v46  ;;  %936 = vmatpush1.bf16.msra.mxu1 %v1841_v47 }
  0x3d   : > { %791 = vmatprep.subr.bf16.mxu0 %v1842_v49  ;;  %937 = vmatprep.subr.bf16.mxu1 %v1844_v50 }
  0x40   : > { %792 = vmatpush1.bf16.msra.mxu0 %v1846_v51  ;;  %938 = vmatpush1.bf16.msra.mxu1 %v1847_v52 }
  0x41   : > { %793 = vmatprep.subr.bf16.mxu0 %v1848_v53  ;;  %939 = vmatprep.subr.bf16.mxu1 %v1850_v54 }
  0x44   : > { %794 = vmatpush1.bf16.msra.mxu0 %v1852_v55  ;;  %940 = vmatpush1.bf16.msra.mxu1 %v1853_v56 }
  0x45   : > { %795 = vmatprep.subr.bf16.mxu0 %v1854_v57  ;;  %941 = vmatprep.subr.bf16.mxu1 %v1856_v58 }
  0x48   : > { %796 = vmatpush1.bf16.msra.mxu0 %v1858_v59  ;;  %942 = vmatpush1.bf16.msra.mxu1 %v1859_v60 }
  0x49   : > { %797 = vmatprep.subr.bf16.mxu0 %v1860_v61  ;;  %943 = vmatprep.subr.bf16.mxu1 %v1862_v62 }
  0x4c   : > { %798 = vmatpush1.bf16.msra.mxu0 %v1864_v63  ;;  %944 = vmatpush1.bf16.msra.mxu1 %v1865_v0 }
  0x4d   : > { %840 = vmatprep.subr.bf16.mxu0 %v1871_v1  ;;  %986 = vmatprep.subr.bf16.mxu1 %v1874_v2 }
  0x4f   : > { %800 = vmatmul.mubr.bf16.vlgmr.msra.gmra.mrb[0].mxu0 %v1866_v3  ;;  %946 = vmatmul.mubr.bf16.vlgmr.msra.gmra.mrb[0].mxu1 %v1866_v3 }
  0x50   : > { %841 = vmatpush1.bf16.msra.mxu0 %v1869_v4  ;;  %987 = vmatpush1.bf16.msra.mxu1 %v1872_v5 }
  0x51   : > { %809 = vmatprep.mubr.bf16.mxu0 %v1875_v6  ;;  %955 = vmatprep.mubr.bf16.mxu1 %v1875_v6 }
  0x52   : > { %842 = vmatprep.subr.bf16.mxu0 %v1883_v7  ;;  %988 = vmatprep.subr.bf16.mxu1 %v1886_v8 }
  0x54   : > { %843 = vmatpush1.bf16.msra.mxu0 %v1881_v9  ;;  %989 = vmatpush1.bf16.msra.mxu1 %v1884_v10 }
  0x57   : > { %810 = vmatmul.mubr.bf16.gmra.mrb[4].mxu0 %v1877_v11  ;;  %956 = vmatmul.mubr.bf16.gmra.mrb[4].mxu1 %v1877_v11 }
  0x58   : > { %819 = vmatprep.mubr.bf16.mxu0 %v1878_v12  ;;  %965 = vmatprep.mubr.bf16.mxu1 %v1878_v12 }
  0x5f   : > { %820 = vmatmul.mubr.bf16.gmra.mrb[8].mxu0 %v1880_v13  ;;  %966 = vmatmul.mubr.bf16.gmra.mrb[8].mxu1 %v1880_v13 }
  0x60   : > { %829 = vmatprep.mubr.bf16.mxu0 %v1887_v14  ;;  %975 = vmatprep.mubr.bf16.mxu1 %v1887_v14 }
  0x67   : > { %830 = vmatmul.mubr.bf16.gmra.mrb[12].mxu0 %v1889_v15  ;;  %976 = vmatmul.mubr.bf16.gmra.mrb[12].mxu1 %v1889_v15 }
  0x68   : > { %872 = vmatprep.mubr.bf16.mxu0 %v1924_v16  ;;  %1018 = vmatprep.mubr.bf16.mxu1 %v1924_v16 }
  0x6f   : > { %1666 = vmatmul.mubr.msk.bf16.vlgmr.msra.gmra.mrb[0].mxu0 %vm754_vm0, %v1890_v17  ;;  %1670 = vmatmul.mubr.msk.bf16.vlgmr.msra.gmra.mrb[0].mxu1 %vm754_vm0, %v1890_v17 }
  0x70   : > { %882 = vmatprep.mubr.bf16.mxu0 %v1924_v16  ;;  %1028 = vmatprep.mubr.bf16.mxu1 %v1924_v16 }
  0x77   : > { %1667 = vmatmul.mubr.msk.bf16.gmra.mrb[4].mxu0 %vm754_vm0, %v1891_v18  ;;  %1671 = vmatmul.mubr.msk.bf16.gmra.mrb[4].mxu1 %vm754_vm0, %v1891_v18 }
  0x78   : > { %892 = vmatprep.mubr.bf16.mxu0 %v1924_v16  ;;  %1038 = vmatprep.mubr.bf16.mxu1 %v1924_v16 }
  0x7f   : > { %1668 = vmatmul.mubr.msk.bf16.gmra.mrb[8].mxu0 %vm754_vm0, %v1892_v19  ;;  %1672 = vmatmul.mubr.msk.bf16.gmra.mrb[8].mxu1 %vm754_vm0, %v1892_v19 }
  0x80   : > { %902 = vmatprep.mubr.bf16.mxu0 %v1924_v16  ;;  %1048 = vmatprep.mubr.bf16.mxu1 %v1924_v16 }
  0x87   : > { %1669 = vmatmul.mubr.msk.bf16.gmra.mrb[12].mxu0 %vm754_vm0, %v1893_v20  ;;  %1673 = vmatmul.mubr.msk.bf16.gmra.mrb[12].mxu1 %vm754_vm0, %v1893_v20 }
 0x142   : > { %v874_v21 = vpop.f32.mrb[0].mxu0  ;;  %v1020_v22 = vpop.f32.mrb[0].mxu1 }
 0x143   : > { %1062 = vst [vmem:[#allocation2] sm:$0xff] %v874_v21  ;;  %1064 = vst [vmem:[#allocation2 + $0x10] sm:$0xff] %v1020_v22  ;;  %v876_v23 = vpop.f32.mrb[1].mxu0  ;;  %v1022_v24 = vpop.f32.mrb[1].mxu1  ;;  %v1094_v29 = vmul.f32 %v874_v21, %v874_v21  ;;  %v1096_v30 = vmul.f32 %v1020_v22, %v1020_v22 }
 0x144   : > { %1063 = vst [vmem:[#allocation2 + $0x8] sm:$0xff] %v876_v23  ;;  %1065 = vst [vmem:[#allocation2 + $0x18] sm:$0xff] %v1022_v24  ;;  %v878_v25 = vpop.f32.mrb[2].mxu0  ;;  %v1024_v26 = vpop.f32.mrb[2].mxu1  ;;  %v1095_v31 = vmul.f32 %v876_v23, %v876_v23  ;;  %v1097_v32 = vmul.f32 %v1022_v24, %v1022_v24 }
 0x145   : > { %1066 = vst [vmem:[#allocation2 + $0x20] sm:$0xff] %v878_v25  ;;  %1068 = vst [vmem:[#allocation2 + $0x30] sm:$0xff] %v1024_v26  ;;  %v880_v27 = vpop.f32.mrb[3].mxu0  ;;  %v1026_v28 = vpop.f32.mrb[3].mxu1  ;;  %v1098_v33 = vmul.f32 %v878_v25, %v878_v25  ;;  %v1100_v34 = vmul.f32 %v1024_v26, %v1024_v26 }
 0x146   : > { %1067 = vst [vmem:[#allocation2 + $0x28] sm:$0xff] %v880_v27  ;;  %1069 = vst [vmem:[#allocation2 + $0x38] sm:$0xff] %v1026_v28  ;;  %v1099_v35 = vmul.f32 %v880_v27, %v880_v27  ;;  %v1101_v36 = vmul.f32 %v1026_v28, %v1026_v28 }
 0x14a   : > { %v884_v37 = vpop.f32.mrb[4].mxu0  ;;  %v1030_v38 = vpop.f32.mrb[4].mxu1 }
 0x14b   : > { %1070 = vst [vmem:[#allocation2 + $0x40] sm:$0xff] %v884_v37  ;;  %v1102_v39 = vmul.f32 %v884_v37, %v884_v37  ;;  %v1126_v40 = vadd.f32 %v884_v37, %v874_v21  ;;  %1072 = vst [vmem:[#allocation2 + $0x50] sm:$0xff] %v1030_v38  ;;  %v1104_v41 = vmul.f32 %v1030_v38, %v1030_v38  ;;  %v886_v43 = vpop.f32.mrb[5].mxu0  ;;  %v1032_v44 = vpop.f32.mrb[5].mxu1 }
 0x14c   : > { %v1128_v42 = vadd.f32 %v1030_v38, %v1020_v22  ;;  %1071 = vst [vmem:[#allocation2 + $0x48] sm:$0xff] %v886_v43  ;;  %v1103_v45 = vmul.f32 %v886_v43, %v886_v43  ;;  %v1127_v46 = vadd.f32 %v886_v43, %v876_v23  ;;  %1073 = vst [vmem:[#allocation2 + $0x58] sm:$0xff] %v1032_v44  ;;  %v888_v49 = vpop.f32.mrb[6].mxu0  ;;  %v1034_v50 = vpop.f32.mrb[6].mxu1 }
 0x14d   : > { %v1105_v47 = vmul.f32 %v1032_v44, %v1032_v44  ;;  %v1129_v48 = vadd.f32 %v1032_v44, %v1022_v24  ;;  %v1150_v51 = vadd.f32 %v1102_v39, %v1094_v29  ;;  %v1152_v52 = vadd.f32 %v1104_v41, %v1096_v30  ;;  %1074 = vst [vmem:[#allocation2 + $0x60] sm:$0xff] %v888_v49  ;;  %v890_v55 = vpop.f32.mrb[7].mxu0  ;;  %v1036_v56 = vpop.f32.mrb[7].mxu1 }
 0x14e   : > { %v1106_v53 = vmul.f32 %v888_v49, %v888_v49  ;;  %v1130_v54 = vadd.f32 %v888_v49, %v878_v25  ;;  %1076 = vst [vmem:[#allocation2 + $0x70] sm:$0xff] %v1034_v50  ;;  %v1151_v57 = vadd.f32 %v1103_v45, %v1095_v31  ;;  %v1108_v59 = vmul.f32 %v1034_v50, %v1034_v50 }
 0x14f   : > { %v1153_v58 = vadd.f32 %v1105_v47, %v1097_v32  ;;  %v1132_v60 = vadd.f32 %v1034_v50, %v1024_v26  ;;  %1075 = vst [vmem:[#allocation2 + $0x68] sm:$0xff] %v890_v55  ;;  %1077 = vst [vmem:[#allocation2 + $0x78] sm:$0xff] %v1036_v56  ;;  %v1107_v62 = vmul.f32 %v890_v55, %v890_v55 }
 0x150   : > { %v1154_v61 = vadd.f32 %v1106_v53, %v1098_v33  ;;  %v1131_v63 = vadd.f32 %v890_v55, %v880_v27  ;;  %v1109_v0 = vmul.f32 %v1036_v56, %v1036_v56  ;;  %v1156_v1 = vadd.f32 %v1108_v59, %v1100_v34 }
 0x151   : > { %v1133_v2 = vadd.f32 %v1036_v56, %v1026_v28  ;;  %v1155_v3 = vadd.f32 %v1107_v62, %v1099_v35 }
 0x152   : > { %v1157_v4 = vadd.f32 %v1109_v0, %v1101_v36  ;;  %v894_v5 = vpop.f32.mrb[8].mxu0  ;;  %v1040_v6 = vpop.f32.mrb[8].mxu1 }
 0x153   : > { %1078 = vst [vmem:[#allocation2 + $0x80] sm:$0xff] %v894_v5  ;;  %v1110_v7 = vmul.f32 %v894_v5, %v894_v5  ;;  %v1134_v8 = vadd.f32 %v1126_v40, %v894_v5  ;;  %1080 = vst [vmem:[#allocation2 + $0x90] sm:$0xff] %v1040_v6  ;;  %v1112_v9 = vmul.f32 %v1040_v6, %v1040_v6  ;;  %v896_v11 = vpop.f32.mrb[9].mxu0  ;;  %v1042_v12 = vpop.f32.mrb[9].mxu1 }
 0x154   : > { %v1136_v10 = vadd.f32 %v1128_v42, %v1040_v6  ;;  %1079 = vst [vmem:[#allocation2 + $0x88] sm:$0xff] %v896_v11  ;;  %v1111_v13 = vmul.f32 %v896_v11, %v896_v11  ;;  %v1135_v14 = vadd.f32 %v1127_v46, %v896_v11  ;;  %1081 = vst [vmem:[#allocation2 + $0x98] sm:$0xff] %v1042_v12  ;;  %v898_v17 = vpop.f32.mrb[10].mxu0  ;;  %v1044_v18 = vpop.f32.mrb[10].mxu1 }
 0x155   : > { %v1113_v15 = vmul.f32 %v1042_v12, %v1042_v12  ;;  %v1137_v16 = vadd.f32 %v1129_v48, %v1042_v12  ;;  %v1158_v19 = vadd.f32 %v1150_v51, %v1110_v7  ;;  %v1160_v20 = vadd.f32 %v1152_v52, %v1112_v9  ;;  %1082 = vst [vmem:[#allocation2 + $0xa0] sm:$0xff] %v898_v17  ;;  %v900_v23 = vpop.f32.mrb[11].mxu0  ;;  %v1046_v24 = vpop.f32.mrb[11].mxu1 }
 0x156   : > { %v1114_v21 = vmul.f32 %v898_v17, %v898_v17  ;;  %v1138_v22 = vadd.f32 %v1130_v54, %v898_v17  ;;  %1084 = vst [vmem:[#allocation2 + $0xb0] sm:$0xff] %v1044_v18  ;;  %v1159_v25 = vadd.f32 %v1151_v57, %v1111_v13  ;;  %v1116_v26 = vmul.f32 %v1044_v18, %v1044_v18 }
 0x157   : > { %v1140_v27 = vadd.f32 %v1132_v60, %v1044_v18  ;;  %1083 = vst [vmem:[#allocation2 + $0xa8] sm:$0xff] %v900_v23  ;;  %v1115_v28 = vmul.f32 %v900_v23, %v900_v23  ;;  %1085 = vst [vmem:[#allocation2 + $0xb8] sm:$0xff] %v1046_v24  ;;  %v1139_v30 = vadd.f32 %v1131_v63, %v900_v23  ;;  %v1925_v17 = vmov 0.0  }
 0x158   : > { %v1162_v29 = vadd.f32 %v1154_v61, %v1114_v21  ;;  %v1117_v31 = vmul.f32 %v1046_v24, %v1046_v24  ;;  %v1141_v32 = vadd.f32 %v1133_v2, %v1046_v24  ;;  %v1164_v33 = vadd.f32 %v1156_v1, %v1116_v26  ;;  %242 = vst.msk [vmem:[#allocation3] sm:$0xff] %vm241_vm1, %v1925_v17 }
 0x159   : > { %v1163_v34 = vadd.f32 %v1155_v3, %v1115_v28  ;;  %v1161_v35 = vadd.f32 %v1153_v58, %v1113_v15  ;;  %243 = vst.msk [vmem:[#allocation3 + $0x8] sm:$0xff] %vm241_vm1, %v1925_v17  ;;  %244 = vst.msk [vmem:[#allocation4] sm:$0xff] %vm241_vm1, %v1925_v17 }
 0x15a   : > { %v1165_v36 = vadd.f32 %v1157_v4, %v1117_v31  ;;  %v904_v37 = vpop.f32.mrb[12].mxu0  ;;  %v1050_v38 = vpop.f32.mrb[12].mxu1  ;;  %245 = vst.msk [vmem:[#allocation4 + $0x8] sm:$0xff] %vm241_vm1, %v1925_v17 }
 0x15b   : > { %1086 = vst [vmem:[#allocation2 + $0xc0] sm:$0xff] %v904_v37  ;;  %v1118_v39 = vmul.f32 %v904_v37, %v904_v37  ;;  %v1142_v40 = vadd.f32 %v1134_v8, %v904_v37  ;;  %1088 = vst [vmem:[#allocation2 + $0xd0] sm:$0xff] %v1050_v38  ;;  %v1120_v41 = vmul.f32 %v1050_v38, %v1050_v38  ;;  %v906_v43 = vpop.f32.mrb[13].mxu0  ;;  %v1052_v44 = vpop.f32.mrb[13].mxu1 }
 0x15c   : > { %v1144_v42 = vadd.f32 %v1136_v10, %v1050_v38  ;;  %1087 = vst [vmem:[#allocation2 + $0xc8] sm:$0xff] %v906_v43  ;;  %v1119_v45 = vmul.f32 %v906_v43, %v906_v43  ;;  %v1143_v46 = vadd.f32 %v1135_v14, %v906_v43  ;;  %1089 = vst [vmem:[#allocation2 + $0xd8] sm:$0xff] %v1052_v44  ;;  %v908_v48 = vpop.f32.mrb[14].mxu0  ;;  %v1054_v49 = vpop.f32.mrb[14].mxu1 }
 0x15d   : > { %v1121_v47 = vmul.f32 %v1052_v44, %v1052_v44  ;;  %v1145_v50 = vadd.f32 %v1137_v16, %v1052_v44  ;;  %v1166_v51 = vadd.f32 %v1158_v19, %v1118_v39  ;;  %1090 = vst [vmem:[#allocation2 + $0xe0] sm:$0xff] %v908_v48  ;;  %v1122_v52 = vmul.f32 %v908_v48, %v908_v48  ;;  %v910_v55 = vpop.f32.mrb[15].mxu0  ;;  %v1056_v56 = vpop.f32.mrb[15].mxu1 }
 0x15e   : > { %v1146_v53 = vadd.f32 %v1138_v22, %v908_v48  ;;  %1092 = vst [vmem:[#allocation2 + $0xf0] sm:$0xff] %v1054_v49  ;;  %v1124_v54 = vmul.f32 %v1054_v49, %v1054_v49  ;;  %v1167_v57 = vadd.f32 %v1159_v25, %v1119_v45  ;;  %v1148_v58 = vadd.f32 %v1140_v27, %v1054_v49 }
 0x15f   : > { %1091 = vst [vmem:[#allocation2 + $0xe8] sm:$0xff] %v910_v55  ;;  %v1123_v59 = vmul.f32 %v910_v55, %v910_v55  ;;  %v1147_v60 = vadd.f32 %v1139_v30, %v910_v55  ;;  %1093 = vst [vmem:[#allocation2 + $0xf8] sm:$0xff] %v1056_v56  ;;  %v1170_v61 = vadd.f32 %v1162_v29, %v1122_v52  ;;  %v1174_v18 = vld [vmem:[#allocation3] sm:$0xff] }
 0x160   : > { %v1125_v62 = vmul.f32 %v1056_v56, %v1056_v56  ;;  %v1149_v63 = vadd.f32 %v1141_v32, %v1056_v56  ;;  %v1176_v0 = vadd.f32 %v1143_v46, %v1142_v40  ;;  %v1168_v3 = vadd.f32 %v1160_v20, %v1120_v41  ;;  %v1191_v20 = vld [vmem:[#allocation4] sm:$0xff]  ;;  %v1175_v23 = vld [vmem:[#allocation3 + $0x8] sm:$0xff] }
 0x161   : > { %v1171_v1 = vadd.f32 %v1163_v34, %v1123_v59  ;;  %v1181_v2 = vadd.f32 %v1147_v60, %v1146_v53  ;;  %v1169_v4 = vadd.f32 %v1161_v35, %v1121_v47  ;;  %v1193_v6 = vadd.f32 %v1167_v57, %v1166_v51  ;;  %v1192_v26 = vld [vmem:[#allocation4 + $0x8] sm:$0xff] }
 0x162   : > { %v1177_v5 = vadd.f32 %v1176_v0, %v1144_v42  ;;  %v1172_v7 = vadd.f32 %v1164_v33, %v1124_v54  ;;  %v1173_v8 = vadd.f32 %v1165_v36, %v1125_v62 }
 0x163   : > { %v1182_v9 = vadd.f32 %v1181_v2, %v1148_v58  ;;  %v1198_v10 = vadd.f32 %v1171_v1, %v1170_v61  ;;  %v1194_v12 = vadd.f32 %v1193_v6, %v1168_v3 }
 0x164   : > { %v1178_v11 = vadd.f32 %v1177_v5, %v1145_v50 }
 0x165   : > { %v1183_v13 = vadd.f32 %v1182_v9, %v1149_v63  ;;  %v1199_v14 = vadd.f32 %v1198_v10, %v1172_v7  ;;  %v1195_v15 = vadd.f32 %v1194_v12, %v1169_v4 }
 0x166   : > { %1179 = vadd.xlane.f32.xlu0 %v1178_v11 }
 0x167   : > { %v1200_v16 = vadd.f32 %v1199_v14, %v1173_v8  ;;  %1196 = vadd.xlane.f32.xlu1 %v1195_v15 }
 0x16a   : > { %1184 = vadd.xlane.f32.xlu0 %v1183_v13 }
 0x16b   : > { %1201 = vadd.xlane.f32.xlu1 %v1200_v16 }
 0x1f3   : > { %v1180_v19 = vpop.xlane.xlu0 %1179 }
 0x1f4   : > { %v1186_v21 = vadd.f32 %v1180_v19, %v1174_v18  ;;  %v1197_v22 = vpop.xlane.xlu1 %1196 }
 0x1f5   : > { %v1203_v24 = vadd.f32 %v1197_v22, %v1191_v20 }
 0x1f6   : > { %1189 = vst.msk [vmem:[#allocation3] sm:$0xff] %vm241_vm1, %v1186_v21 }
 0x1f7   : > { %v1185_v25 = vpop.xlane.xlu0 %1184  ;;  %1205 = vst.msk [vmem:[#allocation4] sm:$0xff] %vm241_vm1, %v1203_v24 }
 0x1f8   : > { %v1187_v27 = vadd.f32 %v1185_v25, %v1175_v23  ;;  %v1202_v28 = vpop.xlane.xlu1 %1201 }
 0x1f9   : > { %v1204_v29 = vadd.f32 %v1202_v28, %v1192_v26 }
 0x1fa   : > { %1190 = vst.msk [vmem:[#allocation3 + $0x8] sm:$0xff] %vm241_vm1, %v1187_v27 }
 0x1fb   : > { %1206 = vst.msk [vmem:[#allocation4 + $0x8] sm:$0xff] %vm241_vm1, %v1204_v29 }
 0x1fc PF: > { %p1674_p5 = scmp.ne.s32.totalorder %s1914_s15, 1 }
 0x1fd   : > { %v1211_v30 = vld [vmem:[#allocation3] sm:$0xff] (!%p1674_p5)  ;;  %v1926_v32 = vmov (!%p1674_p5), 0   ;;  %v1227_v48 = vld [vmem:[%s2349_s2 + $0x8] sm:$0xff] (!%p1674_p5)  ;;  %v1245_v61 = vld [vmem:[#allocation2 + $0x10] sm:$0xff] (!%p1674_p5) }
 0x1fe   : > { %1210 = sbr.rel (%p1674_p5) target bundleno = 693 (0x2b5), region = 48  ;;  %v1216_v31 = vld [vmem:[#allocation4] sm:$0xff] (!%p1674_p5)  ;;  %1894 = vset.pattern.permute.xlu0 (!%p1674_p5), %v1926_v32  ;;  %v1214_v33 = vmul.f32 (!%p1674_p5), 0.00048828125, %v1211_v30  ;;  %1895 = vset.pattern.permute.xlu1 (!%p1674_p5), %v1926_v32  ;;  %v1226_v47 = vld [vmem:[%s2349_s2] sm:$0xff] (!%p1674_p5)  ;;  %v1235_v55 = vld [vmem:[%s2350_s3 + $0x8] sm:$0xff] (!%p1674_p5) }
 0x1ff   : > { %v1218_v34 = vmul.f32 (!%p1674_p5), 0.00048828125, %v1216_v31  ;;  %v1234_v53 = vld [vmem:[%s2350_s3] sm:$0xff] (!%p1674_p5)  ;;  %v1244_v60 = vld [vmem:[#allocation2 + $0x8] sm:$0xff] (!%p1674_p5)  ;;  %v1246_v62 = vld [vmem:[#allocation2 + $0x18] sm:$0xff] (!%p1674_p5) }
 0x200   : > { %v1220_v39 = vmul.f32 (!%p1674_p5), %v1214_v33, %v1214_v33  ;;  %v1243_v59 = vld [vmem:[#allocation2] sm:$0xff] (!%p1674_p5)  ;;  %v1252_v0 = vld [vmem:[#allocation2 + $0x48] sm:$0xff] (!%p1674_p5)  ;;  %v1253_v1 = vld [vmem:[#allocation2 + $0x50] sm:$0xff] (!%p1674_p5) }
 0x201   : > { %v1212_v35 = vld [vmem:[#allocation3 + $0x8] sm:$0xff] (!%p1674_p5)  ;;  %v1251_v63 = vld [vmem:[#allocation2 + $0x40] sm:$0xff] (!%p1674_p5)  ;;  %v1254_v2 = vld [vmem:[#allocation2 + $0x58] sm:$0xff] (!%p1674_p5) }
 0x202   : > { %v1217_v36 = vld [vmem:[#allocation4 + $0x8] sm:$0xff] (!%p1674_p5)  ;;  %v1215_v37 = vmul.f32 (!%p1674_p5), 0.00048828125, %v1212_v35  ;;  %v1222_v41 = vsub.f32 (!%p1674_p5), %v1218_v34, %v1220_v39  ;;  %v1259_v3 = vld [vmem:[#allocation2 + $0x80] sm:$0xff] (!%p1674_p5)  ;;  %v1260_v4 = vld [vmem:[#allocation2 + $0x88] sm:$0xff] (!%p1674_p5) }
 0x203   : > { %v1219_v38 = vmul.f32 (!%p1674_p5), 0.00048828125, %v1217_v36  ;;  %v1261_v5 = vld [vmem:[#allocation2 + $0x90] sm:$0xff] (!%p1674_p5)  ;;  %v1262_v6 = vld [vmem:[#allocation2 + $0x98] sm:$0xff] (!%p1674_p5)  ;;  %v1267_v7 = vld [vmem:[#allocation2 + $0xc0] sm:$0xff] (!%p1674_p5) }
 0x204   : > { %v1221_v40 = vmul.f32 (!%p1674_p5), %v1215_v37, %v1215_v37  ;;  %v1224_v43 = vmax.f32 (!%p1674_p5), %v1222_v41, 0.0  ;;  %v1268_v8 = vld [vmem:[#allocation2 + $0xc8] sm:$0xff] (!%p1674_p5)  ;;  %v1269_v9 = vld [vmem:[#allocation2 + $0xd0] sm:$0xff] (!%p1674_p5)  ;;  %v1270_v10 = vld [vmem:[#allocation2 + $0xd8] sm:$0xff] (!%p1674_p5) }
 0x205   : > { %v1247_v12 = vld [vmem:[#allocation2 + $0x20] sm:$0xff]  ;;  %v1248_v17 = vld [vmem:[#allocation2 + $0x28] sm:$0xff]  ;;  %v1249_v18 = vld [vmem:[#allocation2 + $0x30] sm:$0xff] }
 0x206   : > { %v1223_v42 = vsub.f32 %v1219_v38, %v1221_v40  ;;  %v1228_v45 = vadd.f32 1e-05, %v1224_v43  ;;  %v1250_v19 = vld [vmem:[#allocation2 + $0x38] sm:$0xff]  ;;  %v1255_v24 = vld [vmem:[#allocation2 + $0x60] sm:$0xff]  ;;  %v1256_v25 = vld [vmem:[#allocation2 + $0x68] sm:$0xff] }
 0x207   : > { %v1257_v26 = vld [vmem:[#allocation2 + $0x70] sm:$0xff]  ;;  %v1258_v31 = vld [vmem:[#allocation2 + $0x78] sm:$0xff]  ;;  %v1263_v32 = vld [vmem:[#allocation2 + $0xa0] sm:$0xff] }
 0x208   : > { %v1225_v44 = vmax.f32 %v1223_v42, 0.0  ;;  %1896 = vrsqrt.f32 %v1228_v45  ;;  %v1265_v38 = vld [vmem:[#allocation2 + $0xb0] sm:$0xff]  ;;  %v1266_v39 = vld [vmem:[#allocation2 + $0xb8] sm:$0xff]  ;;  %v1271_v40 = vld [vmem:[#allocation2 + $0xe0] sm:$0xff] }
 0x209   : > { %v1272_v42 = vld [vmem:[#allocation2 + $0xe8] sm:$0xff]  ;;  %v1273_v43 = vld [vmem:[#allocation2 + $0xf0] sm:$0xff] }
 0x20a   : > { %v1229_v46 = vadd.f32 1e-05, %v1225_v44  ;;  %v1274_v44 = vld [vmem:[#allocation2 + $0xf8] sm:$0xff] }
 0x20c   : > { %1898 = vrsqrt.f32 %v1229_v46 }
 0x212   : > { %v1897_v49 = vpop.eup %1896 }
 0x213   : > { %v1232_v51 = vmul.f32 %v1897_v49, %v1226_v47 }
 0x215   : > { %1277 = vperm.xlu0 %1894, %v1232_v51   ;;  %v1236_v54 = vmul.f32 %v1232_v51, %v1214_v33  ;;  %v1264_v33 = vld [vmem:[#allocation2 + $0xa8] sm:$0xff] }
 0x216   : > { %v1899_v50 = vpop.eup %1898 }
 0x217   : > { %v1233_v52 = vmul.f32 %v1899_v50, %v1227_v48  ;;  %v1238_v57 = vsub.f32 %v1234_v53, %v1236_v54 }
 0x219   : > { %v1237_v56 = vmul.f32 %v1233_v52, %v1215_v37  ;;  %1282 = vperm.xlu0 %1894, %v1233_v52   ;;  %1319 = vperm.xlu1 %1895, %v1238_v57  }
 0x21b   : > { %v1239_v58 = vsub.f32 %v1235_v55, %v1237_v56 }
 0x21d   : > { %1324 = vperm.xlu1 %1895, %v1239_v58  }
 0x294   : > { %v1278_v11 = vpop.permute.xlu0 %1277 }
 0x295   : > { %v1285_v13 = vmul.f32 %v1278_v11, %v1243_v59  ;;  %v1286_v14 = vmul.f32 %v1278_v11, %v1244_v60  ;;  %v1287_v15 = vmul.f32 %v1278_v11, %v1245_v61  ;;  %v1288_v16 = vmul.f32 %v1278_v11, %v1246_v62 }
 0x296   : > { %v1293_v20 = vmul.f32 %v1278_v11, %v1251_v63  ;;  %v1294_v21 = vmul.f32 %v1278_v11, %v1252_v0  ;;  %v1295_v22 = vmul.f32 %v1278_v11, %v1253_v1  ;;  %v1296_v23 = vmul.f32 %v1278_v11, %v1254_v2 }
 0x297   : > { %v1301_v27 = vmul.f32 %v1278_v11, %v1259_v3  ;;  %v1302_v28 = vmul.f32 %v1278_v11, %v1260_v4  ;;  %v1303_v29 = vmul.f32 %v1278_v11, %v1261_v5  ;;  %v1304_v30 = vmul.f32 %v1278_v11, %v1262_v6 }
 0x298   : > { %v1309_v34 = vmul.f32 %v1278_v11, %v1267_v7  ;;  %v1310_v35 = vmul.f32 %v1278_v11, %v1268_v8  ;;  %v1311_v36 = vmul.f32 %v1278_v11, %v1269_v9  ;;  %v1312_v37 = vmul.f32 %v1278_v11, %v1270_v10  ;;  %v1283_v41 = vpop.permute.xlu0 %1282  ;;  %v1320_v53 = vpop.permute.xlu1 %1319 }
 0x299   : > { %v1289_v45 = vmul.f32 %v1283_v41, %v1247_v12  ;;  %v1290_v46 = vmul.f32 %v1283_v41, %v1248_v17  ;;  %v1291_v47 = vmul.f32 %v1283_v41, %v1249_v18  ;;  %v1292_v48 = vmul.f32 %v1283_v41, %v1250_v19 }
 0x29a   : > { %v2254_v49 = vmul.f32 %v1283_v41, %v1255_v24  ;;  %v2256_v50 = vmul.f32 %v1283_v41, %v1256_v25  ;;  %v2258_v51 = vmul.f32 %v1283_v41, %v1257_v26  ;;  %v2260_v52 = vmul.f32 %v1283_v41, %v1258_v31 }
 0x29b   : > { %v2262_v54 = vmul.f32 %v1283_v41, %v1263_v32  ;;  %v2264_v55 = vmul.f32 %v1283_v41, %v1264_v33  ;;  %v2266_v56 = vmul.f32 %v1283_v41, %v1265_v38  ;;  %v2268_v57 = vmul.f32 %v1283_v41, %v1266_v39 }
 0x29c   : > { %v2270_v58 = vmul.f32 %v1283_v41, %v1271_v40  ;;  %v2272_v59 = vmul.f32 %v1283_v41, %v1272_v42  ;;  %v2274_v60 = vmul.f32 %v1283_v41, %v1273_v43  ;;  %v2276_v61 = vmul.f32 %v1283_v41, %v1274_v44 }
 0x29d   : > { %v1327_v62 = vadd.f32 %v1320_v53, %v1285_v13  ;;  %v1328_v63 = vadd.f32 %v1320_v53, %v1286_v14  ;;  %v1329_v0 = vadd.f32 %v1320_v53, %v1287_v15  ;;  %v1330_v1 = vadd.f32 %v1320_v53, %v1288_v16 }
 0x29e   : > { %v1335_v2 = vadd.f32 %v1320_v53, %v1293_v20  ;;  %v1336_v3 = vadd.f32 %v1320_v53, %v1294_v21  ;;  %v1337_v4 = vadd.f32 %v1320_v53, %v1295_v22  ;;  %v1338_v5 = vadd.f32 %v1320_v53, %v1296_v23 }
 0x29f   : > { %v1343_v6 = vadd.f32 %v1320_v53, %v1301_v27  ;;  %v1344_v7 = vadd.f32 %v1320_v53, %v1302_v28  ;;  %v1345_v8 = vadd.f32 %v1320_v53, %v1303_v29  ;;  %v1346_v9 = vadd.f32 %v1320_v53, %v1304_v30  ;;  %v1325_v30 = vpop.permute.xlu1 %1324 }
 0x2a0   : > { %v1351_v10 = vadd.f32 %v1320_v53, %v1309_v34  ;;  %v1352_v11 = vadd.f32 %v1320_v53, %v1310_v35  ;;  %v1353_v12 = vadd.f32 %v1320_v53, %v1311_v36  ;;  %v1354_v17 = vadd.f32 %v1320_v53, %v1312_v37 }
 0x2a1   : > { %v1359_v18 = vmax.f32 %v1327_v62, 0.0  ;;  %v1360_v19 = vmax.f32 %v1328_v63, 0.0  ;;  %v1361_v24 = vmax.f32 %v1329_v0, 0.0  ;;  %v1362_v25 = vmax.f32 %v1330_v1, 0.0 }
 0x2a2   : > { %v1367_v13 = vmax.f32 %v1335_v2, 0.0  ;;  %v1368_v14 = vmax.f32 %v1336_v3, 0.0  ;;  %v1369_v15 = vmax.f32 %v1337_v4, 0.0  ;;  %v1370_v16 = vmax.f32 %v1338_v5, 0.0 }
 0x2a3   : > { %v1375_v20 = vmax.f32 %v1343_v6, 0.0  ;;  %v1376_v21 = vmax.f32 %v1344_v7, 0.0  ;;  %v1377_v22 = vmax.f32 %v1345_v8, 0.0  ;;  %v1378_v23 = vmax.f32 %v1346_v9, 0.0 }
 0x2a4   : > { %v1383_v26 = vmax.f32 %v1351_v10, 0.0  ;;  %v1384_v27 = vmax.f32 %v1352_v11, 0.0  ;;  %v1385_v28 = vmax.f32 %v1353_v12, 0.0  ;;  %v1386_v29 = vmax.f32 %v1354_v17, 0.0 }
 0x2a5   : > { %v1695_v31 = vpack.c.bf16 %v1360_v19, %v1359_v18  ;;  %v1696_v32 = vpack.c.bf16 %v1362_v25, %v1361_v24  ;;  %v1699_v33 = vpack.c.bf16 %v1368_v14, %v1367_v13  ;;  %v1700_v34 = vpack.c.bf16 %v1370_v16, %v1369_v15 }
 0x2a6   : > { %v1703_v35 = vpack.c.bf16 %v1376_v21, %v1375_v20  ;;  %v1704_v36 = vpack.c.bf16 %v1378_v23, %v1377_v22  ;;  %v1707_v37 = vpack.c.bf16 %v1384_v27, %v1383_v26  ;;  %v1708_v38 = vpack.c.bf16 %v1386_v29, %v1385_v28 }
 0x2a7   : > { %1487 = vst [vmem:[%s2351_s4] sm:$0xff] %v1695_v31  ;;  %1488 = vst [vmem:[%s2351_s4 + $0x8] sm:$0xff] %v1696_v32  ;;  %v1331_v39 = vadd.f32 %v1325_v30, %v1289_v45  ;;  %v1332_v40 = vadd.f32 %v1325_v30, %v1290_v46  ;;  %v1333_v41 = vadd.f32 %v1325_v30, %v1291_v47 }
 0x2a8   : > { %1491 = vst [vmem:[%s2351_s4 + $0x20] sm:$0xff] %v1699_v33  ;;  %1492 = vst [vmem:[%s2351_s4 + $0x28] sm:$0xff] %v1700_v34  ;;  %v1334_v42 = vadd.f32 %v1325_v30, %v1292_v48  ;;  %v1339_v43 = vadd.f32 %v1325_v30, %v2254_v49  ;;  %v1340_v44 = vadd.f32 %v1325_v30, %v2256_v50 }
 0x2a9   : > { %1495 = vst [vmem:[%s2351_s4 + $0x40] sm:$0xff] %v1703_v35  ;;  %1496 = vst [vmem:[%s2351_s4 + $0x48] sm:$0xff] %v1704_v36  ;;  %v1341_v45 = vadd.f32 %v1325_v30, %v2258_v51  ;;  %v1342_v46 = vadd.f32 %v1325_v30, %v2260_v52  ;;  %v1347_v47 = vadd.f32 %v1325_v30, %v2262_v54  ;;  %v1363_v1 = vmax.f32 %v1331_v39, 0.0 }
 0x2aa   : > { %1499 = vst [vmem:[%s2351_s4 + $0x60] sm:$0xff] %v1707_v37  ;;  %1500 = vst [vmem:[%s2351_s4 + $0x68] sm:$0xff] %v1708_v38  ;;  %v1348_v48 = vadd.f32 %v1325_v30, %v2264_v55  ;;  %v1349_v53 = vadd.f32 %v1325_v30, %v2266_v56  ;;  %v1350_v62 = vadd.f32 %v1325_v30, %v2268_v57  ;;  %v1364_v51 = vmax.f32 %v1332_v40, 0.0 }
 0x2ab   : > { %v1355_v63 = vadd.f32 %v1325_v30, %v2270_v58  ;;  %v1356_v0 = vadd.f32 %v1325_v30, %v2272_v59  ;;  %v1357_v49 = vadd.f32 %v1325_v30, %v2274_v60  ;;  %v1358_v50 = vadd.f32 %v1325_v30, %v2276_v61 }
 0x2ac   : > { %v1365_v2 = vmax.f32 %v1333_v41, 0.0  ;;  %v1366_v52 = vmax.f32 %v1334_v42, 0.0  ;;  %v1371_v3 = vmax.f32 %v1339_v43, 0.0  ;;  %v1372_v54 = vmax.f32 %v1340_v44, 0.0 }
 0x2ad   : > { %v1373_v4 = vmax.f32 %v1341_v45, 0.0  ;;  %v1374_v55 = vmax.f32 %v1342_v46, 0.0  ;;  %v1379_v5 = vmax.f32 %v1347_v47, 0.0  ;;  %v1380_v56 = vmax.f32 %v1348_v48, 0.0 }
 0x2ae   : > { %v1381_v6 = vmax.f32 %v1349_v53, 0.0  ;;  %v1382_v57 = vmax.f32 %v1350_v62, 0.0  ;;  %v1387_v7 = vmax.f32 %v1355_v63, 0.0  ;;  %v1388_v58 = vmax.f32 %v1356_v0, 0.0 }
 0x2af   : > { %v1389_v8 = vmax.f32 %v1357_v49, 0.0  ;;  %v1390_v59 = vmax.f32 %v1358_v50, 0.0  ;;  %v1697_v9 = vpack.c.bf16 %v1364_v51, %v1363_v1  ;;  %v1698_v60 = vpack.c.bf16 %v1366_v52, %v1365_v2 }
 0x2b0   : > { %v1701_v10 = vpack.c.bf16 %v1372_v54, %v1371_v3  ;;  %v1702_v61 = vpack.c.bf16 %v1374_v55, %v1373_v4  ;;  %v1705_v11 = vpack.c.bf16 %v1380_v56, %v1379_v5  ;;  %v1706_v12 = vpack.c.bf16 %v1382_v57, %v1381_v6 }
 0x2b1   : > { %v1709_v17 = vpack.c.bf16 %v1388_v58, %v1387_v7  ;;  %v1710_v18 = vpack.c.bf16 %v1390_v59, %v1389_v8  ;;  %1489 = vst [vmem:[%s2351_s4 + $0x10] sm:$0xff] %v1697_v9  ;;  %1490 = vst [vmem:[%s2351_s4 + $0x18] sm:$0xff] %v1698_v60 }
 0x2b2   : > { %1493 = vst [vmem:[%s2351_s4 + $0x30] sm:$0xff] %v1701_v10  ;;  %1494 = vst [vmem:[%s2351_s4 + $0x38] sm:$0xff] %v1702_v61 }
 0x2b3   : > { %1497 = vst [vmem:[%s2351_s4 + $0x50] sm:$0xff] %v1705_v11  ;;  %1498 = vst [vmem:[%s2351_s4 + $0x58] sm:$0xff] %v1706_v12 }
 0x2b4   : > { %1501 = vst [vmem:[%s2351_s4 + $0x70] sm:$0xff] %v1709_v17  ;;  %1502 = vst [vmem:[%s2351_s4 + $0x78] sm:$0xff] %v1710_v18 }
 0x2b5 PF: > { %s14_s17 = sadd.s32 1, %s1922_s17   ;;  %s2352_s15 = smov %s1918_s16 }
 0x2b6   : > { %p11_p6 = scmp.ge.s32.totalorder %s14_s17, 4   ;;  %s2353_s16 = smov %s2355_s18 }
 0x2b8   :  { %13 = sbr.rel (!%p11_p6) target bundleno = 2 (0x2), region = 80 }

// kernel: tile.6
= control target key start
LH: loop header
LB: loop body
LE: loop exit
PB: predicated region body
PF: predicated region fallthrough
CT: control target
= control target key end

     0   :  { %s22_s0 = inlined_call_operand.vmem [shape: f32[3], index: 0, kind: input, shape index: {}]   ;;  %s23_s1 = inlined_call_operand.vmem [shape: f32[4,3], index: 1, kind: output, shape index: {}]  }
   0x1   :  { %v4_v0 = vld [vmem:[%s22_s0] ss:$0 sm:$0xff] }
   0x2   :  { %5 = vst [vmem:[%s23_s1] sm:$0xf] %v4_v0 }

// kernel: tile.0
= control target key start
LH: loop header
LB: loop body
LE: loop exit
PB: predicated region body
PF: predicated region fallthrough
CT: control target
= control target key end

     0   :  { %vm7_vm0 = vcmask 7168   ;;  %s26_s10 = smov 126   ;;  %s49_s0 = inlined_call_operand.vmem [shape: f32[4,3], index: 0, kind: input, shape index: {}]   ;;  %s50_s1 = inlined_call_operand.vmem [shape: f32[12,1], index: 1, kind: output, shape index: {}]  }
   0x1   :  { %v4_v0 = vld [vmem:[%s49_s0] sm:$0xf]  ;;  %s25_s0 = smov 127  }
   0x2   :  { %5 = vst [vmem:[#allocation0] sm:$0xf] %v4_v0 }
   0x9   :  { %v9_v1 = vld [vmem:[#allocation0] sm:$0xf]  }
   0xa   :  { %v6_v2 = vld [vmem:[#allocation0] sm:$0xf]   ;;  %10 = vrot.lane.b32.xlu0 %v9_v1, %s25_s0 }
   0xb   :  { %8 = vst.msk [vmem:[%s50_s1] ss:$3 sm:$0xf] %vm7_vm0, %v6_v2   ;;  %v15_v3 = vld [vmem:[#allocation0] sm:$0xf]  }
   0xe   :  { %16 = vrot.lane.b32.xlu0 %v15_v3, %s26_s10 }
  0x7c   :  { %v11_v4 = vpop.permute.xlu0 %10  }
  0x7d   :  { %21 = vst.msk [vmem:[%s50_s1 + $0x1] ss:$3 sm:$0xf] %vm7_vm0, %v11_v4  }
  0x80   :  { %v17_v5 = vpop.permute.xlu0 %16  }
  0x81   :  { %22 = vst.msk [vmem:[%s50_s1 + $0x2] ss:$3 sm:$0xf] %vm7_vm0, %v17_v5  }

// kernel: _lambda_.9
= control target key start
LH: loop header
LB: loop body
LE: loop exit
PB: predicated region body
PF: predicated region fallthrough
CT: control target
= control target key end

     0   :  { %s1307_s12 = smov 0   ;;  %s1309_s13 = smov 0   ;;  %s1655_s0 = inlined_call_operand.vmem [shape: bf16[12,144], index: 0, kind: input, shape index: {}]   ;;  %s1656_s1 = inlined_call_operand.vmem [shape: f32[12,1], index: 1, kind: input, shape index: {}]   ;;  %s1657_s2 = inlined_call_operand.vmem [shape: bf16[144,2048], index: 2, kind: input, shape index: {}]   ;;  %s1658_s3 = inlined_call_operand.vmem [shape: f32[12,2048], index: 3, kind: output, shape index: {}]  }
   0x1   :  { %s1311_s14 = smov 0  }
   0x2 LB: > { %s1106_s15 = sadd.s32 4294967295, %s1284_s14   ;;  %s1324_s16 = sadd.s32 1, %s1284_s14   ;;  %s1284_s14 = sphi %s1311_s14, %s1662_s14   ;;  %s1280_s13 = sphi %s1309_s13, %s1661_s13   ;;  %s1276_s12 = sphi %s1307_s12, %s1660_s12  }
   0x3   : > { %s59_s17 = ssub.s32 %s1284_s14, %s1324_s16  ;;  %s62_s18 = sadd.s32 1, %s1280_s13 }
   0x4   : > { %p60_p0 = scmp.eq.s32.totalorder %s59_s17, 0  ;;  %p69_p1 = scmp.ne.s32.totalorder %s1280_s13, %s1276_s12 }
   0x5   : > { %p70_p2 = scmp.eq.s32.totalorder %s1284_s14, 0  ;;  %p99_p3 = scmp.eq.s32.totalorder %s1106_s15, 1 }
   0x6   : > { %s1335_s19 = scalar_select %p60_p0, %s1280_s13, %s62_s18  }
   0x7   : > { %p71_p4 = por %p70_p2, %p69_p1  ;;  %p1337_p5 = por %p99_p3, %p69_p1 }
   0x8   : > { %p1109_p6 = scmp.ge.s32.totalorder %s1284_s14, 2 }
   0xa   : > { %127 = sbr.rel (%p1109_p6) target bundleno = 58 (0x3a), region = 24 }
  0x11   : > { %130 = sbr.rel (!%p71_p4) target bundleno = 58 (0x3a), region = 28  ;;  %s132_s21 = sand.u32 (%p71_p4), 1, %s1280_s13  }
  0x12   : > { %s1197_s22 = sshll.u32 (%p71_p4), %s1284_s14, 5  ;;  %s1199_s23 = smul.u32 (%p71_p4), 576, %s132_s21 }
  0x13   : > { %s1347_s26 = scalar_lea.vmem (%p71_p4), %s1657_s2, %s1197_s22 }
  0x14   : > { %v150_v0 = vld [vmem:[%s1347_s26] sm:$0xff] (%p71_p4)  ;;  %v152_v1 = vld [vmem:[%s1347_s26 + $0x8] sm:$0xff] (%p71_p4)  ;;  %v154_v2 = vld [vmem:[%s1347_s26 + $0x10] sm:$0xff] (%p71_p4)  ;;  %s1355_s27 = scalar_lea.vmem (%p71_p4), [#allocation2], %s1199_s23 }
  0x15   : > { %v156_v3 = vld [vmem:[%s1347_s26 + $0x18] sm:$0xff] (%p71_p4)  ;;  %v158_v4 = vld [vmem:[%s1347_s26 + $0x40] sm:$0xff] (%p71_p4)  ;;  %v160_v5 = vld [vmem:[%s1347_s26 + $0x48] sm:$0xff] (%p71_p4)  ;;  %151 = vst [vmem:[%s1355_s27] sm:$0xff] (%p71_p4), %v150_v0 }
  0x16   : > { %153 = vst [vmem:[%s1355_s27 + $0x8] sm:$0xff] (%p71_p4), %v152_v1  ;;  %155 = vst [vmem:[%s1355_s27 + $0x10] sm:$0xff] (%p71_p4), %v154_v2  ;;  %v162_v6 = vld [vmem:[%s1347_s26 + $0x50] sm:$0xff] (%p71_p4)  ;;  %v164_v7 = vld [vmem:[%s1347_s26 + $0x58] sm:$0xff] (%p71_p4) }
  0x17   : > { %157 = vst [vmem:[%s1355_s27 + $0x18] sm:$0xff] (%p71_p4), %v156_v3  ;;  %159 = vst [vmem:[%s1355_s27 + $0x20] sm:$0xff] (%p71_p4), %v158_v4  ;;  %v166_v8 = vld [vmem:[%s1347_s26 + $0x80] sm:$0xff] (%p71_p4)  ;;  %v168_v9 = vld [vmem:[%s1347_s26 + $0x88] sm:$0xff] (%p71_p4) }
  0x18   : > { %161 = vst [vmem:[%s1355_s27 + $0x28] sm:$0xff] %v160_v5  ;;  %163 = vst [vmem:[%s1355_s27 + $0x30] sm:$0xff] %v162_v6  ;;  %v170_v10 = vld [vmem:[%s1347_s26 + $0x90] sm:$0xff]  ;;  %v172_v11 = vld [vmem:[%s1347_s26 + $0x98] sm:$0xff] }
  0x19   : > { %165 = vst [vmem:[%s1355_s27 + $0x38] sm:$0xff] %v164_v7  ;;  %167 = vst [vmem:[%s1355_s27 + $0x40] sm:$0xff] %v166_v8  ;;  %v174_v12 = vld [vmem:[%s1347_s26 + $0xc0] sm:$0xff]  ;;  %v176_v13 = vld [vmem:[%s1347_s26 + $0xc8] sm:$0xff] }
  0x1a   : > { %169 = vst [vmem:[%s1355_s27 + $0x48] sm:$0xff] %v168_v9  ;;  %171 = vst [vmem:[%s1355_s27 + $0x50] sm:$0xff] %v170_v10  ;;  %v178_v14 = vld [vmem:[%s1347_s26 + $0xd0] sm:$0xff]  ;;  %v180_v15 = vld [vmem:[%s1347_s26 + $0xd8] sm:$0xff] }
  0x1b   : > { %173 = vst [vmem:[%s1355_s27 + $0x58] sm:$0xff] %v172_v11  ;;  %175 = vst [vmem:[%s1355_s27 + $0x60] sm:$0xff] %v174_v12  ;;  %v182_v16 = vld [vmem:[%s1347_s26 + $0x100] sm:$0xff]  ;;  %v184_v17 = vld [vmem:[%s1347_s26 + $0x108] sm:$0xff] }
  0x1c   : > { %177 = vst [vmem:[%s1355_s27 + $0x68] sm:$0xff] %v176_v13  ;;  %179 = vst [vmem:[%s1355_s27 + $0x70] sm:$0xff] %v178_v14  ;;  %v186_v18 = vld [vmem:[%s1347_s26 + $0x110] sm:$0xff]  ;;  %v188_v19 = vld [vmem:[%s1347_s26 + $0x118] sm:$0xff] }
  0x1d   : > { %181 = vst [vmem:[%s1355_s27 + $0x78] sm:$0xff] %v180_v15  ;;  %183 = vst [vmem:[%s1355_s27 + $0x80] sm:$0xff] %v182_v16  ;;  %v190_v20 = vld [vmem:[%s1347_s26 + $0x140] sm:$0xff]  ;;  %v192_v21 = vld [vmem:[%s1347_s26 + $0x148] sm:$0xff] }
  0x1e   : > { %185 = vst [vmem:[%s1355_s27 + $0x88] sm:$0xff] %v184_v17  ;;  %187 = vst [vmem:[%s1355_s27 + $0x90] sm:$0xff] %v186_v18  ;;  %v194_v22 = vld [vmem:[%s1347_s26 + $0x150] sm:$0xff]  ;;  %v196_v23 = vld [vmem:[%s1347_s26 + $0x158] sm:$0xff] }
  0x1f   : > { %189 = vst [vmem:[%s1355_s27 + $0x98] sm:$0xff] %v188_v19  ;;  %191 = vst [vmem:[%s1355_s27 + $0xa0] sm:$0xff] %v190_v20  ;;  %v198_v24 = vld [vmem:[%s1347_s26 + $0x180] sm:$0xff]  ;;  %v200_v25 = vld [vmem:[%s1347_s26 + $0x188] sm:$0xff] }
  0x20   : > { %193 = vst [vmem:[%s1355_s27 + $0xa8] sm:$0xff] %v192_v21  ;;  %195 = vst [vmem:[%s1355_s27 + $0xb0] sm:$0xff] %v194_v22  ;;  %v202_v26 = vld [vmem:[%s1347_s26 + $0x190] sm:$0xff]  ;;  %v204_v27 = vld [vmem:[%s1347_s26 + $0x198] sm:$0xff] }
  0x21   : > { %197 = vst [vmem:[%s1355_s27 + $0xb8] sm:$0xff] %v196_v23  ;;  %199 = vst [vmem:[%s1355_s27 + $0xc0] sm:$0xff] %v198_v24  ;;  %v206_v28 = vld [vmem:[%s1347_s26 + $0x1c0] sm:$0xff]  ;;  %v208_v29 = vld [vmem:[%s1347_s26 + $0x1c8] sm:$0xff] }
  0x22   : > { %201 = vst [vmem:[%s1355_s27 + $0xc8] sm:$0xff] %v200_v25  ;;  %203 = vst [vmem:[%s1355_s27 + $0xd0] sm:$0xff] %v202_v26  ;;  %v210_v30 = vld [vmem:[%s1347_s26 + $0x1d0] sm:$0xff]  ;;  %v212_v31 = vld [vmem:[%s1347_s26 + $0x1d8] sm:$0xff] }
  0x23   : > { %205 = vst [vmem:[%s1355_s27 + $0xd8] sm:$0xff] %v204_v27  ;;  %207 = vst [vmem:[%s1355_s27 + $0xe0] sm:$0xff] %v206_v28  ;;  %v214_v32 = vld [vmem:[%s1347_s26 + $0x200] sm:$0xff]  ;;  %v216_v33 = vld [vmem:[%s1347_s26 + $0x208] sm:$0xff] }
  0x24   : > { %209 = vst [vmem:[%s1355_s27 + $0xe8] sm:$0xff] %v208_v29  ;;  %211 = vst [vmem:[%s1355_s27 + $0xf0] sm:$0xff] %v210_v30  ;;  %v218_v34 = vld [vmem:[%s1347_s26 + $0x210] sm:$0xff]  ;;  %v220_v35 = vld [vmem:[%s1347_s26 + $0x218] sm:$0xff] }
  0x25   : > { %213 = vst [vmem:[%s1355_s27 + $0xf8] sm:$0xff] %v212_v31  ;;  %215 = vst [vmem:[%s1355_s27 + $0x100] sm:$0xff] %v214_v32  ;;  %v222_v36 = vld [vmem:[%s1347_s26 + $0x240] sm:$0xff]  ;;  %v224_v37 = vld [vmem:[%s1347_s26 + $0x248] sm:$0xff] }
  0x26   : > { %217 = vst [vmem:[%s1355_s27 + $0x108] sm:$0xff] %v216_v33  ;;  %219 = vst [vmem:[%s1355_s27 + $0x110] sm:$0xff] %v218_v34  ;;  %v226_v38 = vld [vmem:[%s1347_s26 + $0x250] sm:$0xff]  ;;  %v228_v39 = vld [vmem:[%s1347_s26 + $0x258] sm:$0xff] }
  0x27   : > { %221 = vst [vmem:[%s1355_s27 + $0x118] sm:$0xff] %v220_v35  ;;  %223 = vst [vmem:[%s1355_s27 + $0x120] sm:$0xff] %v222_v36  ;;  %v230_v40 = vld [vmem:[%s1347_s26 + $0x280] sm:$0xff]  ;;  %v232_v41 = vld [vmem:[%s1347_s26 + $0x288] sm:$0xff] }
  0x28   : > { %225 = vst [vmem:[%s1355_s27 + $0x128] sm:$0xff] %v224_v37  ;;  %227 = vst [vmem:[%s1355_s27 + $0x130] sm:$0xff] %v226_v38  ;;  %v234_v42 = vld [vmem:[%s1347_s26 + $0x290] sm:$0xff]  ;;  %v236_v43 = vld [vmem:[%s1347_s26 + $0x298] sm:$0xff] }
  0x29   : > { %229 = vst [vmem:[%s1355_s27 + $0x138] sm:$0xff] %v228_v39  ;;  %231 = vst [vmem:[%s1355_s27 + $0x140] sm:$0xff] %v230_v40  ;;  %v238_v44 = vld [vmem:[%s1347_s26 + $0x2c0] sm:$0xff]  ;;  %v240_v45 = vld [vmem:[%s1347_s26 + $0x2c8] sm:$0xff] }
  0x2a   : > { %233 = vst [vmem:[%s1355_s27 + $0x148] sm:$0xff] %v232_v41  ;;  %235 = vst [vmem:[%s1355_s27 + $0x150] sm:$0xff] %v234_v42  ;;  %v242_v46 = vld [vmem:[%s1347_s26 + $0x2d0] sm:$0xff]  ;;  %v244_v47 = vld [vmem:[%s1347_s26 + $0x2d8] sm:$0xff] }
  0x2b   : > { %237 = vst [vmem:[%s1355_s27 + $0x158] sm:$0xff] %v236_v43  ;;  %239 = vst [vmem:[%s1355_s27 + $0x160] sm:$0xff] %v238_v44  ;;  %v246_v48 = vld [vmem:[%s1347_s26 + $0x300] sm:$0xff]  ;;  %v248_v49 = vld [vmem:[%s1347_s26 + $0x308] sm:$0xff] }
  0x2c   : > { %241 = vst [vmem:[%s1355_s27 + $0x168] sm:$0xff] %v240_v45  ;;  %243 = vst [vmem:[%s1355_s27 + $0x170] sm:$0xff] %v242_v46  ;;  %v250_v50 = vld [vmem:[%s1347_s26 + $0x310] sm:$0xff]  ;;  %v252_v51 = vld [vmem:[%s1347_s26 + $0x318] sm:$0xff] }
  0x2d   : > { %245 = vst [vmem:[%s1355_s27 + $0x178] sm:$0xff] %v244_v47  ;;  %247 = vst [vmem:[%s1355_s27 + $0x180] sm:$0xff] %v246_v48  ;;  %v254_v52 = vld [vmem:[%s1347_s26 + $0x340] sm:$0xff]  ;;  %v256_v53 = vld [vmem:[%s1347_s26 + $0x348] sm:$0xff] }
  0x2e   : > { %249 = vst [vmem:[%s1355_s27 + $0x188] sm:$0xff] %v248_v49  ;;  %251 = vst [vmem:[%s1355_s27 + $0x190] sm:$0xff] %v250_v50  ;;  %v258_v54 = vld [vmem:[%s1347_s26 + $0x350] sm:$0xff]  ;;  %v260_v55 = vld [vmem:[%s1347_s26 + $0x358] sm:$0xff] }
  0x2f   : > { %253 = vst [vmem:[%s1355_s27 + $0x198] sm:$0xff] %v252_v51  ;;  %255 = vst [vmem:[%s1355_s27 + $0x1a0] sm:$0xff] %v254_v52  ;;  %v262_v56 = vld [vmem:[%s1347_s26 + $0x380] sm:$0xff]  ;;  %v264_v57 = vld [vmem:[%s1347_s26 + $0x388] sm:$0xff] }
  0x30   : > { %257 = vst [vmem:[%s1355_s27 + $0x1a8] sm:$0xff] %v256_v53  ;;  %259 = vst [vmem:[%s1355_s27 + $0x1b0] sm:$0xff] %v258_v54  ;;  %v266_v58 = vld [vmem:[%s1347_s26 + $0x390] sm:$0xff]  ;;  %v268_v59 = vld [vmem:[%s1347_s26 + $0x398] sm:$0xff] }
  0x31   : > { %261 = vst [vmem:[%s1355_s27 + $0x1b8] sm:$0xff] %v260_v55  ;;  %263 = vst [vmem:[%s1355_s27 + $0x1c0] sm:$0xff] %v262_v56  ;;  %v270_v60 = vld [vmem:[%s1347_s26 + $0x3c0] sm:$0xff]  ;;  %v272_v61 = vld [vmem:[%s1347_s26 + $0x3c8] sm:$0xff] }
  0x32   : > { %265 = vst [vmem:[%s1355_s27 + $0x1c8] sm:$0xff] %v264_v57  ;;  %267 = vst [vmem:[%s1355_s27 + $0x1d0] sm:$0xff] %v266_v58  ;;  %v274_v62 = vld [vmem:[%s1347_s26 + $0x3d0] sm:$0xff]  ;;  %v276_v63 = vld [vmem:[%s1347_s26 + $0x3d8] sm:$0xff] }
  0x33   : > { %269 = vst [vmem:[%s1355_s27 + $0x1d8] sm:$0xff] %v268_v59  ;;  %271 = vst [vmem:[%s1355_s27 + $0x1e0] sm:$0xff] %v270_v60  ;;  %v278_v0 = vld [vmem:[%s1347_s26 + $0x400] sm:$0xff]  ;;  %v280_v1 = vld [vmem:[%s1347_s26 + $0x408] sm:$0xff] }
  0x34   : > { %273 = vst [vmem:[%s1355_s27 + $0x1e8] sm:$0xff] %v272_v61  ;;  %275 = vst [vmem:[%s1355_s27 + $0x1f0] sm:$0xff] %v274_v62  ;;  %v282_v2 = vld [vmem:[%s1347_s26 + $0x410] sm:$0xff]  ;;  %v284_v3 = vld [vmem:[%s1347_s26 + $0x418] sm:$0xff] }
  0x35   : > { %277 = vst [vmem:[%s1355_s27 + $0x1f8] sm:$0xff] %v276_v63  ;;  %279 = vst [vmem:[%s1355_s27 + $0x200] sm:$0xff] %v278_v0  ;;  %v286_v4 = vld [vmem:[%s1347_s26 + $0x440] sm:$0xff]  ;;  %v288_v5 = vld [vmem:[%s1347_s26 + $0x448] sm:$0xff] }
  0x36   : > { %281 = vst [vmem:[%s1355_s27 + $0x208] sm:$0xff] %v280_v1  ;;  %283 = vst [vmem:[%s1355_s27 + $0x210] sm:$0xff] %v282_v2  ;;  %v290_v6 = vld [vmem:[%s1347_s26 + $0x450] sm:$0xff]  ;;  %v292_v7 = vld [vmem:[%s1347_s26 + $0x458] sm:$0xff] }
  0x37   : > { %285 = vst [vmem:[%s1355_s27 + $0x218] sm:$0xff] %v284_v3  ;;  %287 = vst [vmem:[%s1355_s27 + $0x220] sm:$0xff] %v286_v4 }
  0x38   : > { %289 = vst [vmem:[%s1355_s27 + $0x228] sm:$0xff] %v288_v5  ;;  %291 = vst [vmem:[%s1355_s27 + $0x230] sm:$0xff] %v290_v6 }
  0x39   : > { %293 = vst [vmem:[%s1355_s27 + $0x238] sm:$0xff] %v292_v7 }
  0x3a PF: > { %p1112_p7 = scmp.ge.s32.totalorder %s1284_s14, 1  ;;  %p298_p8 = scmp.lt.s32.totalorder %s1284_s14, 3 }
  0x3c   : > { %p299_p9 = pnand %p1112_p7, %p298_p8 }
  0x3d   : > { %s305_s28 = sand.u32 (!%p299_p9), 1, %s1276_s12   ;;  %vm785_vm0 = vcmask (!%p299_p9), 130048   ;;  %v1503_v8 = vld [vmem:[%s1655_s0 + $0x4] ss:$8 sps:$4 sm:$0x3f] (!%p299_p9)   ;;  %v1286_v9 = vmov (!%p299_p9), 0  }
  0x3e   : > { %302 = sbr.rel (%p299_p9) target bundleno = 383 (0x17f), region = 51  ;;  %1226 = vset.pattern.permute.xlu0 (!%p299_p9), %v1286_v9  ;;  %v404_v10 = vld [vmem:[%s1656_s1] sm:$0xff] (!%p299_p9)  ;;  %1188 = vmatprep.mubr.msk.bf16.mxu0 (!%p299_p9), %vm785_vm0, %v1503_v8  ;;  %v405_v11 = vld [vmem:[%s1656_s1 + $0x8] sm:$0xf] (!%p299_p9)  ;;  %s1113_s17 = sshll.u32 (!%p299_p9), %s305_s28, 7 }
  0x3f   : > { %s1200_s29 = smul.u32 (!%p299_p9), 576, %s305_s28  ;;  %408 = vperm.xlu0 (!%p299_p9), %1226, %v404_v10   ;;  %1189 = vmatprep.mubr.msk.bf16.mxu1 (!%p299_p9), %vm785_vm0, %v1503_v8  ;;  %s1604_s18 = scalar_lea.vmem (!%p299_p9), [#allocation3], %s1113_s17 }
  0x41   : > { %s1515_s9 = scalar_lea.vmem (!%p299_p9), [#allocation2], %s1200_s29 }
  0x42   : > { %v332_v12 = vld [vmem:[%s1515_s9] sm:$0xff] (!%p299_p9)  ;;  %v333_v14 = vld [vmem:[%s1515_s9 + $0x8] sm:$0xff] (!%p299_p9) }
  0x43   : > { %v336_v13 = vld [vmem:[%s1515_s9 + $0x20] sm:$0xff] (!%p299_p9)  ;;  %v337_v16 = vld [vmem:[%s1515_s9 + $0x28] sm:$0xff] (!%p299_p9)  ;;  %413 = vperm.xlu0 (!%p299_p9), %1226, %v405_v11  }
  0x44   : > { %v1117_v15 = vcombine.high (!%p299_p9), %v332_v12, %v336_v13  ;;  %v1116_v17 = vcombine.low (!%p299_p9), %v332_v12, %v336_v13  ;;  %v340_v18 = vld [vmem:[%s1515_s9 + $0x40] sm:$0xff] (!%p299_p9)  ;;  %v1119_v20 = vcombine.high (!%p299_p9), %v333_v14, %v337_v16  ;;  %v1118_v21 = vcombine.low (!%p299_p9), %v333_v14, %v337_v16  ;;  %v341_v23 = vld [vmem:[%s1515_s9 + $0x48] sm:$0xff] (!%p299_p9) }
  0x45   : > { %v344_v19 = vld [vmem:[%s1515_s9 + $0x60] sm:$0xff]  ;;  %v345_v24 = vld [vmem:[%s1515_s9 + $0x68] sm:$0xff]  ;;  %s1198_s12 = sshll.u32 (%p1337_p5), %s1106_s15, 6 }
  0x46   : > { %v1125_v22 = vcombine.high %v340_v18, %v344_v19  ;;  %v348_v25 = vld [vmem:[%s1515_s9 + $0x80] sm:$0xff]  ;;  %789 = vmatprep.subr.bf16.mxu0 %v1117_v15  ;;  %v1127_v26 = vcombine.high %v341_v23, %v345_v24  ;;  %v349_v28 = vld [vmem:[%s1515_s9 + $0x88] sm:$0xff]  ;;  %832 = vmatprep.subr.bf16.mxu1 %v1119_v20  ;;  %v1124_v30 = vcombine.low %v340_v18, %v344_v19  ;;  %v334_v19 = vld [vmem:[%s1515_s9 + $0x10] sm:$0xff]  ;;  %s1002_s20 = scalar_lea.vmem (%p1337_p5), %s1658_s3, %s1198_s12 }
  0x47   : > { %v352_v27 = vld [vmem:[%s1515_s9 + $0xa0] sm:$0xff]  ;;  %v353_v29 = vld [vmem:[%s1515_s9 + $0xa8] sm:$0xff]  ;;  %790 = vmatpush1.bf16.msra.mxu0 %v1116_v17  ;;  %833 = vmatpush1.bf16.msra.mxu1 %v1118_v21  ;;  %v1126_v31 = vcombine.low %v341_v23, %v345_v24  ;;  %v338_v20 = vld [vmem:[%s1515_s9 + $0x30] sm:$0xff] }
  0x48   : > { %791 = vmatprep.subr.bf16.mxu0 %v1125_v22  ;;  %v1133_v32 = vcombine.high %v348_v25, %v352_v27  ;;  %834 = vmatprep.subr.bf16.mxu1 %v1127_v26  ;;  %v1135_v33 = vcombine.high %v349_v28, %v353_v29  ;;  %v356_v34 = vld [vmem:[%s1515_s9 + $0xc0] sm:$0xff]  ;;  %v357_v36 = vld [vmem:[%s1515_s9 + $0xc8] sm:$0xff]  ;;  %v1132_v38 = vcombine.low %v348_v25, %v352_v27  ;;  %v335_v21 = vld [vmem:[%s1515_s9 + $0x18] sm:$0xff] }
  0x49   : > { %v360_v35 = vld [vmem:[%s1515_s9 + $0xe0] sm:$0xff]  ;;  %v361_v37 = vld [vmem:[%s1515_s9 + $0xe8] sm:$0xff]  ;;  %v1134_v39 = vcombine.low %v349_v28, %v353_v29  ;;  %v339_v22 = vld [vmem:[%s1515_s9 + $0x38] sm:$0xff]  ;;  %v1121_v25 = vcombine.high %v334_v19, %v338_v20 }
  0x4a   : > { %v1141_v40 = vcombine.high %v356_v34, %v360_v35  ;;  %v1143_v41 = vcombine.high %v357_v36, %v361_v37  ;;  %v364_v42 = vld [vmem:[%s1515_s9 + $0x100] sm:$0xff]  ;;  %v365_v44 = vld [vmem:[%s1515_s9 + $0x108] sm:$0xff]  ;;  %v1140_v46 = vcombine.low %v356_v34, %v360_v35  ;;  %v1142_v47 = vcombine.low %v357_v36, %v361_v37  ;;  %v342_v27 = vld [vmem:[%s1515_s9 + $0x50] sm:$0xff] }
  0x4b   : > { %792 = vmatpush1.bf16.msra.mxu0 %v1124_v30  ;;  %835 = vmatpush1.bf16.msra.mxu1 %v1126_v31  ;;  %v368_v43 = vld [vmem:[%s1515_s9 + $0x120] sm:$0xff]  ;;  %v369_v45 = vld [vmem:[%s1515_s9 + $0x128] sm:$0xff]  ;;  %v1123_v26 = vcombine.high %v335_v21, %v339_v22  ;;  %v346_v28 = vld [vmem:[%s1515_s9 + $0x70] sm:$0xff] }
  0x4c   : > { %793 = vmatprep.subr.bf16.mxu0 %v1133_v32  ;;  %836 = vmatprep.subr.bf16.mxu1 %v1135_v33  ;;  %v1149_v48 = vcombine.high %v364_v42, %v368_v43  ;;  %v1151_v49 = vcombine.high %v365_v44, %v369_v45  ;;  %v372_v50 = vld [vmem:[%s1515_s9 + $0x140] sm:$0xff]  ;;  %v373_v52 = vld [vmem:[%s1515_s9 + $0x148] sm:$0xff]  ;;  %v1148_v54 = vcombine.low %v364_v42, %v368_v43  ;;  %v343_v30 = vld [vmem:[%s1515_s9 + $0x58] sm:$0xff] }
  0x4d   : > { %v376_v51 = vld [vmem:[%s1515_s9 + $0x160] sm:$0xff]  ;;  %v377_v53 = vld [vmem:[%s1515_s9 + $0x168] sm:$0xff]  ;;  %v1150_v55 = vcombine.low %v365_v44, %v369_v45  ;;  %v347_v31 = vld [vmem:[%s1515_s9 + $0x78] sm:$0xff]  ;;  %v1120_v32 = vcombine.low %v334_v19, %v338_v20  ;;  %v1122_v33 = vcombine.low %v335_v21, %v339_v22  ;;  %v1129_v34 = vcombine.high %v342_v27, %v346_v28 }
  0x4e   : > { %v1157_v56 = vcombine.high %v372_v50, %v376_v51  ;;  %v1159_v57 = vcombine.high %v373_v52, %v377_v53  ;;  %v380_v58 = vld [vmem:[%s1515_s9 + $0x180] sm:$0xff]  ;;  %v381_v60 = vld [vmem:[%s1515_s9 + $0x188] sm:$0xff]  ;;  %v1156_v62 = vcombine.low %v372_v50, %v376_v51  ;;  %v1158_v63 = vcombine.low %v373_v52, %v377_v53  ;;  %v350_v36 = vld [vmem:[%s1515_s9 + $0x90] sm:$0xff] }
  0x4f   : > { %794 = vmatpush1.bf16.msra.mxu0 %v1132_v38  ;;  %837 = vmatpush1.bf16.msra.mxu1 %v1134_v39  ;;  %v384_v59 = vld [vmem:[%s1515_s9 + $0x1a0] sm:$0xff]  ;;  %v385_v61 = vld [vmem:[%s1515_s9 + $0x1a8] sm:$0xff]  ;;  %v1131_v35 = vcombine.high %v343_v30, %v347_v31  ;;  %v354_v37 = vld [vmem:[%s1515_s9 + $0xb0] sm:$0xff] }
  0x50   : > { %795 = vmatprep.subr.bf16.mxu0 %v1141_v40  ;;  %838 = vmatprep.subr.bf16.mxu1 %v1143_v41  ;;  %v1165_v0 = vcombine.high %v380_v58, %v384_v59  ;;  %v1167_v1 = vcombine.high %v381_v60, %v385_v61  ;;  %v388_v2 = vld [vmem:[%s1515_s9 + $0x1c0] sm:$0xff]  ;;  %v389_v4 = vld [vmem:[%s1515_s9 + $0x1c8] sm:$0xff]  ;;  %v1164_v6 = vcombine.low %v380_v58, %v384_v59  ;;  %v351_v38 = vld [vmem:[%s1515_s9 + $0x98] sm:$0xff] }
  0x51   : > { %v392_v3 = vld [vmem:[%s1515_s9 + $0x1e0] sm:$0xff]  ;;  %v393_v5 = vld [vmem:[%s1515_s9 + $0x1e8] sm:$0xff]  ;;  %v1166_v7 = vcombine.low %v381_v60, %v385_v61  ;;  %v355_v39 = vld [vmem:[%s1515_s9 + $0xb8] sm:$0xff]  ;;  %v1128_v40 = vcombine.low %v342_v27, %v346_v28  ;;  %v1130_v41 = vcombine.low %v343_v30, %v347_v31  ;;  %v1137_v42 = vcombine.high %v350_v36, %v354_v37 }
  0x52   : > { %v1173_v9 = vcombine.high %v388_v2, %v392_v3  ;;  %v1175_v10 = vcombine.high %v389_v4, %v393_v5  ;;  %v396_v11 = vld [vmem:[%s1515_s9 + $0x200] sm:$0xff]  ;;  %v397_v13 = vld [vmem:[%s1515_s9 + $0x208] sm:$0xff]  ;;  %v1172_v15 = vcombine.low %v388_v2, %v392_v3  ;;  %v1174_v16 = vcombine.low %v389_v4, %v393_v5  ;;  %v358_v44 = vld [vmem:[%s1515_s9 + $0xd0] sm:$0xff] }
  0x53   : > { %796 = vmatpush1.bf16.msra.mxu0 %v1140_v46  ;;  %839 = vmatpush1.bf16.msra.mxu1 %v1142_v47  ;;  %v400_v12 = vld [vmem:[%s1515_s9 + $0x220] sm:$0xff]  ;;  %v401_v14 = vld [vmem:[%s1515_s9 + $0x228] sm:$0xff]  ;;  %v1139_v43 = vcombine.high %v351_v38, %v355_v39  ;;  %v362_v45 = vld [vmem:[%s1515_s9 + $0xf0] sm:$0xff] }
  0x54   : > { %797 = vmatprep.subr.bf16.mxu0 %v1149_v48  ;;  %840 = vmatprep.subr.bf16.mxu1 %v1151_v49  ;;  %v1181_v17 = vcombine.high %v396_v11, %v400_v12  ;;  %v1183_v18 = vcombine.high %v397_v13, %v401_v14  ;;  %v1180_v23 = vcombine.low %v396_v11, %v400_v12  ;;  %v1562_v29 = vld [vmem:[%s1655_s0] ss:$8 sps:$4 sm:$0x3f]   ;;  %v359_v46 = vld [vmem:[%s1515_s9 + $0xd8] sm:$0xff]  ;;  %v366_v52 = vld [vmem:[%s1515_s9 + $0x110] sm:$0xff] }
  0x55   : > { %v1182_v24 = vcombine.low %v397_v13, %v401_v14  ;;  %v363_v47 = vld [vmem:[%s1515_s9 + $0xf8] sm:$0xff]  ;;  %v1136_v48 = vcombine.low %v350_v36, %v354_v37  ;;  %v1138_v49 = vcombine.low %v351_v38, %v355_v39  ;;  %v1145_v50 = vcombine.high %v358_v44, %v362_v45  ;;  %v370_v53 = vld [vmem:[%s1515_s9 + $0x130] sm:$0xff] }
  0x56   : > { %v1147_v51 = vcombine.high %v359_v46, %v363_v47  ;;  %v374_v59 = vld [vmem:[%s1515_s9 + $0x150] sm:$0xff]  ;;  %v375_v61 = vld [vmem:[%s1515_s9 + $0x158] sm:$0xff] }
  0x57   : > { %798 = vmatpush1.bf16.msra.mxu0 %v1148_v54  ;;  %841 = vmatpush1.bf16.msra.mxu1 %v1150_v55  ;;  %v367_v54 = vld [vmem:[%s1515_s9 + $0x118] sm:$0xff]  ;;  %v378_v60 = vld [vmem:[%s1515_s9 + $0x170] sm:$0xff] }
  0x58   : > { %799 = vmatprep.subr.bf16.mxu0 %v1157_v56  ;;  %842 = vmatprep.subr.bf16.mxu1 %v1159_v57  ;;  %v371_v55 = vld [vmem:[%s1515_s9 + $0x138] sm:$0xff]  ;;  %v1144_v56 = vcombine.low %v358_v44, %v362_v45  ;;  %v1153_v57 = vcombine.high %v366_v52, %v370_v53  ;;  %v382_v3 = vld [vmem:[%s1515_s9 + $0x190] sm:$0xff] }
  0x59   : > { %v1155_v58 = vcombine.high %v367_v54, %v371_v55  ;;  %v386_v4 = vld [vmem:[%s1515_s9 + $0x1b0] sm:$0xff]  ;;  %v383_v5 = vld [vmem:[%s1515_s9 + $0x198] sm:$0xff] }
  0x5a   : > { %v390_v12 = vld [vmem:[%s1515_s9 + $0x1d0] sm:$0xff]  ;;  %v391_v14 = vld [vmem:[%s1515_s9 + $0x1d8] sm:$0xff] }
  0x5b   : > { %800 = vmatpush1.bf16.msra.mxu0 %v1156_v62  ;;  %843 = vmatpush1.bf16.msra.mxu1 %v1158_v63  ;;  %v379_v62 = vld [vmem:[%s1515_s9 + $0x178] sm:$0xff]  ;;  %v1152_v63 = vcombine.low %v366_v52, %v370_v53  ;;  %v394_v13 = vld [vmem:[%s1515_s9 + $0x1f0] sm:$0xff] }
  0x5c   : > { %801 = vmatprep.subr.bf16.mxu0 %v1165_v0  ;;  %844 = vmatprep.subr.bf16.mxu1 %v1167_v1  ;;  %v1154_v0 = vcombine.low %v367_v54, %v371_v55  ;;  %v1161_v1 = vcombine.high %v374_v59, %v378_v60  ;;  %v1163_v2 = vcombine.high %v375_v61, %v379_v62  ;;  %v398_v20 = vld [vmem:[%s1515_s9 + $0x210] sm:$0xff]  ;;  %v399_v22 = vld [vmem:[%s1515_s9 + $0x218] sm:$0xff] }
  0x5d   : > { %v402_v21 = vld [vmem:[%s1515_s9 + $0x230] sm:$0xff] }
  0x5e   : > { %v1184_v28 = vcombine.low %v398_v20, %v402_v21 }
  0x5f   : > { %802 = vmatpush1.bf16.msra.mxu0 %v1164_v6  ;;  %845 = vmatpush1.bf16.msra.mxu1 %v1166_v7  ;;  %v387_v6 = vld [vmem:[%s1515_s9 + $0x1b8] sm:$0xff]  ;;  %v1160_v7 = vcombine.low %v374_v59, %v378_v60 }
  0x60   : > { %803 = vmatprep.subr.bf16.mxu0 %v1173_v9  ;;  %846 = vmatprep.subr.bf16.mxu1 %v1175_v10  ;;  %v1162_v9 = vcombine.low %v375_v61, %v379_v62  ;;  %v1169_v10 = vcombine.high %v382_v3, %v386_v4  ;;  %v1171_v11 = vcombine.high %v383_v5, %v387_v6 }
  0x63   : > { %804 = vmatpush1.bf16.msra.mxu0 %v1172_v15  ;;  %847 = vmatpush1.bf16.msra.mxu1 %v1174_v16  ;;  %v395_v15 = vld [vmem:[%s1515_s9 + $0x1f8] sm:$0xff]  ;;  %v1168_v16 = vcombine.low %v382_v3, %v386_v4 }
  0x64   : > { %805 = vmatprep.subr.bf16.mxu0 %v1181_v17  ;;  %848 = vmatprep.subr.bf16.mxu1 %v1183_v18  ;;  %v1170_v17 = vcombine.low %v383_v5, %v387_v6  ;;  %v1177_v18 = vcombine.high %v390_v12, %v394_v13  ;;  %v1179_v19 = vcombine.high %v391_v14, %v395_v15 }
  0x67   : > { %806 = vmatpush1.bf16.msra.mxu0 %v1180_v23  ;;  %849 = vmatpush1.bf16.msra.mxu1 %v1182_v24  ;;  %v403_v23 = vld [vmem:[%s1515_s9 + $0x238] sm:$0xff]  ;;  %v1176_v24 = vcombine.low %v390_v12, %v394_v13 }
  0x68   : > { %875 = vmatprep.subr.bf16.mxu0 %v1121_v25  ;;  %918 = vmatprep.subr.bf16.mxu1 %v1123_v26  ;;  %v1178_v25 = vcombine.low %v391_v14, %v395_v15  ;;  %v1185_v26 = vcombine.high %v398_v20, %v402_v21  ;;  %v1187_v27 = vcombine.high %v399_v22, %v403_v23 }
  0x69   : > { %v1186_v30 = vcombine.low %v399_v22, %v403_v23 }
  0x6a   : > { %822 = vmatmul.mubr.bf16.vlgmr.msra.gmra.mrb[0].mxu0 %v1562_v29  ;;  %865 = vmatmul.mubr.bf16.vlgmr.msra.gmra.mrb[0].mxu1 %v1562_v29 }
  0x6b   : > { %876 = vmatpush1.bf16.msra.mxu0 %v1120_v32  ;;  %919 = vmatpush1.bf16.msra.mxu1 %v1122_v33 }
  0x6c   : > { %877 = vmatprep.subr.bf16.mxu0 %v1129_v34  ;;  %920 = vmatprep.subr.bf16.mxu1 %v1131_v35 }
  0x6d   : > { %1190 = vmatprep.mubr.msk.bf16.mxu0 %vm785_vm0, %v1503_v8  ;;  %1191 = vmatprep.mubr.msk.bf16.mxu1 %vm785_vm0, %v1503_v8  ;;  %v1146_v8 = vcombine.low %v359_v46, %v363_v47 }
  0x6f   : > { %878 = vmatpush1.bf16.msra.mxu0 %v1128_v40  ;;  %921 = vmatpush1.bf16.msra.mxu1 %v1130_v41 }
  0x70   : > { %879 = vmatprep.subr.bf16.mxu0 %v1137_v42  ;;  %922 = vmatprep.subr.bf16.mxu1 %v1139_v43 }
  0x73   : > { %880 = vmatpush1.bf16.msra.mxu0 %v1136_v48  ;;  %923 = vmatpush1.bf16.msra.mxu1 %v1138_v49 }
  0x74   : > { %881 = vmatprep.subr.bf16.mxu0 %v1145_v50  ;;  %924 = vmatprep.subr.bf16.mxu1 %v1147_v51 }
  0x77   : > { %882 = vmatpush1.bf16.msra.mxu0 %v1144_v56  ;;  %925 = vmatpush1.bf16.msra.mxu1 %v1146_v8 }
  0x78   : > { %883 = vmatprep.subr.bf16.mxu0 %v1153_v57  ;;  %926 = vmatprep.subr.bf16.mxu1 %v1155_v58 }
  0x7b   : > { %884 = vmatpush1.bf16.msra.mxu0 %v1152_v63  ;;  %927 = vmatpush1.bf16.msra.mxu1 %v1154_v0 }
  0x7c   : > { %885 = vmatprep.subr.bf16.mxu0 %v1161_v1  ;;  %928 = vmatprep.subr.bf16.mxu1 %v1163_v2 }
  0x7f   : > { %886 = vmatpush1.bf16.msra.mxu0 %v1160_v7  ;;  %929 = vmatpush1.bf16.msra.mxu1 %v1162_v9 }
  0x80   : > { %887 = vmatprep.subr.bf16.mxu0 %v1169_v10  ;;  %930 = vmatprep.subr.bf16.mxu1 %v1171_v11 }
  0x83   : > { %888 = vmatpush1.bf16.msra.mxu0 %v1168_v16  ;;  %931 = vmatpush1.bf16.msra.mxu1 %v1170_v17 }
  0x84   : > { %889 = vmatprep.subr.bf16.mxu0 %v1177_v18  ;;  %932 = vmatprep.subr.bf16.mxu1 %v1179_v19 }
  0x87   : > { %890 = vmatpush1.bf16.msra.mxu0 %v1176_v24  ;;  %933 = vmatpush1.bf16.msra.mxu1 %v1178_v25 }
  0x88   : > { %891 = vmatprep.subr.bf16.mxu0 %v1185_v26  ;;  %934 = vmatprep.subr.bf16.mxu1 %v1187_v27 }
  0x8b   : > { %892 = vmatpush1.bf16.msra.mxu0 %v1184_v28  ;;  %935 = vmatpush1.bf16.msra.mxu1 %v1186_v30 }
  0x8e   : > { %908 = vmatmul.mubr.bf16.vlgmr.msra.gmra.mrb[4].mxu0 %v1562_v29  ;;  %951 = vmatmul.mubr.bf16.vlgmr.msra.gmra.mrb[4].mxu1 %v1562_v29 }
  0xbe   : > { %v409_v31 = vpop.permute.xlu0 %408 }
  0xc2   : > { %v414_v33 = vpop.permute.xlu0 %413 }
 0x13d   : > { %v823_v32 = vpop.f32.mrb[0].mxu0  ;;  %v866_v35 = vpop.f32.mrb[0].mxu1 }
 0x13e   : > { %v824_v34 = vadd.f32 %v823_v32, %v409_v31  ;;  %v825_v36 = vpop.f32.mrb[1].mxu0  ;;  %v867_v37 = vadd.f32 %v866_v35, %v409_v31  ;;  %v868_v39 = vpop.f32.mrb[1].mxu1 }
 0x13f   : > { %v826_v38 = vadd.f32 %v825_v36, %v409_v31  ;;  %v827_v40 = vpop.f32.mrb[2].mxu0  ;;  %v869_v41 = vadd.f32 %v868_v39, %v409_v31  ;;  %v870_v43 = vpop.f32.mrb[2].mxu1 }
 0x140   : > { %1230 = vtanh.f32 %v824_v34  ;;  %v828_v42 = vadd.f32 %v827_v40, %v414_v33  ;;  %v829_v44 = vpop.f32.mrb[3].mxu0  ;;  %v871_v45 = vadd.f32 %v870_v43, %v414_v33  ;;  %v872_v46 = vpop.f32.mrb[3].mxu1 }
 0x141   : > { %1232 = vtanh.f32 %v867_v37  ;;  %v830_v29 = vadd.f32 %v829_v44, %v414_v33  ;;  %v873_v47 = vadd.f32 %v872_v46, %v414_v33 }
 0x142   : > { %1234 = vtanh.f32 %v826_v38 }
 0x143   : > { %1236 = vtanh.f32 %v869_v41 }
 0x144   : > { %1238 = vtanh.f32 %v828_v42 }
 0x145   : > { %1240 = vtanh.f32 %v871_v45 }
 0x146   : > { %1242 = vtanh.f32 %v830_v29 }
 0x147   : > { %1244 = vtanh.f32 %v873_v47 }
 0x14a   : > { %v1231_v48 = vpop.eup %1230 }
 0x14b   : > { %v1233_v49 = vpop.eup %1232  ;;  %977 = vst [vmem:[%s1604_s18] sm:$0xff] %v1231_v48 }
 0x14c   : > { %v1235_v50 = vpop.eup %1234  ;;  %979 = vst [vmem:[%s1604_s18 + $0x10] sm:$0xff] %v1233_v49 }
 0x14d   : > { %v1237_v51 = vpop.eup %1236  ;;  %978 = vst [vmem:[%s1604_s18 + $0x8] sm:$0xff] %v1235_v50 }
 0x14e   : > { %v1239_v52 = vpop.eup %1238  ;;  %980 = vst [vmem:[%s1604_s18 + $0x18] sm:$0xff] %v1237_v51 }
 0x14f   : > { %v1241_v53 = vpop.eup %1240  ;;  %985 = vst [vmem:[%s1604_s18 + $0x40] sm:$0xf] %v1239_v52 }
 0x150   : > { %v1243_v54 = vpop.eup %1242  ;;  %987 = vst [vmem:[%s1604_s18 + $0x50] sm:$0xf] %v1241_v53 }
 0x151   : > { %v1245_v55 = vpop.eup %1244  ;;  %986 = vst [vmem:[%s1604_s18 + $0x48] sm:$0xf] %v1243_v54 }
 0x152   : > { %988 = vst [vmem:[%s1604_s18 + $0x58] sm:$0xf] %v1245_v55  ;;  %v1015_v16 = vld [vmem:[%s1604_s18] sm:$0xff] (%p1337_p5) }
 0x153   : > { %v1019_v18 = vld [vmem:[%s1604_s18 + $0x10] sm:$0xff] (%p1337_p5)  ;;  %1016 = vst [vmem:[%s1002_s20] sm:$0xff] (%p1337_p5), %v1015_v16 }
 0x154   : > { %v1017_v17 = vld [vmem:[%s1604_s18 + $0x8] sm:$0xff] (%p1337_p5)  ;;  %1020 = vst [vmem:[%s1002_s20 + $0x10] sm:$0xff] (%p1337_p5), %v1019_v18 }
 0x155   : > { %v1021_v19 = vld [vmem:[%s1604_s18 + $0x18] sm:$0xff] (%p1337_p5)  ;;  %1018 = vst [vmem:[%s1002_s20 + $0x8] sm:$0xff] (%p1337_p5), %v1017_v17 }
 0x156   : > { %1022 = vst [vmem:[%s1002_s20 + $0x18] sm:$0xff] (%p1337_p5), %v1021_v19  ;;  %v1031_v24 = vld [vmem:[%s1604_s18 + $0x40] sm:$0xff] (%p1337_p5) }
 0x157   : > { %1032 = vst [vmem:[%s1002_s20 + $0x80] sm:$0xff] (%p1337_p5), %v1031_v24  ;;  %v1035_v26 = vld [vmem:[%s1604_s18 + $0x50] sm:$0xff] (%p1337_p5) }
 0x158   : > { %v1033_v25 = vld [vmem:[%s1604_s18 + $0x48] sm:$0xff] (%p1337_p5)  ;;  %1036 = vst [vmem:[%s1002_s20 + $0x90] sm:$0xff] (%p1337_p5), %v1035_v26 }
 0x159   : > { %v1037_v27 = vld [vmem:[%s1604_s18 + $0x58] sm:$0xff] (%p1337_p5)  ;;  %1034 = vst [vmem:[%s1002_s20 + $0x88] sm:$0xff] (%p1337_p5), %v1033_v25 }
 0x15a   : > { %1038 = vst [vmem:[%s1002_s20 + $0x98] sm:$0xff] (%p1337_p5), %v1037_v27 }
 0x161   : > { %v909_v56 = vpop.f32.mrb[4].mxu0  ;;  %v952_v57 = vpop.f32.mrb[4].mxu1 }
 0x162   : > { %v910_v8 = vadd.f32 %v909_v56, %v409_v31  ;;  %v911_v58 = vpop.f32.mrb[5].mxu0  ;;  %v953_v59 = vadd.f32 %v952_v57, %v409_v31  ;;  %v954_v61 = vpop.f32.mrb[5].mxu1 }
 0x163   : > { %v912_v60 = vadd.f32 %v911_v58, %v409_v31  ;;  %v913_v62 = vpop.f32.mrb[6].mxu0  ;;  %v955_v63 = vadd.f32 %v954_v61, %v409_v31  ;;  %v956_v1 = vpop.f32.mrb[6].mxu1 }
 0x164   : > { %1246 = vtanh.f32 %v910_v8  ;;  %v914_v0 = vadd.f32 %v913_v62, %v414_v33  ;;  %v915_v2 = vpop.f32.mrb[7].mxu0  ;;  %v957_v3 = vadd.f32 %v956_v1, %v414_v33  ;;  %v958_v4 = vpop.f32.mrb[7].mxu1 }
 0x165   : > { %1248 = vtanh.f32 %v953_v59  ;;  %v916_v5 = vadd.f32 %v915_v2, %v414_v33  ;;  %v959_v6 = vadd.f32 %v958_v4, %v414_v33 }
 0x166   : > { %1250 = vtanh.f32 %v912_v60 }
 0x167   : > { %1252 = vtanh.f32 %v955_v63 }
 0x168   : > { %1254 = vtanh.f32 %v914_v0 }
 0x169   : > { %1256 = vtanh.f32 %v957_v3 }
 0x16a   : > { %1258 = vtanh.f32 %v916_v5 }
 0x16b   : > { %1260 = vtanh.f32 %v959_v6 }
 0x16e   : > { %v1247_v7 = vpop.eup %1246 }
 0x16f   : > { %v1249_v9 = vpop.eup %1248  ;;  %981 = vst [vmem:[%s1604_s18 + $0x20] sm:$0xff] %v1247_v7 }
 0x170   : > { %v1251_v10 = vpop.eup %1250  ;;  %983 = vst [vmem:[%s1604_s18 + $0x30] sm:$0xff] %v1249_v9  ;;  %999 = sbr.rel (!%p1337_p5) target bundleno = 383 (0x17f), region = 59 }
 0x171   : > { %v1253_v11 = vpop.eup %1252  ;;  %982 = vst [vmem:[%s1604_s18 + $0x28] sm:$0xff] %v1251_v10 }
 0x172   : > { %v1255_v12 = vpop.eup %1254  ;;  %984 = vst [vmem:[%s1604_s18 + $0x38] sm:$0xff] %v1253_v11 }
 0x173   : > { %v1257_v13 = vpop.eup %1256  ;;  %989 = vst [vmem:[%s1604_s18 + $0x60] sm:$0xf] %v1255_v12 }
 0x174   : > { %v1259_v14 = vpop.eup %1258  ;;  %991 = vst [vmem:[%s1604_s18 + $0x70] sm:$0xf] %v1257_v13 }
 0x175   : > { %v1261_v15 = vpop.eup %1260  ;;  %990 = vst [vmem:[%s1604_s18 + $0x68] sm:$0xf] %v1259_v14 }
 0x176   : > { %992 = vst [vmem:[%s1604_s18 + $0x78] sm:$0xf] %v1261_v15  ;;  %v1023_v20 = vld [vmem:[%s1604_s18 + $0x20] sm:$0xff] (%p1337_p5) }
 0x177   : > { %1024 = vst [vmem:[%s1002_s20 + $0x20] sm:$0xff] %v1023_v20  ;;  %v1027_v22 = vld [vmem:[%s1604_s18 + $0x30] sm:$0xff] }
 0x178   : > { %v1025_v21 = vld [vmem:[%s1604_s18 + $0x28] sm:$0xff]  ;;  %1028 = vst [vmem:[%s1002_s20 + $0x30] sm:$0xff] %v1027_v22 }
 0x179   : > { %1026 = vst [vmem:[%s1002_s20 + $0x28] sm:$0xff] %v1025_v21  ;;  %v1029_v23 = vld [vmem:[%s1604_s18 + $0x38] sm:$0xff] }
 0x17a   : > { %1030 = vst [vmem:[%s1002_s20 + $0x38] sm:$0xff] %v1029_v23  ;;  %v1039_v28 = vld [vmem:[%s1604_s18 + $0x60] sm:$0xff] }
 0x17b   : > { %v1043_v31 = vld [vmem:[%s1604_s18 + $0x70] sm:$0xff]  ;;  %1040 = vst [vmem:[%s1002_s20 + $0xa0] sm:$0xff] %v1039_v28 }
 0x17c   : > { %v1041_v30 = vld [vmem:[%s1604_s18 + $0x68] sm:$0xff]  ;;  %1044 = vst [vmem:[%s1002_s20 + $0xb0] sm:$0xff] %v1043_v31 }
 0x17d   : > { %1042 = vst [vmem:[%s1002_s20 + $0xa8] sm:$0xff] %v1041_v30  ;;  %v1045_v32 = vld [vmem:[%s1604_s18 + $0x78] sm:$0xff] }
 0x17e   : > { %1046 = vst [vmem:[%s1002_s20 + $0xb8] sm:$0xff] %v1045_v32 }
 0x17f PF: > { %p10_p10 = scmp.ge.s32.totalorder %s1324_s16, 4   ;;  %s1660_s12 = smov %s1280_s13 }
 0x180   : > { %s1661_s13 = smov %s1335_s19  ;;  %s1662_s14 = smov %s1324_s16 }
 0x181   :  { %12 = sbr.rel (!%p10_p10) target bundleno = 2 (0x2), region = 113 }

</bundles_post_ra>
